<compile_context>
chip_gen: v6e
topology: v6e:2x2x1
jax: 0.10.0
libtpu: 0.0.40
codegen_flags: <defaults>
</compile_context>

<pallas_src>
import functools

import jax
import jax.numpy as jnp
import numpy as np
from jax import lax
from jax.experimental import pallas as pl
from jax.experimental.pallas import tpu as pltpu


def _fused_cnn_kernel(e0_ref, o0_ref, e1_ref, o1_ref,
                      wconv_ref, bconv_ref, wfc_ref, bfc_ref, out_ref):
    bt = out_ref.shape[0]          # batch tile
    # Slabs: (bt*16, 102) bf16.  Row index = (image, ph); lane index = w_pad*3 + c.
    e0 = e0_ref[...]               # padded rows 0,2,...,30  (h = 2*ph + 0)
    o0 = o0_ref[...]               # padded rows 1,3,...,31  (h = 2*ph + 1)
    e1 = e1_ref[...]               # padded rows 2,4,...,32  (h = 2*ph + 2)
    o1 = o1_ref[...]               # padded rows 3,5,...,33  (h = 2*ph + 3)
    t0 = wconv_ref[0]              # (102, 1024) block-Toeplitz weight for ky = 0
    t1 = wconv_ref[1]
    t2 = wconv_ref[2]

    # Conv rows h = 2*ph (even) and h = 2*ph+1 (odd); lanes = j*512 + pw*32 + o.
    conv_even = (jnp.dot(e0, t0, preferred_element_type=jnp.float32)
                 + jnp.dot(o0, t1, preferred_element_type=jnp.float32)
                 + jnp.dot(e1, t2, preferred_element_type=jnp.float32))
    conv_odd = (jnp.dot(o0, t0, preferred_element_type=jnp.float32)
                + jnp.dot(e1, t1, preferred_element_type=jnp.float32)
                + jnp.dot(o1, t2, preferred_element_type=jnp.float32))

    # 2x2 max pool: h-pool is elementwise (even vs. odd rows), w-pool is a max of the two
    # contiguous 512-lane halves (j = 0 vs. j = 1).  Then bias + ReLU in f32.
    ch = jnp.maximum(conv_even, conv_odd)                    # (bt*16, 1024)
    cw = jnp.maximum(ch[:, :512], ch[:, 512:])               # (bt*16, 512), lane = pw*32+o
    act = jnp.maximum(cw + bconv_ref[...], 0.0)              # bias + ReLU

    # Flatten to (bt, 8192) with lane order ph*512 + pw*32 + o (matches permuted FC weight)
    # and run the FC against the VMEM-resident 128-padded weight.  Lane-dense store.
    act = act.astype(jnp.bfloat16).reshape(bt, 16 * 512)
    fc = jnp.dot(act, wfc_ref[...], preferred_element_type=jnp.float32)   # (bt, 128)
    out_ref[...] = fc + bfc_ref[...]


def prepare_simple_cnn_params(conv_w, conv_b, fc_w, fc_b):
    """One-time transform of the PyTorch parameters into kernel layouts.

    Call once and reuse the result for every forward pass.
    Returns (w_conv_t, b_conv_t, w_fc_p, b_fc_p).
    """
    conv_w = conv_w.astype(jnp.float32)                       # (O=32, C=3, KY=3, KX=3)

    # Block-Toeplitz conv weight T[ky, w_in*3 + c, j*512 + pw*32 + o] = W[o,c,ky,kx]
    # iff w_in == (2*pw + j) + kx.  Zero elsewhere (extra MXU FLOPs are free here).
    kx = np.arange(3).reshape(3, 1, 1)
    w_in = np.arange(34).reshape(1, 34, 1)
    w_out = np.arange(32).reshape(1, 1, 32)
    sel = jnp.asarray((w_in == w_out + kx).astype(np.float32))        # (KX, 34, 32)
    t = jnp.einsum("xiw,ocyx->yicwo", sel, conv_w)                    # (ky, w_in, c, w, o)
    t = t.reshape(3, 34, 3, 16, 2, 32)                                # w -> (pw, j)
    t = jnp.transpose(t, (0, 1, 2, 4, 3, 5))                          # j-major output cols
    w_conv_t = t.reshape(3, 34 * 3, 1024).astype(jnp.bfloat16)        # (3, 102, 1024)

    # Conv bias tiled to the pooled lane order pw*32 + o.
    b_conv_t = jnp.tile(conv_b.astype(jnp.float32), 16).reshape(1, 512)

    # FC weight: rows permuted from NCHW-flatten (c,h,w) to kernel (h,w,c) order,
    # columns zero-padded 10 -> 128 (lane-dense, unmasked stores).
    w_fc = fc_w.astype(jnp.float32).T.reshape(32, 16, 16, 10)         # [c, h, w, j]
    w_fc = jnp.transpose(w_fc, (1, 2, 0, 3)).reshape(32 * 16 * 16, 10)
    w_fc_p = jnp.zeros((8192, 128), jnp.float32).at[:, :10].set(w_fc).astype(jnp.bfloat16)
    b_fc_p = jnp.zeros((1, 128), jnp.float32).at[0, :10].set(fc_b.astype(jnp.float32))
    return w_conv_t, b_conv_t, w_fc_p, b_fc_p


@functools.partial(jax.jit, static_argnames=("batch_tile",))
def simple_cnn_forward(x, w_conv_t, b_conv_t, w_fc_p, b_fc_p, *, batch_tile=None):
    """x: (N, 3, 32, 32) f32 NCHW.  Weights from prepare_simple_cnn_params().
    Returns (N, 10) f32 logits."""
    n = x.shape[0]
    if batch_tile is None:
        if n <= 8:
            batch_tile = 8
        elif n <= 64:
            batch_tile = ((n + 15) // 16) * 16        # bf16 sublane pack
        else:
            batch_tile = 64                           # safe on v7x (64 MiB VMEM); raise on v5e/v6e
    n_pad = ((n + batch_tile - 1) // batch_tile) * batch_tile

    # NCHW -> NHWC, bf16, spatial zero pad (conv padding=1), batch pad; lane-dense rows.
    x_nhwc = jnp.transpose(x, (0, 2, 3, 1)).astype(jnp.bfloat16)       # (N, 32, 32, 3)
    x_pad = jnp.pad(x_nhwc, ((0, n_pad - n), (1, 1), (1, 1), (0, 0)))  # (n_pad, 34, 34, 3)
    rows = x_pad.reshape(n_pad, 34, 34 * 3)                            # (n_pad, 34, 102)

    # Even/odd padded-row slabs (done in XLA, cheap): make the h-pool elementwise in-kernel.
    e0 = rows[:, 0:32:2, :].reshape(n_pad * 16, 102)
    o0 = rows[:, 1:33:2, :].reshape(n_pad * 16, 102)
    e1 = rows[:, 2:34:2, :].reshape(n_pad * 16, 102)
    o1 = rows[:, 3:34:2, :].reshape(n_pad * 16, 102)

    m_tile = batch_tile * 16
    slab_spec = pl.BlockSpec((m_tile, 102), lambda i: (i, 0))
    grid = (n_pad // batch_tile,)

    out = pl.pallas_call(
        _fused_cnn_kernel,
        out_shape=jax.ShapeDtypeStruct((n_pad, 128), jnp.float32),
        grid=grid,
        in_specs=[
            slab_spec, slab_spec, slab_spec, slab_spec,
            pl.BlockSpec((3, 102, 1024), lambda i: (0, 0, 0)),   # Toeplitz conv weight (resident)
            pl.BlockSpec((1, 512), lambda i: (0, 0)),            # tiled conv bias
            pl.BlockSpec((8192, 128), lambda i: (0, 0)),         # FC weight (resident)
            pl.BlockSpec((1, 128), lambda i: (0, 0)),            # FC bias
        ],
        out_specs=pl.BlockSpec((batch_tile, 128), lambda i: (i, 0)),
        compiler_params=pltpu.CompilerParams(
            dimension_semantics=("parallel",),
            vmem_limit_bytes=(48 if batch_tile <= 64 else 100) * 1024 * 1024,
        ),
    )(e0, o0, e1, o1, w_conv_t, b_conv_t, w_fc_p, b_fc_p)

    return out[:n, :10]


def simple_cnn_reference(x, conv_w, conv_b, fc_w, fc_b):
    """Pure-JAX f32 reference mirroring the PyTorch forward exactly."""
    y = lax.conv_general_dilated(
        x.astype(jnp.float32), conv_w.astype(jnp.float32),
        window_strides=(1, 1), padding=((1, 1), (1, 1)),
        dimension_numbers=("NCHW", "OIHW", "NCHW"))
    y = y + conv_b.reshape(1, -1, 1, 1)
    y = jnp.maximum(y, 0.0)
    y = lax.reduce_window(y, -jnp.inf, lax.max,
                          window_dimensions=(1, 1, 2, 2),
                          window_strides=(1, 1, 2, 2), padding="VALID")
    y = y.reshape(y.shape[0], -1)                  # NCHW flatten, matches nn.Linear
    return y @ fc_w.T + fc_b


if __name__ == "__main__":
    key = jax.random.PRNGKey(0)
    k1, k2, k3, k4, k5 = jax.random.split(key, 5)

    n = 2  # spatial/channel sizes are fixed by the module (fc1 expects 32*16*16)
    x = jax.random.normal(k1, (n, 3, 32, 32), jnp.float32)
    conv_w = jax.random.normal(k2, (32, 3, 3, 3), jnp.float32) * 0.1
    conv_b = jax.random.normal(k3, (32,), jnp.float32) * 0.1
    fc_w = jax.random.normal(k4, (10, 32 * 16 * 16), jnp.float32) * 0.01
    fc_b = jax.random.normal(k5, (10,), jnp.float32) * 0.1

    params = prepare_simple_cnn_params(conv_w, conv_b, fc_w, fc_b)  # one-time weight prep
    params = jax.block_until_ready(params)

    out = simple_cnn_forward(x, *params)
    out = jax.block_until_ready(out)

    ref = simple_cnn_reference(x, conv_w, conv_b, fc_w, fc_b)
    np.testing.assert_allclose(np.asarray(out), np.asarray(ref), rtol=5e-2, atol=5e-2)

    print("KERNEL_OK")
</pallas_src>

<mosaic_0001>
module attributes {stable_mosaic.version = 11 : i64} {
  func.func @_fused_cnn_kernel(%arg0: i32, %arg1: memref<128x102xbf16, #tpu.memory_space<vmem>>, %arg2: memref<128x102xbf16, #tpu.memory_space<vmem>>, %arg3: memref<128x102xbf16, #tpu.memory_space<vmem>>, %arg4: memref<128x102xbf16, #tpu.memory_space<vmem>>, %arg5: memref<3x102x1024xbf16, #tpu.memory_space<vmem>>, %arg6: memref<1x512xf32, #tpu.memory_space<vmem>>, %arg7: memref<8192x128xbf16, #tpu.memory_space<vmem>>, %arg8: memref<1x128xf32, #tpu.memory_space<vmem>>, %arg9: memref<8x128xf32, #tpu.memory_space<vmem>>) attributes {dimension_semantics = [#tpu.dimension_semantics<parallel>], iteration_bounds = array<i64: 1>, scalar_prefetch = 0 : i64, scratch_operands = 0 : i64, tpu.core_type = #tpu.core_type<tc>, window_params = [{transform_indices = @transform_0, window_bounds = array<i64: 128, 102>}, {transform_indices = @transform_1, window_bounds = array<i64: 128, 102>}, {transform_indices = @transform_2, window_bounds = array<i64: 128, 102>}, {transform_indices = @transform_3, window_bounds = array<i64: 128, 102>}, {pipeline_mode = #tpu.pipeline_mode<synchronous>, transform_indices = @transform_4, window_bounds = array<i64: 3, 102, 1024>}, {pipeline_mode = #tpu.pipeline_mode<synchronous>, transform_indices = @transform_5, window_bounds = array<i64: 1, 512>}, {pipeline_mode = #tpu.pipeline_mode<synchronous>, transform_indices = @transform_6, window_bounds = array<i64: 8192, 128>}, {pipeline_mode = #tpu.pipeline_mode<synchronous>, transform_indices = @transform_7, window_bounds = array<i64: 1, 128>}, {transform_indices = @transform_8, window_bounds = array<i64: 8, 128>}]} {
    %c0 = arith.constant 0 : index
    %c0_0 = arith.constant 0 : index
    %0 = vector.load %arg1[%c0, %c0_0] : memref<128x102xbf16, #tpu.memory_space<vmem>>, vector<128x102xbf16>
    %c0_1 = arith.constant 0 : index
    %c0_2 = arith.constant 0 : index
    %1 = vector.load %arg2[%c0_1, %c0_2] : memref<128x102xbf16, #tpu.memory_space<vmem>>, vector<128x102xbf16>
    %c0_3 = arith.constant 0 : index
    %c0_4 = arith.constant 0 : index
    %2 = vector.load %arg3[%c0_3, %c0_4] : memref<128x102xbf16, #tpu.memory_space<vmem>>, vector<128x102xbf16>
    %c0_5 = arith.constant 0 : index
    %c0_6 = arith.constant 0 : index
    %3 = vector.load %arg4[%c0_5, %c0_6] : memref<128x102xbf16, #tpu.memory_space<vmem>>, vector<128x102xbf16>
    %c0_7 = arith.constant 0 : index
    %c0_8 = arith.constant 0 : index
    %c0_9 = arith.constant 0 : index
    %4 = vector.load %arg5[%c0_7, %c0_8, %c0_9] : memref<3x102x1024xbf16, #tpu.memory_space<vmem>>, vector<1x102x1024xbf16>
    %5 = vector.shape_cast %4 : vector<1x102x1024xbf16> to vector<102x1024xbf16>
    %c1 = arith.constant 1 : index
    %c0_10 = arith.constant 0 : index
    %c0_11 = arith.constant 0 : index
    %6 = vector.load %arg5[%c1, %c0_10, %c0_11] : memref<3x102x1024xbf16, #tpu.memory_space<vmem>>, vector<1x102x1024xbf16>
    %7 = vector.shape_cast %6 : vector<1x102x1024xbf16> to vector<102x1024xbf16>
    %c2 = arith.constant 2 : index
    %c0_12 = arith.constant 0 : index
    %c0_13 = arith.constant 0 : index
    %8 = vector.load %arg5[%c2, %c0_12, %c0_13] : memref<3x102x1024xbf16, #tpu.memory_space<vmem>>, vector<1x102x1024xbf16>
    %9 = vector.shape_cast %8 : vector<1x102x1024xbf16> to vector<102x1024xbf16>
    %cst = arith.constant dense<0.000000e+00> : vector<128x1024xf32>
    %10 = tpu.matmul %0, %5, %cst {dimension_numbers = #tpu.dot_dimension_numbers<[1], [0], [0], [1], [0, 0, 1, 1], [], []>} : vector<128x102xbf16>, vector<102x1024xbf16>, vector<128x1024xf32> -> vector<128x1024xf32>
    %cst_14 = arith.constant dense<0.000000e+00> : vector<128x1024xf32>
    %11 = tpu.matmul %1, %7, %cst_14 {dimension_numbers = #tpu.dot_dimension_numbers<[1], [0], [0], [1], [0, 0, 1, 1], [], []>} : vector<128x102xbf16>, vector<102x1024xbf16>, vector<128x1024xf32> -> vector<128x1024xf32>
    %12 = arith.addf %10, %11 : vector<128x1024xf32>
    %cst_15 = arith.constant dense<0.000000e+00> : vector<128x1024xf32>
    %13 = tpu.matmul %2, %9, %cst_15 {dimension_numbers = #tpu.dot_dimension_numbers<[1], [0], [0], [1], [0, 0, 1, 1], [], []>} : vector<128x102xbf16>, vector<102x1024xbf16>, vector<128x1024xf32> -> vector<128x1024xf32>
    %14 = arith.addf %12, %13 : vector<128x1024xf32>
    %cst_16 = arith.constant dense<0.000000e+00> : vector<128x1024xf32>
    %15 = tpu.matmul %1, %5, %cst_16 {dimension_numbers = #tpu.dot_dimension_numbers<[1], [0], [0], [1], [0, 0, 1, 1], [], []>} : vector<128x102xbf16>, vector<102x1024xbf16>, vector<128x1024xf32> -> vector<128x1024xf32>
    %cst_17 = arith.constant dense<0.000000e+00> : vector<128x1024xf32>
    %16 = tpu.matmul %2, %7, %cst_17 {dimension_numbers = #tpu.dot_dimension_numbers<[1], [0], [0], [1], [0, 0, 1, 1], [], []>} : vector<128x102xbf16>, vector<102x1024xbf16>, vector<128x1024xf32> -> vector<128x1024xf32>
    %17 = arith.addf %15, %16 : vector<128x1024xf32>
    %cst_18 = arith.constant dense<0.000000e+00> : vector<128x1024xf32>
    %18 = tpu.matmul %3, %9, %cst_18 {dimension_numbers = #tpu.dot_dimension_numbers<[1], [0], [0], [1], [0, 0, 1, 1], [], []>} : vector<128x102xbf16>, vector<102x1024xbf16>, vector<128x1024xf32> -> vector<128x1024xf32>
    %19 = arith.addf %17, %18 : vector<128x1024xf32>
    %20 = arith.maximumf %14, %19 : vector<128x1024xf32>
    %21 = vector.extract_strided_slice %20 {offsets = [0, 0], sizes = [128, 512], strides = [1, 1]} : vector<128x1024xf32> to vector<128x512xf32>
    %22 = vector.extract_strided_slice %20 {offsets = [0, 512], sizes = [128, 512], strides = [1, 1]} : vector<128x1024xf32> to vector<128x512xf32>
    %23 = arith.maximumf %21, %22 : vector<128x512xf32>
    %c0_19 = arith.constant 0 : index
    %c0_20 = arith.constant 0 : index
    %24 = vector.load %arg6[%c0_19, %c0_20] : memref<1x512xf32, #tpu.memory_space<vmem>>, vector<1x512xf32>
    %25 = vector.broadcast %24 : vector<1x512xf32> to vector<128x512xf32>
    %26 = arith.addf %23, %25 : vector<128x512xf32>
    %cst_21 = arith.constant 0.000000e+00 : f32
    %27 = vector.broadcast %cst_21 : f32 to vector<128x512xf32>
    %28 = arith.maximumf %26, %27 : vector<128x512xf32>
    %29 = arith.truncf %28 : vector<128x512xf32> to vector<128x512xbf16>
    %30 = vector.shape_cast %29 : vector<128x512xbf16> to vector<8x8192xbf16>
    %c0_22 = arith.constant 0 : index
    %c0_23 = arith.constant 0 : index
    %31 = vector.load %arg7[%c0_22, %c0_23] : memref<8192x128xbf16, #tpu.memory_space<vmem>>, vector<8192x128xbf16>
    %cst_24 = arith.constant dense<0.000000e+00> : vector<8x128xf32>
    %32 = tpu.matmul %30, %31, %cst_24 {dimension_numbers = #tpu.dot_dimension_numbers<[1], [0], [0], [1], [0, 0, 1, 1], [], []>} : vector<8x8192xbf16>, vector<8192x128xbf16>, vector<8x128xf32> -> vector<8x128xf32>
    %c0_25 = arith.constant 0 : index
    %c0_26 = arith.constant 0 : index
    %33 = vector.load %arg8[%c0_25, %c0_26] : memref<1x128xf32, #tpu.memory_space<vmem>>, vector<1x128xf32>
    %34 = vector.broadcast %33 : vector<1x128xf32> to vector<8x128xf32>
    %35 = arith.addf %32, %34 : vector<8x128xf32>
    %c0_27 = arith.constant 0 : index
    %c0_28 = arith.constant 0 : index
    %36 = vector.load %arg9[%c0_27, %c0_28] : memref<8x128xf32, #tpu.memory_space<vmem>>, vector<8x128xf32>
    tpu.vector_store %arg9[%c0_27, %c0_28], %35 {strides = array<i32>} : memref<8x128xf32, #tpu.memory_space<vmem>>, vector<8x128xf32>,
    return
  }
  func.func @transform_0(%arg0: i32) -> (i32, i32) {
    %c0_i32 = arith.constant 0 : i32
    %c0_i32_0 = arith.constant 0 : i32
    return %arg0, %c0_i32 : i32, i32
  }
  func.func @transform_1(%arg0: i32) -> (i32, i32) {
    %c0_i32 = arith.constant 0 : i32
    %c0_i32_0 = arith.constant 0 : i32
    return %arg0, %c0_i32 : i32, i32
  }
  func.func @transform_2(%arg0: i32) -> (i32, i32) {
    %c0_i32 = arith.constant 0 : i32
    %c0_i32_0 = arith.constant 0 : i32
    return %arg0, %c0_i32 : i32, i32
  }
  func.func @transform_3(%arg0: i32) -> (i32, i32) {
    %c0_i32 = arith.constant 0 : i32
    %c0_i32_0 = arith.constant 0 : i32
    return %arg0, %c0_i32 : i32, i32
  }
  func.func @transform_4(%arg0: i32) -> (i32, i32, i32) {
    %c0_i32 = arith.constant 0 : i32
    %c0_i32_0 = arith.constant 0 : i32
    %c0_i32_1 = arith.constant 0 : i32
    %c0_i32_2 = arith.constant 0 : i32
    return %c0_i32, %c0_i32_0, %c0_i32_1 : i32, i32, i32
  }
  func.func @transform_5(%arg0: i32) -> (i32, i32) {
    %c0_i32 = arith.constant 0 : i32
    %c0_i32_0 = arith.constant 0 : i32
    %c0_i32_1 = arith.constant 0 : i32
    return %c0_i32, %c0_i32_0 : i32, i32
  }
  func.func @transform_6(%arg0: i32) -> (i32, i32) {
    %c0_i32 = arith.constant 0 : i32
    %c0_i32_0 = arith.constant 0 : i32
    %c0_i32_1 = arith.constant 0 : i32
    return %c0_i32, %c0_i32_0 : i32, i32
  }
  func.func @transform_7(%arg0: i32) -> (i32, i32) {
    %c0_i32 = arith.constant 0 : i32
    %c0_i32_0 = arith.constant 0 : i32
    %c0_i32_1 = arith.constant 0 : i32
    return %c0_i32, %c0_i32_0 : i32, i32
  }
  func.func @transform_8(%arg0: i32) -> (i32, i32) {
    %c0_i32 = arith.constant 0 : i32
    %c0_i32_0 = arith.constant 0 : i32
    return %arg0, %c0_i32 : i32, i32
  }
}

</mosaic_0001>

<bundles_post_ra>
// kernel: simple_cnn_forward.1
= control target key start
LH: loop header
LB: loop body
LE: loop exit
PB: predicated region body
PF: predicated region fallthrough
CT: control target
= control target key end

     0   :  { %vm577_vm0 = vcmask 1042432   ;;  %v20318_v3 = vmov 0   ;;  %vm552_vm1 = vcmask 834560   ;;  %s20307_s4 = inlined_call_operand.vmem [shape: bf16[3,102,1024], index: 4, kind: input, shape index: {}]   ;;  %s20308_s1 = inlined_call_operand.vmem [shape: bf16[128,102], index: 1, kind: input, shape index: {}]   ;;  %s20309_s0 = inlined_call_operand.vmem [shape: bf16[128,102], index: 0, kind: input, shape index: {}]   ;;  %s20310_s2 = inlined_call_operand.vmem [shape: bf16[128,102], index: 2, kind: input, shape index: {}]   ;;  %s20311_s3 = inlined_call_operand.vmem [shape: bf16[128,102], index: 3, kind: input, shape index: {}]   ;;  %s20312_s6 = inlined_call_operand.vmem [shape: bf16[8192,128], index: 6, kind: input, shape index: {}]   ;;  %s20313_s5 = inlined_call_operand.vmem [shape: f32[1,512], index: 5, kind: input, shape index: {}]   ;;  %s20314_s7 = inlined_call_operand.vmem [shape: f32[1,128], index: 7, kind: input, shape index: {}]   ;;  %s20315_s8 = inlined_call_operand.vmem [shape: f32[8,128], index: 8, kind: output, shape index: {}]  }
   0x1   :  { %v11260_v0 = vld [vmem:[%s20307_s4 + $0x320] sm:$0x77]  ;;  %v11261_v1 = vld [vmem:[%s20307_s4 + $0x328] sm:$0x77]  ;;  %634 = vmatprep.mubr.bf16.mxu0 %v20318_v3  ;;  %747 = vmatprep.mubr.bf16.mxu1 %v20318_v3  ;;  %v11262_v55 = vld [vmem:[%s20307_s4 + $0x330] sm:$0x77] }
   0x2   :  { %v11252_v2 = vld [vmem:[%s20307_s4 + $0x2e0] sm:$0xff]  ;;  %v13667_v4 = vcombine.high %v11260_v0, %v11260_v0  ;;  %v13669_v5 = vcombine.high %v11261_v1, %v11261_v1  ;;  %v11372_v6 = vcombine.low %v11260_v0, %v11260_v0  ;;  %v11374_v7 = vcombine.low %v11261_v1, %v11261_v1  ;;  %v11253_v9 = vld [vmem:[%s20307_s4 + $0x2e8] sm:$0xff]  ;;  %v11263_v56 = vld [vmem:[%s20307_s4 + $0x338] sm:$0x77] }
   0x3   :  { %v11256_v8 = vld [vmem:[%s20307_s4 + $0x300] sm:$0xff]  ;;  %v11257_v10 = vld [vmem:[%s20307_s4 + $0x308] sm:$0xff]  ;;  %v13826_v59 = vcombine.high %v11262_v55, %v11262_v55  ;;  %v13830_v60 = vcombine.high %v11263_v56, %v11263_v56  ;;  %v11376_v61 = vcombine.low %v11262_v55, %v11262_v55  ;;  %v11378_v62 = vcombine.low %v11263_v56, %v11263_v56  ;;  %v11254_v0 = vld [vmem:[%s20307_s4 + $0x2f0] sm:$0xff] }
   0x4   :  { %v13680_v11 = vcombine.high %v11252_v2, %v11256_v8  ;;  %v13682_v12 = vcombine.high %v11253_v9, %v11257_v10  ;;  %v11244_v13 = vld [vmem:[%s20307_s4 + $0x2a0] sm:$0xff]  ;;  %v11245_v15 = vld [vmem:[%s20307_s4 + $0x2a8] sm:$0xff]  ;;  %11380 = vmatprep.subr.msk.bf16.mxu0 %vm577_vm0, %v13667_v4  ;;  %11389 = vmatprep.subr.msk.bf16.mxu1 %vm577_vm0, %v13669_v5  ;;  %v13698_v16 = vsel %vm577_vm0, %v11372_v6, 0  ;;  %v13701_v17 = vsel %vm577_vm0, %v11374_v7, 0  ;;  %v11258_v1 = vld [vmem:[%s20307_s4 + $0x310] sm:$0xff] }
   0x5   :  { %v11248_v14 = vld [vmem:[%s20307_s4 + $0x2c0] sm:$0xff]  ;;  %v11249_v18 = vld [vmem:[%s20307_s4 + $0x2c8] sm:$0xff]  ;;  %605 = vmatpush1.bf16.msra.mxu0 %v13698_v16  ;;  %718 = vmatpush1.bf16.msra.mxu1 %v13701_v17  ;;  %v13708_v19 = vcombine.low %v11252_v2, %v11256_v8  ;;  %v13710_v20 = vcombine.low %v11253_v9, %v11257_v10  ;;  %v11255_v2 = vld [vmem:[%s20307_s4 + $0x2f8] sm:$0xff]  ;;  %v13856_v7 = vsel %vm577_vm0, %v11376_v61, 0  ;;  %v13859_v8 = vsel %vm577_vm0, %v11378_v62, 0 }
   0x6   :  { %606 = vmatprep.subr.bf16.mxu0 %v13680_v11  ;;  %719 = vmatprep.subr.bf16.mxu1 %v13682_v12  ;;  %v13714_v21 = vcombine.high %v11244_v13, %v11248_v14  ;;  %v13716_v22 = vcombine.high %v11245_v15, %v11249_v18  ;;  %v11236_v23 = vld [vmem:[%s20307_s4 + $0x260] sm:$0xff]  ;;  %v11237_v25 = vld [vmem:[%s20307_s4 + $0x268] sm:$0xff]  ;;  %v13732_v27 = vcombine.low %v11244_v13, %v11248_v14  ;;  %v11259_v6 = vld [vmem:[%s20307_s4 + $0x318] sm:$0xff] }
   0x7   :  { %v11240_v24 = vld [vmem:[%s20307_s4 + $0x280] sm:$0xff]  ;;  %v11241_v26 = vld [vmem:[%s20307_s4 + $0x288] sm:$0xff]  ;;  %v13734_v28 = vcombine.low %v11245_v15, %v11249_v18  ;;  %v11246_v9 = vld [vmem:[%s20307_s4 + $0x2b0] sm:$0xff]  ;;  %v13864_v10 = vcombine.high %v11254_v0, %v11258_v1  ;;  %v13866_v13 = vcombine.high %v11255_v2, %v11259_v6 }
   0x8   :  { %v11228_v29 = vld [vmem:[%s20307_s4 + $0x220] sm:$0xff]  ;;  %v13741_v30 = vcombine.high %v11236_v23, %v11240_v24  ;;  %v13743_v31 = vcombine.high %v11237_v25, %v11241_v26  ;;  %v11229_v33 = vld [vmem:[%s20307_s4 + $0x228] sm:$0xff]  ;;  %v13756_v35 = vcombine.low %v11236_v23, %v11240_v24  ;;  %v13758_v36 = vcombine.low %v11237_v25, %v11241_v26  ;;  %v11250_v14 = vld [vmem:[%s20307_s4 + $0x2d0] sm:$0xff] }
   0x9   :  { %607 = vmatpush1.bf16.msra.mxu0 %v13708_v19  ;;  %720 = vmatpush1.bf16.msra.mxu1 %v13710_v20  ;;  %v11232_v32 = vld [vmem:[%s20307_s4 + $0x240] sm:$0xff]  ;;  %v11233_v34 = vld [vmem:[%s20307_s4 + $0x248] sm:$0xff]  ;;  %v11247_v15 = vld [vmem:[%s20307_s4 + $0x2b8] sm:$0xff]  ;;  %v13883_v23 = vcombine.low %v11254_v0, %v11258_v1  ;;  %v13885_v24 = vcombine.low %v11255_v2, %v11259_v6  ;;  %v13894_v26 = vcombine.high %v11246_v9, %v11250_v14 }
   0xa   :  { %608 = vmatprep.subr.bf16.mxu0 %v13714_v21  ;;  %721 = vmatprep.subr.bf16.mxu1 %v13716_v22  ;;  %v13762_v37 = vcombine.high %v11228_v29, %v11232_v32  ;;  %v13764_v38 = vcombine.high %v11229_v33, %v11233_v34  ;;  %v11220_v39 = vld [vmem:[%s20307_s4 + $0x1e0] sm:$0xff]  ;;  %v11221_v41 = vld [vmem:[%s20307_s4 + $0x1e8] sm:$0xff]  ;;  %v13780_v43 = vcombine.low %v11228_v29, %v11232_v32  ;;  %v11251_v18 = vld [vmem:[%s20307_s4 + $0x2d8] sm:$0xff] }
   0xb   :  { %v11224_v40 = vld [vmem:[%s20307_s4 + $0x200] sm:$0xff]  ;;  %v11225_v42 = vld [vmem:[%s20307_s4 + $0x208] sm:$0xff]  ;;  %v13782_v44 = vcombine.low %v11229_v33, %v11233_v34  ;;  %v13896_v29 = vcombine.high %v11247_v15, %v11251_v18  ;;  %v11238_v32 = vld [vmem:[%s20307_s4 + $0x270] sm:$0xff] }
   0xc   :  { %v13786_v45 = vcombine.high %v11220_v39, %v11224_v40  ;;  %v13788_v46 = vcombine.high %v11221_v41, %v11225_v42  ;;  %v11212_v47 = vld [vmem:[%s20307_s4 + $0x1a0] sm:$0xff]  ;;  %v11213_v49 = vld [vmem:[%s20307_s4 + $0x1a8] sm:$0xff]  ;;  %v13804_v51 = vcombine.low %v11220_v39, %v11224_v40  ;;  %v13806_v52 = vcombine.low %v11221_v41, %v11225_v42  ;;  %v11242_v33 = vld [vmem:[%s20307_s4 + $0x290] sm:$0xff] }
   0xd   :  { %609 = vmatpush1.bf16.msra.mxu0 %v13732_v27  ;;  %722 = vmatpush1.bf16.msra.mxu1 %v13734_v28  ;;  %v11216_v48 = vld [vmem:[%s20307_s4 + $0x1c0] sm:$0xff]  ;;  %v11217_v50 = vld [vmem:[%s20307_s4 + $0x1c8] sm:$0xff]  ;;  %20572 = vst [vmem:[#allocation2_spill] sm:$0xff] %v13896_v29  ;;  %v11239_v34 = vld [vmem:[%s20307_s4 + $0x278] sm:$0xff]  ;;  %v13914_v40 = vcombine.low %v11246_v9, %v11250_v14  ;;  %v13917_v41 = vcombine.low %v11247_v15, %v11251_v18 }
   0xe   :  { %610 = vmatprep.subr.bf16.mxu0 %v13741_v30  ;;  %723 = vmatprep.subr.bf16.mxu1 %v13743_v31  ;;  %v13810_v53 = vcombine.high %v11212_v47, %v11216_v48  ;;  %v13812_v54 = vcombine.high %v11213_v49, %v11217_v50  ;;  %v13822_v57 = vcombine.low %v11212_v47, %v11216_v48  ;;  %v13835_v63 = vld [vmem:[%s20308_s1] sm:$0xff]   ;;  %v13892_v25 = vld [vmem:[%s20308_s1 + $0x8] sm:$0xff]   ;;  %v11243_v39 = vld [vmem:[%s20307_s4 + $0x298] sm:$0xff] }
   0xf   :  { %v13824_v58 = vcombine.low %v11213_v49, %v11217_v50  ;;  %20573 = vst [vmem:[#allocation3_spill] sm:$0xff] %v13914_v40  ;;  %20574 = vst [vmem:[#allocation4_spill] sm:$0xff] %v13917_v41  ;;  %v13920_v42 = vcombine.high %v11238_v32, %v11242_v33  ;;  %v13922_v47 = vcombine.high %v11239_v34, %v11243_v39  ;;  %v11230_v48 = vld [vmem:[%s20307_s4 + $0x230] sm:$0xff]  ;;  %v11231_v50 = vld [vmem:[%s20307_s4 + $0x238] sm:$0xff] }
  0x10   :  { %v11234_v49 = vld [vmem:[%s20307_s4 + $0x250] sm:$0xff]  ;;  %v11235_v55 = vld [vmem:[%s20307_s4 + $0x258] sm:$0xff]  ;;  %v13949_v61 = vcombine.low %v11238_v32, %v11242_v33  ;;  %v13951_v62 = vcombine.low %v11239_v34, %v11243_v39 }
  0x11   :  { %611 = vmatpush1.bf16.msra.mxu0 %v13756_v35  ;;  %724 = vmatpush1.bf16.msra.mxu1 %v13758_v36  ;;  %20575 = vst [vmem:[#allocation5_spill] sm:$0xff] %v13920_v42  ;;  %20576 = vst [vmem:[#allocation6_spill] sm:$0xff] %v13922_v47  ;;  %v13945_v56 = vld [vmem:[%s20308_s1 + $0x10] sm:$0xff]   ;;  %v13955_v0 = vcombine.high %v11230_v48, %v11234_v49  ;;  %v13957_v1 = vcombine.high %v11231_v50, %v11235_v55  ;;  %v11223_v9 = vld [vmem:[%s20307_s4 + $0x1f8] sm:$0xff] }
  0x12   :  { %612 = vmatprep.subr.bf16.mxu0 %v13762_v37  ;;  %725 = vmatprep.subr.bf16.mxu1 %v13764_v38  ;;  %20577 = vst [vmem:[#allocation7_spill] sm:$0xff] %v13949_v61  ;;  %20578 = vst [vmem:[#allocation8_spill] sm:$0xff] %v13951_v62  ;;  %v11222_v2 = vld [vmem:[%s20307_s4 + $0x1f0] sm:$0xff]  ;;  %v11227_v14 = vld [vmem:[%s20307_s4 + $0x218] sm:$0xff]  ;;  %v13973_v15 = vcombine.low %v11230_v48, %v11234_v49  ;;  %v13975_v18 = vcombine.low %v11231_v50, %v11235_v55 }
  0x13   :  { %20579 = vst [vmem:[#allocation9_spill] sm:$0xff] %v13955_v0  ;;  %20580 = vst [vmem:[#allocation10_spill] sm:$0xff] %v13957_v1  ;;  %v11226_v6 = vld [vmem:[%s20307_s4 + $0x210] sm:$0xff]  ;;  %v13981_v33 = vcombine.high %v11223_v9, %v11227_v14  ;;  %v11215_v48 = vld [vmem:[%s20307_s4 + $0x1b8] sm:$0xff]  ;;  %v14005_v55 = vcombine.low %v11223_v9, %v11227_v14 }
  0x14   :  { %20581 = vst [vmem:[#allocation11_spill] sm:$0xff] %v13973_v15  ;;  %20582 = vst [vmem:[#allocation12_spill] sm:$0xff] %v13975_v18  ;;  %v13979_v32 = vcombine.high %v11222_v2, %v11226_v6  ;;  %v11214_v34 = vld [vmem:[%s20307_s4 + $0x1b0] sm:$0xff]  ;;  %v11219_v49 = vld [vmem:[%s20307_s4 + $0x1d8] sm:$0xff]  ;;  %v14003_v50 = vcombine.low %v11222_v2, %v11226_v6 }
  0x15   :  { %613 = vmatpush1.bf16.msra.mxu0 %v13780_v43  ;;  %726 = vmatpush1.bf16.msra.mxu1 %v13782_v44  ;;  %20584 = vst [vmem:[#allocation14_spill] sm:$0xff] %v13981_v33  ;;  %v11218_v39 = vld [vmem:[%s20307_s4 + $0x1d0] sm:$0xff]  ;;  %20586 = vst [vmem:[#allocation16_spill] sm:$0xff] %v14005_v55  ;;  %v142_v2 = vld [vmem:[%s20307_s4 + $0x180] sm:$0x77]  ;;  %v14028_v14 = vcombine.low %v11215_v48, %v11219_v49 }
  0x16   :  { %614 = vmatprep.subr.bf16.mxu0 %v13786_v45  ;;  %727 = vmatprep.subr.bf16.mxu1 %v13788_v46  ;;  %20583 = vst [vmem:[#allocation13_spill] sm:$0xff] %v13979_v32  ;;  %20585 = vst [vmem:[#allocation15_spill] sm:$0xff] %v14003_v50  ;;  %v143_v6 = vld [vmem:[%s20307_s4 + $0x188] sm:$0x77]  ;;  %v14026_v9 = vcombine.low %v11214_v34, %v11218_v39 }
  0x17   :  { %20590 = vst [vmem:[#allocation20_spill] sm:$0xff] %v14028_v14 }
  0x18   :  { %20589 = vst [vmem:[#allocation19_spill] sm:$0xff] %v14026_v9 }
  0x19   :  { %615 = vmatpush1.bf16.msra.mxu0 %v13804_v51  ;;  %728 = vmatpush1.bf16.msra.mxu1 %v13806_v52 }
  0x1a   :  { %616 = vmatprep.subr.bf16.mxu0 %v13810_v53  ;;  %729 = vmatprep.subr.bf16.mxu1 %v13812_v54 }
  0x1d   :  { %617 = vmatpush1.bf16.msra.mxu0 %v13822_v57  ;;  %730 = vmatpush1.bf16.msra.mxu1 %v13824_v58 }
  0x1e   :  { %11398 = vmatprep.subr.msk.bf16.mxu0 %vm577_vm0, %v13826_v59  ;;  %11407 = vmatprep.subr.msk.bf16.mxu1 %vm577_vm0, %v13830_v60 }
  0x20   :  { %11381 = vmatmul.mubr.msk.bf16.vlgmr.msra.gmra.mxu0 %vm552_vm1, %v13835_v63  ;;  %11390 = vmatmul.mubr.msk.bf16.vlgmr.msra.gmra.mxu1 %vm552_vm1, %v13835_v63 }
  0x21   :  { %831 = vmatpush1.bf16.msra.mxu0 %v13856_v7  ;;  %944 = vmatpush1.bf16.msra.mxu1 %v13859_v8 }
  0x22   :  { %644 = vmatprep.mubr.bf16.mxu0 %v20318_v3  ;;  %757 = vmatprep.mubr.bf16.mxu1 %v20318_v3 }
  0x23   :  { %832 = vmatprep.subr.bf16.mxu0 %v13864_v10  ;;  %945 = vmatprep.subr.bf16.mxu1 %v13866_v13 }
  0x25   :  { %833 = vmatpush1.bf16.msra.mxu0 %v13883_v23  ;;  %946 = vmatpush1.bf16.msra.mxu1 %v13885_v24 }
  0x26   :  { %834 = vmatprep.subr.bf16.mxu0 %v13894_v26  ;;  %947 = vmatprep.subr.bf16.mxu1 %v13896_v29 }
  0x28   :  { %11382 = vmatmul.mubr.msk.bf16.gmra.mxu0 %vm552_vm1, %v13892_v25  ;;  %11391 = vmatmul.mubr.msk.bf16.gmra.mxu1 %vm552_vm1, %v13892_v25 }
  0x29   :  { %654 = vmatprep.mubr.bf16.mxu0 %v20318_v3  ;;  %767 = vmatprep.mubr.bf16.mxu1 %v20318_v3 }
  0x2a   :  { %835 = vmatpush1.bf16.msra.mxu0 %v13914_v40  ;;  %948 = vmatpush1.bf16.msra.mxu1 %v13917_v41 }
  0x2b   :  { %836 = vmatprep.subr.bf16.mxu0 %v13920_v42  ;;  %949 = vmatprep.subr.bf16.mxu1 %v13922_v47 }
  0x2e   :  { %837 = vmatpush1.bf16.msra.mxu0 %v13949_v61  ;;  %950 = vmatpush1.bf16.msra.mxu1 %v13951_v62  ;;  %v130_v62 = vld [vmem:[%s20307_s4 + $0x120] sm:$0xff] }
  0x2f   :  { %838 = vmatprep.subr.bf16.mxu0 %v13955_v0  ;;  %951 = vmatprep.subr.bf16.mxu1 %v13957_v1  ;;  %v14009_v1 = vcombine.high %v11214_v34, %v11218_v39  ;;  %v14011_v0 = vcombine.high %v11215_v48, %v11219_v49  ;;  %v14051_v34 = vld [vmem:[%s20308_s1 + $0x20] sm:$0xff]   ;;  %v14062_v39 = vld [vmem:[%s20308_s1 + $0x28] sm:$0xff]   ;;  %v14073_v48 = vld [vmem:[%s20308_s1 + $0x30] sm:$0xff]  }
  0x30   :  { %11383 = vmatmul.mubr.msk.bf16.gmra.mxu0 %vm552_vm1, %v13945_v56  ;;  %11392 = vmatmul.mubr.msk.bf16.gmra.mxu1 %vm552_vm1, %v13945_v56  ;;  %v14084_v49 = vld [vmem:[%s20308_s1 + $0x38] sm:$0xff]  }
  0x31   :  { %664 = vmatprep.mubr.bf16.mxu0 %v20318_v3  ;;  %777 = vmatprep.mubr.bf16.mxu1 %v20318_v3  ;;  %20587 = vst [vmem:[#allocation17_spill] sm:$0xff] %v14009_v1  ;;  %20588 = vst [vmem:[#allocation18_spill] sm:$0xff] %v14011_v0  ;;  %v14016_v3 = vld [vmem:[%s20308_s1 + $0x18] sm:$0xff]  }
  0x32   :  { %839 = vmatpush1.bf16.msra.mxu0 %v13973_v15  ;;  %952 = vmatpush1.bf16.msra.mxu1 %v13975_v18 }
  0x33   :  { %840 = vmatprep.subr.bf16.mxu0 %v13979_v32  ;;  %953 = vmatprep.subr.bf16.mxu1 %v13981_v33  ;;  %v14032_v33 = vcombine.high %v142_v2, %v142_v2  ;;  %v14034_v32 = vcombine.high %v143_v6, %v143_v6 }
  0x35   :  { %20591 = vst [vmem:[#allocation21_spill] sm:$0xff] %v14032_v33  ;;  %20592 = vst [vmem:[#allocation22_spill] sm:$0xff] %v14034_v32 }
  0x36   :  { %841 = vmatpush1.bf16.msra.mxu0 %v14003_v50  ;;  %954 = vmatpush1.bf16.msra.mxu1 %v14005_v55  ;;  %v20593_v50 = vmov 0  }
  0x37   :  { %842 = vmatprep.subr.bf16.mxu0 %v14009_v1  ;;  %955 = vmatprep.subr.bf16.mxu1 %v14011_v0  ;;  %v135_v0 = vld [vmem:[%s20307_s4 + $0x148] sm:$0xff] }
  0x38   :  { %11384 = vmatmul.mubr.msk.bf16.gmra.mxu0 %vm552_vm1, %v14016_v3  ;;  %11393 = vmatmul.mubr.msk.bf16.gmra.mxu1 %vm552_vm1, %v14016_v3  ;;  %v139_v1 = vld [vmem:[%s20307_s4 + $0x168] sm:$0xff] }
  0x39   :  { %674 = vmatprep.mubr.bf16.mxu0 %v20593_v50  ;;  %787 = vmatprep.mubr.bf16.mxu1 %v20593_v50  ;;  %v14115_v15 = vcombine.high %v135_v0, %v139_v1  ;;  %v14134_v47 = vcombine.low %v135_v0, %v139_v1  ;;  %v122_v0 = vld [vmem:[%s20307_s4 + $0xe0] sm:$0xff]  ;;  %v119_v1 = vld [vmem:[%s20307_s4 + $0xc8] sm:$0xff] }
  0x3a   :  { %843 = vmatpush1.bf16.msra.mxu0 %v14026_v9  ;;  %956 = vmatpush1.bf16.msra.mxu1 %v14028_v14  ;;  %v134_v14 = vld [vmem:[%s20307_s4 + $0x140] sm:$0xff] }
  0x3b   :  { %11480 = vmatprep.subr.msk.bf16.mxu0 %vm577_vm0, %v14032_v33  ;;  %11489 = vmatprep.subr.msk.bf16.mxu1 %vm577_vm0, %v14034_v32  ;;  %v11472_v32 = vcombine.low %v142_v2, %v142_v2  ;;  %v11474_v33 = vcombine.low %v143_v6, %v143_v6  ;;  %v138_v9 = vld [vmem:[%s20307_s4 + $0x160] sm:$0xff]  ;;  %20597 = vst [vmem:[#allocation26_spill] sm:$0xff] %v14115_v15  ;;  %20599 = vst [vmem:[#allocation28_spill] sm:$0xff] %v14134_v47 }
  0x3c   :  { %v126_v6 = vld [vmem:[%s20307_s4 + $0x100] sm:$0xff]  ;;  %v14113_v18 = vcombine.high %v134_v14, %v138_v9  ;;  %v14132_v61 = vcombine.low %v134_v14, %v138_v9  ;;  %v123_v9 = vld [vmem:[%s20307_s4 + $0xe8] sm:$0xff] }
  0x3d   :  { %v14105_v55 = vsel %vm577_vm0, %v11472_v32, 0  ;;  %v14108_v2 = vsel %vm577_vm0, %v11474_v33, 0  ;;  %v127_v32 = vld [vmem:[%s20307_s4 + $0x108] sm:$0xff]  ;;  %v14138_v42 = vcombine.high %v126_v6, %v130_v62  ;;  %v14158_v14 = vcombine.low %v126_v6, %v130_v62  ;;  %v114_v62 = vld [vmem:[%s20307_s4 + $0xa0] sm:$0xff] }
  0x3e   :  { %20594 = vst [vmem:[#allocation23_spill] sm:$0xff] %v14105_v55  ;;  %20595 = vst [vmem:[#allocation24_spill] sm:$0xff] %v14108_v2  ;;  %v131_v33 = vld [vmem:[%s20307_s4 + $0x128] sm:$0xff] }
  0x3f   :  { %20596 = vst [vmem:[#allocation25_spill] sm:$0xff] %v14113_v18  ;;  %20598 = vst [vmem:[#allocation27_spill] sm:$0xff] %v14132_v61  ;;  %v14140_v41 = vcombine.high %v127_v32, %v131_v33  ;;  %v111_v6 = vld [vmem:[%s20307_s4 + $0x88] sm:$0xff] }
  0x40   :  { %11385 = vmatmul.mubr.msk.bf16.gmra.mxu0 %vm552_vm1, %v14051_v34  ;;  %11394 = vmatmul.mubr.msk.bf16.gmra.mxu1 %vm552_vm1, %v14051_v34  ;;  %20600 = vst [vmem:[#allocation29_spill] sm:$0xff] %v14138_v42  ;;  %20602 = vst [vmem:[#allocation31_spill] sm:$0xff] %v14158_v14 }
  0x41   :  { %684 = vmatprep.mubr.bf16.mxu0 %v20593_v50  ;;  %797 = vmatprep.mubr.bf16.mxu1 %v20593_v50  ;;  %20601 = vst [vmem:[#allocation30_spill] sm:$0xff] %v14140_v41 }
  0x48   :  { %11386 = vmatmul.mubr.msk.bf16.gmra.mxu0 %vm552_vm1, %v14062_v39  ;;  %11395 = vmatmul.mubr.msk.bf16.gmra.mxu1 %vm552_vm1, %v14062_v39 }
  0x49   :  { %694 = vmatprep.mubr.bf16.mxu0 %v20593_v50  ;;  %807 = vmatprep.mubr.bf16.mxu1 %v20593_v50 }
  0x50   :  { %11387 = vmatmul.mubr.msk.bf16.gmra.mxu0 %vm552_vm1, %v14073_v48  ;;  %11396 = vmatmul.mubr.msk.bf16.gmra.mxu1 %vm552_vm1, %v14073_v48 }
  0x51   :  { %704 = vmatprep.mubr.bf16.mxu0 %v20593_v50  ;;  %817 = vmatprep.mubr.bf16.mxu1 %v20593_v50 }
  0x58   :  { %11388 = vmatmul.mubr.msk.bf16.gmra.mxu0 %vm552_vm1, %v14084_v49  ;;  %11397 = vmatmul.mubr.msk.bf16.gmra.mxu1 %vm552_vm1, %v14084_v49 }
  0x59   :  { %860 = vmatprep.mubr.bf16.mxu0 %v20593_v50  ;;  %973 = vmatprep.mubr.bf16.mxu1 %v20593_v50 }
  0x60   :  { %11399 = vmatmul.mubr.msk.bf16.vlgmr.msra.gmra.mxu0 %vm552_vm1, %v13835_v63  ;;  %11408 = vmatmul.mubr.msk.bf16.vlgmr.msra.gmra.mxu1 %vm552_vm1, %v13835_v63  ;;  %v118_v63 = vld [vmem:[%s20307_s4 + $0xc0] sm:$0xff] }
  0x61   :  { %1405 = vmatpush1.bf16.msra.mxu0 %v14105_v55  ;;  %1518 = vmatpush1.bf16.msra.mxu1 %v14108_v2  ;;  %v14166_v2 = vcombine.high %v119_v1, %v123_v9  ;;  %v110_v55 = vld [vmem:[%s20307_s4 + $0x80] sm:$0xff] }
  0x62   :  { %870 = vmatprep.mubr.bf16.mxu0 %v20593_v50  ;;  %983 = vmatprep.mubr.bf16.mxu1 %v20593_v50 }
  0x63   :  { %1406 = vmatprep.subr.bf16.mxu0 %v14113_v18  ;;  %1519 = vmatprep.subr.bf16.mxu1 %v14115_v15  ;;  %v14161_v15 = vcombine.low %v127_v32, %v131_v33  ;;  %v14164_v18 = vcombine.high %v118_v63, %v122_v0  ;;  %20605 = vst [vmem:[#allocation34_spill] sm:$0xff] %v14166_v2  ;;  %v115_v32 = vld [vmem:[%s20307_s4 + $0xa8] sm:$0xff] }
  0x64   :  { %v14190_v33 = vcombine.low %v119_v1, %v123_v9  ;;  %v14212_v1 = vcombine.low %v110_v55, %v114_v62  ;;  %v14214_v9 = vcombine.low %v111_v6, %v115_v32 }
  0x65   :  { %1407 = vmatpush1.bf16.msra.mxu0 %v14132_v61  ;;  %1520 = vmatpush1.bf16.msra.mxu1 %v14134_v47  ;;  %20603 = vst [vmem:[#allocation32_spill] sm:$0xff] %v14161_v15  ;;  %20604 = vst [vmem:[#allocation33_spill] sm:$0xff] %v14164_v18  ;;  %v102_v47 = vld [vmem:[%s20307_s4 + $0x40] sm:$0xff] }
  0x66   :  { %1408 = vmatprep.subr.bf16.mxu0 %v14138_v42  ;;  %1521 = vmatprep.subr.bf16.mxu1 %v14140_v41  ;;  %20607 = vst [vmem:[#allocation36_spill] sm:$0xff] %v14190_v33  ;;  %v14194_v41 = vcombine.high %v110_v55, %v114_v62  ;;  %v14196_v42 = vcombine.high %v111_v6, %v115_v32  ;;  %20610 = vst [vmem:[#allocation39_spill] sm:$0xff] %v14212_v1  ;;  %v98_v55 = vld [vmem:[%s20307_s4 + $0x20] sm:$0xff]  ;;  %v95_v62 = vld [vmem:[%s20307_s4 + $0x8] sm:$0xff] }
  0x67   :  { %20611 = vst [vmem:[#allocation40_spill] sm:$0xff] %v14214_v9  ;;  %v99_v6 = vld [vmem:[%s20307_s4 + $0x28] sm:$0xff] }
  0x68   :  { %11400 = vmatmul.mubr.msk.bf16.gmra.mxu0 %vm552_vm1, %v13892_v25  ;;  %11409 = vmatmul.mubr.msk.bf16.gmra.mxu1 %vm552_vm1, %v13892_v25  ;;  %v14188_v25 = vcombine.low %v118_v63, %v122_v0  ;;  %20608 = vst [vmem:[#allocation37_spill] sm:$0xff] %v14194_v41  ;;  %20609 = vst [vmem:[#allocation38_spill] sm:$0xff] %v14196_v42  ;;  %v103_v63 = vld [vmem:[%s20307_s4 + $0x48] sm:$0xff] }
  0x69   :  { %880 = vmatprep.mubr.bf16.mxu0 %v20593_v50  ;;  %993 = vmatprep.mubr.bf16.mxu1 %v20593_v50  ;;  %v107_v0 = vld [vmem:[%s20307_s4 + $0x68] sm:$0xff] }
  0x6a   :  { %1409 = vmatpush1.bf16.msra.mxu0 %v14158_v14  ;;  %1522 = vmatpush1.bf16.msra.mxu1 %v14161_v15  ;;  %20606 = vst [vmem:[#allocation35_spill] sm:$0xff] %v14188_v25  ;;  %v106_v15 = vld [vmem:[%s20307_s4 + $0x60] sm:$0xff]  ;;  %v14244_v32 = vcombine.low %v103_v63, %v107_v0 }
  0x6b   :  { %1410 = vmatprep.subr.bf16.mxu0 %v14164_v18  ;;  %1523 = vmatprep.subr.bf16.mxu1 %v14166_v2  ;;  %v14218_v2 = vcombine.high %v102_v47, %v106_v15  ;;  %v14220_v18 = vcombine.high %v103_v63, %v107_v0  ;;  %v94_v14 = vld [vmem:[%s20307_s4] sm:$0xff] }
  0x6c   :  { %20615 = vst [vmem:[#allocation44_spill] sm:$0xff] %v14244_v32 }
  0x6d   :  { %20612 = vst [vmem:[#allocation41_spill] sm:$0xff] %v14218_v2  ;;  %20613 = vst [vmem:[#allocation42_spill] sm:$0xff] %v14220_v18 }
  0x6e   :  { %1411 = vmatpush1.bf16.msra.mxu0 %v14188_v25  ;;  %1524 = vmatpush1.bf16.msra.mxu1 %v14190_v33  ;;  %v144_v33 = vld [vmem:[%s20307_s4 + $0x190] sm:$0x77] }
  0x6f   :  { %1412 = vmatprep.subr.bf16.mxu0 %v14194_v41  ;;  %1525 = vmatprep.subr.bf16.mxu1 %v14196_v42  ;;  %v14248_v42 = vcombine.high %v94_v14, %v98_v55  ;;  %v14250_v41 = vcombine.high %v95_v62, %v99_v6  ;;  %v14266_v63 = vcombine.high %v144_v33, %v144_v33 }
  0x70   :  { %11401 = vmatmul.mubr.msk.bf16.gmra.mxu0 %vm552_vm1, %v13945_v56  ;;  %11410 = vmatmul.mubr.msk.bf16.gmra.mxu1 %vm552_vm1, %v13945_v56  ;;  %v14242_v56 = vcombine.low %v102_v47, %v106_v15  ;;  %v14260_v47 = vcombine.low %v94_v14, %v98_v55  ;;  %v14262_v15 = vcombine.low %v95_v62, %v99_v6  ;;  %v140_v14 = vld [vmem:[%s20307_s4 + $0x170] sm:$0xff]  ;;  %v129_v6 = vld [vmem:[%s20307_s4 + $0x118] sm:$0xff] }
  0x71   :  { %890 = vmatprep.mubr.bf16.mxu0 %v20593_v50  ;;  %1003 = vmatprep.mubr.bf16.mxu1 %v20593_v50  ;;  %20616 = vst [vmem:[#allocation45_spill] sm:$0xff] %v14248_v42  ;;  %20617 = vst [vmem:[#allocation46_spill] sm:$0xff] %v14250_v41  ;;  %v128_v55 = vld [vmem:[%s20307_s4 + $0x110] sm:$0xff] }
  0x72   :  { %1413 = vmatpush1.bf16.msra.mxu0 %v14212_v1  ;;  %1526 = vmatpush1.bf16.msra.mxu1 %v14214_v9  ;;  %20614 = vst [vmem:[#allocation43_spill] sm:$0xff] %v14242_v56  ;;  %v145_v9 = vld [vmem:[%s20307_s4 + $0x198] sm:$0x77]  ;;  %20618 = vst [vmem:[#allocation47_spill] sm:$0xff] %v14260_v47  ;;  %v132_v62 = vld [vmem:[%s20307_s4 + $0x130] sm:$0xff] }
  0x73   :  { %1414 = vmatprep.subr.bf16.mxu0 %v14218_v2  ;;  %1527 = vmatprep.subr.bf16.mxu1 %v14220_v18  ;;  %20619 = vst [vmem:[#allocation48_spill] sm:$0xff] %v14262_v15  ;;  %20620 = vst [vmem:[#allocation49_spill] sm:$0xff] %v14266_v63  ;;  %v14268_v0 = vcombine.high %v145_v9, %v145_v9  ;;  %v96_v18 = vld [vmem:[%s20307_s4 + $0x10] sm:$0xff] }
  0x75   :  { %20621 = vst [vmem:[#allocation50_spill] sm:$0xff] %v14268_v0 }
  0x76   :  { %1415 = vmatpush1.bf16.msra.mxu0 %v14242_v56  ;;  %1528 = vmatpush1.bf16.msra.mxu1 %v14244_v32  ;;  %v112_v56 = vld [vmem:[%s20307_s4 + $0x90] sm:$0xff] }
  0x77   :  { %1416 = vmatprep.subr.bf16.mxu0 %v14248_v42  ;;  %1529 = vmatprep.subr.bf16.mxu1 %v14250_v41  ;;  %v14360_v41 = vld [vmem:[%s20309_s0 + $0x8] sm:$0xff]   ;;  %v14362_v42 = vcombine.high %v128_v55, %v132_v62 }
  0x78   :  { %11402 = vmatmul.mubr.msk.bf16.gmra.mxu0 %vm552_vm1, %v14016_v3  ;;  %11411 = vmatmul.mubr.msk.bf16.gmra.mxu1 %vm552_vm1, %v14016_v3  ;;  %v11476_v3 = vcombine.low %v144_v33, %v144_v33  ;;  %v141_v33 = vld [vmem:[%s20307_s4 + $0x178] sm:$0xff] }
  0x79   :  { %900 = vmatprep.mubr.bf16.mxu0 %v20593_v50  ;;  %1013 = vmatprep.mubr.bf16.mxu1 %v20593_v50  ;;  %20628 = vst [vmem:[#allocation57_spill] sm:$0xff] %v14362_v42 }
  0x7a   :  { %1417 = vmatpush1.bf16.msra.mxu0 %v14260_v47  ;;  %1530 = vmatpush1.bf16.msra.mxu1 %v14262_v15 }
  0x7b   :  { %11498 = vmatprep.subr.msk.bf16.mxu0 %vm577_vm0, %v14266_v63  ;;  %11507 = vmatprep.subr.msk.bf16.mxu1 %vm577_vm0, %v14268_v0 }
  0x80   :  { %11403 = vmatmul.mubr.msk.bf16.gmra.mxu0 %vm552_vm1, %v14051_v34  ;;  %11412 = vmatmul.mubr.msk.bf16.gmra.mxu1 %vm552_vm1, %v14051_v34  ;;  %v11478_v34 = vcombine.low %v145_v9, %v145_v9  ;;  %v14324_v9 = vsel %vm577_vm0, %v11476_v3, 0  ;;  %v133_v3 = vld [vmem:[%s20307_s4 + $0x138] sm:$0xff] }
  0x81   :  { %910 = vmatprep.mubr.bf16.mxu0 %v20593_v50  ;;  %1023 = vmatprep.mubr.bf16.mxu1 %v20593_v50  ;;  %20622 = vst [vmem:[#allocation51_spill] sm:$0xff] %v14324_v9  ;;  %v14364_v32 = vcombine.high %v129_v6, %v133_v3 }
  0x82   :  { %v14336_v0 = vsel %vm577_vm0, %v11478_v34, 0 }
  0x83   :  { %20623 = vst [vmem:[#allocation52_spill] sm:$0xff] %v14336_v0  ;;  %20629 = vst [vmem:[#allocation58_spill] sm:$0xff] %v14364_v32 }
  0x88   :  { %11404 = vmatmul.mubr.msk.bf16.gmra.mxu0 %vm552_vm1, %v14062_v39  ;;  %11413 = vmatmul.mubr.msk.bf16.gmra.mxu1 %vm552_vm1, %v14062_v39  ;;  %v14309_v39 = vld [vmem:[%s20309_s0] sm:$0xff]  }
  0x89   :  { %920 = vmatprep.mubr.bf16.mxu0 %v20593_v50  ;;  %1033 = vmatprep.mubr.bf16.mxu1 %v20593_v50 }
  0x90   :  { %11405 = vmatmul.mubr.msk.bf16.gmra.mxu0 %vm552_vm1, %v14073_v48  ;;  %11414 = vmatmul.mubr.msk.bf16.gmra.mxu1 %vm552_vm1, %v14073_v48  ;;  %v136_v48 = vld [vmem:[%s20307_s4 + $0x150] sm:$0xff] }
  0x91   :  { %930 = vmatprep.mubr.bf16.mxu0 %v20593_v50  ;;  %1043 = vmatprep.mubr.bf16.mxu1 %v20593_v50  ;;  %v14341_v63 = vcombine.high %v136_v48, %v140_v14  ;;  %v14351_v34 = vcombine.low %v136_v48, %v140_v14  ;;  %v120_v48 = vld [vmem:[%s20307_s4 + $0xd0] sm:$0xff] }
  0x92   :  { %v124_v14 = vld [vmem:[%s20307_s4 + $0xf0] sm:$0xff] }
  0x93   :  { %20624 = vst [vmem:[#allocation53_spill] sm:$0xff] %v14341_v63  ;;  %20626 = vst [vmem:[#allocation55_spill] sm:$0xff] %v14351_v34 }
  0x98   :  { %11406 = vmatmul.mubr.msk.bf16.gmra.mxu0 %vm552_vm1, %v14084_v49  ;;  %11415 = vmatmul.mubr.msk.bf16.gmra.mxu1 %vm552_vm1, %v14084_v49  ;;  %v137_v49 = vld [vmem:[%s20307_s4 + $0x158] sm:$0xff] }
  0x99   :  { %1434 = vmatprep.mubr.bf16.mxu0 %v20593_v50  ;;  %1547 = vmatprep.mubr.bf16.mxu1 %v20593_v50  ;;  %v14343_v15 = vcombine.high %v137_v49, %v141_v33  ;;  %v14353_v47 = vcombine.low %v137_v49, %v141_v33  ;;  %v121_v49 = vld [vmem:[%s20307_s4 + $0xd8] sm:$0xff] }
  0x9a   :  { %v125_v33 = vld [vmem:[%s20307_s4 + $0xf8] sm:$0xff] }
  0x9b   :  { %20625 = vst [vmem:[#allocation54_spill] sm:$0xff] %v14343_v15  ;;  %20627 = vst [vmem:[#allocation56_spill] sm:$0xff] %v14353_v47 }
  0xa0   :  { %11481 = vmatmul.mubr.msk.bf16.vlgmr.msra.gmra.mxu0 %vm552_vm1, %v14309_v39  ;;  %11490 = vmatmul.mubr.msk.bf16.vlgmr.msra.gmra.mxu1 %vm552_vm1, %v14309_v39 }
  0xa1   :  { %1631 = vmatpush1.bf16.msra.mxu0 %v14324_v9  ;;  %1744 = vmatpush1.bf16.msra.mxu1 %v14336_v0  ;;  %v14382_v0 = vcombine.low %v128_v55, %v132_v62  ;;  %v14385_v9 = vcombine.low %v129_v6, %v133_v3  ;;  %v116_v55 = vld [vmem:[%s20307_s4 + $0xb0] sm:$0xff]  ;;  %v113_v62 = vld [vmem:[%s20307_s4 + $0x98] sm:$0xff]  ;;  %v14412_v3 = vcombine.low %v120_v48, %v124_v14 }
  0xa2   :  { %1444 = vmatprep.mubr.bf16.mxu0 %v20593_v50  ;;  %1557 = vmatprep.mubr.bf16.mxu1 %v20593_v50  ;;  %v117_v6 = vld [vmem:[%s20307_s4 + $0xb8] sm:$0xff] }
  0xa3   :  { %1632 = vmatprep.subr.bf16.mxu0 %v14341_v63  ;;  %1745 = vmatprep.subr.bf16.mxu1 %v14343_v15  ;;  %20630 = vst [vmem:[#allocation59_spill] sm:$0xff] %v14382_v0  ;;  %20631 = vst [vmem:[#allocation60_spill] sm:$0xff] %v14385_v9  ;;  %v14388_v15 = vcombine.high %v120_v48, %v124_v14  ;;  %v14390_v63 = vcombine.high %v121_v49, %v125_v33  ;;  %v104_v48 = vld [vmem:[%s20307_s4 + $0x50] sm:$0xff] }
  0xa4   :  { %20634 = vst [vmem:[#allocation63_spill] sm:$0xff] %v14412_v3  ;;  %v108_v14 = vld [vmem:[%s20307_s4 + $0x70] sm:$0xff] }
  0xa5   :  { %1633 = vmatpush1.bf16.msra.mxu0 %v14351_v34  ;;  %1746 = vmatpush1.bf16.msra.mxu1 %v14353_v47  ;;  %20632 = vst [vmem:[#allocation61_spill] sm:$0xff] %v14388_v15  ;;  %20633 = vst [vmem:[#allocation62_spill] sm:$0xff] %v14390_v63  ;;  %v14423_v47 = vcombine.high %v112_v56, %v116_v55  ;;  %v14425_v34 = vcombine.high %v113_v62, %v117_v6 }
  0xa6   :  { %1634 = vmatprep.subr.bf16.mxu0 %v14362_v42  ;;  %1747 = vmatprep.subr.bf16.mxu1 %v14364_v32  ;;  %v14414_v32 = vcombine.low %v121_v49, %v125_v33  ;;  %v14419_v42 = vld [vmem:[%s20309_s0 + $0x10] sm:$0xff]   ;;  %v105_v49 = vld [vmem:[%s20307_s4 + $0x58] sm:$0xff] }
  0xa7   :  { %20636 = vst [vmem:[#allocation65_spill] sm:$0xff] %v14423_v47  ;;  %20637 = vst [vmem:[#allocation66_spill] sm:$0xff] %v14425_v34  ;;  %v109_v33 = vld [vmem:[%s20307_s4 + $0x78] sm:$0xff] }
  0xa8   :  { %11482 = vmatmul.mubr.msk.bf16.gmra.mxu0 %vm552_vm1, %v14360_v41  ;;  %11491 = vmatmul.mubr.msk.bf16.gmra.mxu1 %vm552_vm1, %v14360_v41  ;;  %20635 = vst [vmem:[#allocation64_spill] sm:$0xff] %v14414_v32 }
  0xa9   :  { %1454 = vmatprep.mubr.bf16.mxu0 %v20593_v50  ;;  %1567 = vmatprep.mubr.bf16.mxu1 %v20593_v50 }
  0xaa   :  { %1635 = vmatpush1.bf16.msra.mxu0 %v14382_v0  ;;  %1748 = vmatpush1.bf16.msra.mxu1 %v14385_v9  ;;  %v14447_v9 = vcombine.high %v104_v48, %v108_v14  ;;  %v14449_v0 = vcombine.high %v105_v49, %v109_v33 }
  0xab   :  { %1636 = vmatprep.subr.bf16.mxu0 %v14388_v15  ;;  %1749 = vmatprep.subr.bf16.mxu1 %v14390_v63  ;;  %v14441_v63 = vcombine.low %v112_v56, %v116_v55  ;;  %v14443_v15 = vcombine.low %v113_v62, %v117_v6  ;;  %v100_v56 = vld [vmem:[%s20307_s4 + $0x30] sm:$0xff]  ;;  %v97_v55 = vld [vmem:[%s20307_s4 + $0x18] sm:$0xff]  ;;  %v14471_v6 = vcombine.low %v104_v48, %v108_v14  ;;  %v11312_v48 = vld [vmem:[%s20307_s4 + $0x4c0] sm:$0x77] }
  0xac   :  { %20640 = vst [vmem:[#allocation69_spill] sm:$0xff] %v14447_v9  ;;  %20641 = vst [vmem:[#allocation70_spill] sm:$0xff] %v14449_v0  ;;  %v101_v62 = vld [vmem:[%s20307_s4 + $0x38] sm:$0xff]  ;;  %v11313_v14 = vld [vmem:[%s20307_s4 + $0x4c8] sm:$0x77] }
  0xad   :  { %20638 = vst [vmem:[#allocation67_spill] sm:$0xff] %v14441_v63  ;;  %20639 = vst [vmem:[#allocation68_spill] sm:$0xff] %v14443_v15 }
  0xae   :  { %1637 = vmatpush1.bf16.msra.mxu0 %v14412_v3  ;;  %1750 = vmatpush1.bf16.msra.mxu1 %v14414_v32  ;;  %20642 = vst [vmem:[#allocation71_spill] sm:$0xff] %v14471_v6  ;;  %v14479_v32 = vcombine.high %v97_v55, %v101_v62  ;;  %v14484_v3 = vld [vmem:[%s20309_s0 + $0x18] sm:$0xff]  }
  0xaf   :  { %1638 = vmatprep.subr.bf16.mxu0 %v14423_v47  ;;  %1751 = vmatprep.subr.bf16.mxu1 %v14425_v34  ;;  %v14473_v34 = vcombine.low %v105_v49, %v109_v33  ;;  %v14477_v47 = vcombine.high %v96_v18, %v100_v56  ;;  %v14494_v49 = vcombine.low %v96_v18, %v100_v56  ;;  %v14519_v18 = vld [vmem:[%s20309_s0 + $0x20] sm:$0xff]   ;;  %v14530_v56 = vld [vmem:[%s20309_s0 + $0x28] sm:$0xff]  }
  0xb0   :  { %11483 = vmatmul.mubr.msk.bf16.gmra.mxu0 %vm552_vm1, %v14419_v42  ;;  %11492 = vmatmul.mubr.msk.bf16.gmra.mxu1 %vm552_vm1, %v14419_v42  ;;  %20645 = vst [vmem:[#allocation74_spill] sm:$0xff] %v14479_v32  ;;  %v14496_v33 = vcombine.low %v97_v55, %v101_v62  ;;  %v14541_v55 = vld [vmem:[%s20309_s0 + $0x30] sm:$0xff]   ;;  %v14552_v62 = vld [vmem:[%s20309_s0 + $0x38] sm:$0xff]  }
  0xb1   :  { %1464 = vmatprep.mubr.bf16.mxu0 %v20593_v50  ;;  %1577 = vmatprep.mubr.bf16.mxu1 %v20593_v50  ;;  %20643 = vst [vmem:[#allocation72_spill] sm:$0xff] %v14473_v34  ;;  %20644 = vst [vmem:[#allocation73_spill] sm:$0xff] %v14477_v47 }
  0xb2   :  { %1639 = vmatpush1.bf16.msra.mxu0 %v14441_v63  ;;  %1752 = vmatpush1.bf16.msra.mxu1 %v14443_v15  ;;  %20646 = vst [vmem:[#allocation75_spill] sm:$0xff] %v14494_v49  ;;  %20647 = vst [vmem:[#allocation76_spill] sm:$0xff] %v14496_v33  ;;  %v11300_v63 = vld [vmem:[%s20307_s4 + $0x460] sm:$0xff] }
  0xb3   :  { %1640 = vmatprep.subr.bf16.mxu0 %v14447_v9  ;;  %1753 = vmatprep.subr.bf16.mxu1 %v14449_v0  ;;  %v14500_v0 = vcombine.high %v11312_v48, %v11312_v48  ;;  %v14502_v9 = vcombine.high %v11313_v14, %v11313_v14 }
  0xb5   :  { %20648 = vst [vmem:[#allocation77_spill] sm:$0xff] %v14500_v0  ;;  %20649 = vst [vmem:[#allocation78_spill] sm:$0xff] %v14502_v9 }
  0xb6   :  { %1641 = vmatpush1.bf16.msra.mxu0 %v14471_v6  ;;  %1754 = vmatpush1.bf16.msra.mxu1 %v14473_v34 }
  0xb7   :  { %1642 = vmatprep.subr.bf16.mxu0 %v14477_v47  ;;  %1755 = vmatprep.subr.bf16.mxu1 %v14479_v32  ;;  %v11305_v32 = vld [vmem:[%s20307_s4 + $0x488] sm:$0xff] }
  0xb8   :  { %11484 = vmatmul.mubr.msk.bf16.gmra.mxu0 %vm552_vm1, %v14484_v3  ;;  %11493 = vmatmul.mubr.msk.bf16.gmra.mxu1 %vm552_vm1, %v14484_v3  ;;  %v11309_v47 = vld [vmem:[%s20307_s4 + $0x4a8] sm:$0xff] }
  0xb9   :  { %1474 = vmatprep.mubr.bf16.mxu0 %v20593_v50  ;;  %1587 = vmatprep.mubr.bf16.mxu1 %v20593_v50  ;;  %v14583_v15 = vcombine.high %v11305_v32, %v11309_v47  ;;  %v14606_v61 = vcombine.low %v11305_v32, %v11309_v47  ;;  %v11288_v32 = vld [vmem:[%s20307_s4 + $0x400] sm:$0xff] }
  0xba   :  { %1643 = vmatpush1.bf16.msra.mxu0 %v14494_v49  ;;  %1756 = vmatpush1.bf16.msra.mxu1 %v14496_v33  ;;  %v11304_v33 = vld [vmem:[%s20307_s4 + $0x480] sm:$0xff] }
  0xbb   :  { %11580 = vmatprep.subr.msk.bf16.mxu0 %vm577_vm0, %v14500_v0  ;;  %11589 = vmatprep.subr.msk.bf16.mxu1 %vm577_vm0, %v14502_v9  ;;  %v11572_v9 = vcombine.low %v11312_v48, %v11312_v48  ;;  %v11574_v0 = vcombine.low %v11313_v14, %v11313_v14  ;;  %v11308_v49 = vld [vmem:[%s20307_s4 + $0x4a0] sm:$0xff]  ;;  %20653 = vst [vmem:[#allocation82_spill] sm:$0xff] %v14583_v15  ;;  %20657 = vst [vmem:[#allocation86_spill] sm:$0xff] %v14606_v61 }
  0xbc   :  { %v11296_v14 = vld [vmem:[%s20307_s4 + $0x440] sm:$0xff]  ;;  %v14581_v6 = vcombine.high %v11304_v33, %v11308_v49  ;;  %v14604_v25 = vcombine.low %v11304_v33, %v11308_v49  ;;  %v11289_v33 = vld [vmem:[%s20307_s4 + $0x408] sm:$0xff] }
  0xbd   :  { %v14573_v34 = vsel %vm577_vm0, %v11572_v9, 0  ;;  %v14576_v48 = vsel %vm577_vm0, %v11574_v0, 0  ;;  %v11297_v9 = vld [vmem:[%s20307_s4 + $0x448] sm:$0xff]  ;;  %v11292_v49 = vld [vmem:[%s20307_s4 + $0x420] sm:$0xff] }
  0xbe   :  { %20650 = vst [vmem:[#allocation79_spill] sm:$0xff] %v14573_v34  ;;  %20651 = vst [vmem:[#allocation80_spill] sm:$0xff] %v14576_v48  ;;  %v11301_v0 = vld [vmem:[%s20307_s4 + $0x468] sm:$0xff] }
  0xbf   :  { %20652 = vst [vmem:[#allocation81_spill] sm:$0xff] %v14581_v6  ;;  %20656 = vst [vmem:[#allocation85_spill] sm:$0xff] %v14604_v25 }
  0xc0   :  { %11485 = vmatmul.mubr.msk.bf16.gmra.mxu0 %vm552_vm1, %v14519_v18  ;;  %11494 = vmatmul.mubr.msk.bf16.gmra.mxu1 %vm552_vm1, %v14519_v18 }
  0xc1   :  { %1484 = vmatprep.mubr.bf16.mxu0 %v20593_v50  ;;  %1597 = vmatprep.mubr.bf16.mxu1 %v20593_v50 }
  0xc8   :  { %11486 = vmatmul.mubr.msk.bf16.gmra.mxu0 %vm552_vm1, %v14530_v56  ;;  %11495 = vmatmul.mubr.msk.bf16.gmra.mxu1 %vm552_vm1, %v14530_v56 }
  0xc9   :  { %1494 = vmatprep.mubr.bf16.mxu0 %v20593_v50  ;;  %1607 = vmatprep.mubr.bf16.mxu1 %v20593_v50 }
  0xd0   :  { %11487 = vmatmul.mubr.msk.bf16.gmra.mxu0 %vm552_vm1, %v14541_v55  ;;  %11496 = vmatmul.mubr.msk.bf16.gmra.mxu1 %vm552_vm1, %v14541_v55 }
  0xd1   :  { %1504 = vmatprep.mubr.bf16.mxu0 %v20593_v50  ;;  %1617 = vmatprep.mubr.bf16.mxu1 %v20593_v50 }
  0xd8   :  { %11488 = vmatmul.mubr.msk.bf16.gmra.mxu0 %vm552_vm1, %v14552_v62  ;;  %11497 = vmatmul.mubr.msk.bf16.gmra.mxu1 %vm552_vm1, %v14552_v62 }
  0xd9   :  { %1660 = vmatprep.mubr.bf16.mxu0 %v20593_v50  ;;  %1773 = vmatprep.mubr.bf16.mxu1 %v20593_v50 }
  0xe0   :  { %v14594_v2 = vpop.f32.mrf.mxu0  ;;  %v14596_v1 = vpop.f32.mrf.mxu1  ;;  %11499 = vmatmul.mubr.msk.bf16.vlgmr.msra.gmra.mxu0 %vm552_vm1, %v14309_v39  ;;  %11508 = vmatmul.mubr.msk.bf16.vlgmr.msra.gmra.mxu1 %vm552_vm1, %v14309_v39 }
  0xe1   :  { %20654 = vst [vmem:[#allocation83_spill] sm:$0xff] %v14594_v2  ;;  %20655 = vst [vmem:[#allocation84_spill] sm:$0xff] %v14596_v1  ;;  %2205 = vmatpush1.bf16.msra.mxu0 %v14573_v34  ;;  %2318 = vmatpush1.bf16.msra.mxu1 %v14576_v48  ;;  %v14614_v1 = vcombine.high %v11296_v14, %v11300_v63  ;;  %v14616_v2 = vcombine.high %v11297_v9, %v11301_v0 }
  0xe2   :  { %v14608_v40 = vpop.f32.mrf.mxu0  ;;  %v14610_v29 = vpop.f32.mrf.mxu1  ;;  %1670 = vmatprep.mubr.bf16.mxu0 %v20593_v50  ;;  %1783 = vmatprep.mubr.bf16.mxu1 %v20593_v50  ;;  %v14642_v34 = vcombine.low %v11296_v14, %v11300_v63  ;;  %v11284_v63 = vld [vmem:[%s20307_s4 + $0x3e0] sm:$0xff]  ;;  %v11281_v14 = vld [vmem:[%s20307_s4 + $0x3c8] sm:$0xff] }
  0xe3   :  { %20658 = vst [vmem:[#allocation87_spill] sm:$0xff] %v14610_v29  ;;  %20659 = vst [vmem:[#allocation88_spill] sm:$0xff] %v14614_v1  ;;  %2206 = vmatprep.subr.bf16.mxu0 %v14581_v6  ;;  %2319 = vmatprep.subr.bf16.mxu1 %v14583_v15  ;;  %v11293_v15 = vld [vmem:[%s20307_s4 + $0x428] sm:$0xff] }
  0xe4   :  { %20660 = vst [vmem:[#allocation89_spill] sm:$0xff] %v14616_v2  ;;  %v14623_v47 = vpop.f32.mrf.mxu0  ;;  %v14625_v39 = vpop.f32.mrf.mxu1  ;;  %20664 = vst [vmem:[#allocation93_spill] sm:$0xff] %v14642_v34  ;;  %v14650_v29 = vcombine.high %v11289_v33, %v11293_v15 }
  0xe5   :  { %20661 = vst [vmem:[#allocation90_spill] sm:$0xff] %v14623_v47  ;;  %20662 = vst [vmem:[#allocation91_spill] sm:$0xff] %v14625_v39  ;;  %2207 = vmatpush1.bf16.msra.mxu0 %v14604_v25  ;;  %2320 = vmatpush1.bf16.msra.mxu1 %v14606_v61  ;;  %v14645_v39 = vcombine.low %v11297_v9, %v11301_v0  ;;  %v14648_v47 = vcombine.high %v11288_v32, %v11292_v49  ;;  %v11280_v61 = vld [vmem:[%s20307_s4 + $0x3c0] sm:$0xff]  ;;  %v11285_v9 = vld [vmem:[%s20307_s4 + $0x3e8] sm:$0xff] }
  0xe6   :  { %v14638_v6 = vpop.f32.mrf.mxu0  ;;  %v14640_v48 = vpop.f32.mrf.mxu1  ;;  %2208 = vmatprep.subr.bf16.mxu0 %v14614_v1  ;;  %2321 = vmatprep.subr.bf16.mxu1 %v14616_v2  ;;  %20667 = vst [vmem:[#allocation96_spill] sm:$0xff] %v14650_v29  ;;  %v14682_v1 = vcombine.low %v11289_v33, %v11293_v15  ;;  %v11276_v15 = vld [vmem:[%s20307_s4 + $0x3a0] sm:$0xff] }
  0xe7   :  { %20663 = vst [vmem:[#allocation92_spill] sm:$0xff] %v14638_v6  ;;  %20665 = vst [vmem:[#allocation94_spill] sm:$0xff] %v14645_v39 }
  0xe8   :  { %20666 = vst [vmem:[#allocation95_spill] sm:$0xff] %v14648_v47  ;;  %v14655_v25 = vpop.f32.mrf.mxu0  ;;  %v14657_v6 = vpop.f32.mrf.mxu1  ;;  %11500 = vmatmul.mubr.msk.bf16.gmra.mxu0 %vm552_vm1, %v14360_v41  ;;  %11509 = vmatmul.mubr.msk.bf16.gmra.mxu1 %vm552_vm1, %v14360_v41  ;;  %v14680_v41 = vcombine.low %v11288_v32, %v11292_v49  ;;  %20673 = vst [vmem:[#allocation102_spill] sm:$0xff] %v14682_v1  ;;  %v11273_v32 = vld [vmem:[%s20307_s4 + $0x388] sm:$0xff] }
  0xe9   :  { %20668 = vst [vmem:[#allocation97_spill] sm:$0xff] %v14655_v25  ;;  %20669 = vst [vmem:[#allocation98_spill] sm:$0xff] %v14657_v6  ;;  %1680 = vmatprep.mubr.bf16.mxu0 %v20593_v50  ;;  %1793 = vmatprep.mubr.bf16.mxu1 %v20593_v50  ;;  %v14686_v6 = vcombine.high %v11280_v61, %v11284_v63  ;;  %v14688_v25 = vcombine.high %v11281_v14, %v11285_v9  ;;  %v11277_v49 = vld [vmem:[%s20307_s4 + $0x3a8] sm:$0xff] }
  0xea   :  { %v14674_v0 = vpop.f32.mrf.mxu0  ;;  %v14676_v2 = vpop.f32.mrf.mxu1  ;;  %2209 = vmatpush1.bf16.msra.mxu0 %v14642_v34  ;;  %2322 = vmatpush1.bf16.msra.mxu1 %v14645_v39  ;;  %20672 = vst [vmem:[#allocation101_spill] sm:$0xff] %v14680_v41  ;;  %v14714_v39 = vcombine.low %v11281_v14, %v11285_v9  ;;  %v11269_v14 = vld [vmem:[%s20307_s4 + $0x368] sm:$0xff] }
  0xeb   :  { %20670 = vst [vmem:[#allocation99_spill] sm:$0xff] %v14674_v0  ;;  %20671 = vst [vmem:[#allocation100_spill] sm:$0xff] %v14676_v2  ;;  %2210 = vmatprep.subr.bf16.mxu0 %v14648_v47  ;;  %2323 = vmatprep.subr.bf16.mxu1 %v14650_v29  ;;  %v11272_v2 = vld [vmem:[%s20307_s4 + $0x380] sm:$0xff]  ;;  %v14712_v47 = vcombine.low %v11280_v61, %v11284_v63  ;;  %v11265_v63 = vld [vmem:[%s20307_s4 + $0x348] sm:$0xff] }
  0xec   :  { %20674 = vst [vmem:[#allocation103_spill] sm:$0xff] %v14686_v6  ;;  %20675 = vst [vmem:[#allocation104_spill] sm:$0xff] %v14688_v25  ;;  %v14693_v0 = vpop.f32.mrf.mxu0  ;;  %v14695_v34 = vpop.f32.mrf.mxu1  ;;  %v11268_v61 = vld [vmem:[%s20307_s4 + $0x360] sm:$0xff] }
  0xed   :  { %20676 = vst [vmem:[#allocation105_spill] sm:$0xff] %v14693_v0  ;;  %20677 = vst [vmem:[#allocation106_spill] sm:$0xff] %v14695_v34  ;;  %v14718_v34 = vcombine.high %v11272_v2, %v11276_v15  ;;  %v14720_v0 = vcombine.high %v11273_v32, %v11277_v49 }
  0xee   :  { %v14706_v33 = vpop.f32.mrf.mxu0  ;;  %v14708_v29 = vpop.f32.mrf.mxu1  ;;  %2211 = vmatpush1.bf16.msra.mxu0 %v14680_v41  ;;  %2324 = vmatpush1.bf16.msra.mxu1 %v14682_v1  ;;  %20680 = vst [vmem:[#allocation109_spill] sm:$0xff] %v14712_v47  ;;  %20681 = vst [vmem:[#allocation110_spill] sm:$0xff] %v14714_v39 }
  0xef   :  { %20678 = vst [vmem:[#allocation107_spill] sm:$0xff] %v14706_v33  ;;  %20679 = vst [vmem:[#allocation108_spill] sm:$0xff] %v14708_v29  ;;  %2212 = vmatprep.subr.bf16.mxu0 %v14686_v6  ;;  %2325 = vmatprep.subr.bf16.mxu1 %v14688_v25  ;;  %v11264_v29 = vld [vmem:[%s20307_s4 + $0x340] sm:$0xff]  ;;  %v14752_v6 = vcombine.low %v11273_v32, %v11277_v49 }
  0xf0   :  { %20682 = vst [vmem:[#allocation111_spill] sm:$0xff] %v14718_v34  ;;  %20683 = vst [vmem:[#allocation112_spill] sm:$0xff] %v14720_v0  ;;  %v14725_v33 = vpop.f32.mrf.mxu0  ;;  %v14727_v41 = vpop.f32.mrf.mxu1  ;;  %11501 = vmatmul.mubr.msk.bf16.gmra.mxu0 %vm552_vm1, %v14419_v42  ;;  %11510 = vmatmul.mubr.msk.bf16.gmra.mxu1 %vm552_vm1, %v14419_v42  ;;  %v14750_v42 = vcombine.low %v11272_v2, %v11276_v15  ;;  %v14756_v1 = vcombine.high %v11264_v29, %v11268_v61  ;;  %v14772_v2 = vld [vmem:[%s20307_s4 + $0x4d8] sm:$0x77] }
  0xf1   :  { %20684 = vst [vmem:[#allocation113_spill] sm:$0xff] %v14725_v33  ;;  %20685 = vst [vmem:[#allocation114_spill] sm:$0xff] %v14727_v41  ;;  %1690 = vmatprep.mubr.bf16.mxu0 %v20593_v50  ;;  %1803 = vmatprep.mubr.bf16.mxu1 %v20593_v50  ;;  %v14758_v41 = vcombine.high %v11265_v63, %v11269_v14  ;;  %v14780_v49 = vcombine.low %v11264_v29, %v11268_v61 }
  0xf2   :  { %v14744_v9 = vpop.f32.mrf.mxu0  ;;  %v14746_v25 = vpop.f32.mrf.mxu1  ;;  %2213 = vmatpush1.bf16.msra.mxu0 %v14712_v47  ;;  %2326 = vmatpush1.bf16.msra.mxu1 %v14714_v39  ;;  %20687 = vst [vmem:[#allocation116_spill] sm:$0xff] %v14750_v42  ;;  %20688 = vst [vmem:[#allocation117_spill] sm:$0xff] %v14752_v6  ;;  %v14767_v39 = vld [vmem:[%s20307_s4 + $0x4d0] sm:$0x77]  ;;  %v14792_v47 = vcombine.high %v14772_v2, %v14772_v2 }
  0xf3   :  { %20686 = vst [vmem:[#allocation115_spill] sm:$0xff] %v14744_v9  ;;  %2214 = vmatprep.subr.bf16.mxu0 %v14718_v34  ;;  %2327 = vmatprep.subr.bf16.mxu1 %v14720_v0  ;;  %20689 = vst [vmem:[#allocation118_spill] sm:$0xff] %v14756_v1  ;;  %v14782_v0 = vcombine.low %v11265_v63, %v11269_v14  ;;  %v14788_v34 = vcombine.high %v14767_v39, %v14767_v39 }
  0xf4   :  { %20690 = vst [vmem:[#allocation119_spill] sm:$0xff] %v14758_v41  ;;  %v14760_v33 = vpop.f32.mrf.mxu0  ;;  %v14762_v9 = vpop.f32.mrf.mxu1  ;;  %20694 = vst [vmem:[#allocation123_spill] sm:$0xff] %v14780_v49 }
  0xf5   :  { %20691 = vst [vmem:[#allocation120_spill] sm:$0xff] %v14762_v9  ;;  %20695 = vst [vmem:[#allocation124_spill] sm:$0xff] %v14782_v0 }
  0xf6   :  { %v14774_v15 = vpop.f32.mrf.mxu0  ;;  %v14776_v32 = vpop.f32.mrf.mxu1  ;;  %2215 = vmatpush1.bf16.msra.mxu0 %v14750_v42  ;;  %2328 = vmatpush1.bf16.msra.mxu1 %v14752_v6  ;;  %20696 = vst [vmem:[#allocation125_spill] sm:$0xff] %v14788_v34  ;;  %20697 = vst [vmem:[#allocation126_spill] sm:$0xff] %v14792_v47 }
  0xf7   :  { %20692 = vst [vmem:[#allocation121_spill] sm:$0xff] %v14774_v15  ;;  %20693 = vst [vmem:[#allocation122_spill] sm:$0xff] %v14776_v32  ;;  %2216 = vmatprep.subr.bf16.mxu0 %v14756_v1  ;;  %2329 = vmatprep.subr.bf16.mxu1 %v14758_v41 }
  0xf8   :  { %v14794_v32 = vpop.f32.mrf.mxu0  ;;  %v14796_v42 = vpop.f32.mrf.mxu1  ;;  %11502 = vmatmul.mubr.msk.bf16.gmra.mxu0 %vm552_vm1, %v14484_v3  ;;  %11511 = vmatmul.mubr.msk.bf16.gmra.mxu1 %vm552_vm1, %v14484_v3 }
  0xf9   :  { %20698 = vst [vmem:[#allocation127_spill] sm:$0xff] %v14794_v32  ;;  %20699 = vst [vmem:[#allocation128_spill] sm:$0xff] %v14796_v42  ;;  %1700 = vmatprep.mubr.bf16.mxu0 %v20593_v50  ;;  %1813 = vmatprep.mubr.bf16.mxu1 %v20593_v50 }
  0xfa   :  { %v14804_v29 = vpop.f32.mrf.mxu0  ;;  %v14806_v61 = vpop.f32.mrf.mxu1  ;;  %2217 = vmatpush1.bf16.msra.mxu0 %v14780_v49  ;;  %2330 = vmatpush1.bf16.msra.mxu1 %v14782_v0 }
  0xfb   :  { %20700 = vst [vmem:[#allocation129_spill] sm:$0xff] %v14804_v29  ;;  %20701 = vst [vmem:[#allocation130_spill] sm:$0xff] %v14806_v61  ;;  %11598 = vmatprep.subr.msk.bf16.mxu0 %vm577_vm0, %v14788_v34  ;;  %11607 = vmatprep.subr.msk.bf16.mxu1 %vm577_vm0, %v14792_v47 }
  0xfc   :  { %v14814_v63 = vpop.f32.mrf.mxu0  ;;  %v14816_v3 = vpop.f32.mrf.mxu1 }
  0xfd   :  { %20702 = vst [vmem:[#allocation131_spill] sm:$0xff] %v14814_v63  ;;  %20703 = vst [vmem:[#allocation132_spill] sm:$0xff] %v14816_v3 }
  0xfe   :  { %v14818_v14 = vpop.f32.mrf.mxu0  ;;  %v14820_v41 = vpop.f32.mrf.mxu1 }
  0xff   :  { %20704 = vst [vmem:[#allocation133_spill] sm:$0xff] %v14818_v14  ;;  %20705 = vst [vmem:[#allocation134_spill] sm:$0xff] %v14820_v41 }
 0x100   :  { %v14822_v1 = vpop.f32.mrf.mxu0  ;;  %v14824_v6 = vpop.f32.mrf.mxu1  ;;  %11503 = vmatmul.mubr.msk.bf16.gmra.mxu0 %vm552_vm1, %v14519_v18  ;;  %11512 = vmatmul.mubr.msk.bf16.gmra.mxu1 %vm552_vm1, %v14519_v18 }
 0x101   :  { %20706 = vst [vmem:[#allocation135_spill] sm:$0xff] %v14822_v1  ;;  %20707 = vst [vmem:[#allocation136_spill] sm:$0xff] %v14824_v6  ;;  %1710 = vmatprep.mubr.bf16.mxu0 %v20593_v50  ;;  %1823 = vmatprep.mubr.bf16.mxu1 %v20593_v50 }
 0x102   :  { %v14832_v47 = vpop.f32.mrf.mxu0  ;;  %v14834_v34 = vpop.f32.mrf.mxu1 }
 0x103   :  { %20708 = vst [vmem:[#allocation137_spill] sm:$0xff] %v14832_v47  ;;  %20709 = vst [vmem:[#allocation138_spill] sm:$0xff] %v14834_v34 }
 0x104   :  { %v14836_v0 = vpop.f32.mrf.mxu0  ;;  %v14838_v49 = vpop.f32.mrf.mxu1 }
 0x105   :  { %20710 = vst [vmem:[#allocation139_spill] sm:$0xff] %v14836_v0  ;;  %20711 = vst [vmem:[#allocation140_spill] sm:$0xff] %v14838_v49 }
 0x106   :  { %v14840_v1 = vpop.f32.mrf.mxu0  ;;  %v14842_v6 = vpop.f32.mrf.mxu1 }
 0x107   :  { %20712 = vst [vmem:[#allocation141_spill] sm:$0xff] %v14840_v1  ;;  %20713 = vst [vmem:[#allocation142_spill] sm:$0xff] %v14842_v6 }
 0x108   :  { %v14844_v41 = vpop.f32.mrf.mxu0  ;;  %v14846_v14 = vpop.f32.mrf.mxu1  ;;  %11504 = vmatmul.mubr.msk.bf16.gmra.mxu0 %vm552_vm1, %v14530_v56  ;;  %11513 = vmatmul.mubr.msk.bf16.gmra.mxu1 %vm552_vm1, %v14530_v56 }
 0x109   :  { %20714 = vst [vmem:[#allocation143_spill] sm:$0xff] %v14844_v41  ;;  %20715 = vst [vmem:[#allocation144_spill] sm:$0xff] %v14846_v14  ;;  %1720 = vmatprep.mubr.bf16.mxu0 %v20593_v50  ;;  %1833 = vmatprep.mubr.bf16.mxu1 %v20593_v50 }
 0x10a   :  { %v14854_v18 = vpop.f32.mrf.mxu0  ;;  %v14856_v49 = vpop.f32.mrf.mxu1 }
 0x10b   :  { %20716 = vst [vmem:[#allocation145_spill] sm:$0xff] %v14854_v18  ;;  %20717 = vst [vmem:[#allocation146_spill] sm:$0xff] %v14856_v49 }
 0x10c   :  { %v14858_v1 = vpop.f32.mrf.mxu0  ;;  %v14860_v6 = vpop.f32.mrf.mxu1 }
 0x10d   :  { %20718 = vst [vmem:[#allocation147_spill] sm:$0xff] %v14858_v1  ;;  %20719 = vst [vmem:[#allocation148_spill] sm:$0xff] %v14860_v6 }
 0x10e   :  { %v14862_v41 = vpop.f32.mrf.mxu0  ;;  %v14864_v14 = vpop.f32.mrf.mxu1 }
 0x10f   :  { %20720 = vst [vmem:[#allocation149_spill] sm:$0xff] %v14862_v41  ;;  %20721 = vst [vmem:[#allocation150_spill] sm:$0xff] %v14864_v14 }
 0x110   :  { %v14866_v0 = vpop.f32.mrf.mxu0  ;;  %v14868_v34 = vpop.f32.mrf.mxu1  ;;  %11505 = vmatmul.mubr.msk.bf16.gmra.mxu0 %vm552_vm1, %v14541_v55  ;;  %11514 = vmatmul.mubr.msk.bf16.gmra.mxu1 %vm552_vm1, %v14541_v55 }
 0x111   :  { %20722 = vst [vmem:[#allocation151_spill] sm:$0xff] %v14866_v0  ;;  %20723 = vst [vmem:[#allocation152_spill] sm:$0xff] %v14868_v34  ;;  %1730 = vmatprep.mubr.bf16.mxu0 %v20593_v50  ;;  %1843 = vmatprep.mubr.bf16.mxu1 %v20593_v50 }
 0x112   :  { %v14876_v56 = vpop.f32.mrf.mxu0  ;;  %v14878_v6 = vpop.f32.mrf.mxu1 }
 0x113   :  { %20724 = vst [vmem:[#allocation153_spill] sm:$0xff] %v14876_v56  ;;  %20725 = vst [vmem:[#allocation154_spill] sm:$0xff] %v14878_v6  ;;  %v11298_v56 = vld [vmem:[%s20307_s4 + $0x450] sm:$0xff] }
 0x114   :  { %v14880_v41 = vpop.f32.mrf.mxu0  ;;  %v14882_v14 = vpop.f32.mrf.mxu1 }
 0x115   :  { %20726 = vst [vmem:[#allocation155_spill] sm:$0xff] %v14880_v41  ;;  %20727 = vst [vmem:[#allocation156_spill] sm:$0xff] %v14882_v14 }
 0x116   :  { %v14884_v0 = vpop.f32.mrf.mxu0  ;;  %v14886_v34 = vpop.f32.mrf.mxu1 }
 0x117   :  { %20728 = vst [vmem:[#allocation157_spill] sm:$0xff] %v14884_v0  ;;  %20729 = vst [vmem:[#allocation158_spill] sm:$0xff] %v14886_v34  ;;  %v11576_v34 = vcombine.low %v14767_v39, %v14767_v39  ;;  %v11310_v39 = vld [vmem:[%s20307_s4 + $0x4b0] sm:$0xff] }
 0x118   :  { %v14888_v1 = vpop.f32.mrf.mxu0  ;;  %v14890_v49 = vpop.f32.mrf.mxu1  ;;  %11506 = vmatmul.mubr.msk.bf16.gmra.mxu0 %vm552_vm1, %v14552_v62  ;;  %11515 = vmatmul.mubr.msk.bf16.gmra.mxu1 %vm552_vm1, %v14552_v62  ;;  %v11306_v62 = vld [vmem:[%s20307_s4 + $0x490] sm:$0xff] }
 0x119   :  { %20730 = vst [vmem:[#allocation159_spill] sm:$0xff] %v14888_v1  ;;  %20731 = vst [vmem:[#allocation160_spill] sm:$0xff] %v14890_v49  ;;  %2234 = vmatprep.mubr.bf16.mxu0 %v20593_v50  ;;  %2347 = vmatprep.mubr.bf16.mxu1 %v20593_v50  ;;  %v11578_v49 = vcombine.low %v14772_v2, %v14772_v2  ;;  %v14909_v1 = vld [vmem:[%s20310_s2] sm:$0xff]   ;;  %v11307_v2 = vld [vmem:[%s20307_s4 + $0x498] sm:$0xff]  ;;  %v14940_v18 = vcombine.high %v11306_v62, %v11310_v39 }
 0x11a   :  { %v14898_v55 = vpop.f32.mrf.mxu0  ;;  %v14900_v14 = vpop.f32.mrf.mxu1  ;;  %v14963_v63 = vcombine.low %v11306_v62, %v11310_v39 }
 0x11b   :  { %20732 = vst [vmem:[#allocation161_spill] sm:$0xff] %v14898_v55  ;;  %20733 = vst [vmem:[#allocation162_spill] sm:$0xff] %v14900_v14  ;;  %v11311_v14 = vld [vmem:[%s20307_s4 + $0x4b8] sm:$0xff] }
 0x11c   :  { %v14914_v0 = vpop.f32.mrf.mxu0  ;;  %v14916_v55 = vpop.f32.mrf.mxu1  ;;  %20740 = vst [vmem:[#allocation169_spill] sm:$0xff] %v14940_v18  ;;  %v14942_v47 = vcombine.high %v11307_v2, %v11311_v14  ;;  %20744 = vst [vmem:[#allocation173_spill] sm:$0xff] %v14963_v63  ;;  %v14965_v61 = vcombine.low %v11307_v2, %v11311_v14  ;;  %v11290_v14 = vld [vmem:[%s20307_s4 + $0x410] sm:$0xff] }
 0x11d   :  { %20734 = vst [vmem:[#allocation163_spill] sm:$0xff] %v14914_v0  ;;  %20735 = vst [vmem:[#allocation164_spill] sm:$0xff] %v14916_v55  ;;  %v14932_v0 = vsel %vm577_vm0, %v11576_v34, 0  ;;  %v14935_v55 = vsel %vm577_vm0, %v11578_v49, 0  ;;  %v11299_v34 = vld [vmem:[%s20307_s4 + $0x458] sm:$0xff]  ;;  %v11294_v2 = vld [vmem:[%s20307_s4 + $0x430] sm:$0xff] }
 0x11e   :  { %v14927_v41 = vpop.f32.mrf.mxu0  ;;  %v14929_v6 = vpop.f32.mrf.mxu1  ;;  %20738 = vst [vmem:[#allocation167_spill] sm:$0xff] %v14932_v0  ;;  %20739 = vst [vmem:[#allocation168_spill] sm:$0xff] %v14935_v55  ;;  %v11303_v49 = vld [vmem:[%s20307_s4 + $0x478] sm:$0xff] }
 0x11f   :  { %20736 = vst [vmem:[#allocation165_spill] sm:$0xff] %v14927_v41  ;;  %20737 = vst [vmem:[#allocation166_spill] sm:$0xff] %v14929_v6  ;;  %v11302_v41 = vld [vmem:[%s20307_s4 + $0x470] sm:$0xff] }
 0x120   :  { %20741 = vst [vmem:[#allocation170_spill] sm:$0xff] %v14942_v47  ;;  %v14953_v6 = vpop.f32.mrf.mxu0  ;;  %v14955_v3 = vpop.f32.mrf.mxu1  ;;  %11581 = vmatmul.mubr.msk.bf16.vlgmr.msra.gmra.mxu0 %vm552_vm1, %v14909_v1  ;;  %11590 = vmatmul.mubr.msk.bf16.vlgmr.msra.gmra.mxu1 %vm552_vm1, %v14909_v1  ;;  %20745 = vst [vmem:[#allocation174_spill] sm:$0xff] %v14965_v61 }
 0x121   :  { %20742 = vst [vmem:[#allocation171_spill] sm:$0xff] %v14953_v6  ;;  %20743 = vst [vmem:[#allocation172_spill] sm:$0xff] %v14955_v3  ;;  %2431 = vmatpush1.bf16.msra.mxu0 %v14932_v0  ;;  %2544 = vmatpush1.bf16.msra.mxu1 %v14935_v55  ;;  %v14973_v3 = vcombine.high %v11298_v56, %v11302_v41  ;;  %v14975_v6 = vcombine.high %v11299_v34, %v11303_v49  ;;  %v14980_v55 = vld [vmem:[%s20310_s2 + $0x8] sm:$0xff]   ;;  %v11291_v0 = vld [vmem:[%s20307_s4 + $0x418] sm:$0xff] }
 0x122   :  { %v14967_v29 = vpop.f32.mrf.mxu0  ;;  %v14969_v42 = vpop.f32.mrf.mxu1  ;;  %2244 = vmatprep.mubr.bf16.mxu0 %v20593_v50  ;;  %2357 = vmatprep.mubr.bf16.mxu1 %v20593_v50 }
 0x123   :  { %20746 = vst [vmem:[#allocation175_spill] sm:$0xff] %v14967_v29  ;;  %20747 = vst [vmem:[#allocation176_spill] sm:$0xff] %v14969_v42  ;;  %2432 = vmatprep.subr.bf16.mxu0 %v14940_v18  ;;  %2545 = vmatprep.subr.bf16.mxu1 %v14942_v47  ;;  %v11295_v47 = vld [vmem:[%s20307_s4 + $0x438] sm:$0xff]  ;;  %v15009_v42 = vcombine.low %v11299_v34, %v11303_v49  ;;  %v15012_v29 = vcombine.high %v11290_v14, %v11294_v2 }
 0x124   :  { %20748 = vst [vmem:[#allocation177_spill] sm:$0xff] %v14973_v3  ;;  %20749 = vst [vmem:[#allocation178_spill] sm:$0xff] %v14975_v6  ;;  %v14987_v62 = vpop.f32.mrf.mxu0  ;;  %v14989_v39 = vpop.f32.mrf.mxu1  ;;  %v15014_v32 = vcombine.high %v11291_v0, %v11295_v47  ;;  %v11287_v34 = vld [vmem:[%s20307_s4 + $0x3f8] sm:$0xff] }
 0x125   :  { %20750 = vst [vmem:[#allocation179_spill] sm:$0xff] %v14987_v62  ;;  %20751 = vst [vmem:[#allocation180_spill] sm:$0xff] %v14989_v39  ;;  %2433 = vmatpush1.bf16.msra.mxu0 %v14963_v63  ;;  %2546 = vmatpush1.bf16.msra.mxu1 %v14965_v61  ;;  %v15006_v39 = vcombine.low %v11298_v56, %v11302_v41  ;;  %v11282_v61 = vld [vmem:[%s20307_s4 + $0x3d0] sm:$0xff]  ;;  %v11283_v56 = vld [vmem:[%s20307_s4 + $0x3d8] sm:$0xff] }
 0x126   :  { %v15002_v18 = vpop.f32.mrf.mxu0  ;;  %v15004_v62 = vpop.f32.mrf.mxu1  ;;  %2434 = vmatprep.subr.bf16.mxu0 %v14973_v3  ;;  %20755 = vst [vmem:[#allocation184_spill] sm:$0xff] %v15009_v42  ;;  %2547 = vmatprep.subr.bf16.mxu1 %v14975_v6  ;;  %20756 = vst [vmem:[#allocation185_spill] sm:$0xff] %v15012_v29  ;;  %v11286_v41 = vld [vmem:[%s20307_s4 + $0x3f0] sm:$0xff]  ;;  %v15044_v3 = vcombine.low %v11290_v14, %v11294_v2 }
 0x127   :  { %20752 = vst [vmem:[#allocation181_spill] sm:$0xff] %v15002_v18  ;;  %20753 = vst [vmem:[#allocation182_spill] sm:$0xff] %v15004_v62  ;;  %v11274_v14 = vld [vmem:[%s20307_s4 + $0x390] sm:$0xff] }
 0x128   :  { %20754 = vst [vmem:[#allocation183_spill] sm:$0xff] %v15006_v39  ;;  %20757 = vst [vmem:[#allocation186_spill] sm:$0xff] %v15014_v32  ;;  %v15019_v63 = vpop.f32.mrf.mxu0  ;;  %v15021_v18 = vpop.f32.mrf.mxu1  ;;  %11582 = vmatmul.mubr.msk.bf16.gmra.mxu0 %vm552_vm1, %v14980_v55  ;;  %11591 = vmatmul.mubr.msk.bf16.gmra.mxu1 %vm552_vm1, %v14980_v55 }
 0x129   :  { %20758 = vst [vmem:[#allocation187_spill] sm:$0xff] %v15019_v63  ;;  %20759 = vst [vmem:[#allocation188_spill] sm:$0xff] %v15021_v18  ;;  %2254 = vmatprep.mubr.bf16.mxu0 %v20593_v50  ;;  %2367 = vmatprep.mubr.bf16.mxu1 %v20593_v50  ;;  %v15046_v18 = vcombine.low %v11291_v0, %v11295_v47  ;;  %v15051_v63 = vld [vmem:[%s20310_s2 + $0x10] sm:$0xff]  }
 0x12a   :  { %v15038_v49 = vpop.f32.mrf.mxu0  ;;  %v15040_v6 = vpop.f32.mrf.mxu1  ;;  %2435 = vmatpush1.bf16.msra.mxu0 %v15006_v39  ;;  %2548 = vmatpush1.bf16.msra.mxu1 %v15009_v42  ;;  %20762 = vst [vmem:[#allocation191_spill] sm:$0xff] %v15044_v3  ;;  %v11278_v0 = vld [vmem:[%s20307_s4 + $0x3b0] sm:$0xff] }
 0x12b   :  { %20760 = vst [vmem:[#allocation189_spill] sm:$0xff] %v15038_v49  ;;  %20761 = vst [vmem:[#allocation190_spill] sm:$0xff] %v15040_v6  ;;  %2436 = vmatprep.subr.bf16.mxu0 %v15012_v29  ;;  %2549 = vmatprep.subr.bf16.mxu1 %v15014_v32  ;;  %v15055_v49 = vcombine.high %v11282_v61, %v11286_v41  ;;  %v15057_v6 = vcombine.high %v11283_v56, %v11287_v34  ;;  %v11275_v32 = vld [vmem:[%s20307_s4 + $0x398] sm:$0xff] }
 0x12c   :  { %20763 = vst [vmem:[#allocation192_spill] sm:$0xff] %v15046_v18  ;;  %v15062_v2 = vpop.f32.mrf.mxu0  ;;  %v15064_v47 = vpop.f32.mrf.mxu1  ;;  %v11279_v29 = vld [vmem:[%s20307_s4 + $0x3b8] sm:$0xff]  ;;  %v15087_v62 = vcombine.high %v11274_v14, %v11278_v0 }
 0x12d   :  { %20764 = vst [vmem:[#allocation193_spill] sm:$0xff] %v15055_v49  ;;  %20765 = vst [vmem:[#allocation194_spill] sm:$0xff] %v15057_v6  ;;  %v15089_v15 = vcombine.high %v11275_v32, %v11279_v29 }
 0x12e   :  { %20766 = vst [vmem:[#allocation195_spill] sm:$0xff] %v15062_v2  ;;  %20767 = vst [vmem:[#allocation196_spill] sm:$0xff] %v15064_v47  ;;  %v15075_v42 = vpop.f32.mrf.mxu0  ;;  %v15077_v39 = vpop.f32.mrf.mxu1  ;;  %2437 = vmatpush1.bf16.msra.mxu0 %v15044_v3  ;;  %2550 = vmatpush1.bf16.msra.mxu1 %v15046_v18  ;;  %v15081_v47 = vcombine.low %v11282_v61, %v11286_v41  ;;  %v15083_v2 = vcombine.low %v11283_v56, %v11287_v34  ;;  %v11270_v61 = vld [vmem:[%s20307_s4 + $0x370] sm:$0xff]  ;;  %v11267_v41 = vld [vmem:[%s20307_s4 + $0x358] sm:$0xff] }
 0x12f   :  { %20768 = vst [vmem:[#allocation197_spill] sm:$0xff] %v15075_v42  ;;  %20769 = vst [vmem:[#allocation198_spill] sm:$0xff] %v15077_v39  ;;  %2438 = vmatprep.subr.bf16.mxu0 %v15055_v49  ;;  %2551 = vmatprep.subr.bf16.mxu1 %v15057_v6  ;;  %v11266_v39 = vld [vmem:[%s20307_s4 + $0x350] sm:$0xff]  ;;  %v11271_v56 = vld [vmem:[%s20307_s4 + $0x378] sm:$0xff]  ;;  %v15119_v49 = vcombine.low %v11274_v14, %v11278_v0  ;;  %v15121_v18 = vcombine.low %v11275_v32, %v11279_v29 }
 0x130   :  { %20770 = vst [vmem:[#allocation199_spill] sm:$0xff] %v15081_v47  ;;  %20771 = vst [vmem:[#allocation200_spill] sm:$0xff] %v15083_v2  ;;  %v15094_v42 = vpop.f32.mrf.mxu0  ;;  %v15096_v3 = vpop.f32.mrf.mxu1  ;;  %11583 = vmatmul.mubr.msk.bf16.gmra.mxu0 %vm552_vm1, %v15051_v63  ;;  %11592 = vmatmul.mubr.msk.bf16.gmra.mxu1 %vm552_vm1, %v15051_v63  ;;  %v15144_v29 = vcombine.low %v11266_v39, %v11270_v61  ;;  %v15146_v0 = vcombine.low %v11267_v41, %v11271_v56 }
 0x131   :  { %20772 = vst [vmem:[#allocation201_spill] sm:$0xff] %v15087_v62  ;;  %20773 = vst [vmem:[#allocation202_spill] sm:$0xff] %v15089_v15  ;;  %2264 = vmatprep.mubr.bf16.mxu0 %v20593_v50  ;;  %2377 = vmatprep.mubr.bf16.mxu1 %v20593_v50 }
 0x132   :  { %20774 = vst [vmem:[#allocation203_spill] sm:$0xff] %v15094_v42  ;;  %20775 = vst [vmem:[#allocation204_spill] sm:$0xff] %v15096_v3  ;;  %v15113_v34 = vpop.f32.mrf.mxu0  ;;  %v15115_v6 = vpop.f32.mrf.mxu1  ;;  %2439 = vmatpush1.bf16.msra.mxu0 %v15081_v47  ;;  %2552 = vmatpush1.bf16.msra.mxu1 %v15083_v2  ;;  %v15125_v3 = vcombine.high %v11266_v39, %v11270_v61  ;;  %v15127_v42 = vcombine.high %v11267_v41, %v11271_v56  ;;  %v15136_v2 = vld [vmem:[%s20310_s2 + $0x18] sm:$0xff]  }
 0x133   :  { %20776 = vst [vmem:[#allocation205_spill] sm:$0xff] %v15113_v34  ;;  %20777 = vst [vmem:[#allocation206_spill] sm:$0xff] %v15115_v6  ;;  %2440 = vmatprep.subr.bf16.mxu0 %v15087_v62  ;;  %2553 = vmatprep.subr.bf16.mxu1 %v15089_v15 }
 0x134   :  { %20778 = vst [vmem:[#allocation207_spill] sm:$0xff] %v15119_v49  ;;  %20779 = vst [vmem:[#allocation208_spill] sm:$0xff] %v15121_v18  ;;  %v15129_v9 = vpop.f32.mrf.mxu0  ;;  %v15131_v34 = vpop.f32.mrf.mxu1 }
 0x135   :  { %20780 = vst [vmem:[#allocation209_spill] sm:$0xff] %v15125_v3  ;;  %20781 = vst [vmem:[#allocation210_spill] sm:$0xff] %v15127_v42 }
 0x136   :  { %20782 = vst [vmem:[#allocation211_spill] sm:$0xff] %v15129_v9  ;;  %20783 = vst [vmem:[#allocation212_spill] sm:$0xff] %v15131_v34  ;;  %v15138_v14 = vpop.f32.mrf.mxu0  ;;  %v15140_v32 = vpop.f32.mrf.mxu1  ;;  %2441 = vmatpush1.bf16.msra.mxu0 %v15119_v49  ;;  %2554 = vmatpush1.bf16.msra.mxu1 %v15121_v18 }
 0x137   :  { %20784 = vst [vmem:[#allocation213_spill] sm:$0xff] %v15138_v14  ;;  %20785 = vst [vmem:[#allocation214_spill] sm:$0xff] %v15140_v32  ;;  %2442 = vmatprep.subr.bf16.mxu0 %v15125_v3  ;;  %2555 = vmatprep.subr.bf16.mxu1 %v15127_v42  ;;  %v15177_v42 = vld [vmem:[%s20310_s2 + $0x20] sm:$0xff]  }
 0x138   :  { %20786 = vst [vmem:[#allocation215_spill] sm:$0xff] %v15144_v29  ;;  %20787 = vst [vmem:[#allocation216_spill] sm:$0xff] %v15146_v0  ;;  %v15150_v15 = vpop.f32.mrf.mxu0  ;;  %v15152_v62 = vpop.f32.mrf.mxu1  ;;  %11584 = vmatmul.mubr.msk.bf16.gmra.mxu0 %vm552_vm1, %v15136_v2  ;;  %11593 = vmatmul.mubr.msk.bf16.gmra.mxu1 %vm552_vm1, %v15136_v2 }
 0x139   :  { %20788 = vst [vmem:[#allocation217_spill] sm:$0xff] %v15150_v15  ;;  %20789 = vst [vmem:[#allocation218_spill] sm:$0xff] %v15152_v62  ;;  %2274 = vmatprep.mubr.bf16.mxu0 %v20593_v50  ;;  %2387 = vmatprep.mubr.bf16.mxu1 %v20593_v50 }
 0x13a   :  { %v15160_v39 = vpop.f32.mrf.mxu0  ;;  %v15162_v61 = vpop.f32.mrf.mxu1  ;;  %2443 = vmatpush1.bf16.msra.mxu0 %v15144_v29  ;;  %2556 = vmatpush1.bf16.msra.mxu1 %v15146_v0 }
 0x13b   :  { %20790 = vst [vmem:[#allocation219_spill] sm:$0xff] %v15160_v39  ;;  %20791 = vst [vmem:[#allocation220_spill] sm:$0xff] %v15162_v61  ;;  %11616 = vmatprep.subr.msk.bf16.mxu0 %vm577_vm0, %v13667_v4  ;;  %11625 = vmatprep.subr.msk.bf16.mxu1 %vm577_vm0, %v13669_v5 }
 0x13c   :  { %v15170_v41 = vpop.f32.mrf.mxu0  ;;  %v15172_v56 = vpop.f32.mrf.mxu1 }
 0x13d   :  { %20792 = vst [vmem:[#allocation221_spill] sm:$0xff] %v15170_v41  ;;  %20793 = vst [vmem:[#allocation222_spill] sm:$0xff] %v15172_v56 }
 0x13e   :  { %v15179_v3 = vpop.f32.mrf.mxu0  ;;  %v15181_v29 = vpop.f32.mrf.mxu1 }
 0x13f   :  { %20794 = vst [vmem:[#allocation223_spill] sm:$0xff] %v15179_v3  ;;  %20795 = vst [vmem:[#allocation224_spill] sm:$0xff] %v15181_v29 }
 0x140   :  { %v15183_v0 = vpop.f32.mrf.mxu0  ;;  %v15185_v18 = vpop.f32.mrf.mxu1  ;;  %11585 = vmatmul.mubr.msk.bf16.gmra.mxu0 %vm552_vm1, %v15177_v42  ;;  %11594 = vmatmul.mubr.msk.bf16.gmra.mxu1 %vm552_vm1, %v15177_v42 }
 0x141   :  { %20796 = vst [vmem:[#allocation225_spill] sm:$0xff] %v15183_v0  ;;  %20797 = vst [vmem:[#allocation226_spill] sm:$0xff] %v15185_v18  ;;  %2284 = vmatprep.mubr.bf16.mxu0 %v20593_v50  ;;  %2397 = vmatprep.mubr.bf16.mxu1 %v20593_v50  ;;  %v15204_v18 = vld [vmem:[%s20310_s2 + $0x28] sm:$0xff]  }
 0x142   :  { %v15193_v4 = vpop.f32.mrf.mxu0  ;;  %v15195_v5 = vpop.f32.mrf.mxu1 }
 0x143   :  { %20798 = vst [vmem:[#allocation227_spill] sm:$0xff] %v15193_v4  ;;  %20799 = vst [vmem:[#allocation228_spill] sm:$0xff] %v15195_v5 }
 0x144   :  { %v15197_v49 = vpop.f32.mrf.mxu0  ;;  %v15199_v47 = vpop.f32.mrf.mxu1 }
 0x145   :  { %20800 = vst [vmem:[#allocation229_spill] sm:$0xff] %v15197_v49  ;;  %20801 = vst [vmem:[#allocation230_spill] sm:$0xff] %v15199_v47 }
 0x146   :  { %v15206_v0 = vpop.f32.mrf.mxu0  ;;  %v15208_v29 = vpop.f32.mrf.mxu1 }
 0x147   :  { %20802 = vst [vmem:[#allocation231_spill] sm:$0xff] %v15206_v0  ;;  %20803 = vst [vmem:[#allocation232_spill] sm:$0xff] %v15208_v29 }
 0x148   :  { %v15210_v3 = vpop.f32.mrf.mxu0  ;;  %v15212_v56 = vpop.f32.mrf.mxu1  ;;  %11586 = vmatmul.mubr.msk.bf16.gmra.mxu0 %vm552_vm1, %v15204_v18  ;;  %11595 = vmatmul.mubr.msk.bf16.gmra.mxu1 %vm552_vm1, %v15204_v18 }
 0x149   :  { %20804 = vst [vmem:[#allocation233_spill] sm:$0xff] %v15210_v3  ;;  %20805 = vst [vmem:[#allocation234_spill] sm:$0xff] %v15212_v56  ;;  %2294 = vmatprep.mubr.bf16.mxu0 %v20593_v50  ;;  %2407 = vmatprep.mubr.bf16.mxu1 %v20593_v50  ;;  %v15231_v56 = vld [vmem:[%s20310_s2 + $0x30] sm:$0xff]  }
 0x14a   :  { %v15220_v47 = vpop.f32.mrf.mxu0  ;;  %v15222_v49 = vpop.f32.mrf.mxu1 }
 0x14b   :  { %20806 = vst [vmem:[#allocation235_spill] sm:$0xff] %v15220_v47  ;;  %20807 = vst [vmem:[#allocation236_spill] sm:$0xff] %v15222_v49 }
 0x14c   :  { %v15224_v0 = vpop.f32.mrf.mxu0  ;;  %v15226_v29 = vpop.f32.mrf.mxu1 }
 0x14d   :  { %20808 = vst [vmem:[#allocation237_spill] sm:$0xff] %v15224_v0  ;;  %20809 = vst [vmem:[#allocation238_spill] sm:$0xff] %v15226_v29 }
 0x14e   :  { %v15233_v3 = vpop.f32.mrf.mxu0  ;;  %v15235_v5 = vpop.f32.mrf.mxu1 }
 0x14f   :  { %20810 = vst [vmem:[#allocation239_spill] sm:$0xff] %v15233_v3  ;;  %20811 = vst [vmem:[#allocation240_spill] sm:$0xff] %v15235_v5 }
 0x150   :  { %v15237_v4 = vpop.f32.mrf.mxu0  ;;  %v15239_v41 = vpop.f32.mrf.mxu1  ;;  %11587 = vmatmul.mubr.msk.bf16.gmra.mxu0 %vm552_vm1, %v15231_v56  ;;  %11596 = vmatmul.mubr.msk.bf16.gmra.mxu1 %vm552_vm1, %v15231_v56 }
 0x151   :  { %20812 = vst [vmem:[#allocation241_spill] sm:$0xff] %v15237_v4  ;;  %20813 = vst [vmem:[#allocation242_spill] sm:$0xff] %v15239_v41  ;;  %2304 = vmatprep.mubr.bf16.mxu0 %v20593_v50  ;;  %2417 = vmatprep.mubr.bf16.mxu1 %v20593_v50  ;;  %v15258_v41 = vld [vmem:[%s20310_s2 + $0x38] sm:$0xff]  }
 0x152   :  { %v15247_v29 = vpop.f32.mrf.mxu0  ;;  %v15249_v0 = vpop.f32.mrf.mxu1 }
 0x153   :  { %20814 = vst [vmem:[#allocation243_spill] sm:$0xff] %v15247_v29  ;;  %20815 = vst [vmem:[#allocation244_spill] sm:$0xff] %v15249_v0 }
 0x154   :  { %v15251_v3 = vpop.f32.mrf.mxu0  ;;  %v15253_v5 = vpop.f32.mrf.mxu1 }
 0x155   :  { %20816 = vst [vmem:[#allocation245_spill] sm:$0xff] %v15251_v3  ;;  %20817 = vst [vmem:[#allocation246_spill] sm:$0xff] %v15253_v5 }
 0x156   :  { %v15260_v4 = vpop.f32.mrf.mxu0  ;;  %v15262_v49 = vpop.f32.mrf.mxu1 }
 0x157   :  { %20818 = vst [vmem:[#allocation247_spill] sm:$0xff] %v15260_v4  ;;  %20819 = vst [vmem:[#allocation248_spill] sm:$0xff] %v15262_v49 }
 0x158   :  { %v15264_v47 = vpop.f32.mrf.mxu0  ;;  %v15266_v61 = vpop.f32.mrf.mxu1  ;;  %11588 = vmatmul.mubr.msk.bf16.gmra.mxu0 %vm552_vm1, %v15258_v41  ;;  %11597 = vmatmul.mubr.msk.bf16.gmra.mxu1 %vm552_vm1, %v15258_v41 }
 0x159   :  { %20820 = vst [vmem:[#allocation249_spill] sm:$0xff] %v15264_v47  ;;  %20821 = vst [vmem:[#allocation250_spill] sm:$0xff] %v15266_v61  ;;  %2460 = vmatprep.mubr.bf16.mxu0 %v20593_v50  ;;  %2573 = vmatprep.mubr.bf16.mxu1 %v20593_v50 }
 0x15a   :  { %v15274_v5 = vpop.f32.mrf.mxu0  ;;  %v15276_v3 = vpop.f32.mrf.mxu1 }
 0x15b   :  { %20822 = vst [vmem:[#allocation251_spill] sm:$0xff] %v15274_v5  ;;  %20823 = vst [vmem:[#allocation252_spill] sm:$0xff] %v15276_v3 }
 0x15c   :  { %v15278_v4 = vpop.f32.mrf.mxu0  ;;  %v15280_v49 = vpop.f32.mrf.mxu1 }
 0x15d   :  { %20824 = vst [vmem:[#allocation253_spill] sm:$0xff] %v15278_v4  ;;  %20825 = vst [vmem:[#allocation254_spill] sm:$0xff] %v15280_v49 }
 0x15e   :  { %v15282_v47 = vpop.f32.mrf.mxu0  ;;  %v15284_v61 = vpop.f32.mrf.mxu1 }
 0x15f   :  { %20826 = vst [vmem:[#allocation255_spill] sm:$0xff] %v15282_v47  ;;  %20827 = vst [vmem:[#allocation256_spill] sm:$0xff] %v15284_v61 }
 0x160   :  { %v15286_v0 = vpop.f32.mrf.mxu0  ;;  %v15288_v29 = vpop.f32.mrf.mxu1  ;;  %11599 = vmatmul.mubr.msk.bf16.vlgmr.msra.gmra.mxu0 %vm552_vm1, %v14909_v1  ;;  %11608 = vmatmul.mubr.msk.bf16.vlgmr.msra.gmra.mxu1 %vm552_vm1, %v14909_v1 }
 0x161   :  { %2785 = vmatpush1.bf16.msra.mxu0 %v13698_v16  ;;  %2898 = vmatpush1.bf16.msra.mxu1 %v13701_v17 }
 0x162   :  { %v15296_v4 = vpop.f32.mrf.mxu0  ;;  %v15298_v49 = vpop.f32.mrf.mxu1  ;;  %2470 = vmatprep.mubr.bf16.mxu0 %v20593_v50  ;;  %2583 = vmatprep.mubr.bf16.mxu1 %v20593_v50 }
 0x163   :  { %2786 = vmatprep.subr.bf16.mxu0 %v13680_v11  ;;  %2899 = vmatprep.subr.bf16.mxu1 %v13682_v12 }
 0x164   :  { %v15304_v61 = vpop.f32.mrf.mxu0  ;;  %v15306_v47 = vpop.f32.mrf.mxu1 }
 0x165   :  { %2787 = vmatpush1.bf16.msra.mxu0 %v13708_v19  ;;  %2900 = vmatpush1.bf16.msra.mxu1 %v13710_v20 }
 0x166   :  { %v15310_v16 = vpop.f32.mrf.mxu0  ;;  %v15312_v17 = vpop.f32.mrf.mxu1  ;;  %2788 = vmatprep.subr.bf16.mxu0 %v13714_v21  ;;  %2901 = vmatprep.subr.bf16.mxu1 %v13716_v22 }
 0x168   :  { %v15316_v3 = vpop.f32.mrf.mxu0  ;;  %v15318_v11 = vpop.f32.mrf.mxu1  ;;  %11600 = vmatmul.mubr.msk.bf16.gmra.mxu0 %vm552_vm1, %v14980_v55  ;;  %11609 = vmatmul.mubr.msk.bf16.gmra.mxu1 %vm552_vm1, %v14980_v55 }
 0x169   :  { %2480 = vmatprep.mubr.bf16.mxu0 %v20593_v50  ;;  %2593 = vmatprep.mubr.bf16.mxu1 %v20593_v50 }
 0x16a   :  { %v15326_v12 = vpop.f32.mrf.mxu0  ;;  %v15328_v19 = vpop.f32.mrf.mxu1  ;;  %2789 = vmatpush1.bf16.msra.mxu0 %v13732_v27  ;;  %2902 = vmatpush1.bf16.msra.mxu1 %v13734_v28 }
 0x16b   :  { %2790 = vmatprep.subr.bf16.mxu0 %v13741_v30  ;;  %2903 = vmatprep.subr.bf16.mxu1 %v13743_v31 }
 0x16c   :  { %v15334_v20 = vpop.f32.mrf.mxu0  ;;  %v15336_v21 = vpop.f32.mrf.mxu1 }
 0x16e   :  { %v15338_v22 = vpop.f32.mrf.mxu0  ;;  %v15340_v5 = vpop.f32.mrf.mxu1  ;;  %2791 = vmatpush1.bf16.msra.mxu0 %v13756_v35  ;;  %2904 = vmatpush1.bf16.msra.mxu1 %v13758_v36 }
 0x16f   :  { %2792 = vmatprep.subr.bf16.mxu0 %v13762_v37  ;;  %2905 = vmatprep.subr.bf16.mxu1 %v13764_v38 }
 0x170   :  { %v15346_v27 = vpop.f32.mrf.mxu0  ;;  %v15348_v28 = vpop.f32.mrf.mxu1  ;;  %11601 = vmatmul.mubr.msk.bf16.gmra.mxu0 %vm552_vm1, %v15051_v63  ;;  %11610 = vmatmul.mubr.msk.bf16.gmra.mxu1 %vm552_vm1, %v15051_v63 }
 0x171   :  { %2490 = vmatprep.mubr.bf16.mxu0 %v20593_v50  ;;  %2603 = vmatprep.mubr.bf16.mxu1 %v20593_v50 }
 0x172   :  { %v15356_v30 = vpop.f32.mrf.mxu0  ;;  %v15358_v31 = vpop.f32.mrf.mxu1  ;;  %2793 = vmatpush1.bf16.msra.mxu0 %v13780_v43  ;;  %2906 = vmatpush1.bf16.msra.mxu1 %v13782_v44 }
 0x173   :  { %2794 = vmatprep.subr.bf16.mxu0 %v13786_v45  ;;  %2907 = vmatprep.subr.bf16.mxu1 %v13788_v46 }
 0x174   :  { %v15364_v35 = vpop.f32.mrf.mxu0  ;;  %v15366_v36 = vpop.f32.mrf.mxu1 }
 0x176   :  { %v15368_v37 = vpop.f32.mrf.mxu0  ;;  %v15370_v38 = vpop.f32.mrf.mxu1  ;;  %2795 = vmatpush1.bf16.msra.mxu0 %v13804_v51  ;;  %2908 = vmatpush1.bf16.msra.mxu1 %v13806_v52 }
 0x177   :  { %2796 = vmatprep.subr.bf16.mxu0 %v13810_v53  ;;  %2909 = vmatprep.subr.bf16.mxu1 %v13812_v54 }
 0x178   :  { %v15376_v43 = vpop.f32.mrf.mxu0  ;;  %v15378_v44 = vpop.f32.mrf.mxu1  ;;  %11602 = vmatmul.mubr.msk.bf16.gmra.mxu0 %vm552_vm1, %v15136_v2  ;;  %11611 = vmatmul.mubr.msk.bf16.gmra.mxu1 %vm552_vm1, %v15136_v2 }
 0x179   :  { %2500 = vmatprep.mubr.bf16.mxu0 %v20593_v50  ;;  %2613 = vmatprep.mubr.bf16.mxu1 %v20593_v50 }
 0x17a   :  { %v15386_v45 = vpop.f32.mrf.mxu0  ;;  %v15388_v46 = vpop.f32.mrf.mxu1  ;;  %2797 = vmatpush1.bf16.msra.mxu0 %v13822_v57  ;;  %2910 = vmatpush1.bf16.msra.mxu1 %v13824_v58 }
 0x17b   :  { %11634 = vmatprep.subr.msk.bf16.mxu0 %vm577_vm0, %v13826_v59  ;;  %11643 = vmatprep.subr.msk.bf16.mxu1 %vm577_vm0, %v13830_v60 }
 0x17c   :  { %v15396_v51 = vpop.f32.mrf.mxu0  ;;  %v15398_v52 = vpop.f32.mrf.mxu1 }
 0x17e   :  { %v15400_v53 = vpop.f32.mrf.mxu0  ;;  %v15402_v54 = vpop.f32.mrf.mxu1 }
 0x180   :  { %v15404_v39 = vpop.f32.mrf.mxu0  ;;  %v15406_v62 = vpop.f32.mrf.mxu1  ;;  %11603 = vmatmul.mubr.msk.bf16.gmra.mxu0 %vm552_vm1, %v15177_v42  ;;  %11612 = vmatmul.mubr.msk.bf16.gmra.mxu1 %vm552_vm1, %v15177_v42 }
 0x181   :  { %2510 = vmatprep.mubr.bf16.mxu0 %v20593_v50  ;;  %2623 = vmatprep.mubr.bf16.mxu1 %v20593_v50 }
 0x182   :  { %v15414_v57 = vpop.f32.mrf.mxu0  ;;  %v15416_v58 = vpop.f32.mrf.mxu1 }
 0x184   :  { %v15418_v59 = vpop.f32.mrf.mxu0  ;;  %v15420_v60 = vpop.f32.mrf.mxu1 }
 0x185   :  { %20828 = vst [vmem:[#allocation257_spill] sm:$0xff] %v15418_v59  ;;  %20829 = vst [vmem:[#allocation258_spill] sm:$0xff] %v15420_v60 }
 0x186   :  { %v15422_v15 = vpop.f32.mrf.mxu0  ;;  %v15424_v32 = vpop.f32.mrf.mxu1 }
 0x187   :  { %20830 = vst [vmem:[#allocation259_spill] sm:$0xff] %v15422_v15  ;;  %20831 = vst [vmem:[#allocation260_spill] sm:$0xff] %v15424_v32 }
 0x188   :  { %v15426_v14 = vpop.f32.mrf.mxu0  ;;  %v15428_v34 = vpop.f32.mrf.mxu1  ;;  %11604 = vmatmul.mubr.msk.bf16.gmra.mxu0 %vm552_vm1, %v15204_v18  ;;  %11613 = vmatmul.mubr.msk.bf16.gmra.mxu1 %vm552_vm1, %v15204_v18 }
 0x189   :  { %20832 = vst [vmem:[#allocation261_spill] sm:$0xff] %v15426_v14  ;;  %20833 = vst [vmem:[#allocation262_spill] sm:$0xff] %v15428_v34  ;;  %2520 = vmatprep.mubr.bf16.mxu0 %v20593_v50  ;;  %2633 = vmatprep.mubr.bf16.mxu1 %v20593_v50 }
 0x18a   :  { %v15436_v9 = vpop.f32.mrf.mxu0  ;;  %v15438_v6 = vpop.f32.mrf.mxu1 }
 0x18b   :  { %20834 = vst [vmem:[#allocation263_spill] sm:$0xff] %v15436_v9  ;;  %20835 = vst [vmem:[#allocation264_spill] sm:$0xff] %v15438_v6 }
 0x18c   :  { %v15440_v15 = vpop.f32.mrf.mxu0  ;;  %v15442_v32 = vpop.f32.mrf.mxu1 }
 0x18d   :  { %20836 = vst [vmem:[#allocation265_spill] sm:$0xff] %v15440_v15  ;;  %20837 = vst [vmem:[#allocation266_spill] sm:$0xff] %v15442_v32 }
 0x18e   :  { %v15444_v14 = vpop.f32.mrf.mxu0  ;;  %v15446_v34 = vpop.f32.mrf.mxu1 }
 0x18f   :  { %20838 = vst [vmem:[#allocation267_spill] sm:$0xff] %v15444_v14  ;;  %20839 = vst [vmem:[#allocation268_spill] sm:$0xff] %v15446_v34 }
 0x190   :  { %v15448_v60 = vpop.f32.mrf.mxu0  ;;  %v15450_v59 = vpop.f32.mrf.mxu1  ;;  %11605 = vmatmul.mubr.msk.bf16.gmra.mxu0 %vm552_vm1, %v15231_v56  ;;  %11614 = vmatmul.mubr.msk.bf16.gmra.mxu1 %vm552_vm1, %v15231_v56 }
 0x191   :  { %20840 = vst [vmem:[#allocation269_spill] sm:$0xff] %v15448_v60  ;;  %20841 = vst [vmem:[#allocation270_spill] sm:$0xff] %v15450_v59  ;;  %2530 = vmatprep.mubr.bf16.mxu0 %v20593_v50  ;;  %2643 = vmatprep.mubr.bf16.mxu1 %v20593_v50 }
 0x192   :  { %v15458_v15 = vpop.f32.mrf.mxu0  ;;  %v15460_v32 = vpop.f32.mrf.mxu1 }
 0x193   :  { %20842 = vst [vmem:[#allocation271_spill] sm:$0xff] %v15458_v15  ;;  %20843 = vst [vmem:[#allocation272_spill] sm:$0xff] %v15460_v32 }
 0x194   :  { %v15462_v14 = vpop.f32.mrf.mxu0  ;;  %v15464_v34 = vpop.f32.mrf.mxu1 }
 0x195   :  { %20844 = vst [vmem:[#allocation273_spill] sm:$0xff] %v15462_v14  ;;  %20845 = vst [vmem:[#allocation274_spill] sm:$0xff] %v15464_v34 }
 0x196   :  { %v15466_v60 = vpop.f32.mrf.mxu0  ;;  %v15468_v59 = vpop.f32.mrf.mxu1 }
 0x197   :  { %20846 = vst [vmem:[#allocation275_spill] sm:$0xff] %v15466_v60  ;;  %20847 = vst [vmem:[#allocation276_spill] sm:$0xff] %v15468_v59 }
 0x198   :  { %v15470_v6 = vpop.f32.mrf.mxu0  ;;  %v15472_v9 = vpop.f32.mrf.mxu1  ;;  %11606 = vmatmul.mubr.msk.bf16.gmra.mxu0 %vm552_vm1, %v15258_v41  ;;  %11615 = vmatmul.mubr.msk.bf16.gmra.mxu1 %vm552_vm1, %v15258_v41 }
 0x199   :  { %20848 = vst [vmem:[#allocation277_spill] sm:$0xff] %v15470_v6  ;;  %20849 = vst [vmem:[#allocation278_spill] sm:$0xff] %v15472_v9  ;;  %2814 = vmatprep.mubr.bf16.mxu0 %v20593_v50  ;;  %2927 = vmatprep.mubr.bf16.mxu1 %v20593_v50 }
 0x19a   :  { %v15480_v14 = vpop.f32.mrf.mxu0  ;;  %v15482_v34 = vpop.f32.mrf.mxu1 }
 0x19c   :  { %v15484_v60 = vpop.f32.mrf.mxu0  ;;  %v15486_v59 = vpop.f32.mrf.mxu1 }
 0x19d   :  { %20850 = vst [vmem:[#allocation279_spill] sm:$0xff] %v15484_v60  ;;  %20851 = vst [vmem:[#allocation280_spill] sm:$0xff] %v15486_v59 }
 0x19e   :  { %v15488_v6 = vpop.f32.mrf.mxu0  ;;  %v15490_v9 = vpop.f32.mrf.mxu1 }
 0x19f   :  { %20852 = vst [vmem:[#allocation281_spill] sm:$0xff] %v15490_v9 }
 0x1a0   :  { %v15492_v32 = vpop.f32.mrf.mxu0  ;;  %v15494_v15 = vpop.f32.mrf.mxu1  ;;  %11617 = vmatmul.mubr.msk.bf16.vlgmr.msra.gmra.mxu0 %vm552_vm1, %v14909_v1  ;;  %11626 = vmatmul.mubr.msk.bf16.vlgmr.msra.gmra.mxu1 %vm552_vm1, %v14909_v1 }
 0x1a1   :  { %20853 = vst [vmem:[#allocation282_spill] sm:$0xff] %v15492_v32  ;;  %20854 = vst [vmem:[#allocation283_spill] sm:$0xff] %v15494_v15  ;;  %3011 = vmatpush1.bf16.msra.mxu0 %v13856_v7  ;;  %3124 = vmatpush1.bf16.msra.mxu1 %v13859_v8 }
 0x1a2   :  { %v15502_v60 = vpop.f32.mrf.mxu0  ;;  %v15504_v59 = vpop.f32.mrf.mxu1  ;;  %2824 = vmatprep.mubr.bf16.mxu0 %v20593_v50  ;;  %2937 = vmatprep.mubr.bf16.mxu1 %v20593_v50 }
 0x1a3   :  { %20855 = vst [vmem:[#allocation284_spill] sm:$0xff] %v15502_v60  ;;  %20856 = vst [vmem:[#allocation285_spill] sm:$0xff] %v15504_v59  ;;  %3012 = vmatprep.subr.bf16.mxu0 %v13864_v10  ;;  %3125 = vmatprep.subr.bf16.mxu1 %v13866_v13  ;;  %v20861_v59 = vld [vmem:[#allocation2_spill] sm:$0xff] }
 0x1a4   :  { %v15510_v15 = vpop.f32.mrf.mxu0  ;;  %v15512_v32 = vpop.f32.mrf.mxu1 }
 0x1a5   :  { %20857 = vst [vmem:[#allocation286_spill] sm:$0xff] %v15510_v15  ;;  %20858 = vst [vmem:[#allocation287_spill] sm:$0xff] %v15512_v32  ;;  %3013 = vmatpush1.bf16.msra.mxu0 %v13883_v23  ;;  %3126 = vmatpush1.bf16.msra.mxu1 %v13885_v24  ;;  %v20866_v24 = vld [vmem:[#allocation3_spill] sm:$0xff] }
 0x1a6   :  { %v15516_v7 = vpop.f32.mrf.mxu0  ;;  %v15518_v8 = vpop.f32.mrf.mxu1  ;;  %3014 = vmatprep.subr.bf16.mxu0 %v13894_v26  ;;  %3127 = vmatprep.subr.bf16.mxu1 %v20861_v59  ;;  %v20867_v26 = vld [vmem:[#allocation4_spill] sm:$0xff]  ;;  %v20868_v59 = vld [vmem:[#allocation5_spill] sm:$0xff]  ;;  %v20874_v15 = vld [vmem:[#allocation7_spill] sm:$0xff] }
 0x1a7   :  { %20859 = vst [vmem:[#allocation288_spill] sm:$0xff] %v15516_v7  ;;  %20860 = vst [vmem:[#allocation289_spill] sm:$0xff] %v15518_v8 }
 0x1a8   :  { %v15522_v60 = vpop.f32.mrf.mxu0  ;;  %v15524_v10 = vpop.f32.mrf.mxu1  ;;  %11618 = vmatmul.mubr.msk.bf16.gmra.mxu0 %vm552_vm1, %v14980_v55  ;;  %11627 = vmatmul.mubr.msk.bf16.gmra.mxu1 %vm552_vm1, %v14980_v55 }
 0x1a9   :  { %20862 = vst [vmem:[#allocation2_spill] sm:$0xff] %v15522_v60  ;;  %20863 = vst [vmem:[#allocation290_spill] sm:$0xff] %v15524_v10  ;;  %2834 = vmatprep.mubr.bf16.mxu0 %v20593_v50  ;;  %2947 = vmatprep.mubr.bf16.mxu1 %v20593_v50  ;;  %v20869_v10 = vld [vmem:[#allocation6_spill] sm:$0xff] }
 0x1aa   :  { %v15532_v13 = vpop.f32.mrf.mxu0  ;;  %v15534_v23 = vpop.f32.mrf.mxu1  ;;  %3015 = vmatpush1.bf16.msra.mxu0 %v20866_v24  ;;  %3128 = vmatpush1.bf16.msra.mxu1 %v20867_v26  ;;  %v20877_v24 = vld [vmem:[#allocation10_spill] sm:$0xff] }
 0x1ab   :  { %20864 = vst [vmem:[#allocation291_spill] sm:$0xff] %v15532_v13  ;;  %20865 = vst [vmem:[#allocation292_spill] sm:$0xff] %v15534_v23  ;;  %3016 = vmatprep.subr.bf16.mxu0 %v20868_v59  ;;  %3129 = vmatprep.subr.bf16.mxu1 %v20869_v10  ;;  %v20875_v13 = vld [vmem:[#allocation8_spill] sm:$0xff]  ;;  %v20876_v23 = vld [vmem:[#allocation9_spill] sm:$0xff] }
 0x1ac   :  { %v15540_v60 = vpop.f32.mrf.mxu0  ;;  %v15542_v8 = vpop.f32.mrf.mxu1 }
 0x1ad   :  { %20870 = vst [vmem:[#allocation3_spill] sm:$0xff] %v15540_v60  ;;  %20871 = vst [vmem:[#allocation4_spill] sm:$0xff] %v15542_v8  ;;  %v20890_v60 = vld [vmem:[#allocation15_spill] sm:$0xff] }
 0x1ae   :  { %v15544_v7 = vpop.f32.mrf.mxu0  ;;  %v15546_v32 = vpop.f32.mrf.mxu1  ;;  %3017 = vmatpush1.bf16.msra.mxu0 %v20874_v15  ;;  %3130 = vmatpush1.bf16.msra.mxu1 %v20875_v13  ;;  %v20882_v13 = vld [vmem:[#allocation11_spill] sm:$0xff] }
 0x1af   :  { %20872 = vst [vmem:[#allocation5_spill] sm:$0xff] %v15544_v7  ;;  %20873 = vst [vmem:[#allocation6_spill] sm:$0xff] %v15546_v32  ;;  %3018 = vmatprep.subr.bf16.mxu0 %v20876_v23  ;;  %3131 = vmatprep.subr.bf16.mxu1 %v20877_v24  ;;  %v20883_v23 = vld [vmem:[#allocation12_spill] sm:$0xff]  ;;  %v20884_v24 = vld [vmem:[#allocation13_spill] sm:$0xff] }
 0x1b0   :  { %v15552_v26 = vpop.f32.mrf.mxu0  ;;  %v15554_v59 = vpop.f32.mrf.mxu1  ;;  %11619 = vmatmul.mubr.msk.bf16.gmra.mxu0 %vm552_vm1, %v15051_v63  ;;  %11628 = vmatmul.mubr.msk.bf16.gmra.mxu1 %vm552_vm1, %v15051_v63 }
 0x1b1   :  { %20878 = vst [vmem:[#allocation7_spill] sm:$0xff] %v15552_v26  ;;  %20879 = vst [vmem:[#allocation8_spill] sm:$0xff] %v15554_v59  ;;  %2844 = vmatprep.mubr.bf16.mxu0 %v20593_v50  ;;  %2957 = vmatprep.mubr.bf16.mxu1 %v20593_v50  ;;  %v20885_v59 = vld [vmem:[#allocation14_spill] sm:$0xff] }
 0x1b2   :  { %v15562_v15 = vpop.f32.mrf.mxu0  ;;  %v15564_v10 = vpop.f32.mrf.mxu1  ;;  %3019 = vmatpush1.bf16.msra.mxu0 %v20882_v13  ;;  %3132 = vmatpush1.bf16.msra.mxu1 %v20883_v23  ;;  %v20893_v13 = vld [vmem:[#allocation18_spill] sm:$0xff] }
 0x1b3   :  { %20880 = vst [vmem:[#allocation9_spill] sm:$0xff] %v15562_v15  ;;  %20881 = vst [vmem:[#allocation10_spill] sm:$0xff] %v15564_v10  ;;  %3020 = vmatprep.subr.bf16.mxu0 %v20884_v24  ;;  %3133 = vmatprep.subr.bf16.mxu1 %v20885_v59  ;;  %v20891_v15 = vld [vmem:[#allocation16_spill] sm:$0xff]  ;;  %v20892_v10 = vld [vmem:[#allocation17_spill] sm:$0xff] }
 0x1b4   :  { %v15570_v26 = vpop.f32.mrf.mxu0  ;;  %v15572_v32 = vpop.f32.mrf.mxu1 }
 0x1b5   :  { %20886 = vst [vmem:[#allocation11_spill] sm:$0xff] %v15570_v26  ;;  %20887 = vst [vmem:[#allocation12_spill] sm:$0xff] %v15572_v32  ;;  %v1439_v26 = vadd.f32 %v15296_v4, %v14608_v40  ;;  %v20944_v40 = vld [vmem:[#allocation90_spill] sm:$0xff] }
 0x1b6   :  { %v15574_v7 = vpop.f32.mrf.mxu0  ;;  %v15576_v8 = vpop.f32.mrf.mxu1  ;;  %3021 = vmatpush1.bf16.msra.mxu0 %v20890_v60  ;;  %3134 = vmatpush1.bf16.msra.mxu1 %v20891_v15  ;;  %v20898_v15 = vld [vmem:[#allocation19_spill] sm:$0xff]  ;;  %v1441_v4 = vadd.f32 %v15304_v61, %v20944_v40  ;;  %v1556_v40 = vadd.f32 %v15312_v17, %v14640_v48 }
 0x1b7   :  { %20888 = vst [vmem:[#allocation13_spill] sm:$0xff] %v15574_v7  ;;  %20889 = vst [vmem:[#allocation14_spill] sm:$0xff] %v15576_v8  ;;  %3022 = vmatprep.subr.bf16.mxu0 %v20892_v10  ;;  %3135 = vmatprep.subr.bf16.mxu1 %v20893_v13  ;;  %v20899_v10 = vld [vmem:[#allocation20_spill] sm:$0xff]  ;;  %v20900_v13 = vld [vmem:[#allocation21_spill] sm:$0xff] }
 0x1b8   :  { %v15582_v23 = vpop.f32.mrf.mxu0  ;;  %v15584_v24 = vpop.f32.mrf.mxu1  ;;  %11620 = vmatmul.mubr.msk.bf16.gmra.mxu0 %vm552_vm1, %v15136_v2  ;;  %11629 = vmatmul.mubr.msk.bf16.gmra.mxu1 %vm552_vm1, %v15136_v2 }
 0x1b9   :  { %20894 = vst [vmem:[#allocation15_spill] sm:$0xff] %v15582_v23  ;;  %20895 = vst [vmem:[#allocation16_spill] sm:$0xff] %v15584_v24  ;;  %2854 = vmatprep.mubr.bf16.mxu0 %v20593_v50  ;;  %2967 = vmatprep.mubr.bf16.mxu1 %v20593_v50  ;;  %v20901_v24 = vld [vmem:[#allocation22_spill] sm:$0xff] }
 0x1ba   :  { %v15592_v60 = vpop.f32.mrf.mxu0  ;;  %v15594_v59 = vpop.f32.mrf.mxu1  ;;  %3023 = vmatpush1.bf16.msra.mxu0 %v20898_v15  ;;  %3136 = vmatpush1.bf16.msra.mxu1 %v20899_v10 }
 0x1bb   :  { %20896 = vst [vmem:[#allocation17_spill] sm:$0xff] %v15592_v60  ;;  %20897 = vst [vmem:[#allocation18_spill] sm:$0xff] %v15594_v59  ;;  %11652 = vmatprep.subr.msk.bf16.mxu0 %vm577_vm0, %v20900_v13  ;;  %11661 = vmatprep.subr.msk.bf16.mxu1 %vm577_vm0, %v20901_v24 }
 0x1bc   :  { %v15602_v23 = vpop.f32.mrf.mxu0  ;;  %v15604_v8 = vpop.f32.mrf.mxu1 }
 0x1bd   :  { %20902 = vst [vmem:[#allocation19_spill] sm:$0xff] %v15602_v23  ;;  %20903 = vst [vmem:[#allocation20_spill] sm:$0xff] %v15604_v8  ;;  %v20938_v8 = vld [vmem:[#allocation84_spill] sm:$0xff] }
 0x1be   :  { %v15606_v7 = vpop.f32.mrf.mxu0  ;;  %v15608_v32 = vpop.f32.mrf.mxu1  ;;  %v1550_v23 = vadd.f32 %v15288_v29, %v20938_v8  ;;  %v20943_v29 = vld [vmem:[#allocation24_spill] sm:$0xff] }
 0x1bf   :  { %20904 = vst [vmem:[#allocation21_spill] sm:$0xff] %v15606_v7  ;;  %20905 = vst [vmem:[#allocation22_spill] sm:$0xff] %v15608_v32 }
 0x1c0   :  { %v15610_v60 = vpop.f32.mrf.mxu0  ;;  %v15612_v59 = vpop.f32.mrf.mxu1  ;;  %11621 = vmatmul.mubr.msk.bf16.gmra.mxu0 %vm552_vm1, %v15177_v42  ;;  %11630 = vmatmul.mubr.msk.bf16.gmra.mxu1 %vm552_vm1, %v15177_v42 }
 0x1c1   :  { %20906 = vst [vmem:[#allocation293_spill] sm:$0xff] %v15610_v60  ;;  %20907 = vst [vmem:[#allocation294_spill] sm:$0xff] %v15612_v59  ;;  %2864 = vmatprep.mubr.bf16.mxu0 %v20593_v50  ;;  %2977 = vmatprep.mubr.bf16.mxu1 %v20593_v50 }
 0x1c2   :  { %v15620_v24 = vpop.f32.mrf.mxu0  ;;  %v15622_v15 = vpop.f32.mrf.mxu1 }
 0x1c3   :  { %20908 = vst [vmem:[#allocation295_spill] sm:$0xff] %v15620_v24  ;;  %20909 = vst [vmem:[#allocation296_spill] sm:$0xff] %v15622_v15 }
 0x1c4   :  { %v15624_v10 = vpop.f32.mrf.mxu0  ;;  %v15626_v13 = vpop.f32.mrf.mxu1 }
 0x1c5   :  { %20910 = vst [vmem:[#allocation297_spill] sm:$0xff] %v15624_v10  ;;  %20911 = vst [vmem:[#allocation298_spill] sm:$0xff] %v15626_v13 }
 0x1c6   :  { %v15628_v60 = vpop.f32.mrf.mxu0  ;;  %v15630_v59 = vpop.f32.mrf.mxu1 }
 0x1c7   :  { %20912 = vst [vmem:[#allocation299_spill] sm:$0xff] %v15628_v60  ;;  %20913 = vst [vmem:[#allocation300_spill] sm:$0xff] %v15630_v59 }
 0x1c8   :  { %v15632_v32 = vpop.f32.mrf.mxu0  ;;  %v15634_v7 = vpop.f32.mrf.mxu1  ;;  %11622 = vmatmul.mubr.msk.bf16.gmra.mxu0 %vm552_vm1, %v15204_v18  ;;  %11631 = vmatmul.mubr.msk.bf16.gmra.mxu1 %vm552_vm1, %v15204_v18 }
 0x1c9   :  { %20914 = vst [vmem:[#allocation301_spill] sm:$0xff] %v15632_v32  ;;  %20915 = vst [vmem:[#allocation302_spill] sm:$0xff] %v15634_v7  ;;  %2874 = vmatprep.mubr.bf16.mxu0 %v20593_v50  ;;  %2987 = vmatprep.mubr.bf16.mxu1 %v20593_v50 }
 0x1ca   :  { %v15642_v10 = vpop.f32.mrf.mxu0  ;;  %v15644_v13 = vpop.f32.mrf.mxu1 }
 0x1cb   :  { %20916 = vst [vmem:[#allocation303_spill] sm:$0xff] %v15642_v10  ;;  %20917 = vst [vmem:[#allocation304_spill] sm:$0xff] %v15644_v13 }
 0x1cc   :  { %v15646_v60 = vpop.f32.mrf.mxu0  ;;  %v15648_v59 = vpop.f32.mrf.mxu1 }
 0x1cd   :  { %20918 = vst [vmem:[#allocation305_spill] sm:$0xff] %v15646_v60  ;;  %20919 = vst [vmem:[#allocation306_spill] sm:$0xff] %v15648_v59 }
 0x1ce   :  { %v15650_v32 = vpop.f32.mrf.mxu0  ;;  %v15652_v7 = vpop.f32.mrf.mxu1 }
 0x1cf   :  { %20920 = vst [vmem:[#allocation307_spill] sm:$0xff] %v15650_v32  ;;  %20921 = vst [vmem:[#allocation308_spill] sm:$0xff] %v15652_v7 }
 0x1d0   :  { %v15654_v15 = vpop.f32.mrf.mxu0  ;;  %v15656_v24 = vpop.f32.mrf.mxu1  ;;  %11623 = vmatmul.mubr.msk.bf16.gmra.mxu0 %vm552_vm1, %v15231_v56  ;;  %11632 = vmatmul.mubr.msk.bf16.gmra.mxu1 %vm552_vm1, %v15231_v56 }
 0x1d1   :  { %20922 = vst [vmem:[#allocation309_spill] sm:$0xff] %v15654_v15  ;;  %20923 = vst [vmem:[#allocation310_spill] sm:$0xff] %v15656_v24  ;;  %2884 = vmatprep.mubr.bf16.mxu0 %v20593_v50  ;;  %2997 = vmatprep.mubr.bf16.mxu1 %v20593_v50 }
 0x1d2   :  { %v15664_v60 = vpop.f32.mrf.mxu0  ;;  %v15666_v59 = vpop.f32.mrf.mxu1 }
 0x1d3   :  { %20924 = vst [vmem:[#allocation311_spill] sm:$0xff] %v15664_v60  ;;  %20925 = vst [vmem:[#allocation312_spill] sm:$0xff] %v15666_v59  ;;  %v20937_v59 = vld [vmem:[#allocation83_spill] sm:$0xff] }
 0x1d4   :  { %v15668_v32 = vpop.f32.mrf.mxu0  ;;  %v15670_v7 = vpop.f32.mrf.mxu1  ;;  %v1437_v60 = vadd.f32 %v15286_v0, %v20937_v59  ;;  %v20942_v59 = vld [vmem:[#allocation23_spill] sm:$0xff] }
 0x1d5   :  { %20926 = vst [vmem:[#allocation313_spill] sm:$0xff] %v15668_v32  ;;  %20927 = vst [vmem:[#allocation314_spill] sm:$0xff] %v15670_v7 }
 0x1d6   :  { %v15672_v15 = vpop.f32.mrf.mxu0  ;;  %v15674_v24 = vpop.f32.mrf.mxu1 }
 0x1d7   :  { %20928 = vst [vmem:[#allocation315_spill] sm:$0xff] %v15672_v15  ;;  %20929 = vst [vmem:[#allocation316_spill] sm:$0xff] %v15674_v24 }
 0x1d8   :  { %v15676_v13 = vpop.f32.mrf.mxu0  ;;  %v15678_v10 = vpop.f32.mrf.mxu1  ;;  %11624 = vmatmul.mubr.msk.bf16.gmra.mxu0 %vm552_vm1, %v15258_v41  ;;  %11633 = vmatmul.mubr.msk.bf16.gmra.mxu1 %vm552_vm1, %v15258_v41 }
 0x1d9   :  { %20930 = vst [vmem:[#allocation317_spill] sm:$0xff] %v15676_v13  ;;  %20931 = vst [vmem:[#allocation318_spill] sm:$0xff] %v15678_v10  ;;  %3040 = vmatprep.mubr.bf16.mxu0 %v20593_v50  ;;  %3153 = vmatprep.mubr.bf16.mxu1 %v20593_v50 }
 0x1da   :  { %v15686_v32 = vpop.f32.mrf.mxu0  ;;  %v15688_v7 = vpop.f32.mrf.mxu1 }
 0x1db   :  { %20932 = vst [vmem:[#allocation319_spill] sm:$0xff] %v15686_v32 }
 0x1dc   :  { %v15690_v15 = vpop.f32.mrf.mxu0  ;;  %v15692_v24 = vpop.f32.mrf.mxu1 }
 0x1dd   :  { %20933 = vst [vmem:[#allocation320_spill] sm:$0xff] %v15690_v15  ;;  %20934 = vst [vmem:[#allocation321_spill] sm:$0xff] %v15692_v24 }
 0x1de   :  { %v15694_v13 = vpop.f32.mrf.mxu0  ;;  %v15696_v10 = vpop.f32.mrf.mxu1 }
 0x1df   :  { %20935 = vst [vmem:[#allocation322_spill] sm:$0xff] %v15694_v13  ;;  %20936 = vst [vmem:[#allocation323_spill] sm:$0xff] %v15696_v10  ;;  %v20939_v13 = vld [vmem:[#allocation87_spill] sm:$0xff] }
 0x1e0   :  { %v2236_v32 = vpop.f32.mrf.mxu0  ;;  %v2349_v9 = vpop.f32.mrf.mxu1  ;;  %11635 = vmatmul.mubr.msk.bf16.vlgmr.msra.gmra.mxu0 %vm552_vm1, %v14909_v1  ;;  %11644 = vmatmul.mubr.msk.bf16.vlgmr.msra.gmra.mxu1 %vm552_vm1, %v14909_v1  ;;  %v1552_v10 = vadd.f32 %v15298_v49, %v20939_v13  ;;  %v20945_v1 = vld [vmem:[#allocation91_spill] sm:$0xff]  ;;  %v20948_v13 = vld [vmem:[#allocation92_spill] sm:$0xff] }
 0x1e1   :  { %v15710_v24 = vadd.f32 %v2236_v32, %v1437_v60  ;;  %v15712_v0 = vadd.f32 %v2349_v9, %v1550_v23  ;;  %3237 = vmatpush1.bf16.msra.mxu0 %v20942_v59  ;;  %3350 = vmatpush1.bf16.msra.mxu1 %v20943_v29  ;;  %v1554_v49 = vadd.f32 %v15306_v47, %v20945_v1  ;;  %v20946_v23 = vld [vmem:[#allocation25_spill] sm:$0xff]  ;;  %v20947_v60 = vld [vmem:[#allocation26_spill] sm:$0xff]  ;;  %v20949_v47 = vld [vmem:[#allocation27_spill] sm:$0xff] }
 0x1e2   :  { %v2238_v8 = vpop.f32.mrf.mxu0  ;;  %v2351_v15 = vpop.f32.mrf.mxu1  ;;  %3050 = vmatprep.mubr.bf16.mxu0 %v20593_v50  ;;  %3163 = vmatprep.mubr.bf16.mxu1 %v20593_v50  ;;  %v1443_v61 = vadd.f32 %v15310_v16, %v20948_v13  ;;  %v20952_v1 = vld [vmem:[#allocation30_spill] sm:$0xff]  ;;  %v20953_v16 = vld [vmem:[#allocation97_spill] sm:$0xff] }
 0x1e3   :  { %20940 = vst [vmem:[#allocation83_spill] sm:$0xff] %v15710_v24  ;;  %20941 = vst [vmem:[#allocation84_spill] sm:$0xff] %v15712_v0  ;;  %v15722_v32 = vadd.f32 %v2238_v8, %v1439_v26  ;;  %v15724_v9 = vadd.f32 %v2351_v15, %v1552_v10  ;;  %3238 = vmatprep.subr.bf16.mxu0 %v20946_v23  ;;  %3351 = vmatprep.subr.bf16.mxu1 %v20947_v60  ;;  %v20950_v26 = vld [vmem:[#allocation28_spill] sm:$0xff]  ;;  %v20951_v8 = vld [vmem:[#allocation29_spill] sm:$0xff] }
 0x1e4   :  { %v2240_v59 = vpop.f32.mrf.mxu0  ;;  %v2353_v29 = vpop.f32.mrf.mxu1  ;;  %v1447_v23 = vadd.f32 %v15316_v3, %v20953_v16  ;;  %v20954_v60 = vld [vmem:[#allocation98_spill] sm:$0xff] }
 0x1e5   :  { %v15732_v0 = vadd.f32 %v2240_v59, %v1441_v4  ;;  %v15734_v24 = vadd.f32 %v2353_v29, %v1554_v49  ;;  %3239 = vmatpush1.bf16.msra.mxu0 %v20949_v47  ;;  %3352 = vmatpush1.bf16.msra.mxu1 %v20950_v26  ;;  %v1560_v48 = vadd.f32 %v15318_v11, %v20954_v60  ;;  %v20957_v49 = vld [vmem:[#allocation99_spill] sm:$0xff]  ;;  %v20958_v47 = vld [vmem:[#allocation100_spill] sm:$0xff]  ;;  %v20968_v60 = vld [vmem:[#allocation34_spill] sm:$0xff] }
 0x1e6   :  { %v2242_v15 = vpop.f32.mrf.mxu0  ;;  %v2355_v10 = vpop.f32.mrf.mxu1  ;;  %3240 = vmatprep.subr.bf16.mxu0 %v20951_v8  ;;  %3353 = vmatprep.subr.bf16.mxu1 %v20952_v1  ;;  %v1449_v13 = vadd.f32 %v15326_v12, %v20957_v49  ;;  %v1562_v3 = vadd.f32 %v15328_v19, %v20958_v47  ;;  %v20961_v12 = vld [vmem:[#allocation105_spill] sm:$0xff]  ;;  %v20963_v8 = vld [vmem:[#allocation32_spill] sm:$0xff] }
 0x1e7   :  { %v15744_v17 = vadd.f32 %v2242_v15, %v1443_v61  ;;  %v15746_v4 = vadd.f32 %v2355_v10, %v1556_v40  ;;  %v1451_v61 = vadd.f32 %v15334_v20, %v20961_v12  ;;  %v20962_v10 = vld [vmem:[#allocation31_spill] sm:$0xff] }
 0x1e8   :  { %v2246_v59 = vpop.f32.mrf.mxu0  ;;  %v2359_v29 = vpop.f32.mrf.mxu1  ;;  %11636 = vmatmul.mubr.msk.bf16.gmra.mxu0 %vm552_vm1, %v14980_v55  ;;  %11645 = vmatmul.mubr.msk.bf16.gmra.mxu1 %vm552_vm1, %v14980_v55  ;;  %v20964_v55 = vld [vmem:[#allocation106_spill] sm:$0xff]  ;;  %v20969_v20 = vld [vmem:[#allocation107_spill] sm:$0xff] }
 0x1e9   :  { %20955 = vst [vmem:[#allocation87_spill] sm:$0xff] %v15744_v17  ;;  %20956 = vst [vmem:[#allocation23_spill] sm:$0xff] %v15746_v4  ;;  %v15756_v26 = vadd.f32 %v2246_v59, %v1447_v23  ;;  %v15758_v11 = vadd.f32 %v2359_v29, %v1560_v48  ;;  %3060 = vmatprep.mubr.bf16.mxu0 %v20593_v50  ;;  %3173 = vmatprep.mubr.bf16.mxu1 %v20593_v50  ;;  %v20967_v23 = vld [vmem:[#allocation33_spill] sm:$0xff]  ;;  %v20970_v29 = vld [vmem:[#allocation108_spill] sm:$0xff] }
 0x1ea   :  { %v2248_v40 = vpop.f32.mrf.mxu0  ;;  %v2361_v15 = vpop.f32.mrf.mxu1  ;;  %3241 = vmatpush1.bf16.msra.mxu0 %v20962_v10  ;;  %3354 = vmatpush1.bf16.msra.mxu1 %v20963_v8  ;;  %v1564_v19 = vadd.f32 %v15336_v21, %v20964_v55  ;;  %v1453_v59 = vadd.f32 %v15338_v22, %v20969_v20  ;;  %v1566_v47 = vadd.f32 %v15340_v5, %v20970_v29  ;;  %v20973_v21 = vld [vmem:[#allocation113_spill] sm:$0xff]  ;;  %v20975_v8 = vld [vmem:[#allocation36_spill] sm:$0xff]  ;;  %v20976_v55 = vld [vmem:[#allocation114_spill] sm:$0xff] }
 0x1eb   :  { %20959 = vst [vmem:[#allocation24_spill] sm:$0xff] %v15756_v26  ;;  %20960 = vst [vmem:[#allocation90_spill] sm:$0xff] %v15758_v11  ;;  %v15768_v1 = vadd.f32 %v2248_v40, %v1449_v13  ;;  %v15770_v16 = vadd.f32 %v2361_v15, %v1562_v3  ;;  %3242 = vmatprep.subr.bf16.mxu0 %v20967_v23  ;;  %3355 = vmatprep.subr.bf16.mxu1 %v20968_v60  ;;  %v20974_v15 = vld [vmem:[#allocation35_spill] sm:$0xff]  ;;  %v20979_v5 = vld [vmem:[#allocation37_spill] sm:$0xff] }
 0x1ec   :  { %v2250_v48 = vpop.f32.mrf.mxu0  ;;  %v2363_v49 = vpop.f32.mrf.mxu1  ;;  %v1457_v13 = vadd.f32 %v15346_v27, %v20973_v21  ;;  %v1570_v23 = vadd.f32 %v15348_v28, %v20976_v55  ;;  %v1572_v28 = vadd.f32 %v15358_v31, %v14746_v25  ;;  %v20984_v21 = vld [vmem:[#allocation39_spill] sm:$0xff] }
 0x1ed   :  { %20965 = vst [vmem:[#allocation91_spill] sm:$0xff] %v15768_v1  ;;  %20966 = vst [vmem:[#allocation25_spill] sm:$0xff] %v15770_v16  ;;  %v15778_v12 = vadd.f32 %v2250_v48, %v1451_v61  ;;  %v15780_v10 = vadd.f32 %v2363_v49, %v1564_v19  ;;  %v20980_v61 = vld [vmem:[#allocation38_spill] sm:$0xff]  ;;  %v20981_v19 = vld [vmem:[#allocation115_spill] sm:$0xff] }
 0x1ee   :  { %v2252_v3 = vpop.f32.mrf.mxu0  ;;  %v2365_v40 = vpop.f32.mrf.mxu1  ;;  %3243 = vmatpush1.bf16.msra.mxu0 %v20974_v15  ;;  %3356 = vmatpush1.bf16.msra.mxu1 %v20975_v8  ;;  %v1459_v27 = vadd.f32 %v15356_v30, %v20981_v19  ;;  %v1461_v30 = vadd.f32 %v15364_v35, %v14760_v33  ;;  %v20990_v15 = vld [vmem:[#allocation42_spill] sm:$0xff]  ;;  %v20991_v33 = vld [vmem:[#allocation121_spill] sm:$0xff] }
 0x1ef   :  { %20971 = vst [vmem:[#allocation26_spill] sm:$0xff] %v15778_v12  ;;  %20972 = vst [vmem:[#allocation92_spill] sm:$0xff] %v15780_v10  ;;  %v15788_v22 = vadd.f32 %v2252_v3, %v1453_v59  ;;  %v15790_v60 = vadd.f32 %v2365_v40, %v1566_v47  ;;  %3244 = vmatprep.subr.bf16.mxu0 %v20979_v5  ;;  %3357 = vmatprep.subr.bf16.mxu1 %v20980_v61  ;;  %v20985_v3 = vld [vmem:[#allocation40_spill] sm:$0xff]  ;;  %v20989_v40 = vld [vmem:[#allocation41_spill] sm:$0xff] }
 0x1f0   :  { %v2256_v48 = vpop.f32.mrf.mxu0  ;;  %v2369_v49 = vpop.f32.mrf.mxu1  ;;  %11637 = vmatmul.mubr.msk.bf16.gmra.mxu0 %vm552_vm1, %v15051_v63  ;;  %11646 = vmatmul.mubr.msk.bf16.gmra.mxu1 %vm552_vm1, %v15051_v63  ;;  %v20986_v63 = vld [vmem:[#allocation120_spill] sm:$0xff]  ;;  %v1463_v35 = vadd.f32 %v15368_v37, %v20991_v33 }
 0x1f1   :  { %20977 = vst [vmem:[#allocation27_spill] sm:$0xff] %v15788_v22  ;;  %20978 = vst [vmem:[#allocation28_spill] sm:$0xff] %v15790_v60  ;;  %v15802_v20 = vadd.f32 %v2256_v48, %v1457_v13  ;;  %v15804_v59 = vadd.f32 %v2369_v49, %v1570_v23  ;;  %3070 = vmatprep.mubr.bf16.mxu0 %v20593_v50  ;;  %3183 = vmatprep.mubr.bf16.mxu1 %v20593_v50  ;;  %v20992_v23 = vld [vmem:[#allocation122_spill] sm:$0xff] }
 0x1f2   :  { %v2258_v29 = vpop.f32.mrf.mxu0  ;;  %v2371_v47 = vpop.f32.mrf.mxu1  ;;  %3245 = vmatpush1.bf16.msra.mxu0 %v20984_v21  ;;  %3358 = vmatpush1.bf16.msra.mxu1 %v20985_v3  ;;  %v1574_v25 = vadd.f32 %v15366_v36, %v20986_v63  ;;  %v1576_v5 = vadd.f32 %v15370_v38, %v20992_v23  ;;  %v20995_v36 = vld [vmem:[#allocation127_spill] sm:$0xff]  ;;  %v21001_v38 = vld [vmem:[#allocation45_spill] sm:$0xff] }
 0x1f3   :  { %20982 = vst [vmem:[#allocation29_spill] sm:$0xff] %v15802_v20  ;;  %20983 = vst [vmem:[#allocation30_spill] sm:$0xff] %v15804_v59  ;;  %v15814_v31 = vadd.f32 %v2258_v29, %v1459_v27  ;;  %v15816_v13 = vadd.f32 %v2371_v47, %v1572_v28  ;;  %3246 = vmatprep.subr.bf16.mxu0 %v20989_v40  ;;  %3359 = vmatprep.subr.bf16.mxu1 %v20990_v15  ;;  %v20996_v28 = vld [vmem:[#allocation43_spill] sm:$0xff]  ;;  %v20997_v29 = vld [vmem:[#allocation44_spill] sm:$0xff] }
 0x1f4   :  { %v2260_v8 = vpop.f32.mrf.mxu0  ;;  %v2373_v55 = vpop.f32.mrf.mxu1  ;;  %v1467_v27 = vadd.f32 %v15376_v43, %v20995_v36  ;;  %v20998_v47 = vld [vmem:[#allocation128_spill] sm:$0xff]  ;;  %v21003_v63 = vld [vmem:[#allocation129_spill] sm:$0xff] }
 0x1f5   :  { %20987 = vst [vmem:[#allocation97_spill] sm:$0xff] %v15814_v31  ;;  %20988 = vst [vmem:[#allocation98_spill] sm:$0xff] %v15816_v13  ;;  %v15824_v61 = vadd.f32 %v2260_v8, %v1461_v30  ;;  %v15826_v19 = vadd.f32 %v2373_v55, %v1574_v25  ;;  %v1580_v21 = vadd.f32 %v15378_v44, %v20998_v47  ;;  %v21002_v30 = vld [vmem:[#allocation46_spill] sm:$0xff]  ;;  %v21009_v36 = vld [vmem:[#allocation48_spill] sm:$0xff] }
 0x1f6   :  { %v2262_v48 = vpop.f32.mrf.mxu0  ;;  %v2375_v49 = vpop.f32.mrf.mxu1  ;;  %3247 = vmatpush1.bf16.msra.mxu0 %v20996_v28  ;;  %3360 = vmatpush1.bf16.msra.mxu1 %v20997_v29  ;;  %v1469_v43 = vadd.f32 %v15386_v45, %v21003_v63  ;;  %v21004_v44 = vld [vmem:[#allocation130_spill] sm:$0xff]  ;;  %v21007_v45 = vld [vmem:[#allocation131_spill] sm:$0xff]  ;;  %v21015_v47 = vld [vmem:[#allocation133_spill] sm:$0xff] }
 0x1f7   :  { %20993 = vst [vmem:[#allocation99_spill] sm:$0xff] %v15824_v61  ;;  %20994 = vst [vmem:[#allocation100_spill] sm:$0xff] %v15826_v19  ;;  %v15834_v37 = vadd.f32 %v2262_v48, %v1463_v35  ;;  %v15836_v3 = vadd.f32 %v2375_v49, %v1576_v5  ;;  %3248 = vmatprep.subr.bf16.mxu0 %v21001_v38  ;;  %3361 = vmatprep.subr.bf16.mxu1 %v21002_v30  ;;  %v21008_v5 = vld [vmem:[#allocation47_spill] sm:$0xff]  ;;  %v21013_v49 = vld [vmem:[#allocation49_spill] sm:$0xff] }
 0x1f8   :  { %v2266_v25 = vpop.f32.mrf.mxu0  ;;  %v2379_v40 = vpop.f32.mrf.mxu1  ;;  %11638 = vmatmul.mubr.msk.bf16.gmra.mxu0 %vm552_vm1, %v15136_v2  ;;  %11647 = vmatmul.mubr.msk.bf16.gmra.mxu1 %vm552_vm1, %v15136_v2  ;;  %v1582_v15 = vadd.f32 %v15388_v46, %v21004_v44  ;;  %v1471_v33 = vadd.f32 %v15396_v51, %v21007_v45  ;;  %v21010_v2 = vld [vmem:[#allocation132_spill] sm:$0xff]  ;;  %v21014_v28 = vld [vmem:[#allocation50_spill] sm:$0xff] }
 0x1f9   :  { %20999 = vst [vmem:[#allocation105_spill] sm:$0xff] %v15834_v37  ;;  %21000 = vst [vmem:[#allocation31_spill] sm:$0xff] %v15836_v3  ;;  %v15848_v8 = vadd.f32 %v2266_v25, %v1467_v27  ;;  %v15850_v55 = vadd.f32 %v2379_v40, %v1580_v21  ;;  %3080 = vmatprep.mubr.bf16.mxu0 %v20593_v50  ;;  %3193 = vmatprep.mubr.bf16.mxu1 %v20593_v50  ;;  %v21016_v38 = vld [vmem:[#allocation134_spill] sm:$0xff]  ;;  %v21019_v40 = vld [vmem:[#allocation135_spill] sm:$0xff] }
 0x1fa   :  { %v2268_v35 = vpop.f32.mrf.mxu0  ;;  %v2381_v23 = vpop.f32.mrf.mxu1  ;;  %3249 = vmatpush1.bf16.msra.mxu0 %v21008_v5  ;;  %3362 = vmatpush1.bf16.msra.mxu1 %v21009_v36  ;;  %v1584_v46 = vadd.f32 %v15398_v52, %v21010_v2  ;;  %v1473_v21 = vadd.f32 %v15400_v53, %v21015_v47  ;;  %v1586_v30 = vadd.f32 %v15402_v54, %v21016_v38  ;;  %v21023_v53 = vld [vmem:[#allocation137_spill] sm:$0xff]  ;;  %v21024_v36 = vld [vmem:[#allocation138_spill] sm:$0xff] }
 0x1fb   :  { %21005 = vst [vmem:[#allocation32_spill] sm:$0xff] %v15848_v8  ;;  %21006 = vst [vmem:[#allocation106_spill] sm:$0xff] %v15850_v55  ;;  %v15860_v27 = vadd.f32 %v2268_v35, %v1469_v43  ;;  %v15862_v48 = vadd.f32 %v2381_v23, %v1582_v15  ;;  %11670 = vmatprep.subr.msk.bf16.mxu0 %vm577_vm0, %v21013_v49  ;;  %11679 = vmatprep.subr.msk.bf16.mxu1 %vm577_vm0, %v21014_v28  ;;  %v21020_v15 = vld [vmem:[#allocation136_spill] sm:$0xff]  ;;  %v21027_v49 = vld [vmem:[#allocation139_spill] sm:$0xff] }
 0x1fc   :  { %v2270_v51 = vpop.f32.mrf.mxu0  ;;  %v2383_v29 = vpop.f32.mrf.mxu1  ;;  %v1477_v44 = vadd.f32 %v15404_v39, %v21019_v40  ;;  %v1590_v45 = vadd.f32 %v15406_v62, %v21020_v15  ;;  %v1479_v5 = vadd.f32 %v15414_v57, %v21023_v53  ;;  %v1592_v39 = vadd.f32 %v15416_v58, %v21024_v36  ;;  %v21028_v28 = vld [vmem:[#allocation257_spill] sm:$0xff]  ;;  %v21030_v47 = vld [vmem:[#allocation258_spill] sm:$0xff]  ;;  %v21036_v15 = vld [vmem:[#allocation260_spill] sm:$0xff] }
 0x1fd   :  { %21011 = vst [vmem:[#allocation33_spill] sm:$0xff] %v15860_v27  ;;  %21012 = vst [vmem:[#allocation34_spill] sm:$0xff] %v15862_v48  ;;  %v15872_v63 = vadd.f32 %v2270_v51, %v1471_v33  ;;  %v15874_v52 = vadd.f32 %v2383_v29, %v1584_v46  ;;  %v1481_v51 = vadd.f32 %v21028_v28, %v21027_v49  ;;  %v21029_v29 = vld [vmem:[#allocation140_spill] sm:$0xff]  ;;  %v21039_v49 = vld [vmem:[#allocation143_spill] sm:$0xff] }
 0x1fe   :  { %v2272_v43 = vpop.f32.mrf.mxu0  ;;  %v2385_v25 = vpop.f32.mrf.mxu1  ;;  %v21040_v28 = vld [vmem:[#allocation261_spill] sm:$0xff] }
 0x1ff   :  { %21017 = vst [vmem:[#allocation107_spill] sm:$0xff] %v15872_v63  ;;  %21018 = vst [vmem:[#allocation108_spill] sm:$0xff] %v15874_v52  ;;  %v15880_v35 = vadd.f32 %v2272_v43, %v1473_v21  ;;  %v15882_v23 = vadd.f32 %v2385_v25, %v1586_v30  ;;  %v1594_v21 = vadd.f32 %v21030_v47, %v21029_v29  ;;  %v21033_v43 = vld [vmem:[#allocation141_spill] sm:$0xff]  ;;  %v21034_v25 = vld [vmem:[#allocation259_spill] sm:$0xff] }
 0x200   :  { %v2276_v54 = vpop.f32.mrf.mxu0  ;;  %v2389_v33 = vpop.f32.mrf.mxu1  ;;  %11639 = vmatmul.mubr.msk.bf16.gmra.mxu0 %vm552_vm1, %v15177_v42  ;;  %11648 = vmatmul.mubr.msk.bf16.gmra.mxu1 %vm552_vm1, %v15177_v42  ;;  %v1483_v40 = vadd.f32 %v21034_v25, %v21033_v43  ;;  %v21045_v43 = vld [vmem:[#allocation145_spill] sm:$0xff]  ;;  %v21046_v25 = vld [vmem:[#allocation263_spill] sm:$0xff]  ;;  %v21355_v52 = vld [vmem:[#allocation118_spill] sm:$0xff] }
 0x201   :  { %21021 = vst [vmem:[#allocation113_spill] sm:$0xff] %v15880_v35  ;;  %21022 = vst [vmem:[#allocation35_spill] sm:$0xff] %v15882_v23  ;;  %v15892_v2 = vadd.f32 %v2276_v54, %v1477_v44  ;;  %v15894_v62 = vadd.f32 %v2389_v33, %v1590_v45  ;;  %3090 = vmatprep.mubr.bf16.mxu0 %v20593_v50  ;;  %3203 = vmatprep.mubr.bf16.mxu1 %v20593_v50  ;;  %v21035_v44 = vld [vmem:[#allocation142_spill] sm:$0xff]  ;;  %v21353_v23 = vld [vmem:[#allocation116_spill] sm:$0xff] }
 0x202   :  { %v2278_v57 = vpop.f32.mrf.mxu0  ;;  %v2391_v46 = vpop.f32.mrf.mxu1  ;;  %v1596_v45 = vadd.f32 %v21036_v15, %v21035_v44  ;;  %v21354_v35 = vld [vmem:[#allocation117_spill] sm:$0xff]  ;;  %v21364_v63 = vld [vmem:[#allocation126_spill] sm:$0xff] }
 0x203   :  { %21025 = vst [vmem:[#allocation36_spill] sm:$0xff] %v15892_v2  ;;  %21026 = vst [vmem:[#allocation114_spill] sm:$0xff] %v15894_v62  ;;  %v15902_v42 = vadd.f32 %v2278_v57, %v1479_v5  ;;  %v15904_v38 = vadd.f32 %v2391_v46, %v1592_v39  ;;  %v1487_v5 = vadd.f32 %v21040_v28, %v21039_v49  ;;  %v21041_v57 = vld [vmem:[#allocation144_spill] sm:$0xff]  ;;  %v21042_v39 = vld [vmem:[#allocation262_spill] sm:$0xff] }
 0x204   :  { %v2280_v58 = vpop.f32.mrf.mxu0  ;;  %v2393_v30 = vpop.f32.mrf.mxu1  ;;  %v1600_v46 = vadd.f32 %v21042_v39, %v21041_v57  ;;  %v21052_v49 = vld [vmem:[#allocation265_spill] sm:$0xff]  ;;  %v21053_v57 = vld [vmem:[#allocation148_spill] sm:$0xff]  ;;  %v21054_v39 = vld [vmem:[#allocation266_spill] sm:$0xff] }
 0x205   :  { %21031 = vst [vmem:[#allocation37_spill] sm:$0xff] %v15902_v42  ;;  %21032 = vst [vmem:[#allocation38_spill] sm:$0xff] %v15904_v38  ;;  %v15910_v53 = vadd.f32 %v2280_v58, %v1481_v51  ;;  %v15912_v54 = vadd.f32 %v2393_v30, %v1594_v21  ;;  %v1489_v38 = vadd.f32 %v21046_v25, %v21045_v43  ;;  %v21047_v21 = vld [vmem:[#allocation146_spill] sm:$0xff]  ;;  %v21048_v58 = vld [vmem:[#allocation264_spill] sm:$0xff] }
 0x206   :  { %v2282_v33 = vpop.f32.mrf.mxu0  ;;  %v2395_v36 = vpop.f32.mrf.mxu1  ;;  %v1602_v30 = vadd.f32 %v21048_v58, %v21047_v21  ;;  %v1604_v43 = vadd.f32 %v21054_v39, %v21053_v57  ;;  %v21059_v58 = vld [vmem:[#allocation150_spill] sm:$0xff]  ;;  %v21064_v57 = vld [vmem:[#allocation269_spill] sm:$0xff] }
 0x207   :  { %21037 = vst [vmem:[#allocation115_spill] sm:$0xff] %v15910_v53  ;;  %21038 = vst [vmem:[#allocation39_spill] sm:$0xff] %v15912_v54  ;;  %v15918_v29 = vadd.f32 %v2282_v33, %v1483_v40  ;;  %v15920_v47 = vadd.f32 %v2395_v36, %v1596_v45  ;;  %v21051_v36 = vld [vmem:[#allocation147_spill] sm:$0xff]  ;;  %v21280_v53 = vld [vmem:[#allocation241_spill] sm:$0xff] }
 0x208   :  { %v2286_v44 = vpop.f32.mrf.mxu0  ;;  %v2399_v51 = vpop.f32.mrf.mxu1  ;;  %11640 = vmatmul.mubr.msk.bf16.gmra.mxu0 %vm552_vm1, %v15204_v18  ;;  %11649 = vmatmul.mubr.msk.bf16.gmra.mxu1 %vm552_vm1, %v15204_v18  ;;  %v1491_v28 = vadd.f32 %v21052_v49, %v21051_v36  ;;  %v21063_v54 = vld [vmem:[#allocation151_spill] sm:$0xff]  ;;  %v21304_v42 = vld [vmem:[#allocation249_spill] sm:$0xff] }
 0x209   :  { %21043 = vst [vmem:[#allocation40_spill] sm:$0xff] %v15918_v29  ;;  %21044 = vst [vmem:[#allocation120_spill] sm:$0xff] %v15920_v47  ;;  %v15930_v15 = vadd.f32 %v2286_v44, %v1487_v5  ;;  %v15932_v40 = vadd.f32 %v2399_v51, %v1600_v46  ;;  %3100 = vmatprep.mubr.bf16.mxu0 %v20593_v50  ;;  %3213 = vmatprep.mubr.bf16.mxu1 %v20593_v50  ;;  %v21057_v46 = vld [vmem:[#allocation149_spill] sm:$0xff]  ;;  %v21058_v51 = vld [vmem:[#allocation267_spill] sm:$0xff] }
 0x20a   :  { %v2288_v45 = vpop.f32.mrf.mxu0  ;;  %v2401_v33 = vpop.f32.mrf.mxu1  ;;  %v1493_v21 = vadd.f32 %v21058_v51, %v21057_v46  ;;  %v21069_v46 = vld [vmem:[#allocation153_spill] sm:$0xff]  ;;  %v21070_v51 = vld [vmem:[#allocation271_spill] sm:$0xff] }
 0x20b   :  { %21049 = vst [vmem:[#allocation41_spill] sm:$0xff] %v15930_v15  ;;  %21050 = vst [vmem:[#allocation42_spill] sm:$0xff] %v15932_v40  ;;  %v15940_v18 = vadd.f32 %v2288_v45, %v1489_v38  ;;  %v15942_v25 = vadd.f32 %v2401_v33, %v1602_v30  ;;  %v21060_v40 = vld [vmem:[#allocation268_spill] sm:$0xff]  ;;  %v1497_v38 = vadd.f32 %v21064_v57, %v21063_v54  ;;  %v21066_v30 = vld [vmem:[#allocation270_spill] sm:$0xff] }
 0x20c   :  { %v2290_v5 = vpop.f32.mrf.mxu0  ;;  %v2403_v44 = vpop.f32.mrf.mxu1  ;;  %v1606_v15 = vadd.f32 %v21060_v40, %v21059_v58  ;;  %v21065_v45 = vld [vmem:[#allocation152_spill] sm:$0xff] }
 0x20d   :  { %21055 = vst [vmem:[#allocation121_spill] sm:$0xff] %v15940_v18  ;;  %21056 = vst [vmem:[#allocation122_spill] sm:$0xff] %v15942_v25  ;;  %v15948_v47 = vadd.f32 %v2290_v5, %v1491_v28  ;;  %v15950_v29 = vadd.f32 %v2403_v44, %v1604_v43  ;;  %v1610_v33 = vadd.f32 %v21066_v30, %v21065_v45  ;;  %v21071_v43 = vld [vmem:[#allocation154_spill] sm:$0xff]  ;;  %v21072_v54 = vld [vmem:[#allocation272_spill] sm:$0xff] }
 0x20e   :  { %v2292_v36 = vpop.f32.mrf.mxu0  ;;  %v2405_v49 = vpop.f32.mrf.mxu1  ;;  %v1499_v18 = vadd.f32 %v21070_v51, %v21069_v46  ;;  %v1612_v5 = vadd.f32 %v21072_v54, %v21071_v43  ;;  %v21077_v45 = vld [vmem:[#allocation156_spill] sm:$0xff]  ;;  %v21078_v30 = vld [vmem:[#allocation274_spill] sm:$0xff] }
 0x20f   :  { %21061 = vst [vmem:[#allocation127_spill] sm:$0xff] %v15948_v47  ;;  %21062 = vst [vmem:[#allocation43_spill] sm:$0xff] %v15950_v29  ;;  %v15956_v39 = vadd.f32 %v2292_v36, %v1493_v21  ;;  %v15958_v25 = vadd.f32 %v2405_v49, %v1606_v15  ;;  %v21075_v36 = vld [vmem:[#allocation155_spill] sm:$0xff]  ;;  %v21076_v49 = vld [vmem:[#allocation273_spill] sm:$0xff]  ;;  %v1614_v46 = vadd.f32 %v21078_v30, %v21077_v45 }
 0x210   :  { %v2296_v40 = vpop.f32.mrf.mxu0  ;;  %v2409_v28 = vpop.f32.mrf.mxu1  ;;  %11641 = vmatmul.mubr.msk.bf16.gmra.mxu0 %vm552_vm1, %v15231_v56  ;;  %11650 = vmatmul.mubr.msk.bf16.gmra.mxu1 %vm552_vm1, %v15231_v56  ;;  %v1501_v57 = vadd.f32 %v21076_v49, %v21075_v36  ;;  %v21083_v54 = vld [vmem:[#allocation158_spill] sm:$0xff]  ;;  %v21087_v29 = vld [vmem:[#allocation159_spill] sm:$0xff]  ;;  %v21088_v45 = vld [vmem:[#allocation277_spill] sm:$0xff] }
 0x211   :  { %21067 = vst [vmem:[#allocation44_spill] sm:$0xff] %v15956_v39  ;;  %21068 = vst [vmem:[#allocation128_spill] sm:$0xff] %v15958_v25  ;;  %v15968_v44 = vadd.f32 %v2296_v40, %v1497_v38  ;;  %v15970_v21 = vadd.f32 %v2409_v28, %v1610_v33  ;;  %3110 = vmatprep.mubr.bf16.mxu0 %v20593_v50  ;;  %3223 = vmatprep.mubr.bf16.mxu1 %v20593_v50  ;;  %v21081_v33 = vld [vmem:[#allocation157_spill] sm:$0xff]  ;;  %v21082_v28 = vld [vmem:[#allocation275_spill] sm:$0xff] }
 0x212   :  { %v2298_v15 = vpop.f32.mrf.mxu0  ;;  %v2411_v58 = vpop.f32.mrf.mxu1  ;;  %v1503_v43 = vadd.f32 %v21082_v28, %v21081_v33  ;;  %v21093_v33 = vld [vmem:[#allocation161_spill] sm:$0xff] }
 0x213   :  { %21073 = vst [vmem:[#allocation45_spill] sm:$0xff] %v15968_v44  ;;  %21074 = vst [vmem:[#allocation46_spill] sm:$0xff] %v15970_v21  ;;  %v15978_v56 = vadd.f32 %v2298_v15, %v1499_v18  ;;  %v15980_v51 = vadd.f32 %v2411_v58, %v1612_v5  ;;  %v21084_v21 = vld [vmem:[#allocation276_spill] sm:$0xff]  ;;  %v1507_v18 = vadd.f32 %v21088_v45, %v21087_v29  ;;  %v21090_v5 = vld [vmem:[#allocation278_spill] sm:$0xff] }
 0x214   :  { %v2300_v38 = vpop.f32.mrf.mxu0  ;;  %v2413_v40 = vpop.f32.mrf.mxu1  ;;  %v1616_v44 = vadd.f32 %v21084_v21, %v21083_v54  ;;  %v21089_v15 = vld [vmem:[#allocation160_spill] sm:$0xff]  ;;  %v1509_v28 = vadd.f32 %v15480_v14, %v21093_v33  ;;  %v21098_v54 = vld [vmem:[#allocation279_spill] sm:$0xff]  ;;  %v21256_v47 = vld [vmem:[#allocation233_spill] sm:$0xff] }
 0x215   :  { %21079 = vst [vmem:[#allocation129_spill] sm:$0xff] %v15978_v56  ;;  %21080 = vst [vmem:[#allocation130_spill] sm:$0xff] %v15980_v51  ;;  %v15986_v25 = vadd.f32 %v2300_v38, %v1501_v57  ;;  %v15988_v39 = vadd.f32 %v2413_v40, %v1614_v46  ;;  %v1620_v58 = vadd.f32 %v21090_v5, %v21089_v15  ;;  %v21094_v46 = vld [vmem:[#allocation162_spill] sm:$0xff]  ;;  %v21100_v45 = vld [vmem:[#allocation280_spill] sm:$0xff] }
 0x216   :  { %v2302_v36 = vpop.f32.mrf.mxu0  ;;  %v2415_v49 = vpop.f32.mrf.mxu1  ;;  %v1622_v29 = vadd.f32 %v15482_v34, %v21094_v46 }
 0x217   :  { %21085 = vst [vmem:[#allocation131_spill] sm:$0xff] %v15986_v25  ;;  %21086 = vst [vmem:[#allocation47_spill] sm:$0xff] %v15988_v39  ;;  %v15994_v30 = vadd.f32 %v2302_v36, %v1503_v43  ;;  %v15996_v51 = vadd.f32 %v2415_v49, %v1616_v44  ;;  %v21097_v43 = vld [vmem:[#allocation163_spill] sm:$0xff]  ;;  %v21099_v49 = vld [vmem:[#allocation164_spill] sm:$0xff] }
 0x218   :  { %v2306_v21 = vpop.f32.mrf.mxu0  ;;  %v2419_v57 = vpop.f32.mrf.mxu1  ;;  %11642 = vmatmul.mubr.msk.bf16.gmra.mxu0 %vm552_vm1, %v15258_v41  ;;  %11651 = vmatmul.mubr.msk.bf16.gmra.mxu1 %vm552_vm1, %v15258_v41  ;;  %v1511_v36 = vadd.f32 %v21098_v54, %v21097_v43  ;;  %v1624_v15 = vadd.f32 %v21100_v45, %v21099_v49  ;;  %v21109_v49 = vld [vmem:[#allocation282_spill] sm:$0xff] }
 0x219   :  { %21091 = vst [vmem:[#allocation48_spill] sm:$0xff] %v15994_v30  ;;  %21092 = vst [vmem:[#allocation132_spill] sm:$0xff] %v15996_v51  ;;  %v16006_v38 = vadd.f32 %v2306_v21, %v1507_v18  ;;  %v16008_v40 = vadd.f32 %v2419_v57, %v1620_v58  ;;  %3266 = vmatprep.mubr.bf16.mxu0 %v20593_v50  ;;  %3379 = vmatprep.mubr.bf16.mxu1 %v20593_v50  ;;  %v21103_v58 = vld [vmem:[#allocation165_spill] sm:$0xff]  ;;  %v21104_v21 = vld [vmem:[#allocation166_spill] sm:$0xff] }
 0x21a   :  { %v2308_v14 = vpop.f32.mrf.mxu0  ;;  %v2421_v44 = vpop.f32.mrf.mxu1  ;;  %v1513_v33 = vadd.f32 %v15488_v6, %v21103_v58  ;;  %v21105_v57 = vld [vmem:[#allocation281_spill] sm:$0xff]  ;;  %v21108_v51 = vld [vmem:[#allocation171_spill] sm:$0xff]  ;;  %v21115_v58 = vld [vmem:[#allocation284_spill] sm:$0xff] }
 0x21b   :  { %21095 = vst [vmem:[#allocation49_spill] sm:$0xff] %v16006_v38  ;;  %21096 = vst [vmem:[#allocation50_spill] sm:$0xff] %v16008_v40  ;;  %v16016_v41 = vadd.f32 %v2308_v14, %v1509_v28  ;;  %v16018_v5 = vadd.f32 %v2421_v44, %v1622_v29  ;;  %v1626_v46 = vadd.f32 %v21105_v57, %v21104_v21  ;;  %v21110_v14 = vld [vmem:[#allocation172_spill] sm:$0xff]  ;;  %v21111_v29 = vld [vmem:[#allocation283_spill] sm:$0xff] }
 0x21c   :  { %v2310_v34 = vpop.f32.mrf.mxu0  ;;  %v2423_v18 = vpop.f32.mrf.mxu1  ;;  %v1663_v28 = vadd.f32 %v21109_v49, %v21108_v51  ;;  %v1776_v44 = vadd.f32 %v21111_v29, %v21110_v14  ;;  %v21114_v6 = vld [vmem:[#allocation175_spill] sm:$0xff]  ;;  %v21116_v51 = vld [vmem:[#allocation176_spill] sm:$0xff]  ;;  %v21123_v49 = vld [vmem:[#allocation286_spill] sm:$0xff] }
 0x21d   :  { %21101 = vst [vmem:[#allocation133_spill] sm:$0xff] %v16016_v41  ;;  %21102 = vst [vmem:[#allocation134_spill] sm:$0xff] %v16018_v5  ;;  %v16024_v40 = vadd.f32 %v2310_v34, %v1511_v36  ;;  %v16026_v38 = vadd.f32 %v2423_v18, %v1624_v15  ;;  %v1665_v41 = vadd.f32 %v21115_v58, %v21114_v6  ;;  %v16041_v15 = vld [vmem:[%s20308_s1] sm:$0xff]   ;;  %v21117_v34 = vld [vmem:[#allocation285_spill] sm:$0xff] }
 0x21e   :  { %v2312_v43 = vpop.f32.mrf.mxu0  ;;  %v2425_v54 = vpop.f32.mrf.mxu1  ;;  %v1778_v18 = vadd.f32 %v21117_v34, %v21116_v51  ;;  %v21124_v58 = vld [vmem:[#allocation180_spill] sm:$0xff]  ;;  %v21130_v34 = vld [vmem:[#allocation181_spill] sm:$0xff] }
 0x21f   :  { %21106 = vst [vmem:[#allocation135_spill] sm:$0xff] %v16024_v40  ;;  %21107 = vst [vmem:[#allocation136_spill] sm:$0xff] %v16026_v38  ;;  %v16032_v45 = vadd.f32 %v2312_v43, %v1513_v33  ;;  %v16034_v5 = vadd.f32 %v2425_v54, %v1626_v46  ;;  %v21120_v46 = vld [vmem:[#allocation51_spill] sm:$0xff]  ;;  %v21121_v43 = vld [vmem:[#allocation52_spill] sm:$0xff] }
 0x220   :  { %v2462_v21 = vpop.f32.mrf.mxu0  ;;  %v2575_v36 = vpop.f32.mrf.mxu1  ;;  %11653 = vmatmul.mubr.msk.bf16.vlgmr.msra.gmra.mxu0 %vm552_vm1, %v16041_v15  ;;  %11662 = vmatmul.mubr.msk.bf16.vlgmr.msra.gmra.mxu1 %vm552_vm1, %v16041_v15  ;;  %v21122_v54 = vld [vmem:[#allocation179_spill] sm:$0xff] }
 0x221   :  { %21112 = vst [vmem:[#allocation137_spill] sm:$0xff] %v16032_v45  ;;  %21113 = vst [vmem:[#allocation138_spill] sm:$0xff] %v16034_v5  ;;  %v16049_v33 = vadd.f32 %v2462_v21, %v1663_v28  ;;  %v16051_v57 = vadd.f32 %v2575_v36, %v1776_v44  ;;  %3463 = vmatpush1.bf16.msra.mxu0 %v21120_v46  ;;  %3576 = vmatpush1.bf16.msra.mxu1 %v21121_v43  ;;  %v21125_v5 = vld [vmem:[#allocation287_spill] sm:$0xff]  ;;  %v21128_v21 = vld [vmem:[#allocation53_spill] sm:$0xff] }
 0x222   :  { %v1667_v14 = vadd.f32 %v21123_v49, %v21122_v54  ;;  %v2464_v29 = vpop.f32.mrf.mxu0  ;;  %v2577_v6 = vpop.f32.mrf.mxu1  ;;  %3276 = vmatprep.mubr.bf16.mxu0 %v20593_v50  ;;  %3389 = vmatprep.mubr.bf16.mxu1 %v20593_v50  ;;  %v1780_v51 = vadd.f32 %v21125_v5, %v21124_v58  ;;  %v21129_v36 = vld [vmem:[#allocation54_spill] sm:$0xff]  ;;  %v21131_v46 = vld [vmem:[#allocation288_spill] sm:$0xff] }
 0x223   :  { %21118 = vst [vmem:[#allocation139_spill] sm:$0xff] %v16049_v33  ;;  %21119 = vst [vmem:[#allocation257_spill] sm:$0xff] %v16051_v57  ;;  %v16061_v28 = vadd.f32 %v2464_v29, %v1665_v41  ;;  %v16063_v44 = vadd.f32 %v2577_v6, %v1778_v18  ;;  %3464 = vmatprep.subr.bf16.mxu0 %v21128_v21  ;;  %3577 = vmatprep.subr.bf16.mxu1 %v21129_v36  ;;  %v21132_v57 = vld [vmem:[#allocation182_spill] sm:$0xff]  ;;  %v21133_v33 = vld [vmem:[#allocation289_spill] sm:$0xff] }
 0x224   :  { %v1669_v43 = vadd.f32 %v21131_v46, %v21130_v34  ;;  %v2466_v54 = vpop.f32.mrf.mxu0  ;;  %v2579_v49 = vpop.f32.mrf.mxu1  ;;  %v1782_v45 = vadd.f32 %v21133_v33, %v21132_v57  ;;  %v21136_v41 = vld [vmem:[#allocation55_spill] sm:$0xff]  ;;  %v21137_v5 = vld [vmem:[#allocation56_spill] sm:$0xff]  ;;  %v21138_v6 = vld [vmem:[#allocation57_spill] sm:$0xff] }
 0x225   :  { %21126 = vst [vmem:[#allocation140_spill] sm:$0xff] %v16061_v28  ;;  %21127 = vst [vmem:[#allocation258_spill] sm:$0xff] %v16063_v44  ;;  %v16071_v38 = vadd.f32 %v2466_v54, %v1667_v14  ;;  %v16073_v40 = vadd.f32 %v2579_v49, %v1780_v51  ;;  %3465 = vmatpush1.bf16.msra.mxu0 %v21136_v41  ;;  %3578 = vmatpush1.bf16.msra.mxu1 %v21137_v5  ;;  %v21139_v58 = vld [vmem:[#allocation58_spill] sm:$0xff]  ;;  %v21140_v21 = vld [vmem:[#allocation187_spill] sm:$0xff] }
 0x226   :  { %v2468_v18 = vpop.f32.mrf.mxu0  ;;  %v2581_v29 = vpop.f32.mrf.mxu1  ;;  %3466 = vmatprep.subr.bf16.mxu0 %v21138_v6  ;;  %3579 = vmatprep.subr.bf16.mxu1 %v21139_v58  ;;  %v21141_v36 = vld [vmem:[#allocation2_spill] sm:$0xff]  ;;  %v21142_v46 = vld [vmem:[#allocation188_spill] sm:$0xff]  ;;  %v21146_v51 = vld [vmem:[#allocation189_spill] sm:$0xff] }
 0x227   :  { %21134 = vst [vmem:[#allocation141_spill] sm:$0xff] %v16071_v38  ;;  %21135 = vst [vmem:[#allocation259_spill] sm:$0xff] %v16073_v40  ;;  %v1673_v34 = vadd.f32 %v21141_v36, %v21140_v21  ;;  %v21143_v44 = vld [vmem:[#allocation290_spill] sm:$0xff]  ;;  %v16083_v57 = vadd.f32 %v2468_v18, %v1669_v43  ;;  %v16085_v14 = vadd.f32 %v2581_v29, %v1782_v45  ;;  %v21147_v54 = vld [vmem:[#allocation291_spill] sm:$0xff] }
 0x228   :  { %v1786_v33 = vadd.f32 %v21143_v44, %v21142_v46  ;;  %v1675_v49 = vadd.f32 %v21147_v54, %v21146_v51  ;;  %v2472_v41 = vpop.f32.mrf.mxu0  ;;  %v2585_v5 = vpop.f32.mrf.mxu1  ;;  %v16092_v6 = vld [vmem:[%s20308_s1 + $0x8] sm:$0xff]   ;;  %v21148_v44 = vld [vmem:[#allocation190_spill] sm:$0xff]  ;;  %v21149_v43 = vld [vmem:[#allocation292_spill] sm:$0xff] }
 0x229   :  { %21144 = vst [vmem:[#allocation142_spill] sm:$0xff] %v16083_v57  ;;  %21145 = vst [vmem:[#allocation260_spill] sm:$0xff] %v16085_v14  ;;  %11654 = vmatmul.mubr.msk.bf16.gmra.mxu0 %vm552_vm1, %v16092_v6  ;;  %11663 = vmatmul.mubr.msk.bf16.gmra.mxu1 %vm552_vm1, %v16092_v6  ;;  %v1788_v45 = vadd.f32 %v21149_v43, %v21148_v44  ;;  %v16100_v18 = vadd.f32 %v2472_v41, %v1673_v34  ;;  %v21152_v58 = vld [vmem:[#allocation195_spill] sm:$0xff]  ;;  %v21155_v14 = vld [vmem:[#allocation60_spill] sm:$0xff] }
 0x22a   :  { %v16102_v29 = vadd.f32 %v2585_v5, %v1786_v33  ;;  %3286 = vmatprep.mubr.bf16.mxu0 %v20593_v50  ;;  %3399 = vmatprep.mubr.bf16.mxu1 %v20593_v50  ;;  %v21153_v21 = vld [vmem:[#allocation3_spill] sm:$0xff]  ;;  %v2474_v46 = vpop.f32.mrf.mxu0  ;;  %v2587_v51 = vpop.f32.mrf.mxu1  ;;  %v21156_v57 = vld [vmem:[#allocation196_spill] sm:$0xff]  ;;  %v21160_v41 = vld [vmem:[#allocation61_spill] sm:$0xff] }
 0x22b   :  { %21150 = vst [vmem:[#allocation143_spill] sm:$0xff] %v16100_v18  ;;  %v1677_v36 = vadd.f32 %v21153_v21, %v21152_v58  ;;  %v21154_v54 = vld [vmem:[#allocation59_spill] sm:$0xff]  ;;  %3580 = vmatpush1.bf16.msra.mxu1 %v21155_v14  ;;  %v21157_v40 = vld [vmem:[#allocation4_spill] sm:$0xff]  ;;  %v16112_v34 = vadd.f32 %v2474_v46, %v1675_v49  ;;  %v16114_v33 = vadd.f32 %v2587_v51, %v1788_v45  ;;  %v21161_v5 = vld [vmem:[#allocation62_spill] sm:$0xff] }
 0x22c   :  { %21151 = vst [vmem:[#allocation261_spill] sm:$0xff] %v16102_v29  ;;  %3467 = vmatpush1.bf16.msra.mxu0 %v21154_v54  ;;  %v1790_v44 = vadd.f32 %v21157_v40, %v21156_v57  ;;  %3581 = vmatprep.subr.bf16.mxu1 %v21161_v5  ;;  %v2476_v43 = vpop.f32.mrf.mxu0  ;;  %v2589_v29 = vpop.f32.mrf.mxu1  ;;  %v21162_v58 = vld [vmem:[#allocation197_spill] sm:$0xff]  ;;  %v21164_v38 = vld [vmem:[#allocation198_spill] sm:$0xff]  ;;  %v21168_v40 = vld [vmem:[#allocation203_spill] sm:$0xff] }
 0x22d   :  { %21158 = vst [vmem:[#allocation144_spill] sm:$0xff] %v16112_v34  ;;  %21159 = vst [vmem:[#allocation262_spill] sm:$0xff] %v16114_v33  ;;  %3468 = vmatprep.subr.bf16.mxu0 %v21160_v41  ;;  %v21163_v21 = vld [vmem:[#allocation5_spill] sm:$0xff]  ;;  %v21165_v54 = vld [vmem:[#allocation6_spill] sm:$0xff]  ;;  %v16122_v14 = vadd.f32 %v2476_v43, %v1677_v36 }
 0x22e   :  { %v1679_v18 = vadd.f32 %v21163_v21, %v21162_v58  ;;  %v1792_v28 = vadd.f32 %v21165_v54, %v21164_v38  ;;  %v16124_v30 = vadd.f32 %v2589_v29, %v1790_v44  ;;  %v21169_v57 = vld [vmem:[#allocation7_spill] sm:$0xff]  ;;  %v2478_v45 = vpop.f32.mrf.mxu0  ;;  %v2591_v46 = vpop.f32.mrf.mxu1  ;;  %v21171_v41 = vld [vmem:[#allocation64_spill] sm:$0xff]  ;;  %v21176_v38 = vld [vmem:[#allocation65_spill] sm:$0xff] }
 0x22f   :  { %21166 = vst [vmem:[#allocation145_spill] sm:$0xff] %v16122_v14  ;;  %v1683_v49 = vadd.f32 %v21169_v57, %v21168_v40  ;;  %v21170_v51 = vld [vmem:[#allocation63_spill] sm:$0xff]  ;;  %3582 = vmatpush1.bf16.msra.mxu1 %v21171_v41  ;;  %v21172_v5 = vld [vmem:[#allocation204_spill] sm:$0xff]  ;;  %v21177_v29 = vld [vmem:[#allocation66_spill] sm:$0xff] }
 0x230   :  { %21167 = vst [vmem:[#allocation263_spill] sm:$0xff] %v16124_v30  ;;  %3469 = vmatpush1.bf16.msra.mxu0 %v21170_v51  ;;  %v21173_v33 = vld [vmem:[#allocation8_spill] sm:$0xff]  ;;  %v16132_v58 = vadd.f32 %v2478_v45, %v1679_v18  ;;  %v16134_v21 = vadd.f32 %v2591_v46, %v1792_v28  ;;  %3583 = vmatprep.subr.bf16.mxu1 %v21177_v29  ;;  %v21178_v36 = vld [vmem:[#allocation205_spill] sm:$0xff]  ;;  %v2482_v54 = vpop.f32.mrf.mxu0  ;;  %v2595_v40 = vpop.f32.mrf.mxu1  ;;  %v21180_v28 = vld [vmem:[#allocation206_spill] sm:$0xff] }
 0x231   :  { %v1796_v34 = vadd.f32 %v21173_v33, %v21172_v5  ;;  %3470 = vmatprep.subr.bf16.mxu0 %v21176_v38  ;;  %v21179_v44 = vld [vmem:[#allocation9_spill] sm:$0xff]  ;;  %v16143_v57 = vld [vmem:[%s20308_s1 + $0x10] sm:$0xff]   ;;  %v21181_v18 = vld [vmem:[#allocation10_spill] sm:$0xff]  ;;  %v16151_v45 = vadd.f32 %v2482_v54, %v1683_v49 }
 0x232   :  { %21174 = vst [vmem:[#allocation146_spill] sm:$0xff] %v16132_v58  ;;  %21175 = vst [vmem:[#allocation264_spill] sm:$0xff] %v16134_v21  ;;  %v1685_v43 = vadd.f32 %v21179_v44, %v21178_v36  ;;  %11655 = vmatmul.mubr.msk.bf16.gmra.mxu0 %vm552_vm1, %v16143_v57  ;;  %11664 = vmatmul.mubr.msk.bf16.gmra.mxu1 %vm552_vm1, %v16143_v57  ;;  %v1798_v33 = vadd.f32 %v21181_v18, %v21180_v28  ;;  %v21184_v51 = vld [vmem:[#allocation211_spill] sm:$0xff]  ;;  %v2484_v38 = vpop.f32.mrf.mxu0  ;;  %v2597_v29 = vpop.f32.mrf.mxu1  ;;  %v21187_v44 = vld [vmem:[#allocation68_spill] sm:$0xff] }
 0x233   :  { %21182 = vst [vmem:[#allocation147_spill] sm:$0xff] %v16151_v45  ;;  %v16153_v46 = vadd.f32 %v2595_v40, %v1796_v34  ;;  %3296 = vmatprep.mubr.bf16.mxu0 %v20593_v50  ;;  %3409 = vmatprep.mubr.bf16.mxu1 %v20593_v50  ;;  %v21185_v41 = vld [vmem:[#allocation11_spill] sm:$0xff]  ;;  %v21188_v21 = vld [vmem:[#allocation212_spill] sm:$0xff]  ;;  %v21192_v54 = vld [vmem:[#allocation69_spill] sm:$0xff] }
 0x234   :  { %v1687_v5 = vadd.f32 %v21185_v41, %v21184_v51  ;;  %v21186_v36 = vld [vmem:[#allocation67_spill] sm:$0xff]  ;;  %3584 = vmatpush1.bf16.msra.mxu1 %v21187_v44  ;;  %v21189_v58 = vld [vmem:[#allocation12_spill] sm:$0xff]  ;;  %v16163_v49 = vadd.f32 %v2484_v38, %v1685_v43  ;;  %v16165_v34 = vadd.f32 %v2597_v29, %v1798_v33  ;;  %v21193_v40 = vld [vmem:[#allocation70_spill] sm:$0xff]  ;;  %v2486_v18 = vpop.f32.mrf.mxu0 }
 0x235   :  { %21183 = vst [vmem:[#allocation265_spill] sm:$0xff] %v16153_v46  ;;  %3471 = vmatpush1.bf16.msra.mxu0 %v21186_v36  ;;  %v1800_v28 = vadd.f32 %v21189_v58, %v21188_v21  ;;  %3585 = vmatprep.subr.bf16.mxu1 %v21193_v40  ;;  %v2599_v46 = vpop.f32.mrf.mxu1  ;;  %v21194_v51 = vld [vmem:[#allocation213_spill] sm:$0xff]  ;;  %v21196_v30 = vld [vmem:[#allocation214_spill] sm:$0xff]  ;;  %v21201_v21 = vld [vmem:[#allocation15_spill] sm:$0xff] }
 0x236   :  { %21190 = vst [vmem:[#allocation148_spill] sm:$0xff] %v16163_v49  ;;  %21191 = vst [vmem:[#allocation266_spill] sm:$0xff] %v16165_v34  ;;  %3472 = vmatprep.subr.bf16.mxu0 %v21192_v54  ;;  %v21195_v41 = vld [vmem:[#allocation13_spill] sm:$0xff]  ;;  %v21197_v36 = vld [vmem:[#allocation14_spill] sm:$0xff]  ;;  %v16173_v44 = vadd.f32 %v2486_v18, %v1687_v5  ;;  %v2488_v33 = vpop.f32.mrf.mxu0 }
 0x237   :  { %v1689_v45 = vadd.f32 %v21195_v41, %v21194_v51  ;;  %v1802_v14 = vadd.f32 %v21197_v36, %v21196_v30  ;;  %v16175_v39 = vadd.f32 %v2599_v46, %v1800_v28  ;;  %v21200_v58 = vld [vmem:[#allocation217_spill] sm:$0xff]  ;;  %v2601_v38 = vpop.f32.mrf.mxu1  ;;  %v21202_v29 = vld [vmem:[#allocation71_spill] sm:$0xff]  ;;  %v21203_v54 = vld [vmem:[#allocation72_spill] sm:$0xff] }
 0x238   :  { %21198 = vst [vmem:[#allocation149_spill] sm:$0xff] %v16173_v44  ;;  %v1693_v43 = vadd.f32 %v21201_v21, %v21200_v58  ;;  %3586 = vmatpush1.bf16.msra.mxu1 %v21203_v54  ;;  %v21204_v40 = vld [vmem:[#allocation218_spill] sm:$0xff]  ;;  %v21205_v34 = vld [vmem:[#allocation16_spill] sm:$0xff]  ;;  %v21208_v30 = vld [vmem:[#allocation73_spill] sm:$0xff]  ;;  %v2492_v36 = vpop.f32.mrf.mxu0 }
 0x239   :  { %21199 = vst [vmem:[#allocation267_spill] sm:$0xff] %v16175_v39  ;;  %3473 = vmatpush1.bf16.msra.mxu0 %v21202_v29  ;;  %v1806_v49 = vadd.f32 %v21205_v34, %v21204_v40  ;;  %v16183_v51 = vadd.f32 %v2488_v33, %v1689_v45  ;;  %v16185_v41 = vadd.f32 %v2601_v38, %v1802_v14  ;;  %v21209_v46 = vld [vmem:[#allocation74_spill] sm:$0xff]  ;;  %v21210_v5 = vld [vmem:[#allocation219_spill] sm:$0xff]  ;;  %v21211_v28 = vld [vmem:[#allocation17_spill] sm:$0xff]  ;;  %v2605_v58 = vpop.f32.mrf.mxu1 }
 0x23a   :  { %3474 = vmatprep.subr.bf16.mxu0 %v21208_v30  ;;  %3587 = vmatprep.subr.bf16.mxu1 %v21209_v46  ;;  %v1695_v18 = vadd.f32 %v21211_v28, %v21210_v5  ;;  %v16194_v21 = vld [vmem:[%s20308_s1 + $0x18] sm:$0xff]   ;;  %v21212_v14 = vld [vmem:[#allocation220_spill] sm:$0xff]  ;;  %v21213_v45 = vld [vmem:[#allocation18_spill] sm:$0xff]  ;;  %v16202_v33 = vadd.f32 %v2492_v36, %v1693_v43  ;;  %v2494_v30 = vpop.f32.mrf.mxu0 }
 0x23b   :  { %21206 = vst [vmem:[#allocation150_spill] sm:$0xff] %v16183_v51  ;;  %21207 = vst [vmem:[#allocation268_spill] sm:$0xff] %v16185_v41  ;;  %11656 = vmatmul.mubr.msk.bf16.gmra.mxu0 %vm552_vm1, %v16194_v21  ;;  %11665 = vmatmul.mubr.msk.bf16.gmra.mxu1 %vm552_vm1, %v16194_v21  ;;  %v1808_v34 = vadd.f32 %v21213_v45, %v21212_v14  ;;  %v16204_v38 = vadd.f32 %v2605_v58, %v1806_v49  ;;  %v21216_v29 = vld [vmem:[#allocation221_spill] sm:$0xff]  ;;  %v21217_v54 = vld [vmem:[#allocation19_spill] sm:$0xff]  ;;  %v2607_v46 = vpop.f32.mrf.mxu1 }
 0x23c   :  { %21214 = vst [vmem:[#allocation151_spill] sm:$0xff] %v16202_v33  ;;  %3306 = vmatprep.mubr.bf16.mxu0 %v20593_v50  ;;  %3419 = vmatprep.mubr.bf16.mxu1 %v20593_v50  ;;  %v1697_v40 = vadd.f32 %v21217_v54, %v21216_v29  ;;  %v21218_v5 = vld [vmem:[#allocation75_spill] sm:$0xff]  ;;  %v21219_v28 = vld [vmem:[#allocation76_spill] sm:$0xff]  ;;  %v21220_v41 = vld [vmem:[#allocation222_spill] sm:$0xff]  ;;  %v16214_v43 = vadd.f32 %v2494_v30, %v1695_v18  ;;  %v2496_v45 = vpop.f32.mrf.mxu0 }
 0x23d   :  { %21215 = vst [vmem:[#allocation269_spill] sm:$0xff] %v16204_v38  ;;  %3475 = vmatpush1.bf16.msra.mxu0 %v21218_v5  ;;  %3588 = vmatpush1.bf16.msra.mxu1 %v21219_v28  ;;  %v21221_v51 = vld [vmem:[#allocation20_spill] sm:$0xff]  ;;  %v16216_v49 = vadd.f32 %v2607_v46, %v1808_v34  ;;  %v21224_v36 = vld [vmem:[#allocation77_spill] sm:$0xff]  ;;  %v21225_v58 = vld [vmem:[#allocation78_spill] sm:$0xff]  ;;  %v2609_v29 = vpop.f32.mrf.mxu1 }
 0x23e   :  { %v1810_v14 = vadd.f32 %v21221_v51, %v21220_v41  ;;  %21222 = vst [vmem:[#allocation152_spill] sm:$0xff] %v16214_v43  ;;  %11696 = vmatprep.subr.msk.bf16.mxu0 %vm577_vm0, %v21224_v36  ;;  %11705 = vmatprep.subr.msk.bf16.mxu1 %vm577_vm0, %v21225_v58  ;;  %v21226_v54 = vld [vmem:[#allocation223_spill] sm:$0xff]  ;;  %v21227_v38 = vld [vmem:[#allocation21_spill] sm:$0xff]  ;;  %v21228_v33 = vld [vmem:[#allocation224_spill] sm:$0xff]  ;;  %v16226_v44 = vadd.f32 %v2496_v45, %v1697_v40  ;;  %v2498_v41 = vpop.f32.mrf.mxu0 }
 0x23f   :  { %21223 = vst [vmem:[#allocation270_spill] sm:$0xff] %v16216_v49  ;;  %v1699_v5 = vadd.f32 %v21227_v38, %v21226_v54  ;;  %v21229_v28 = vld [vmem:[#allocation22_spill] sm:$0xff]  ;;  %v2611_v18 = vpop.f32.mrf.mxu1  ;;  %v21232_v34 = vld [vmem:[#allocation225_spill] sm:$0xff]  ;;  %v21238_v38 = vld [vmem:[#allocation227_spill] sm:$0xff] }
 0x240   :  { %v1812_v39 = vadd.f32 %v21229_v28, %v21228_v33  ;;  %21230 = vst [vmem:[#allocation153_spill] sm:$0xff] %v16226_v44  ;;  %v16228_v51 = vadd.f32 %v2609_v29, %v1810_v14  ;;  %v21233_v30 = vld [vmem:[#allocation293_spill] sm:$0xff]  ;;  %v21234_v36 = vld [vmem:[#allocation226_spill] sm:$0xff]  ;;  %v21239_v54 = vld [vmem:[#allocation295_spill] sm:$0xff]  ;;  %v2502_v33 = vpop.f32.mrf.mxu0 }
 0x241   :  { %v1703_v46 = vadd.f32 %v21233_v30, %v21232_v34  ;;  %v21235_v49 = vld [vmem:[#allocation294_spill] sm:$0xff]  ;;  %v16234_v43 = vadd.f32 %v2498_v41, %v1699_v5  ;;  %v1705_v56 = vadd.f32 %v21239_v54, %v21238_v38  ;;  %v2615_v40 = vpop.f32.mrf.mxu1  ;;  %v21241_v45 = vld [vmem:[#allocation296_spill] sm:$0xff]  ;;  %v21245_v34 = vld [vmem:[#allocation297_spill] sm:$0xff] }
 0x242   :  { %21231 = vst [vmem:[#allocation271_spill] sm:$0xff] %v16228_v51  ;;  %v1816_v58 = vadd.f32 %v21235_v49, %v21234_v36  ;;  %v16236_v25 = vadd.f32 %v2611_v18, %v1812_v39  ;;  %v16243_v14 = vld [vmem:[%s20308_s1 + $0x20] sm:$0xff]   ;;  %v21240_v49 = vld [vmem:[#allocation228_spill] sm:$0xff]  ;;  %v2504_v28 = vpop.f32.mrf.mxu0  ;;  %v21244_v18 = vld [vmem:[#allocation229_spill] sm:$0xff] }
 0x243   :  { %21236 = vst [vmem:[#allocation154_spill] sm:$0xff] %v16234_v43  ;;  %11657 = vmatmul.mubr.msk.bf16.gmra.mxu0 %vm552_vm1, %v16243_v14  ;;  %11666 = vmatmul.mubr.msk.bf16.gmra.mxu1 %vm552_vm1, %v16243_v14  ;;  %v1818_v39 = vadd.f32 %v21241_v45, %v21240_v49  ;;  %v16251_v29 = vadd.f32 %v2502_v33, %v1703_v46  ;;  %v2617_v41 = vpop.f32.mrf.mxu1  ;;  %v21246_v36 = vld [vmem:[#allocation230_spill] sm:$0xff]  ;;  %v21252_v45 = vld [vmem:[#allocation232_spill] sm:$0xff] }
 0x244   :  { %21237 = vst [vmem:[#allocation272_spill] sm:$0xff] %v16236_v25  ;;  %v16253_v5 = vadd.f32 %v2615_v40, %v1816_v58  ;;  %3316 = vmatprep.mubr.bf16.mxu0 %v20593_v50  ;;  %3429 = vmatprep.mubr.bf16.mxu1 %v20593_v50  ;;  %v1707_v30 = vadd.f32 %v21245_v34, %v21244_v18  ;;  %v21247_v38 = vld [vmem:[#allocation298_spill] sm:$0xff]  ;;  %v2506_v46 = vpop.f32.mrf.mxu0  ;;  %v21250_v58 = vld [vmem:[#allocation231_spill] sm:$0xff] }
 0x245   :  { %21242 = vst [vmem:[#allocation155_spill] sm:$0xff] %v16251_v29  ;;  %v1820_v54 = vadd.f32 %v21247_v38, %v21246_v36  ;;  %v16261_v25 = vadd.f32 %v2504_v28, %v1705_v56  ;;  %v16263_v43 = vadd.f32 %v2617_v41, %v1818_v39  ;;  %v2619_v33 = vpop.f32.mrf.mxu1  ;;  %v21251_v40 = vld [vmem:[#allocation299_spill] sm:$0xff]  ;;  %v21257_v36 = vld [vmem:[#allocation301_spill] sm:$0xff]  ;;  %v21258_v28 = vld [vmem:[#allocation234_spill] sm:$0xff] }
 0x246   :  { %21243 = vst [vmem:[#allocation273_spill] sm:$0xff] %v16253_v5  ;;  %v1709_v49 = vadd.f32 %v21251_v40, %v21250_v58  ;;  %v21253_v5 = vld [vmem:[#allocation300_spill] sm:$0xff]  ;;  %v16269_v51 = vadd.f32 %v2506_v46, %v1707_v30  ;;  %v2508_v18 = vpop.f32.mrf.mxu0  ;;  %v1713_v56 = vadd.f32 %v21257_v36, %v21256_v47  ;;  %v21259_v39 = vld [vmem:[#allocation302_spill] sm:$0xff]  ;;  %v21262_v58 = vld [vmem:[#allocation235_spill] sm:$0xff] }
 0x247   :  { %21248 = vst [vmem:[#allocation156_spill] sm:$0xff] %v16261_v25  ;;  %21249 = vst [vmem:[#allocation274_spill] sm:$0xff] %v16263_v43  ;;  %v1822_v29 = vadd.f32 %v21253_v5, %v21252_v45  ;;  %v16271_v44 = vadd.f32 %v2619_v33, %v1820_v54  ;;  %v2621_v34 = vpop.f32.mrf.mxu1  ;;  %v1826_v41 = vadd.f32 %v21259_v39, %v21258_v28  ;;  %v21263_v40 = vld [vmem:[#allocation303_spill] sm:$0xff]  ;;  %v21264_v47 = vld [vmem:[#allocation236_spill] sm:$0xff] }
 0x248   :  { %21254 = vst [vmem:[#allocation157_spill] sm:$0xff] %v16269_v51  ;;  %v16277_v38 = vadd.f32 %v2508_v18, %v1709_v49  ;;  %v1715_v25 = vadd.f32 %v21263_v40, %v21262_v58  ;;  %v2512_v5 = vpop.f32.mrf.mxu0  ;;  %v16286_v54 = vld [vmem:[%s20308_s1 + $0x28] sm:$0xff]   ;;  %v21265_v46 = vld [vmem:[#allocation304_spill] sm:$0xff]  ;;  %v21269_v36 = vld [vmem:[#allocation305_spill] sm:$0xff] }
 0x249   :  { %21255 = vst [vmem:[#allocation275_spill] sm:$0xff] %v16271_v44  ;;  %v16279_v43 = vadd.f32 %v2621_v34, %v1822_v29  ;;  %v2625_v30 = vpop.f32.mrf.mxu1  ;;  %v1828_v29 = vadd.f32 %v21265_v46, %v21264_v47  ;;  %v16294_v33 = vadd.f32 %v2512_v5, %v1713_v56  ;;  %v21268_v34 = vld [vmem:[#allocation237_spill] sm:$0xff]  ;;  %v21270_v39 = vld [vmem:[#allocation238_spill] sm:$0xff]  ;;  %v21276_v46 = vld [vmem:[#allocation240_spill] sm:$0xff] }
 0x24a   :  { %21260 = vst [vmem:[#allocation158_spill] sm:$0xff] %v16277_v38  ;;  %v16296_v49 = vadd.f32 %v2625_v30, %v1826_v41  ;;  %v2514_v45 = vpop.f32.mrf.mxu0  ;;  %v1717_v28 = vadd.f32 %v21269_v36, %v21268_v34  ;;  %v21271_v58 = vld [vmem:[#allocation306_spill] sm:$0xff]  ;;  %v21274_v41 = vld [vmem:[#allocation239_spill] sm:$0xff] }
 0x24b   :  { %21261 = vst [vmem:[#allocation276_spill] sm:$0xff] %v16279_v43  ;;  %11658 = vmatmul.mubr.msk.bf16.gmra.mxu0 %vm552_vm1, %v16286_v54  ;;  %11667 = vmatmul.mubr.msk.bf16.gmra.mxu1 %vm552_vm1, %v16286_v54  ;;  %21266 = vst [vmem:[#allocation159_spill] sm:$0xff] %v16294_v33  ;;  %v2627_v18 = vpop.f32.mrf.mxu1  ;;  %v1830_v40 = vadd.f32 %v21271_v58, %v21270_v39  ;;  %v16304_v43 = vadd.f32 %v2514_v45, %v1715_v25  ;;  %v21275_v30 = vld [vmem:[#allocation307_spill] sm:$0xff]  ;;  %v21281_v39 = vld [vmem:[#allocation309_spill] sm:$0xff] }
 0x24c   :  { %21267 = vst [vmem:[#allocation277_spill] sm:$0xff] %v16296_v49  ;;  %3326 = vmatprep.mubr.bf16.mxu0 %v20593_v50  ;;  %3439 = vmatprep.mubr.bf16.mxu1 %v20593_v50  ;;  %v16306_v38 = vadd.f32 %v2627_v18, %v1828_v29  ;;  %v2516_v56 = vpop.f32.mrf.mxu0  ;;  %v1719_v47 = vadd.f32 %v21275_v30, %v21274_v41  ;;  %v21277_v49 = vld [vmem:[#allocation308_spill] sm:$0xff]  ;;  %v21282_v45 = vld [vmem:[#allocation242_spill] sm:$0xff]  ;;  %v21286_v41 = vld [vmem:[#allocation243_spill] sm:$0xff] }
 0x24d   :  { %21272 = vst [vmem:[#allocation160_spill] sm:$0xff] %v16304_v43  ;;  %v2629_v5 = vpop.f32.mrf.mxu1  ;;  %v1832_v33 = vadd.f32 %v21277_v49, %v21276_v46  ;;  %v16312_v44 = vadd.f32 %v2516_v56, %v1717_v28  ;;  %v1723_v25 = vadd.f32 %v21281_v39, %v21280_v53  ;;  %v21283_v29 = vld [vmem:[#allocation310_spill] sm:$0xff]  ;;  %v21287_v30 = vld [vmem:[#allocation311_spill] sm:$0xff]  ;;  %v21288_v53 = vld [vmem:[#allocation244_spill] sm:$0xff] }
 0x24e   :  { %21273 = vst [vmem:[#allocation278_spill] sm:$0xff] %v16306_v38  ;;  %v16314_v51 = vadd.f32 %v2629_v5, %v1830_v40  ;;  %v2518_v34 = vpop.f32.mrf.mxu0  ;;  %v1836_v18 = vadd.f32 %v21283_v29, %v21282_v45  ;;  %v1725_v43 = vadd.f32 %v21287_v30, %v21286_v41  ;;  %v16329_v40 = vld [vmem:[%s20308_s1 + $0x30] sm:$0xff]   ;;  %v21293_v39 = vld [vmem:[#allocation313_spill] sm:$0xff]  ;;  %v21294_v29 = vld [vmem:[#allocation246_spill] sm:$0xff] }
 0x24f   :  { %21278 = vst [vmem:[#allocation161_spill] sm:$0xff] %v16312_v44  ;;  %v2631_v36 = vpop.f32.mrf.mxu1  ;;  %v16320_v58 = vadd.f32 %v2518_v34, %v1719_v47  ;;  %v21289_v56 = vld [vmem:[#allocation312_spill] sm:$0xff]  ;;  %v21295_v41 = vld [vmem:[#allocation314_spill] sm:$0xff] }
 0x250   :  { %21279 = vst [vmem:[#allocation162_spill] sm:$0xff] %v16314_v51  ;;  %v16322_v38 = vadd.f32 %v2631_v36, %v1832_v33  ;;  %v2522_v49 = vpop.f32.mrf.mxu0  ;;  %v1838_v33 = vadd.f32 %v21289_v56, %v21288_v53  ;;  %v21292_v36 = vld [vmem:[#allocation245_spill] sm:$0xff]  ;;  %v1840_v30 = vadd.f32 %v21295_v41, %v21294_v29  ;;  %v21300_v56 = vld [vmem:[#allocation248_spill] sm:$0xff] }
 0x251   :  { %21284 = vst [vmem:[#allocation163_spill] sm:$0xff] %v16320_v58  ;;  %v2635_v28 = vpop.f32.mrf.mxu1  ;;  %v16337_v5 = vadd.f32 %v2522_v49, %v1723_v25  ;;  %v1727_v45 = vadd.f32 %v21293_v39, %v21292_v36  ;;  %v21305_v29 = vld [vmem:[#allocation317_spill] sm:$0xff] }
 0x252   :  { %21285 = vst [vmem:[#allocation279_spill] sm:$0xff] %v16322_v38  ;;  %v16339_v47 = vadd.f32 %v2635_v28, %v1836_v18  ;;  %v2524_v46 = vpop.f32.mrf.mxu0  ;;  %v21298_v18 = vld [vmem:[#allocation247_spill] sm:$0xff] }
 0x253   :  { %11659 = vmatmul.mubr.msk.bf16.gmra.mxu0 %vm552_vm1, %v16329_v40  ;;  %11668 = vmatmul.mubr.msk.bf16.gmra.mxu1 %vm552_vm1, %v16329_v40  ;;  %21290 = vst [vmem:[#allocation164_spill] sm:$0xff] %v16337_v5  ;;  %v2637_v34 = vpop.f32.mrf.mxu1  ;;  %v16347_v38 = vadd.f32 %v2524_v46, %v1725_v43  ;;  %v21299_v28 = vld [vmem:[#allocation315_spill] sm:$0xff]  ;;  %v1733_v43 = vadd.f32 %v21305_v29, %v21304_v42  ;;  %v21306_v46 = vld [vmem:[#allocation250_spill] sm:$0xff]  ;;  %v21312_v42 = vld [vmem:[#allocation252_spill] sm:$0xff] }
 0x254   :  { %21291 = vst [vmem:[#allocation280_spill] sm:$0xff] %v16339_v47  ;;  %3336 = vmatprep.mubr.bf16.mxu0 %v20593_v50  ;;  %3449 = vmatprep.mubr.bf16.mxu1 %v20593_v50  ;;  %v16349_v58 = vadd.f32 %v2637_v34, %v1838_v33  ;;  %v2526_v25 = vpop.f32.mrf.mxu0  ;;  %v1729_v53 = vadd.f32 %v21299_v28, %v21298_v18  ;;  %v21301_v47 = vld [vmem:[#allocation316_spill] sm:$0xff]  ;;  %v21307_v33 = vld [vmem:[#allocation318_spill] sm:$0xff]  ;;  %v21310_v18 = vld [vmem:[#allocation251_spill] sm:$0xff] }
 0x255   :  { %21296 = vst [vmem:[#allocation165_spill] sm:$0xff] %v16347_v38  ;;  %v2639_v49 = vpop.f32.mrf.mxu1  ;;  %v1842_v5 = vadd.f32 %v21301_v47, %v21300_v56  ;;  %v16355_v51 = vadd.f32 %v2526_v25, %v1727_v45  ;;  %v1846_v34 = vadd.f32 %v21307_v33, %v21306_v46  ;;  %v21311_v28 = vld [vmem:[#allocation319_spill] sm:$0xff]  ;;  %v21317_v46 = vld [vmem:[#allocation254_spill] sm:$0xff]  ;;  %v21318_v33 = vld [vmem:[#allocation321_spill] sm:$0xff] }
 0x256   :  { %21297 = vst [vmem:[#allocation166_spill] sm:$0xff] %v16349_v58  ;;  %v16357_v44 = vadd.f32 %v2639_v49, %v1840_v30  ;;  %v2528_v36 = vpop.f32.mrf.mxu0  ;;  %v1735_v38 = vadd.f32 %v21311_v28, %v21310_v18  ;;  %v16372_v30 = vld [vmem:[%s20308_s1 + $0x38] sm:$0xff]   ;;  %v1850_v18 = vadd.f32 %v21318_v33, %v21317_v46  ;;  %v21332_v33 = vld [vmem:[#allocation82_spill] sm:$0xff] }
 0x257   :  { %21302 = vst [vmem:[#allocation281_spill] sm:$0xff] %v16355_v51  ;;  %v2641_v39 = vpop.f32.mrf.mxu1  ;;  %v16363_v41 = vadd.f32 %v2528_v36, %v1729_v53  ;;  %v21315_v36 = vld [vmem:[#allocation253_spill] sm:$0xff] }
 0x258   :  { %21303 = vst [vmem:[#allocation171_spill] sm:$0xff] %v16357_v44  ;;  %v16365_v58 = vadd.f32 %v2641_v39, %v1842_v5  ;;  %v2532_v47 = vpop.f32.mrf.mxu0  ;;  %v1848_v5 = vadd.f32 %v15688_v7, %v21312_v42  ;;  %v21316_v39 = vld [vmem:[#allocation320_spill] sm:$0xff] }
 0x259   :  { %21308 = vst [vmem:[#allocation282_spill] sm:$0xff] %v16363_v41  ;;  %v2645_v45 = vpop.f32.mrf.mxu1  ;;  %v16380_v25 = vadd.f32 %v2532_v47, %v1733_v43  ;;  %v1737_v29 = vadd.f32 %v21316_v39, %v21315_v36  ;;  %v21322_v47 = vld [vmem:[#allocation322_spill] sm:$0xff]  ;;  %v21323_v42 = vld [vmem:[#allocation256_spill] sm:$0xff] }
 0x25a   :  { %21309 = vst [vmem:[#allocation172_spill] sm:$0xff] %v16365_v58  ;;  %v16382_v49 = vadd.f32 %v2645_v45, %v1846_v34  ;;  %v2534_v53 = vpop.f32.mrf.mxu0  ;;  %v21321_v34 = vld [vmem:[#allocation255_spill] sm:$0xff] }
 0x25b   :  { %11660 = vmatmul.mubr.msk.bf16.gmra.mxu0 %vm552_vm1, %v16372_v30  ;;  %11669 = vmatmul.mubr.msk.bf16.gmra.mxu1 %vm552_vm1, %v16372_v30  ;;  %21313 = vst [vmem:[#allocation283_spill] sm:$0xff] %v16380_v25  ;;  %v2647_v56 = vpop.f32.mrf.mxu1  ;;  %v16390_v28 = vadd.f32 %v2534_v53, %v1735_v38  ;;  %v1739_v45 = vadd.f32 %v21322_v47, %v21321_v34 }
 0x25c   :  { %21314 = vst [vmem:[#allocation175_spill] sm:$0xff] %v16382_v49  ;;  %3492 = vmatprep.mubr.bf16.mxu0 %v20593_v50  ;;  %3605 = vmatprep.mubr.bf16.mxu1 %v20593_v50  ;;  %v16392_v58 = vadd.f32 %v2647_v56, %v1848_v5  ;;  %v2536_v7 = vpop.f32.mrf.mxu0  ;;  %v21324_v49 = vld [vmem:[#allocation323_spill] sm:$0xff]  ;;  %v21330_v56 = vld [vmem:[#allocation80_spill] sm:$0xff] }
 0x25d   :  { %21319 = vst [vmem:[#allocation284_spill] sm:$0xff] %v16390_v28  ;;  %v2649_v43 = vpop.f32.mrf.mxu1  ;;  %v1852_v25 = vadd.f32 %v21324_v49, %v21323_v42  ;;  %v16398_v41 = vadd.f32 %v2536_v7, %v1737_v29  ;;  %v21329_v49 = vld [vmem:[#allocation79_spill] sm:$0xff]  ;;  %v21336_v42 = vld [vmem:[#allocation89_spill] sm:$0xff] }
 0x25e   :  { %21320 = vst [vmem:[#allocation176_spill] sm:$0xff] %v16392_v58  ;;  %v16400_v44 = vadd.f32 %v2649_v43, %v1850_v18  ;;  %v2538_v36 = vpop.f32.mrf.mxu0  ;;  %v21334_v43 = vld [vmem:[#allocation86_spill] sm:$0xff]  ;;  %v21348_v58 = vld [vmem:[#allocation112_spill] sm:$0xff] }
 0x25f   :  { %21325 = vst [vmem:[#allocation285_spill] sm:$0xff] %v16398_v41  ;;  %v2651_v39 = vpop.f32.mrf.mxu1  ;;  %v16402_v51 = vadd.f32 %v2538_v36, %v1739_v45  ;;  %v21335_v45 = vld [vmem:[#allocation88_spill] sm:$0xff]  ;;  %v21343_v41 = vld [vmem:[#allocation103_spill] sm:$0xff] }
 0x260   :  { %21326 = vst [vmem:[#allocation51_spill] sm:$0xff] %v16400_v44  ;;  %v16404_v38 = vadd.f32 %v2651_v39, %v1852_v25  ;;  %v16406_v5 = vpop.f32.mrf.mxu0  ;;  %v21331_v25 = vld [vmem:[#allocation81_spill] sm:$0xff]  ;;  %v21342_v44 = vld [vmem:[#allocation102_spill] sm:$0xff] }
 0x261   :  { %21327 = vst [vmem:[#allocation52_spill] sm:$0xff] %v16402_v51  ;;  %v16408_v53 = vpop.f32.mrf.mxu1  ;;  %v21341_v51 = vld [vmem:[#allocation101_spill] sm:$0xff] }
 0x262   :  { %21328 = vst [vmem:[#allocation179_spill] sm:$0xff] %v16404_v38  ;;  %v16416_v29 = vpop.f32.mrf.mxu0 }
 0x263   :  { %11671 = vmatmul.mubr.msk.bf16.vlgmr.msra.gmra.mxu0 %vm552_vm1, %v16041_v15  ;;  %11680 = vmatmul.mubr.msk.bf16.vlgmr.msra.gmra.mxu1 %vm552_vm1, %v16041_v15  ;;  %v16418_v46 = vpop.f32.mrf.mxu1  ;;  %v21333_v15 = vld [vmem:[#allocation85_spill] sm:$0xff] }
 0x264   :  { %3753 = vmatpush1.bf16.msra.mxu0 %v21329_v49  ;;  %3866 = vmatpush1.bf16.msra.mxu1 %v21330_v56  ;;  %v16424_v18 = vpop.f32.mrf.mxu0 }
 0x265   :  { %3502 = vmatprep.mubr.bf16.mxu0 %v20593_v50  ;;  %3615 = vmatprep.mubr.bf16.mxu1 %v20593_v50  ;;  %v16426_v7 = vpop.f32.mrf.mxu1 }
 0x266   :  { %3754 = vmatprep.subr.bf16.mxu0 %v21331_v25  ;;  %3867 = vmatprep.subr.bf16.mxu1 %v21332_v33  ;;  %v16430_v34 = vpop.f32.mrf.mxu0  ;;  %v21337_v25 = vld [vmem:[#allocation93_spill] sm:$0xff]  ;;  %v21338_v33 = vld [vmem:[#allocation94_spill] sm:$0xff] }
 0x267   :  { %v16432_v47 = vpop.f32.mrf.mxu1 }
 0x268   :  { %3755 = vmatpush1.bf16.msra.mxu0 %v21333_v15  ;;  %3868 = vmatpush1.bf16.msra.mxu1 %v21334_v43  ;;  %v16436_v36 = vpop.f32.mrf.mxu0  ;;  %v21339_v15 = vld [vmem:[#allocation95_spill] sm:$0xff]  ;;  %v21340_v43 = vld [vmem:[#allocation96_spill] sm:$0xff] }
 0x269   :  { %3756 = vmatprep.subr.bf16.mxu0 %v21335_v45  ;;  %3869 = vmatprep.subr.bf16.mxu1 %v21336_v42  ;;  %v16438_v39 = vpop.f32.mrf.mxu1 }
 0x26a   :  { %v16446_v49 = vpop.f32.mrf.mxu0 }
 0x26b   :  { %11672 = vmatmul.mubr.msk.bf16.gmra.mxu0 %vm552_vm1, %v16092_v6  ;;  %11681 = vmatmul.mubr.msk.bf16.gmra.mxu1 %vm552_vm1, %v16092_v6  ;;  %v16448_v56 = vpop.f32.mrf.mxu1 }
 0x26c   :  { %3512 = vmatprep.mubr.bf16.mxu0 %v20593_v50  ;;  %3625 = vmatprep.mubr.bf16.mxu1 %v20593_v50  ;;  %v16454_v45 = vpop.f32.mrf.mxu0 }
 0x26d   :  { %3757 = vmatpush1.bf16.msra.mxu0 %v21337_v25  ;;  %3870 = vmatpush1.bf16.msra.mxu1 %v21338_v33  ;;  %v16456_v42 = vpop.f32.mrf.mxu1  ;;  %v21344_v25 = vld [vmem:[#allocation104_spill] sm:$0xff] }
 0x26e   :  { %3758 = vmatprep.subr.bf16.mxu0 %v21339_v15  ;;  %3871 = vmatprep.subr.bf16.mxu1 %v21340_v43  ;;  %v16458_v6 = vpop.f32.mrf.mxu0  ;;  %v21346_v43 = vld [vmem:[#allocation110_spill] sm:$0xff] }
 0x26f   :  { %v16460_v38 = vpop.f32.mrf.mxu1 }
 0x270   :  { %v16466_v33 = vpop.f32.mrf.mxu0 }
 0x271   :  { %3759 = vmatpush1.bf16.msra.mxu0 %v21341_v51  ;;  %3872 = vmatpush1.bf16.msra.mxu1 %v21342_v44  ;;  %v16468_v15 = vpop.f32.mrf.mxu1 }
 0x272   :  { %3760 = vmatprep.subr.bf16.mxu0 %v21343_v41  ;;  %3873 = vmatprep.subr.bf16.mxu1 %v21344_v25  ;;  %v16476_v51 = vpop.f32.mrf.mxu0  ;;  %v21345_v41 = vld [vmem:[#allocation109_spill] sm:$0xff]  ;;  %v21347_v25 = vld [vmem:[#allocation111_spill] sm:$0xff] }
 0x273   :  { %11673 = vmatmul.mubr.msk.bf16.gmra.mxu0 %vm552_vm1, %v16143_v57  ;;  %11682 = vmatmul.mubr.msk.bf16.gmra.mxu1 %vm552_vm1, %v16143_v57  ;;  %v16478_v44 = vpop.f32.mrf.mxu1 }
 0x274   :  { %3522 = vmatprep.mubr.bf16.mxu0 %v20593_v50  ;;  %3635 = vmatprep.mubr.bf16.mxu1 %v20593_v50  ;;  %v16484_v28 = vpop.f32.mrf.mxu0 }
 0x275   :  { %3761 = vmatpush1.bf16.msra.mxu0 %v21345_v41  ;;  %3874 = vmatpush1.bf16.msra.mxu1 %v21346_v43  ;;  %21349 = vst [vmem:[#allocation286_spill] sm:$0xff] %v16484_v28  ;;  %v16486_v62 = vpop.f32.mrf.mxu1  ;;  %v21356_v41 = vld [vmem:[#allocation119_spill] sm:$0xff] }
 0x276   :  { %3762 = vmatprep.subr.bf16.mxu0 %v21347_v25  ;;  %3875 = vmatprep.subr.bf16.mxu1 %v21348_v58  ;;  %21350 = vst [vmem:[#allocation180_spill] sm:$0xff] %v16486_v62  ;;  %v16488_v57 = vpop.f32.mrf.mxu0  ;;  %v21362_v58 = vld [vmem:[#allocation124_spill] sm:$0xff] }
 0x277   :  { %21351 = vst [vmem:[#allocation287_spill] sm:$0xff] %v16488_v57  ;;  %v16490_v2 = vpop.f32.mrf.mxu1 }
 0x278   :  { %21352 = vst [vmem:[#allocation53_spill] sm:$0xff] %v16490_v2  ;;  %v16496_v43 = vpop.f32.mrf.mxu0 }
 0x279   :  { %3763 = vmatpush1.bf16.msra.mxu0 %v21353_v23  ;;  %3876 = vmatpush1.bf16.msra.mxu1 %v21354_v35  ;;  %21357 = vst [vmem:[#allocation54_spill] sm:$0xff] %v16496_v43  ;;  %v16498_v25 = vpop.f32.mrf.mxu1 }
 0x27a   :  { %3764 = vmatprep.subr.bf16.mxu0 %v21355_v52  ;;  %3877 = vmatprep.subr.bf16.mxu1 %v21356_v41  ;;  %21358 = vst [vmem:[#allocation181_spill] sm:$0xff] %v16498_v25  ;;  %v16506_v23 = vpop.f32.mrf.mxu0  ;;  %v21361_v52 = vld [vmem:[#allocation123_spill] sm:$0xff]  ;;  %v21363_v41 = vld [vmem:[#allocation125_spill] sm:$0xff] }
 0x27b   :  { %11674 = vmatmul.mubr.msk.bf16.gmra.mxu0 %vm552_vm1, %v16194_v21  ;;  %11683 = vmatmul.mubr.msk.bf16.gmra.mxu1 %vm552_vm1, %v16194_v21  ;;  %21359 = vst [vmem:[#allocation288_spill] sm:$0xff] %v16506_v23  ;;  %v16508_v35 = vpop.f32.mrf.mxu1 }
 0x27c   :  { %3532 = vmatprep.mubr.bf16.mxu0 %v20593_v50  ;;  %3645 = vmatprep.mubr.bf16.mxu1 %v20593_v50  ;;  %21360 = vst [vmem:[#allocation182_spill] sm:$0xff] %v16508_v35  ;;  %v16516_v48 = vpop.f32.mrf.mxu0 }
 0x27d   :  { %3765 = vmatpush1.bf16.msra.mxu0 %v21361_v52  ;;  %3878 = vmatpush1.bf16.msra.mxu1 %v21362_v58  ;;  %21365 = vst [vmem:[#allocation289_spill] sm:$0xff] %v16516_v48  ;;  %v16518_v21 = vpop.f32.mrf.mxu1 }
 0x27e   :  { %11714 = vmatprep.subr.msk.bf16.mxu0 %vm577_vm0, %v21363_v41  ;;  %11723 = vmatprep.subr.msk.bf16.mxu1 %vm577_vm0, %v21364_v63  ;;  %21366 = vst [vmem:[#allocation55_spill] sm:$0xff] %v16518_v21  ;;  %v16520_v27 = vpop.f32.mrf.mxu0 }
 0x27f   :  { %21367 = vst [vmem:[#allocation56_spill] sm:$0xff] %v16520_v27  ;;  %v16522_v55 = vpop.f32.mrf.mxu1 }
 0x280   :  { %21368 = vst [vmem:[#allocation57_spill] sm:$0xff] %v16522_v55  ;;  %v16524_v8 = vpop.f32.mrf.mxu0 }
 0x281   :  { %21369 = vst [vmem:[#allocation58_spill] sm:$0xff] %v16524_v8  ;;  %v16526_v3 = vpop.f32.mrf.mxu1 }
 0x282   :  { %21370 = vst [vmem:[#allocation187_spill] sm:$0xff] %v16526_v3  ;;  %v16534_v63 = vpop.f32.mrf.mxu0 }
 0x283   :  { %11675 = vmatmul.mubr.msk.bf16.gmra.mxu0 %vm552_vm1, %v16243_v14  ;;  %11684 = vmatmul.mubr.msk.bf16.gmra.mxu1 %vm552_vm1, %v16243_v14  ;;  %21371 = vst [vmem:[#allocation2_spill] sm:$0xff] %v16534_v63  ;;  %v16536_v52 = vpop.f32.mrf.mxu1  ;;  %v16712_v63 = vld [vmem:[%s20311_s3 + $0x18] sm:$0xff]  }
 0x284   :  { %3542 = vmatprep.mubr.bf16.mxu0 %v20593_v50  ;;  %3655 = vmatprep.mubr.bf16.mxu1 %v20593_v50  ;;  %21372 = vst [vmem:[#allocation188_spill] sm:$0xff] %v16536_v52  ;;  %v16538_v58 = vpop.f32.mrf.mxu0 }
 0x285   :  { %21373 = vst [vmem:[#allocation290_spill] sm:$0xff] %v16538_v58  ;;  %v16540_v41 = vpop.f32.mrf.mxu1 }
 0x286   :  { %21374 = vst [vmem:[#allocation189_spill] sm:$0xff] %v16540_v41  ;;  %v16542_v37 = vpop.f32.mrf.mxu0 }
 0x287   :  { %21375 = vst [vmem:[#allocation291_spill] sm:$0xff] %v16542_v37  ;;  %v16544_v19 = vpop.f32.mrf.mxu1 }
 0x288   :  { %21376 = vst [vmem:[#allocation190_spill] sm:$0xff] %v16544_v19  ;;  %v16546_v61 = vpop.f32.mrf.mxu0 }
 0x289   :  { %21377 = vst [vmem:[#allocation292_spill] sm:$0xff] %v16546_v61  ;;  %v16548_v3 = vpop.f32.mrf.mxu1 }
 0x28a   :  { %21378 = vst [vmem:[#allocation195_spill] sm:$0xff] %v16548_v3  ;;  %v16556_v14 = vpop.f32.mrf.mxu0 }
 0x28b   :  { %11676 = vmatmul.mubr.msk.bf16.gmra.mxu0 %vm552_vm1, %v16286_v54  ;;  %11685 = vmatmul.mubr.msk.bf16.gmra.mxu1 %vm552_vm1, %v16286_v54  ;;  %21379 = vst [vmem:[#allocation3_spill] sm:$0xff] %v16556_v14  ;;  %v16558_v41 = vpop.f32.mrf.mxu1  ;;  %v16677_v14 = vld [vmem:[%s20311_s3 + $0x10] sm:$0xff]  }
 0x28c   :  { %3552 = vmatprep.mubr.bf16.mxu0 %v20593_v50  ;;  %3665 = vmatprep.mubr.bf16.mxu1 %v20593_v50  ;;  %21380 = vst [vmem:[#allocation59_spill] sm:$0xff] %v16558_v41  ;;  %v16560_v37 = vpop.f32.mrf.mxu0 }
 0x28d   :  { %21381 = vst [vmem:[#allocation60_spill] sm:$0xff] %v16560_v37  ;;  %v16562_v19 = vpop.f32.mrf.mxu1 }
 0x28e   :  { %21382 = vst [vmem:[#allocation196_spill] sm:$0xff] %v16562_v19  ;;  %v16564_v61 = vpop.f32.mrf.mxu0 }
 0x28f   :  { %21383 = vst [vmem:[#allocation4_spill] sm:$0xff] %v16564_v61  ;;  %v16566_v3 = vpop.f32.mrf.mxu1 }
 0x290   :  { %21384 = vst [vmem:[#allocation61_spill] sm:$0xff] %v16566_v3  ;;  %v16568_v58 = vpop.f32.mrf.mxu0 }
 0x291   :  { %21385 = vst [vmem:[#allocation62_spill] sm:$0xff] %v16568_v58  ;;  %v16570_v52 = vpop.f32.mrf.mxu1 }
 0x292   :  { %21386 = vst [vmem:[#allocation197_spill] sm:$0xff] %v16570_v52  ;;  %v16578_v54 = vpop.f32.mrf.mxu0 }
 0x293   :  { %11677 = vmatmul.mubr.msk.bf16.gmra.mxu0 %vm552_vm1, %v16329_v40  ;;  %11686 = vmatmul.mubr.msk.bf16.gmra.mxu1 %vm552_vm1, %v16329_v40  ;;  %21387 = vst [vmem:[#allocation5_spill] sm:$0xff] %v16578_v54  ;;  %v16580_v19 = vpop.f32.mrf.mxu1 }
 0x294   :  { %3562 = vmatprep.mubr.bf16.mxu0 %v20593_v50  ;;  %3675 = vmatprep.mubr.bf16.mxu1 %v20593_v50  ;;  %21388 = vst [vmem:[#allocation198_spill] sm:$0xff] %v16580_v19  ;;  %v16582_v61 = vpop.f32.mrf.mxu0 }
 0x295   :  { %21389 = vst [vmem:[#allocation6_spill] sm:$0xff] %v16582_v61  ;;  %v16584_v3 = vpop.f32.mrf.mxu1 }
 0x296   :  { %21390 = vst [vmem:[#allocation203_spill] sm:$0xff] %v16584_v3  ;;  %v16586_v58 = vpop.f32.mrf.mxu0 }
 0x297   :  { %21391 = vst [vmem:[#allocation7_spill] sm:$0xff] %v16586_v58  ;;  %v16588_v52 = vpop.f32.mrf.mxu1 }
 0x298   :  { %21392 = vst [vmem:[#allocation63_spill] sm:$0xff] %v16588_v52  ;;  %v16590_v37 = vpop.f32.mrf.mxu0 }
 0x299   :  { %21393 = vst [vmem:[#allocation64_spill] sm:$0xff] %v16590_v37  ;;  %v16592_v41 = vpop.f32.mrf.mxu1 }
 0x29a   :  { %21394 = vst [vmem:[#allocation204_spill] sm:$0xff] %v16592_v41  ;;  %v16600_v40 = vpop.f32.mrf.mxu0  ;;  %v16611_v41 = vld [vmem:[%s20311_s3] sm:$0xff]  }
 0x29b   :  { %11678 = vmatmul.mubr.msk.bf16.gmra.mxu0 %vm552_vm1, %v16372_v30  ;;  %11687 = vmatmul.mubr.msk.bf16.gmra.mxu1 %vm552_vm1, %v16372_v30  ;;  %21395 = vst [vmem:[#allocation8_spill] sm:$0xff] %v16600_v40  ;;  %v16602_v3 = vpop.f32.mrf.mxu1 }
 0x29c   :  { %3782 = vmatprep.mubr.bf16.mxu0 %v20593_v50  ;;  %3895 = vmatprep.mubr.bf16.mxu1 %v20593_v50  ;;  %21396 = vst [vmem:[#allocation65_spill] sm:$0xff] %v16602_v3  ;;  %v16604_v58 = vpop.f32.mrf.mxu0 }
 0x29d   :  { %21397 = vst [vmem:[#allocation66_spill] sm:$0xff] %v16604_v58  ;;  %v16606_v52 = vpop.f32.mrf.mxu1  ;;  %v21404_v58 = vld [vmem:[#allocation168_spill] sm:$0xff] }
 0x29e   :  { %21398 = vst [vmem:[#allocation205_spill] sm:$0xff] %v16606_v52  ;;  %v16613_v37 = vpop.f32.mrf.mxu0  ;;  %v21403_v52 = vld [vmem:[#allocation167_spill] sm:$0xff] }
 0x29f   :  { %21399 = vst [vmem:[#allocation9_spill] sm:$0xff] %v16613_v37  ;;  %v16615_v30 = vpop.f32.mrf.mxu1 }
 0x2a0   :  { %21400 = vst [vmem:[#allocation206_spill] sm:$0xff] %v16615_v30  ;;  %v16617_v61 = vpop.f32.mrf.mxu0 }
 0x2a1   :  { %21401 = vst [vmem:[#allocation10_spill] sm:$0xff] %v16617_v61  ;;  %v16619_v19 = vpop.f32.mrf.mxu1  ;;  %v21407_v61 = vld [vmem:[#allocation169_spill] sm:$0xff] }
 0x2a2   :  { %21402 = vst [vmem:[#allocation211_spill] sm:$0xff] %v16619_v19  ;;  %v16627_v3 = vpop.f32.mrf.mxu0  ;;  %v21408_v19 = vld [vmem:[#allocation170_spill] sm:$0xff] }
 0x2a3   :  { %11697 = vmatmul.mubr.msk.bf16.vlgmr.msra.gmra.mxu0 %vm552_vm1, %v16611_v41  ;;  %11706 = vmatmul.mubr.msk.bf16.vlgmr.msra.gmra.mxu1 %vm552_vm1, %v16611_v41  ;;  %21405 = vst [vmem:[#allocation11_spill] sm:$0xff] %v16627_v3  ;;  %v16629_v40 = vpop.f32.mrf.mxu1 }
 0x2a4   :  { %3979 = vmatpush1.bf16.msra.mxu0 %v21403_v52  ;;  %4092 = vmatpush1.bf16.msra.mxu1 %v21404_v58  ;;  %21406 = vst [vmem:[#allocation67_spill] sm:$0xff] %v16629_v40  ;;  %v16635_v30 = vpop.f32.mrf.mxu0  ;;  %v16642_v52 = vld [vmem:[%s20311_s3 + $0x8] sm:$0xff]   ;;  %v21411_v58 = vld [vmem:[#allocation173_spill] sm:$0xff]  ;;  %v21412_v40 = vld [vmem:[#allocation174_spill] sm:$0xff] }
 0x2a5   :  { %3792 = vmatprep.mubr.bf16.mxu0 %v20593_v50  ;;  %3905 = vmatprep.mubr.bf16.mxu1 %v20593_v50  ;;  %21409 = vst [vmem:[#allocation68_spill] sm:$0xff] %v16635_v30  ;;  %v16637_v37 = vpop.f32.mrf.mxu1 }
 0x2a6   :  { %3980 = vmatprep.subr.bf16.mxu0 %v21407_v61  ;;  %4093 = vmatprep.subr.bf16.mxu1 %v21408_v19  ;;  %21410 = vst [vmem:[#allocation212_spill] sm:$0xff] %v16637_v37  ;;  %v16646_v3 = vpop.f32.mrf.mxu0  ;;  %v21415_v61 = vld [vmem:[#allocation177_spill] sm:$0xff]  ;;  %v21416_v19 = vld [vmem:[#allocation178_spill] sm:$0xff] }
 0x2a7   :  { %21413 = vst [vmem:[#allocation12_spill] sm:$0xff] %v16646_v3  ;;  %v16648_v54 = vpop.f32.mrf.mxu1 }
 0x2a8   :  { %3981 = vmatpush1.bf16.msra.mxu0 %v21411_v58  ;;  %4094 = vmatpush1.bf16.msra.mxu1 %v21412_v40  ;;  %21414 = vst [vmem:[#allocation69_spill] sm:$0xff] %v16648_v54  ;;  %v16652_v30 = vpop.f32.mrf.mxu0 }
 0x2a9   :  { %3982 = vmatprep.subr.bf16.mxu0 %v21415_v61  ;;  %4095 = vmatprep.subr.bf16.mxu1 %v21416_v19  ;;  %21417 = vst [vmem:[#allocation70_spill] sm:$0xff] %v16652_v30  ;;  %v16654_v37 = vpop.f32.mrf.mxu1  ;;  %v21421_v61 = vld [vmem:[#allocation183_spill] sm:$0xff]  ;;  %v21422_v19 = vld [vmem:[#allocation184_spill] sm:$0xff]  ;;  %v21423_v30 = vld [vmem:[#allocation185_spill] sm:$0xff] }
 0x2aa   :  { %21418 = vst [vmem:[#allocation213_spill] sm:$0xff] %v16654_v37  ;;  %v16662_v40 = vpop.f32.mrf.mxu0  ;;  %v21424_v37 = vld [vmem:[#allocation186_spill] sm:$0xff] }
 0x2ab   :  { %11698 = vmatmul.mubr.msk.bf16.gmra.mxu0 %vm552_vm1, %v16642_v52  ;;  %11707 = vmatmul.mubr.msk.bf16.gmra.mxu1 %vm552_vm1, %v16642_v52  ;;  %21419 = vst [vmem:[#allocation13_spill] sm:$0xff] %v16662_v40  ;;  %v16664_v58 = vpop.f32.mrf.mxu1 }
 0x2ac   :  { %3802 = vmatprep.mubr.bf16.mxu0 %v20593_v50  ;;  %3915 = vmatprep.mubr.bf16.mxu1 %v20593_v50  ;;  %21420 = vst [vmem:[#allocation214_spill] sm:$0xff] %v16664_v58  ;;  %v16670_v54 = vpop.f32.mrf.mxu0 }
 0x2ad   :  { %3983 = vmatpush1.bf16.msra.mxu0 %v21421_v61  ;;  %4096 = vmatpush1.bf16.msra.mxu1 %v21422_v19  ;;  %21425 = vst [vmem:[#allocation14_spill] sm:$0xff] %v16670_v54  ;;  %v16672_v3 = vpop.f32.mrf.mxu1  ;;  %v21429_v61 = vld [vmem:[#allocation191_spill] sm:$0xff]  ;;  %v21430_v19 = vld [vmem:[#allocation192_spill] sm:$0xff] }
 0x2ae   :  { %3984 = vmatprep.subr.bf16.mxu0 %v21423_v30  ;;  %4097 = vmatprep.subr.bf16.mxu1 %v21424_v37  ;;  %21426 = vst [vmem:[#allocation217_spill] sm:$0xff] %v16672_v3  ;;  %v16679_v40 = vpop.f32.mrf.mxu0  ;;  %v21431_v30 = vld [vmem:[#allocation193_spill] sm:$0xff]  ;;  %v21432_v37 = vld [vmem:[#allocation194_spill] sm:$0xff] }
 0x2af   :  { %21427 = vst [vmem:[#allocation15_spill] sm:$0xff] %v16679_v40  ;;  %v16681_v58 = vpop.f32.mrf.mxu1 }
 0x2b0   :  { %21428 = vst [vmem:[#allocation71_spill] sm:$0xff] %v16681_v58  ;;  %v16687_v54 = vpop.f32.mrf.mxu0 }
 0x2b1   :  { %3985 = vmatpush1.bf16.msra.mxu0 %v21429_v61  ;;  %4098 = vmatpush1.bf16.msra.mxu1 %v21430_v19  ;;  %21433 = vst [vmem:[#allocation72_spill] sm:$0xff] %v16687_v54  ;;  %v16689_v3 = vpop.f32.mrf.mxu1  ;;  %v21439_v54 = vld [vmem:[#allocation201_spill] sm:$0xff] }
 0x2b2   :  { %3986 = vmatprep.subr.bf16.mxu0 %v21431_v30  ;;  %4099 = vmatprep.subr.bf16.mxu1 %v21432_v37  ;;  %21434 = vst [vmem:[#allocation218_spill] sm:$0xff] %v16689_v3  ;;  %v16697_v61 = vpop.f32.mrf.mxu0  ;;  %v21437_v30 = vld [vmem:[#allocation199_spill] sm:$0xff]  ;;  %v21438_v37 = vld [vmem:[#allocation200_spill] sm:$0xff]  ;;  %v21440_v3 = vld [vmem:[#allocation202_spill] sm:$0xff] }
 0x2b3   :  { %11699 = vmatmul.mubr.msk.bf16.gmra.mxu0 %vm552_vm1, %v16677_v14  ;;  %11708 = vmatmul.mubr.msk.bf16.gmra.mxu1 %vm552_vm1, %v16677_v14  ;;  %21435 = vst [vmem:[#allocation16_spill] sm:$0xff] %v16697_v61  ;;  %v16699_v19 = vpop.f32.mrf.mxu1 }
 0x2b4   :  { %3812 = vmatprep.mubr.bf16.mxu0 %v20593_v50  ;;  %3925 = vmatprep.mubr.bf16.mxu1 %v20593_v50  ;;  %21436 = vst [vmem:[#allocation73_spill] sm:$0xff] %v16699_v19  ;;  %v16705_v58 = vpop.f32.mrf.mxu0 }
 0x2b5   :  { %3987 = vmatpush1.bf16.msra.mxu0 %v21437_v30  ;;  %4100 = vmatpush1.bf16.msra.mxu1 %v21438_v37  ;;  %21441 = vst [vmem:[#allocation74_spill] sm:$0xff] %v16705_v58  ;;  %v16707_v40 = vpop.f32.mrf.mxu1  ;;  %v21445_v30 = vld [vmem:[#allocation207_spill] sm:$0xff]  ;;  %v21446_v37 = vld [vmem:[#allocation208_spill] sm:$0xff] }
 0x2b6   :  { %3988 = vmatprep.subr.bf16.mxu0 %v21439_v54  ;;  %4101 = vmatprep.subr.bf16.mxu1 %v21440_v3  ;;  %21442 = vst [vmem:[#allocation219_spill] sm:$0xff] %v16707_v40  ;;  %v16714_v61 = vpop.f32.mrf.mxu0  ;;  %v21447_v54 = vld [vmem:[#allocation209_spill] sm:$0xff]  ;;  %v21448_v3 = vld [vmem:[#allocation210_spill] sm:$0xff] }
 0x2b7   :  { %21443 = vst [vmem:[#allocation17_spill] sm:$0xff] %v16714_v61  ;;  %v16716_v19 = vpop.f32.mrf.mxu1 }
 0x2b8   :  { %21444 = vst [vmem:[#allocation220_spill] sm:$0xff] %v16716_v19  ;;  %v16722_v58 = vpop.f32.mrf.mxu0  ;;  %v16745_v19 = vld [vmem:[%s20311_s3 + $0x20] sm:$0xff]  }
 0x2b9   :  { %3989 = vmatpush1.bf16.msra.mxu0 %v21445_v30  ;;  %4102 = vmatpush1.bf16.msra.mxu1 %v21446_v37  ;;  %21449 = vst [vmem:[#allocation18_spill] sm:$0xff] %v16722_v58  ;;  %v16724_v40 = vpop.f32.mrf.mxu1 }
 0x2ba   :  { %3990 = vmatprep.subr.bf16.mxu0 %v21447_v54  ;;  %4103 = vmatprep.subr.bf16.mxu1 %v21448_v3  ;;  %21450 = vst [vmem:[#allocation221_spill] sm:$0xff] %v16724_v40  ;;  %v16732_v30 = vpop.f32.mrf.mxu0  ;;  %v21453_v54 = vld [vmem:[#allocation215_spill] sm:$0xff]  ;;  %v21454_v3 = vld [vmem:[#allocation216_spill] sm:$0xff] }
 0x2bb   :  { %11700 = vmatmul.mubr.msk.bf16.gmra.mxu0 %vm552_vm1, %v16712_v63  ;;  %11709 = vmatmul.mubr.msk.bf16.gmra.mxu1 %vm552_vm1, %v16712_v63  ;;  %21451 = vst [vmem:[#allocation19_spill] sm:$0xff] %v16732_v30  ;;  %v16734_v37 = vpop.f32.mrf.mxu1 }
 0x2bc   :  { %3822 = vmatprep.mubr.bf16.mxu0 %v20593_v50  ;;  %3935 = vmatprep.mubr.bf16.mxu1 %v20593_v50  ;;  %21452 = vst [vmem:[#allocation75_spill] sm:$0xff] %v16734_v37  ;;  %v16738_v58 = vpop.f32.mrf.mxu0 }
 0x2bd   :  { %3991 = vmatpush1.bf16.msra.mxu0 %v21453_v54  ;;  %4104 = vmatpush1.bf16.msra.mxu1 %v21454_v3  ;;  %21455 = vst [vmem:[#allocation76_spill] sm:$0xff] %v16738_v58  ;;  %v16740_v40 = vpop.f32.mrf.mxu1 }
 0x2be   :  { %21456 = vst [vmem:[#allocation222_spill] sm:$0xff] %v16740_v40  ;;  %v16747_v61 = vpop.f32.mrf.mxu0 }
 0x2bf   :  { %21457 = vst [vmem:[#allocation20_spill] sm:$0xff] %v16747_v61  ;;  %v16749_v8 = vpop.f32.mrf.mxu1 }
 0x2c0   :  { %21458 = vst [vmem:[#allocation77_spill] sm:$0xff] %v16749_v8  ;;  %v16751_v30 = vpop.f32.mrf.mxu0 }
 0x2c1   :  { %21459 = vst [vmem:[#allocation78_spill] sm:$0xff] %v16751_v30  ;;  %v16753_v37 = vpop.f32.mrf.mxu1 }
 0x2c2   :  { %21460 = vst [vmem:[#allocation223_spill] sm:$0xff] %v16753_v37  ;;  %v16761_v54 = vpop.f32.mrf.mxu0  ;;  %v16772_v37 = vld [vmem:[%s20311_s3 + $0x28] sm:$0xff]  }
 0x2c3   :  { %11701 = vmatmul.mubr.msk.bf16.gmra.mxu0 %vm552_vm1, %v16745_v19  ;;  %11710 = vmatmul.mubr.msk.bf16.gmra.mxu1 %vm552_vm1, %v16745_v19  ;;  %21461 = vst [vmem:[#allocation21_spill] sm:$0xff] %v16761_v54  ;;  %v16763_v3 = vpop.f32.mrf.mxu1 }
 0x2c4   :  { %3832 = vmatprep.mubr.bf16.mxu0 %v20593_v50  ;;  %3945 = vmatprep.mubr.bf16.mxu1 %v20593_v50  ;;  %21462 = vst [vmem:[#allocation224_spill] sm:$0xff] %v16763_v3  ;;  %v16765_v61 = vpop.f32.mrf.mxu0 }
 0x2c5   :  { %21463 = vst [vmem:[#allocation22_spill] sm:$0xff] %v16765_v61  ;;  %v16767_v8 = vpop.f32.mrf.mxu1 }
 0x2c6   :  { %21464 = vst [vmem:[#allocation225_spill] sm:$0xff] %v16767_v8  ;;  %v16774_v30 = vpop.f32.mrf.mxu0 }
 0x2c7   :  { %21465 = vst [vmem:[#allocation293_spill] sm:$0xff] %v16774_v30  ;;  %v16776_v40 = vpop.f32.mrf.mxu1 }
 0x2c8   :  { %21466 = vst [vmem:[#allocation226_spill] sm:$0xff] %v16776_v40  ;;  %v16778_v58 = vpop.f32.mrf.mxu0 }
 0x2c9   :  { %21467 = vst [vmem:[#allocation294_spill] sm:$0xff] %v16778_v58  ;;  %v16780_v13 = vpop.f32.mrf.mxu1 }
 0x2ca   :  { %21468 = vst [vmem:[#allocation227_spill] sm:$0xff] %v16780_v13  ;;  %v16788_v8 = vpop.f32.mrf.mxu0  ;;  %v16799_v13 = vld [vmem:[%s20311_s3 + $0x30] sm:$0xff]  }
 0x2cb   :  { %11702 = vmatmul.mubr.msk.bf16.gmra.mxu0 %vm552_vm1, %v16772_v37  ;;  %11711 = vmatmul.mubr.msk.bf16.gmra.mxu1 %vm552_vm1, %v16772_v37  ;;  %21469 = vst [vmem:[#allocation295_spill] sm:$0xff] %v16788_v8  ;;  %v16790_v61 = vpop.f32.mrf.mxu1 }
 0x2cc   :  { %3842 = vmatprep.mubr.bf16.mxu0 %v20593_v50  ;;  %3955 = vmatprep.mubr.bf16.mxu1 %v20593_v50  ;;  %21470 = vst [vmem:[#allocation228_spill] sm:$0xff] %v16790_v61  ;;  %v16792_v30 = vpop.f32.mrf.mxu0 }
 0x2cd   :  { %21471 = vst [vmem:[#allocation296_spill] sm:$0xff] %v16792_v30  ;;  %v16794_v40 = vpop.f32.mrf.mxu1 }
 0x2ce   :  { %21472 = vst [vmem:[#allocation229_spill] sm:$0xff] %v16794_v40  ;;  %v16801_v58 = vpop.f32.mrf.mxu0 }
 0x2cf   :  { %21473 = vst [vmem:[#allocation297_spill] sm:$0xff] %v16801_v58  ;;  %v16803_v3 = vpop.f32.mrf.mxu1 }
 0x2d0   :  { %21474 = vst [vmem:[#allocation230_spill] sm:$0xff] %v16803_v3  ;;  %v16805_v54 = vpop.f32.mrf.mxu0 }
 0x2d1   :  { %21475 = vst [vmem:[#allocation298_spill] sm:$0xff] %v16805_v54  ;;  %v16807_v31 = vpop.f32.mrf.mxu1 }
 0x2d2   :  { %21476 = vst [vmem:[#allocation231_spill] sm:$0xff] %v16807_v31  ;;  %v16815_v40 = vpop.f32.mrf.mxu0  ;;  %v16826_v31 = vld [vmem:[%s20311_s3 + $0x38] sm:$0xff]  }
 0x2d3   :  { %11703 = vmatmul.mubr.msk.bf16.gmra.mxu0 %vm552_vm1, %v16799_v13  ;;  %11712 = vmatmul.mubr.msk.bf16.gmra.mxu1 %vm552_vm1, %v16799_v13  ;;  %21477 = vst [vmem:[#allocation299_spill] sm:$0xff] %v16815_v40  ;;  %v16817_v30 = vpop.f32.mrf.mxu1 }
 0x2d4   :  { %3852 = vmatprep.mubr.bf16.mxu0 %v20593_v50  ;;  %3965 = vmatprep.mubr.bf16.mxu1 %v20593_v50  ;;  %21478 = vst [vmem:[#allocation232_spill] sm:$0xff] %v16817_v30  ;;  %v16819_v58 = vpop.f32.mrf.mxu0 }
 0x2d5   :  { %21479 = vst [vmem:[#allocation300_spill] sm:$0xff] %v16819_v58  ;;  %v16821_v3 = vpop.f32.mrf.mxu1 }
 0x2d6   :  { %21480 = vst [vmem:[#allocation233_spill] sm:$0xff] %v16821_v3  ;;  %v16828_v54 = vpop.f32.mrf.mxu0 }
 0x2d7   :  { %21481 = vst [vmem:[#allocation301_spill] sm:$0xff] %v16828_v54  ;;  %v16830_v61 = vpop.f32.mrf.mxu1 }
 0x2d8   :  { %21482 = vst [vmem:[#allocation234_spill] sm:$0xff] %v16830_v61  ;;  %v16832_v8 = vpop.f32.mrf.mxu0 }
 0x2d9   :  { %21483 = vst [vmem:[#allocation302_spill] sm:$0xff] %v16832_v8  ;;  %v16834_v55 = vpop.f32.mrf.mxu1 }
 0x2da   :  { %21484 = vst [vmem:[#allocation235_spill] sm:$0xff] %v16834_v55  ;;  %v16842_v3 = vpop.f32.mrf.mxu0 }
 0x2db   :  { %11704 = vmatmul.mubr.msk.bf16.gmra.mxu0 %vm552_vm1, %v16826_v31  ;;  %11713 = vmatmul.mubr.msk.bf16.gmra.mxu1 %vm552_vm1, %v16826_v31  ;;  %21485 = vst [vmem:[#allocation303_spill] sm:$0xff] %v16842_v3  ;;  %v16844_v58 = vpop.f32.mrf.mxu1 }
 0x2dc   :  { %4008 = vmatprep.mubr.bf16.mxu0 %v20593_v50  ;;  %4121 = vmatprep.mubr.bf16.mxu1 %v20593_v50  ;;  %21486 = vst [vmem:[#allocation236_spill] sm:$0xff] %v16844_v58  ;;  %v16846_v54 = vpop.f32.mrf.mxu0 }
 0x2dd   :  { %21487 = vst [vmem:[#allocation304_spill] sm:$0xff] %v16846_v54  ;;  %v16848_v61 = vpop.f32.mrf.mxu1 }
 0x2de   :  { %21488 = vst [vmem:[#allocation237_spill] sm:$0xff] %v16848_v61  ;;  %v16850_v8 = vpop.f32.mrf.mxu0 }
 0x2df   :  { %21489 = vst [vmem:[#allocation305_spill] sm:$0xff] %v16850_v8  ;;  %v16852_v55 = vpop.f32.mrf.mxu1 }
 0x2e0   :  { %21490 = vst [vmem:[#allocation238_spill] sm:$0xff] %v16852_v55  ;;  %v16854_v30 = vpop.f32.mrf.mxu0 }
 0x2e1   :  { %v16856_v40 = vpop.f32.mrf.mxu1 }
 0x2e2   :  { %v16864_v54 = vpop.f32.mrf.mxu0 }
 0x2e3   :  { %11715 = vmatmul.mubr.msk.bf16.vlgmr.msra.gmra.mxu0 %vm552_vm1, %v16611_v41  ;;  %11724 = vmatmul.mubr.msk.bf16.vlgmr.msra.gmra.mxu1 %vm552_vm1, %v16611_v41  ;;  %v16866_v61 = vpop.f32.mrf.mxu1 }
 0x2e4   :  { %4018 = vmatprep.mubr.bf16.mxu0 %v20593_v50  ;;  %4131 = vmatprep.mubr.bf16.mxu1 %v20593_v50  ;;  %v16868_v8 = vpop.f32.mrf.mxu0 }
 0x2e5   :  { %v16870_v55 = vpop.f32.mrf.mxu1 }
 0x2e6   :  { %v16872_v58 = vpop.f32.mrf.mxu0 }
 0x2e7   :  { %v16874_v3 = vpop.f32.mrf.mxu1 }
 0x2e9   :  { %v16876_v27 = vpop.f32.mrf.mxu0  ;;  %v16878_v21 = vpop.f32.mrf.mxu1 }
 0x2eb   :  { %11716 = vmatmul.mubr.msk.bf16.gmra.mxu0 %vm552_vm1, %v16642_v52  ;;  %11725 = vmatmul.mubr.msk.bf16.gmra.mxu1 %vm552_vm1, %v16642_v52  ;;  %v16886_v41 = vpop.f32.mrf.mxu0  ;;  %v16888_v48 = vpop.f32.mrf.mxu1 }
 0x2ec   :  { %4028 = vmatprep.mubr.bf16.mxu0 %v20593_v50  ;;  %4141 = vmatprep.mubr.bf16.mxu1 %v20593_v50 }
 0x2ed   :  { %v16890_v59 = vpop.f32.mrf.mxu0  ;;  %v16892_v20 = vpop.f32.mrf.mxu1 }
 0x2ef   :  { %v16894_v35 = vpop.f32.mrf.mxu0  ;;  %v16896_v23 = vpop.f32.mrf.mxu1 }
 0x2f2   :  { %v16898_v25 = vpop.f32.mrf.mxu0  ;;  %v16900_v43 = vpop.f32.mrf.mxu1 }
 0x2f3   :  { %11717 = vmatmul.mubr.msk.bf16.gmra.mxu0 %vm552_vm1, %v16677_v14  ;;  %11726 = vmatmul.mubr.msk.bf16.gmra.mxu1 %vm552_vm1, %v16677_v14 }
 0x2f4   :  { %4038 = vmatprep.mubr.bf16.mxu0 %v20593_v50  ;;  %4151 = vmatprep.mubr.bf16.mxu1 %v20593_v50  ;;  %v16908_v52 = vpop.f32.mrf.mxu0  ;;  %v16910_v60 = vpop.f32.mrf.mxu1 }
 0x2f6   :  { %v16912_v22 = vpop.f32.mrf.mxu0  ;;  %v16914_v2 = vpop.f32.mrf.mxu1 }
 0x2f7   :  { %21491 = vst [vmem:[#allocation306_spill] sm:$0xff] %v16912_v22  ;;  %21492 = vst [vmem:[#allocation239_spill] sm:$0xff] %v16914_v2 }
 0x2f8   :  { %v16916_v57 = vpop.f32.mrf.mxu0  ;;  %v16918_v62 = vpop.f32.mrf.mxu1 }
 0x2f9   :  { %21493 = vst [vmem:[#allocation307_spill] sm:$0xff] %v16916_v57  ;;  %21494 = vst [vmem:[#allocation240_spill] sm:$0xff] %v16918_v62 }
 0x2fb   :  { %v16920_v28 = vpop.f32.mrf.mxu0  ;;  %v16922_v10 = vpop.f32.mrf.mxu1  ;;  %11718 = vmatmul.mubr.msk.bf16.gmra.mxu0 %vm552_vm1, %v16712_v63  ;;  %11727 = vmatmul.mubr.msk.bf16.gmra.mxu1 %vm552_vm1, %v16712_v63 }
 0x2fc   :  { %21495 = vst [vmem:[#allocation308_spill] sm:$0xff] %v16920_v28  ;;  %21496 = vst [vmem:[#allocation241_spill] sm:$0xff] %v16922_v10  ;;  %4048 = vmatprep.mubr.bf16.mxu0 %v20593_v50  ;;  %4161 = vmatprep.mubr.bf16.mxu1 %v20593_v50 }
 0x2fd   :  { %v16930_v14 = vpop.f32.mrf.mxu0  ;;  %v16932_v2 = vpop.f32.mrf.mxu1 }
 0x2fe   :  { %21497 = vst [vmem:[#allocation309_spill] sm:$0xff] %v16932_v2 }
 0x2ff   :  { %v16934_v57 = vpop.f32.mrf.mxu0  ;;  %v16936_v62 = vpop.f32.mrf.mxu1 }
 0x300   :  { %21498 = vst [vmem:[#allocation242_spill] sm:$0xff] %v16934_v57  ;;  %21499 = vst [vmem:[#allocation310_spill] sm:$0xff] %v16936_v62 }
 0x301   :  { %v16938_v28 = vpop.f32.mrf.mxu0  ;;  %v16940_v10 = vpop.f32.mrf.mxu1 }
 0x302   :  { %21500 = vst [vmem:[#allocation243_spill] sm:$0xff] %v16938_v28  ;;  %21501 = vst [vmem:[#allocation311_spill] sm:$0xff] %v16940_v10 }
 0x303   :  { %v16942_v22 = vpop.f32.mrf.mxu0  ;;  %v16944_v12 = vpop.f32.mrf.mxu1  ;;  %11719 = vmatmul.mubr.msk.bf16.gmra.mxu0 %vm552_vm1, %v16745_v19  ;;  %11728 = vmatmul.mubr.msk.bf16.gmra.mxu1 %vm552_vm1, %v16745_v19 }
 0x304   :  { %21502 = vst [vmem:[#allocation244_spill] sm:$0xff] %v16942_v22  ;;  %21503 = vst [vmem:[#allocation312_spill] sm:$0xff] %v16944_v12  ;;  %4058 = vmatprep.mubr.bf16.mxu0 %v20593_v50  ;;  %4171 = vmatprep.mubr.bf16.mxu1 %v20593_v50 }
 0x305   :  { %v16952_v63 = vpop.f32.mrf.mxu0  ;;  %v16954_v62 = vpop.f32.mrf.mxu1 }
 0x306   :  { %21504 = vst [vmem:[#allocation245_spill] sm:$0xff] %v16954_v62 }
 0x307   :  { %v16956_v28 = vpop.f32.mrf.mxu0  ;;  %v16958_v10 = vpop.f32.mrf.mxu1 }
 0x308   :  { %21505 = vst [vmem:[#allocation313_spill] sm:$0xff] %v16956_v28  ;;  %21506 = vst [vmem:[#allocation246_spill] sm:$0xff] %v16958_v10 }
 0x309   :  { %v16960_v22 = vpop.f32.mrf.mxu0  ;;  %v16962_v12 = vpop.f32.mrf.mxu1 }
 0x30a   :  { %21507 = vst [vmem:[#allocation314_spill] sm:$0xff] %v16960_v22  ;;  %21508 = vst [vmem:[#allocation247_spill] sm:$0xff] %v16962_v12 }
 0x30b   :  { %v16964_v57 = vpop.f32.mrf.mxu0  ;;  %v16966_v2 = vpop.f32.mrf.mxu1  ;;  %11720 = vmatmul.mubr.msk.bf16.gmra.mxu0 %vm552_vm1, %v16772_v37  ;;  %11729 = vmatmul.mubr.msk.bf16.gmra.mxu1 %vm552_vm1, %v16772_v37 }
 0x30c   :  { %21509 = vst [vmem:[#allocation315_spill] sm:$0xff] %v16964_v57  ;;  %21510 = vst [vmem:[#allocation248_spill] sm:$0xff] %v16966_v2  ;;  %4068 = vmatprep.mubr.bf16.mxu0 %v20593_v50  ;;  %4181 = vmatprep.mubr.bf16.mxu1 %v20593_v50 }
 0x30d   :  { %v16974_v19 = vpop.f32.mrf.mxu0  ;;  %v16976_v10 = vpop.f32.mrf.mxu1 }
 0x30e   :  { %21511 = vst [vmem:[#allocation316_spill] sm:$0xff] %v16974_v19  ;;  %21512 = vst [vmem:[#allocation249_spill] sm:$0xff] %v16976_v10  ;;  %v21598_v19 = vld [vmem:[#allocation83_spill] sm:$0xff] }
 0x30f   :  { %v16978_v22 = vpop.f32.mrf.mxu0  ;;  %v16980_v12 = vpop.f32.mrf.mxu1 }
 0x310   :  { %21513 = vst [vmem:[#allocation317_spill] sm:$0xff] %v16978_v22  ;;  %21514 = vst [vmem:[#allocation250_spill] sm:$0xff] %v16980_v12 }
 0x311   :  { %v16982_v57 = vpop.f32.mrf.mxu0  ;;  %v16984_v2 = vpop.f32.mrf.mxu1 }
 0x312   :  { %21515 = vst [vmem:[#allocation318_spill] sm:$0xff] %v16982_v57  ;;  %21516 = vst [vmem:[#allocation251_spill] sm:$0xff] %v16984_v2 }
 0x313   :  { %v16986_v28 = vpop.f32.mrf.mxu0  ;;  %v16988_v62 = vpop.f32.mrf.mxu1  ;;  %11721 = vmatmul.mubr.msk.bf16.gmra.mxu0 %vm552_vm1, %v16799_v13  ;;  %11730 = vmatmul.mubr.msk.bf16.gmra.mxu1 %vm552_vm1, %v16799_v13 }
 0x314   :  { %21517 = vst [vmem:[#allocation319_spill] sm:$0xff] %v16986_v28  ;;  %21518 = vst [vmem:[#allocation252_spill] sm:$0xff] %v16988_v62  ;;  %4078 = vmatprep.mubr.bf16.mxu0 %v20593_v50  ;;  %4191 = vmatprep.mubr.bf16.mxu1 %v20593_v50 }
 0x315   :  { %v16996_v37 = vpop.f32.mrf.mxu0  ;;  %v16998_v12 = vpop.f32.mrf.mxu1 }
 0x316   :  { %21519 = vst [vmem:[#allocation253_spill] sm:$0xff] %v16996_v37  ;;  %21520 = vst [vmem:[#allocation320_spill] sm:$0xff] %v16998_v12 }
 0x317   :  { %v17000_v57 = vpop.f32.mrf.mxu0  ;;  %v17002_v2 = vpop.f32.mrf.mxu1 }
 0x318   :  { %21521 = vst [vmem:[#allocation254_spill] sm:$0xff] %v17000_v57  ;;  %21522 = vst [vmem:[#allocation321_spill] sm:$0xff] %v17002_v2 }
 0x319   :  { %v17004_v28 = vpop.f32.mrf.mxu0  ;;  %v17006_v62 = vpop.f32.mrf.mxu1 }
 0x31a   :  { %21523 = vst [vmem:[#allocation255_spill] sm:$0xff] %v17004_v28  ;;  %21524 = vst [vmem:[#allocation322_spill] sm:$0xff] %v17006_v62 }
 0x31b   :  { %v17008_v22 = vpop.f32.mrf.mxu0  ;;  %v17010_v10 = vpop.f32.mrf.mxu1  ;;  %11722 = vmatmul.mubr.msk.bf16.gmra.mxu0 %vm552_vm1, %v16826_v31  ;;  %11731 = vmatmul.mubr.msk.bf16.gmra.mxu1 %vm552_vm1, %v16826_v31 }
 0x31c   :  { %21525 = vst [vmem:[#allocation256_spill] sm:$0xff] %v17008_v22  ;;  %21526 = vst [vmem:[#allocation323_spill] sm:$0xff] %v17010_v10 }
 0x31d   :  { %v17016_v50 = vpop.f32.mrf.mxu0  ;;  %v17018_v13 = vpop.f32.mrf.mxu1 }
 0x31e   :  { %21527 = vst [vmem:[#allocation79_spill] sm:$0xff] %v17016_v50  ;;  %21528 = vst [vmem:[#allocation80_spill] sm:$0xff] %v17018_v13 }
 0x31f   :  { %v17020_v57 = vpop.f32.mrf.mxu0  ;;  %v17022_v2 = vpop.f32.mrf.mxu1 }
 0x320   :  { %21529 = vst [vmem:[#allocation81_spill] sm:$0xff] %v17020_v57  ;;  %21530 = vst [vmem:[#allocation82_spill] sm:$0xff] %v17022_v2 }
 0x321   :  { %v17024_v28 = vpop.f32.mrf.mxu0  ;;  %v17026_v62 = vpop.f32.mrf.mxu1 }
 0x322   :  { %21531 = vst [vmem:[#allocation85_spill] sm:$0xff] %v17024_v28  ;;  %21532 = vst [vmem:[#allocation86_spill] sm:$0xff] %v17026_v62 }
 0x323   :  { %v17028_v22 = vpop.f32.mrf.mxu0  ;;  %v17030_v10 = vpop.f32.mrf.mxu1 }
 0x324   :  { %21533 = vst [vmem:[#allocation88_spill] sm:$0xff] %v17028_v22  ;;  %21534 = vst [vmem:[#allocation89_spill] sm:$0xff] %v17030_v10 }
 0x325   :  { %v17032_v12 = vpop.f32.mrf.mxu0  ;;  %v17034_v37 = vpop.f32.mrf.mxu1  ;;  %v21730_v16 = vld [vmem:[#allocation80_spill] sm:$0xff] }
 0x326   :  { %21535 = vst [vmem:[#allocation93_spill] sm:$0xff] %v17032_v12  ;;  %21536 = vst [vmem:[#allocation94_spill] sm:$0xff] %v17034_v37 }
 0x327   :  { %v17036_v31 = vpop.f32.mrf.mxu0  ;;  %v17038_v50 = vpop.f32.mrf.mxu1 }
 0x328   :  { %21537 = vst [vmem:[#allocation95_spill] sm:$0xff] %v17036_v31  ;;  %21538 = vst [vmem:[#allocation96_spill] sm:$0xff] %v17038_v50 }
 0x329   :  { %v17040_v13 = vpop.f32.mrf.mxu0  ;;  %v17042_v57 = vpop.f32.mrf.mxu1 }
 0x32a   :  { %21539 = vst [vmem:[#allocation101_spill] sm:$0xff] %v17040_v13  ;;  %21540 = vst [vmem:[#allocation102_spill] sm:$0xff] %v17042_v57 }
 0x32b   :  { %v17044_v2 = vpop.f32.mrf.mxu0  ;;  %v17046_v28 = vpop.f32.mrf.mxu1 }
 0x32c   :  { %21541 = vst [vmem:[#allocation103_spill] sm:$0xff] %v17044_v2  ;;  %21542 = vst [vmem:[#allocation104_spill] sm:$0xff] %v17046_v28 }
 0x32d   :  { %v17048_v62 = vpop.f32.mrf.mxu0  ;;  %v17050_v22 = vpop.f32.mrf.mxu1 }
 0x32e   :  { %21543 = vst [vmem:[#allocation109_spill] sm:$0xff] %v17048_v62  ;;  %21544 = vst [vmem:[#allocation110_spill] sm:$0xff] %v17050_v22 }
 0x32f   :  { %v17052_v10 = vpop.f32.mrf.mxu0  ;;  %v17054_v12 = vpop.f32.mrf.mxu1  ;;  %v21762_v4 = vld [vmem:[#allocation96_spill] sm:$0xff] }
 0x330   :  { %21545 = vst [vmem:[#allocation111_spill] sm:$0xff] %v17052_v10  ;;  %21546 = vst [vmem:[#allocation112_spill] sm:$0xff] %v17054_v12 }
 0x331   :  { %v17056_v37 = vpop.f32.mrf.mxu0  ;;  %v17058_v31 = vpop.f32.mrf.mxu1 }
 0x332   :  { %21547 = vst [vmem:[#allocation116_spill] sm:$0xff] %v17056_v37  ;;  %21548 = vst [vmem:[#allocation117_spill] sm:$0xff] %v17058_v31 }
 0x333   :  { %v17060_v50 = vpop.f32.mrf.mxu0  ;;  %v17062_v13 = vpop.f32.mrf.mxu1 }
 0x334   :  { %21549 = vst [vmem:[#allocation118_spill] sm:$0xff] %v17060_v50  ;;  %21550 = vst [vmem:[#allocation119_spill] sm:$0xff] %v17062_v13 }
 0x335   :  { %v17064_v57 = vpop.f32.mrf.mxu0  ;;  %v17066_v2 = vpop.f32.mrf.mxu1 }
 0x336   :  { %21551 = vst [vmem:[#allocation123_spill] sm:$0xff] %v17064_v57  ;;  %21552 = vst [vmem:[#allocation124_spill] sm:$0xff] %v17066_v2 }
 0x337   :  { %v17068_v28 = vpop.f32.mrf.mxu0  ;;  %v17070_v62 = vpop.f32.mrf.mxu1 }
 0x338   :  { %21553 = vst [vmem:[#allocation125_spill] sm:$0xff] %v17068_v28  ;;  %21554 = vst [vmem:[#allocation126_spill] sm:$0xff] %v17070_v62 }
 0x339   :  { %v17072_v22 = vpop.f32.mrf.mxu0  ;;  %v17074_v10 = vpop.f32.mrf.mxu1 }
 0x33a   :  { %21555 = vst [vmem:[#allocation167_spill] sm:$0xff] %v17072_v22  ;;  %21556 = vst [vmem:[#allocation168_spill] sm:$0xff] %v17074_v10 }
 0x33b   :  { %v17076_v12 = vpop.f32.mrf.mxu0  ;;  %v17078_v37 = vpop.f32.mrf.mxu1 }
 0x33c   :  { %21557 = vst [vmem:[#allocation169_spill] sm:$0xff] %v17076_v12  ;;  %21558 = vst [vmem:[#allocation170_spill] sm:$0xff] %v17078_v37 }
 0x33d   :  { %v17080_v31 = vpop.f32.mrf.mxu0  ;;  %v17082_v50 = vpop.f32.mrf.mxu1 }
 0x33e   :  { %21559 = vst [vmem:[#allocation173_spill] sm:$0xff] %v17080_v31  ;;  %21560 = vst [vmem:[#allocation174_spill] sm:$0xff] %v17082_v50 }
 0x33f   :  { %v17084_v13 = vpop.f32.mrf.mxu0  ;;  %v17086_v57 = vpop.f32.mrf.mxu1 }
 0x340   :  { %21561 = vst [vmem:[#allocation177_spill] sm:$0xff] %v17084_v13  ;;  %21562 = vst [vmem:[#allocation178_spill] sm:$0xff] %v17086_v57 }
 0x341   :  { %v17088_v2 = vpop.f32.mrf.mxu0  ;;  %v17090_v28 = vpop.f32.mrf.mxu1 }
 0x342   :  { %21563 = vst [vmem:[#allocation183_spill] sm:$0xff] %v17088_v2  ;;  %21564 = vst [vmem:[#allocation184_spill] sm:$0xff] %v17090_v28 }
 0x343   :  { %v17092_v62 = vpop.f32.mrf.mxu0  ;;  %v17094_v22 = vpop.f32.mrf.mxu1 }
 0x344   :  { %21565 = vst [vmem:[#allocation185_spill] sm:$0xff] %v17092_v62  ;;  %21566 = vst [vmem:[#allocation186_spill] sm:$0xff] %v17094_v22 }
 0x345   :  { %v17096_v10 = vpop.f32.mrf.mxu0  ;;  %v17098_v12 = vpop.f32.mrf.mxu1 }
 0x346   :  { %21567 = vst [vmem:[#allocation191_spill] sm:$0xff] %v17096_v10  ;;  %21568 = vst [vmem:[#allocation192_spill] sm:$0xff] %v17098_v12 }
 0x347   :  { %v17100_v37 = vpop.f32.mrf.mxu0  ;;  %v17102_v31 = vpop.f32.mrf.mxu1 }
 0x348   :  { %21569 = vst [vmem:[#allocation193_spill] sm:$0xff] %v17100_v37  ;;  %21570 = vst [vmem:[#allocation194_spill] sm:$0xff] %v17102_v31 }
 0x349   :  { %v17104_v50 = vpop.f32.mrf.mxu0  ;;  %v17106_v13 = vpop.f32.mrf.mxu1 }
 0x34a   :  { %21571 = vst [vmem:[#allocation199_spill] sm:$0xff] %v17104_v50  ;;  %21572 = vst [vmem:[#allocation200_spill] sm:$0xff] %v17106_v13 }
 0x34b   :  { %v17108_v57 = vpop.f32.mrf.mxu0  ;;  %v17110_v2 = vpop.f32.mrf.mxu1 }
 0x34c   :  { %21573 = vst [vmem:[#allocation201_spill] sm:$0xff] %v17108_v57  ;;  %21574 = vst [vmem:[#allocation202_spill] sm:$0xff] %v17110_v2 }
 0x34d   :  { %v17112_v28 = vpop.f32.mrf.mxu0  ;;  %v17114_v62 = vpop.f32.mrf.mxu1 }
 0x34e   :  { %21575 = vst [vmem:[#allocation207_spill] sm:$0xff] %v17112_v28  ;;  %21576 = vst [vmem:[#allocation208_spill] sm:$0xff] %v17114_v62 }
 0x34f   :  { %v17116_v22 = vpop.f32.mrf.mxu0  ;;  %v17118_v10 = vpop.f32.mrf.mxu1 }
 0x350   :  { %21577 = vst [vmem:[#allocation209_spill] sm:$0xff] %v17116_v22  ;;  %21578 = vst [vmem:[#allocation210_spill] sm:$0xff] %v17118_v10 }
 0x351   :  { %v17120_v12 = vpop.f32.mrf.mxu0  ;;  %v17122_v37 = vpop.f32.mrf.mxu1 }
 0x352   :  { %21579 = vst [vmem:[#allocation215_spill] sm:$0xff] %v17120_v12  ;;  %21580 = vst [vmem:[#allocation216_spill] sm:$0xff] %v17122_v37  ;;  %v4524_v37 = vlaneseq }
 0x353   :  { %v17124_v31 = vpop.f32.mrf.mxu0  ;;  %v17126_v50 = vpop.f32.mrf.mxu1 }
 0x354   :  { %21581 = vst [vmem:[#allocation324_spill] sm:$0xff] %v17124_v31  ;;  %21582 = vst [vmem:[#allocation325_spill] sm:$0xff] %v17126_v50 }
 0x355   :  { %v17128_v13 = vpop.f32.mrf.mxu0  ;;  %v17130_v57 = vpop.f32.mrf.mxu1 }
 0x356   :  { %21583 = vst [vmem:[#allocation326_spill] sm:$0xff] %v17128_v13  ;;  %21584 = vst [vmem:[#allocation327_spill] sm:$0xff] %v17130_v57 }
 0x357   :  { %v17132_v2 = vpop.f32.mrf.mxu0  ;;  %v17134_v28 = vpop.f32.mrf.mxu1 }
 0x358   :  { %21585 = vst [vmem:[#allocation328_spill] sm:$0xff] %v17132_v2  ;;  %21586 = vst [vmem:[#allocation329_spill] sm:$0xff] %v17134_v28  ;;  %v17152_v2 = vshrl.u32 %v4524_v37, 7  ;;  %v13090_v37 = vld [vmem:[%s20312_s6 + $0xf8] sm:$0xff]  }
 0x359   :  { %v17136_v62 = vpop.f32.mrf.mxu0  ;;  %v17138_v22 = vpop.f32.mrf.mxu1  ;;  %12347 = vmatprep.subr.bf16.mxu1 %v13090_v37 }
 0x35a   :  { %21587 = vst [vmem:[#allocation330_spill] sm:$0xff] %v17136_v62  ;;  %21588 = vst [vmem:[#allocation331_spill] sm:$0xff] %v17138_v22  ;;  %v13088_v62 = vld [vmem:[%s20312_s6 + $0x78] sm:$0xff]  }
 0x35b   :  { %v17140_v10 = vpop.f32.mrf.mxu0  ;;  %v17142_v12 = vpop.f32.mrf.mxu1  ;;  %21595 = vst [vmem:[#allocation338_spill] sm:$0xff] %v17152_v2  ;;  %12325 = vmatprep.subr.bf16.mxu0 %v13088_v62 }
 0x35c   :  { %21589 = vst [vmem:[#allocation332_spill] sm:$0xff] %v17140_v10  ;;  %21590 = vst [vmem:[#allocation333_spill] sm:$0xff] %v17142_v12 }
 0x35d   :  { %v17144_v31 = vpop.f32.mrf.mxu0  ;;  %v17146_v50 = vpop.f32.mrf.mxu1 }
 0x35e   :  { %21591 = vst [vmem:[#allocation334_spill] sm:$0xff] %v17144_v31  ;;  %21592 = vst [vmem:[#allocation335_spill] sm:$0xff] %v17146_v50  ;;  %v13089_v31 = vld [vmem:[%s20312_s6 + $0x38] sm:$0xff]   ;;  %v3269_v50 = vadd.f32 %v16854_v30, %v16406_v5  ;;  %v3271_v5 = vadd.f32 %v16864_v54, %v16416_v29  ;;  %v3273_v30 = vadd.f32 %v16868_v8, %v16424_v18  ;;  %v21599_v54 = vld [vmem:[#allocation84_spill] sm:$0xff] }
 0x35f   :  { %v17148_v13 = vpop.f32.mrf.mxu0  ;;  %v17150_v57 = vpop.f32.mrf.mxu1  ;;  %12326 = vmatpush3.bf16.msra.mxu0 %v13089_v31  ;;  %v3386_v31 = vadd.f32 %v16870_v55, %v16426_v7  ;;  %v3388_v8 = vadd.f32 %v16874_v3, %v16432_v47  ;;  %v21631_v3 = vld [vmem:[#allocation309_spill] sm:$0xff]  ;;  %v21640_v29 = vld [vmem:[#allocation56_spill] sm:$0xff] }
 0x360   :  { %21593 = vst [vmem:[#allocation336_spill] sm:$0xff] %v17148_v13  ;;  %21594 = vst [vmem:[#allocation337_spill] sm:$0xff] %v17150_v57  ;;  %v3382_v57 = vadd.f32 %v16856_v40, %v16408_v53  ;;  %v3384_v53 = vadd.f32 %v16866_v61, %v16418_v46  ;;  %v21638_v46 = vld [vmem:[#allocation55_spill] sm:$0xff] }
 0x361   :  { %v17157_v22 = vpop.f32.mrf.mxu0  ;;  %v17159_v10 = vpop.f32.mrf.mxu1 }
 0x362   :  { %21596 = vst [vmem:[#allocation339_spill] sm:$0xff] %v17157_v22  ;;  %21597 = vst [vmem:[#allocation340_spill] sm:$0xff] %v17159_v10  ;;  %v13091_v10 = vld [vmem:[%s20312_s6 + $0xb8] sm:$0xff]  }
 0x363   :  { %v3784_v13 = vpop.f32.mrf.mxu0  ;;  %v3897_v12 = vpop.f32.mrf.mxu1  ;;  %12348 = vmatpush3.bf16.msra.mxu1 %v13091_v10 }
 0x364   :  { %v17179_v62 = vadd.f32 %v3784_v13, %v3269_v50  ;;  %v17181_v40 = vadd.f32 %v3897_v12, %v3382_v57  ;;  %v3275_v57 = vadd.f32 %v16872_v58, %v16430_v34  ;;  %v3392_v34 = vadd.f32 %v16878_v21, %v16438_v39  ;;  %v21629_v13 = vld [vmem:[#allocation288_spill] sm:$0xff] }
 0x365   :  { %v3786_v22 = vpop.f32.mrf.mxu0  ;;  %v3899_v28 = vpop.f32.mrf.mxu1 }
 0x366   :  { %v17191_v61 = vadd.f32 %v3786_v22, %v3271_v5  ;;  %v17193_v12 = vadd.f32 %v3899_v28, %v3384_v53  ;;  %v3279_v28 = vadd.f32 %v16876_v27, %v16436_v36  ;;  %v3281_v53 = vadd.f32 %v16886_v41, %v16446_v49 }
 0x367   :  { %v3788_v55 = vpop.f32.mrf.mxu0  ;;  %v3901_v18 = vpop.f32.mrf.mxu1  ;;  %v3394_v27 = vadd.f32 %v16888_v48, %v16448_v56  ;;  %v3396_v49 = vadd.f32 %v16892_v20, %v16456_v42  ;;  %v13093_v20 = vld [vmem:[%s20312_s6 + $0x30] sm:$0xff]   ;;  %v3398_v42 = vadd.f32 %v16896_v23, %v16460_v38  ;;  %v3404_v23 = vadd.f32 %v16910_v60, %v16478_v44  ;;  %v21616_v60 = vld [vmem:[#allocation239_spill] sm:$0xff] }
 0x368   :  { %v17203_v50 = vadd.f32 %v3788_v55, %v3273_v30  ;;  %v17205_v22 = vadd.f32 %v3901_v18, %v3386_v31  ;;  %v21619_v55 = vld [vmem:[#allocation53_spill] sm:$0xff]  ;;  %v21620_v56 = vld [vmem:[#allocation240_spill] sm:$0xff] }
 0x369   :  { %v3790_v58 = vpop.f32.mrf.mxu0  ;;  %v3903_v47 = vpop.f32.mrf.mxu1 }
 0x36a   :  { %21600 = vst [vmem:[#allocation83_spill] sm:$0xff] %v17205_v22  ;;  %v17215_v37 = vadd.f32 %v3790_v58, %v3275_v57  ;;  %v17217_v5 = vadd.f32 %v3903_v47, %v3388_v8  ;;  %v3283_v8 = vadd.f32 %v16890_v59, %v16454_v45  ;;  %v13094_v59 = vld [vmem:[%s20312_s6 + $0xf0] sm:$0xff]   ;;  %v3285_v45 = vadd.f32 %v16894_v35, %v16458_v6  ;;  %v21718_v6 = vld [vmem:[#allocation322_spill] sm:$0xff] }
 0x36b   :  { %v3794_v36 = vpop.f32.mrf.mxu0  ;;  %v3907_v39 = vpop.f32.mrf.mxu1  ;;  %v3289_v58 = vadd.f32 %v16898_v25, %v16466_v33  ;;  %v3402_v33 = vadd.f32 %v16900_v43, %v16468_v15  ;;  %v3291_v25 = vadd.f32 %v16908_v52, %v16476_v51  ;;  %12349 = vmatprep.subr.bf16.mxu1 %v13094_v59  ;;  %v21613_v15 = vld [vmem:[#allocation286_spill] sm:$0xff]  ;;  %v21615_v52 = vld [vmem:[#allocation180_spill] sm:$0xff] }
 0x36c   :  { %21601 = vst [vmem:[#allocation84_spill] sm:$0xff] %v17215_v37  ;;  %21602 = vst [vmem:[#allocation341_spill] sm:$0xff] %v17217_v5  ;;  %v17227_v31 = vadd.f32 %v3794_v36, %v3279_v28  ;;  %v17229_v57 = vadd.f32 %v3907_v39, %v3392_v34  ;;  %v13092_v34 = vld [vmem:[%s20312_s6 + $0x70] sm:$0xff]   ;;  %v21614_v51 = vld [vmem:[#allocation306_spill] sm:$0xff]  ;;  %v3406_v44 = vadd.f32 %v21616_v60, %v21615_v52 }
 0x36d   :  { %v3796_v41 = vpop.f32.mrf.mxu0  ;;  %v3909_v48 = vpop.f32.mrf.mxu1  ;;  %v13095_v36 = vld [vmem:[%s20312_s6 + $0xb0] sm:$0xff]   ;;  %12327 = vmatprep.subr.bf16.mxu0 %v13092_v34  ;;  %v3293_v43 = vadd.f32 %v21614_v51, %v21613_v15  ;;  %v21617_v39 = vld [vmem:[#allocation287_spill] sm:$0xff]  ;;  %v21625_v51 = vld [vmem:[#allocation54_spill] sm:$0xff] }
 0x36e   :  { %21603 = vst [vmem:[#allocation342_spill] sm:$0xff] %v17227_v31  ;;  %21604 = vst [vmem:[#allocation343_spill] sm:$0xff] %v17229_v57  ;;  %v17239_v18 = vadd.f32 %v3796_v41, %v3281_v53  ;;  %v17241_v28 = vadd.f32 %v3909_v48, %v3394_v27  ;;  %12328 = vmatpush3.bf16.msra.mxu0 %v13093_v20  ;;  %12350 = vmatpush3.bf16.msra.mxu1 %v13095_v36  ;;  %v21618_v20 = vld [vmem:[#allocation307_spill] sm:$0xff]  ;;  %v21626_v52 = vld [vmem:[#allocation308_spill] sm:$0xff] }
 0x36f   :  { %v3798_v47 = vpop.f32.mrf.mxu0  ;;  %v3911_v53 = vpop.f32.mrf.mxu1  ;;  %v3295_v59 = vadd.f32 %v21618_v20, %v21617_v39  ;;  %v3299_v60 = vadd.f32 %v21626_v52, %v21625_v51  ;;  %v21628_v39 = vld [vmem:[#allocation241_spill] sm:$0xff]  ;;  %v21667_v36 = vld [vmem:[#allocation291_spill] sm:$0xff]  ;;  %v13103_v57 = vld [vmem:[%s20312_s6 + $0xa0] sm:$0xff]  }
 0x370   :  { %21605 = vst [vmem:[#allocation344_spill] sm:$0xff] %v17239_v18  ;;  %21606 = vst [vmem:[#allocation345_spill] sm:$0xff] %v17241_v28  ;;  %v17266_v35 = vadd.f32 %v3798_v47, %v3283_v8  ;;  %v17268_v38 = vadd.f32 %v3911_v53, %v3396_v49  ;;  %v3408_v8 = vadd.f32 %v21620_v56, %v21619_v55  ;;  %v21627_v47 = vld [vmem:[#allocation181_spill] sm:$0xff]  ;;  %v21630_v55 = vld [vmem:[#allocation182_spill] sm:$0xff] }
 0x371   :  { %v3800_v41 = vpop.f32.mrf.mxu0  ;;  %v3913_v48 = vpop.f32.mrf.mxu1  ;;  %v3412_v20 = vadd.f32 %v21628_v39, %v21627_v47  ;;  %v3301_v56 = vadd.f32 %v16930_v14, %v21629_v13  ;;  %v3414_v7 = vadd.f32 %v21631_v3, %v21630_v55  ;;  %v21636_v52 = vld [vmem:[#allocation289_spill] sm:$0xff]  ;;  %v21637_v47 = vld [vmem:[#allocation242_spill] sm:$0xff]  ;;  %v21641_v3 = vld [vmem:[#allocation243_spill] sm:$0xff] }
 0x372   :  { %21607 = vst [vmem:[#allocation346_spill] sm:$0xff] %v17266_v35  ;;  %21608 = vst [vmem:[#allocation347_spill] sm:$0xff] %v17268_v38  ;;  %v17280_v34 = vadd.f32 %v3800_v41, %v3285_v45  ;;  %v17282_v53 = vadd.f32 %v3913_v48, %v3398_v42  ;;  %v3303_v39 = vadd.f32 %v21637_v47, %v21636_v52  ;;  %v21639_v14 = vld [vmem:[#allocation310_spill] sm:$0xff]  ;;  %v21642_v27 = vld [vmem:[#allocation57_spill] sm:$0xff] }
 0x373   :  { %v3804_v30 = vpop.f32.mrf.mxu0  ;;  %v3917_v21 = vpop.f32.mrf.mxu1  ;;  %v3416_v13 = vadd.f32 %v21639_v14, %v21638_v46  ;;  %v3305_v55 = vadd.f32 %v21641_v3, %v21640_v29  ;;  %v21648_v47 = vld [vmem:[#allocation58_spill] sm:$0xff]  ;;  %v21649_v46 = vld [vmem:[#allocation244_spill] sm:$0xff]  ;;  %v21650_v29 = vld [vmem:[#allocation187_spill] sm:$0xff] }
 0x374   :  { %21611 = vst [vmem:[#allocation348_spill] sm:$0xff] %v17280_v34  ;;  %21612 = vst [vmem:[#allocation349_spill] sm:$0xff] %v17282_v53  ;;  %v17296_v48 = vadd.f32 %v3804_v30, %v3289_v58  ;;  %v17298_v15 = vadd.f32 %v3917_v21, %v3402_v33  ;;  %v21643_v53 = vld [vmem:[#allocation311_spill] sm:$0xff]  ;;  %v17334_v14 = vadd.f32 %v21649_v46, %v21648_v47  ;;  %v21651_v3 = vld [vmem:[#allocation312_spill] sm:$0xff] }
 0x375   :  { %v3806_v41 = vpop.f32.mrf.mxu0  ;;  %v3919_v10 = vpop.f32.mrf.mxu1  ;;  %v3418_v42 = vadd.f32 %v21643_v53, %v21642_v27  ;;  %v21652_v27 = vld [vmem:[#allocation2_spill] sm:$0xff]  ;;  %v13096_v46 = vld [vmem:[%s20312_s6 + $0x68] sm:$0xff]   ;;  %v21706_v49 = vld [vmem:[#allocation320_spill] sm:$0xff] }
 0x376   :  { %21623 = vst [vmem:[#allocation286_spill] sm:$0xff] %v17296_v48  ;;  %21624 = vst [vmem:[#allocation306_spill] sm:$0xff] %v17298_v15  ;;  %v17312_v33 = vadd.f32 %v3806_v41, %v3291_v25  ;;  %v17314_v51 = vadd.f32 %v3919_v10, %v3404_v23  ;;  %v17338_v15 = vadd.f32 %v21651_v3, %v21650_v29  ;;  %v21653_v25 = vld [vmem:[#allocation188_spill] sm:$0xff]  ;;  %v21659_v3 = vld [vmem:[#allocation290_spill] sm:$0xff]  ;;  %12329 = vmatprep.subr.bf16.mxu0 %v13096_v46 }
 0x377   :  { %v3808_v30 = vpop.f32.mrf.mxu0  ;;  %v3921_v48 = vpop.f32.mrf.mxu1  ;;  %v17342_v53 = vadd.f32 %v16952_v63, %v21652_v27  ;;  %v21661_v27 = vld [vmem:[#allocation189_spill] sm:$0xff]  ;;  %v21662_v10 = vld [vmem:[#allocation246_spill] sm:$0xff]  ;;  %v21681_v46 = vld [vmem:[#allocation59_spill] sm:$0xff] }
 0x378   :  { %21634 = vst [vmem:[#allocation180_spill] sm:$0xff] %v17312_v33  ;;  %21635 = vst [vmem:[#allocation239_spill] sm:$0xff] %v17314_v51  ;;  %v17328_v41 = vadd.f32 %v3808_v30, %v3293_v43  ;;  %v17330_v52 = vadd.f32 %v3921_v48, %v3406_v44  ;;  %v21654_v33 = vld [vmem:[#allocation245_spill] sm:$0xff]  ;;  %v13099_v48 = vld [vmem:[%s20312_s6 + $0xa8] sm:$0xff]  }
 0x379   :  { %v17346_v58 = vadd.f32 %v21654_v33, %v21653_v25  ;;  %v3810_v43 = vpop.f32.mrf.mxu0  ;;  %v3923_v30 = vpop.f32.mrf.mxu1  ;;  %v21660_v51 = vld [vmem:[#allocation313_spill] sm:$0xff]  ;;  %v17362_v33 = vadd.f32 %v21662_v10, %v21661_v27  ;;  %v21670_v44 = vld [vmem:[#allocation247_spill] sm:$0xff]  ;;  %v21671_v10 = vld [vmem:[#allocation292_spill] sm:$0xff] }
 0x37a   :  { %21646 = vst [vmem:[#allocation287_spill] sm:$0xff] %v17328_v41  ;;  %21647 = vst [vmem:[#allocation307_spill] sm:$0xff] %v17330_v52  ;;  %v17352_v23 = vadd.f32 %v3810_v43, %v3295_v59  ;;  %v17354_v29 = vadd.f32 %v3923_v30, %v3408_v8  ;;  %v17358_v63 = vadd.f32 %v21660_v51, %v21659_v3  ;;  %v13097_v8 = vld [vmem:[%s20312_s6 + $0x28] sm:$0xff]   ;;  %v21668_v52 = vld [vmem:[#allocation314_spill] sm:$0xff] }
 0x37b   :  { %v3814_v25 = vpop.f32.mrf.mxu0  ;;  %v3927_v21 = vpop.f32.mrf.mxu1  ;;  %v13098_v59 = vld [vmem:[%s20312_s6 + $0xe8] sm:$0xff]   ;;  %v17387_v47 = vadd.f32 %v21668_v52, %v21667_v36  ;;  %v21669_v41 = vld [vmem:[#allocation190_spill] sm:$0xff]  ;;  %12330 = vmatpush3.bf16.msra.mxu0 %v13097_v8  ;;  %v21693_v30 = vld [vmem:[#allocation61_spill] sm:$0xff] }
 0x37c   :  { %21657 = vst [vmem:[#allocation53_spill] sm:$0xff] %v17352_v23  ;;  %21658 = vst [vmem:[#allocation240_spill] sm:$0xff] %v17354_v29  ;;  %v17378_v3 = vadd.f32 %v3814_v25, %v3299_v60  ;;  %v17380_v27 = vadd.f32 %v3927_v21, %v3412_v20  ;;  %v17391_v34 = vadd.f32 %v21670_v44, %v21669_v41  ;;  %v21672_v23 = vld [vmem:[#allocation315_spill] sm:$0xff]  ;;  %12351 = vmatprep.subr.bf16.mxu1 %v13098_v59  ;;  %v21678_v44 = vld [vmem:[#allocation248_spill] sm:$0xff] }
 0x37d   :  { %v17395_v51 = vadd.f32 %v21672_v23, %v21671_v10  ;;  %v3816_v60 = vpop.f32.mrf.mxu0  ;;  %v3929_v25 = vpop.f32.mrf.mxu1  ;;  %v21677_v41 = vld [vmem:[#allocation195_spill] sm:$0xff]  ;;  %v21680_v10 = vld [vmem:[#allocation316_spill] sm:$0xff]  ;;  %v21682_v59 = vld [vmem:[#allocation249_spill] sm:$0xff]  ;;  %12352 = vmatpush3.bf16.msra.mxu1 %v13099_v48 }
 0x37e   :  { %21665 = vst [vmem:[#allocation54_spill] sm:$0xff] %v17378_v3  ;;  %21666 = vst [vmem:[#allocation308_spill] sm:$0xff] %v17380_v27  ;;  %v17401_v36 = vadd.f32 %v3816_v60, %v3301_v56  ;;  %v17403_v52 = vadd.f32 %v3929_v25, %v3414_v7  ;;  %v17407_v43 = vadd.f32 %v21678_v44, %v21677_v41  ;;  %v21679_v23 = vld [vmem:[#allocation3_spill] sm:$0xff]  ;;  %v21683_v21 = vld [vmem:[#allocation60_spill] sm:$0xff] }
 0x37f   :  { %v17411_v45 = vadd.f32 %v21680_v10, %v21679_v23  ;;  %v17415_v38 = vadd.f32 %v21682_v59, %v21681_v46  ;;  %v21684_v3 = vld [vmem:[#allocation317_spill] sm:$0xff]  ;;  %v3818_v56 = vpop.f32.mrf.mxu0  ;;  %v3931_v7 = vpop.f32.mrf.mxu1  ;;  %v21689_v10 = vld [vmem:[#allocation196_spill] sm:$0xff]  ;;  %v21690_v46 = vld [vmem:[#allocation250_spill] sm:$0xff] }
 0x380   :  { %21675 = vst [vmem:[#allocation181_spill] sm:$0xff] %v17401_v36  ;;  %21676 = vst [vmem:[#allocation241_spill] sm:$0xff] %v17403_v52  ;;  %v17419_v29 = vadd.f32 %v21684_v3, %v21683_v21  ;;  %v17425_v44 = vadd.f32 %v3818_v56, %v3303_v39  ;;  %v17427_v23 = vadd.f32 %v3931_v7, %v3416_v13  ;;  %v21691_v27 = vld [vmem:[#allocation4_spill] sm:$0xff]  ;;  %v21692_v3 = vld [vmem:[#allocation318_spill] sm:$0xff] }
 0x381   :  { %v17431_v59 = vadd.f32 %v21690_v46, %v21689_v10  ;;  %v17435_v21 = vadd.f32 %v21692_v3, %v21691_v27  ;;  %v21694_v48 = vld [vmem:[#allocation251_spill] sm:$0xff]  ;;  %v21695_v60 = vld [vmem:[#allocation62_spill] sm:$0xff]  ;;  %v3820_v39 = vpop.f32.mrf.mxu0  ;;  %v3933_v56 = vpop.f32.mrf.mxu1  ;;  %v21701_v3 = vld [vmem:[#allocation197_spill] sm:$0xff] }
 0x382   :  { %21687 = vst [vmem:[#allocation288_spill] sm:$0xff] %v17425_v44  ;;  %21688 = vst [vmem:[#allocation182_spill] sm:$0xff] %v17427_v23  ;;  %v17439_v20 = vadd.f32 %v21694_v48, %v21693_v30  ;;  %v21696_v36 = vld [vmem:[#allocation319_spill] sm:$0xff]  ;;  %v17449_v41 = vadd.f32 %v3820_v39, %v3305_v55  ;;  %v17451_v27 = vadd.f32 %v3933_v56, %v3418_v42  ;;  %v21702_v52 = vld [vmem:[#allocation252_spill] sm:$0xff] }
 0x383   :  { %v17443_v8 = vadd.f32 %v21696_v36, %v21695_v60  ;;  %v17455_v30 = vadd.f32 %v21702_v52, %v21701_v3  ;;  %v21703_v48 = vld [vmem:[#allocation5_spill] sm:$0xff]  ;;  %v21705_v60 = vld [vmem:[#allocation198_spill] sm:$0xff]  ;;  %v3824_v55 = vpop.f32.mrf.mxu0  ;;  %v3937_v39 = vpop.f32.mrf.mxu1  ;;  %v21717_v10 = vld [vmem:[#allocation63_spill] sm:$0xff] }
 0x384   :  { %21699 = vst [vmem:[#allocation309_spill] sm:$0xff] %v17449_v41  ;;  %21700 = vst [vmem:[#allocation289_spill] sm:$0xff] %v17451_v27  ;;  %v21704_v25 = vld [vmem:[#allocation253_spill] sm:$0xff]  ;;  %v17463_v35 = vadd.f32 %v21706_v49, %v21705_v60  ;;  %v21707_v7 = vld [vmem:[#allocation6_spill] sm:$0xff]  ;;  %v17474_v46 = vadd.f32 %v3824_v55, %v17334_v14  ;;  %v17489_v56 = vadd.f32 %v21718_v6, %v21717_v10 }
 0x385   :  { %v17459_v36 = vadd.f32 %v21704_v25, %v21703_v48  ;;  %v21708_v44 = vld [vmem:[#allocation254_spill] sm:$0xff]  ;;  %v17477_v25 = vadd.f32 %v3937_v39, %v17338_v15  ;;  %v21713_v49 = vld [vmem:[#allocation203_spill] sm:$0xff]  ;;  %v21714_v48 = vld [vmem:[#allocation321_spill] sm:$0xff]  ;;  %v3826_v14 = vpop.f32.mrf.mxu0  ;;  %v3939_v55 = vpop.f32.mrf.mxu1 }
 0x386   :  { %v17467_v13 = vadd.f32 %v21708_v44, %v21707_v7  ;;  %21711 = vst [vmem:[#allocation242_spill] sm:$0xff] %v17474_v46  ;;  %v17481_v60 = vadd.f32 %v21714_v48, %v21713_v49  ;;  %v21715_v44 = vld [vmem:[#allocation7_spill] sm:$0xff]  ;;  %v21719_v41 = vld [vmem:[#allocation64_spill] sm:$0xff]  ;;  %v17500_v52 = vadd.f32 %v3826_v14, %v17342_v53  ;;  %v21729_v28 = vld [vmem:[#allocation65_spill] sm:$0xff] }
 0x387   :  { %21712 = vst [vmem:[#allocation55_spill] sm:$0xff] %v17477_v25  ;;  %v21716_v7 = vld [vmem:[#allocation255_spill] sm:$0xff]  ;;  %v21720_v3 = vld [vmem:[#allocation256_spill] sm:$0xff]  ;;  %v17515_v39 = vadd.f32 %v21730_v16, %v21729_v28  ;;  %v21731_v46 = vld [vmem:[#allocation66_spill] sm:$0xff]  ;;  %v3828_v53 = vpop.f32.mrf.mxu0  ;;  %v3941_v14 = vpop.f32.mrf.mxu1 }
 0x388   :  { %v17485_v23 = vadd.f32 %v21716_v7, %v21715_v44  ;;  %v17493_v27 = vadd.f32 %v21720_v3, %v21719_v41  ;;  %21723 = vst [vmem:[#allocation310_spill] sm:$0xff] %v17500_v52  ;;  %v17503_v44 = vadd.f32 %v3939_v55, %v17346_v58  ;;  %v21725_v6 = vld [vmem:[#allocation204_spill] sm:$0xff]  ;;  %v21726_v10 = vld [vmem:[#allocation323_spill] sm:$0xff]  ;;  %v21732_v48 = vld [vmem:[#allocation81_spill] sm:$0xff]  ;;  %v17526_v49 = vadd.f32 %v3828_v53, %v17358_v63 }
 0x389   :  { %v17507_v7 = vadd.f32 %v21726_v10, %v21725_v6  ;;  %v21727_v41 = vld [vmem:[#allocation8_spill] sm:$0xff]  ;;  %v21728_v3 = vld [vmem:[#allocation79_spill] sm:$0xff]  ;;  %v17519_v25 = vadd.f32 %v21732_v48, %v21731_v46  ;;  %v4522_v16 = vld [vmem:[%s20313_s5] sm:$0xf]  ;;  %v3943_v6 = vpop.f32.mrf.mxu1  ;;  %v4538_v58 = vsub.s32 3, %v17152_v2 }
 0x38a   :  { %21724 = vst [vmem:[#allocation56_spill] sm:$0xff] %v17503_v44  ;;  %v17511_v42 = vadd.f32 %v21728_v3, %v21727_v41  ;;  %21735 = vst [vmem:[#allocation243_spill] sm:$0xff] %v17526_v49  ;;  %v17529_v41 = vadd.f32 %v3941_v14, %v17362_v33  ;;  %v21737_v28 = vld [vmem:[#allocation205_spill] sm:$0xff]  ;;  %v21738_v46 = vld [vmem:[#allocation82_spill] sm:$0xff]  ;;  %v3830_v14 = vpop.f32.mrf.mxu0 }
 0x38b   :  { %v17536_v48 = vadd.f32 %v21738_v46, %v21737_v28  ;;  %v21739_v3 = vld [vmem:[#allocation9_spill] sm:$0xff]  ;;  %v21741_v52 = vld [vmem:[#allocation206_spill] sm:$0xff]  ;;  %v21744_v53 = vld [vmem:[#allocation88_spill] sm:$0xff]  ;;  %v17555_v1 = vadd.f32 %v3830_v14, %v17387_v47  ;;  %v3947_v49 = vpop.f32.mrf.mxu1 }
 0x38c   :  { %21736 = vst [vmem:[#allocation57_spill] sm:$0xff] %v17529_v41  ;;  %v21740_v15 = vld [vmem:[#allocation85_spill] sm:$0xff]  ;;  %v21742_v10 = vld [vmem:[#allocation86_spill] sm:$0xff]  ;;  %v21751_v47 = vld [vmem:[#allocation11_spill] sm:$0xff]  ;;  %v3834_v28 = vpop.f32.mrf.mxu0 }
 0x38d   :  { %v17540_v55 = vadd.f32 %v21740_v15, %v21739_v3  ;;  %v17544_v44 = vadd.f32 %v21742_v10, %v21741_v52  ;;  %v21743_v63 = vld [vmem:[#allocation10_spill] sm:$0xff]  ;;  %21747 = vst [vmem:[#allocation311_spill] sm:$0xff] %v17555_v1  ;;  %v17558_v15 = vadd.f32 %v3943_v6, %v17391_v34  ;;  %v21752_v14 = vld [vmem:[#allocation93_spill] sm:$0xff]  ;;  %v21753_v6 = vld [vmem:[#allocation67_spill] sm:$0xff]  ;;  %v21763_v1 = vsub.s32 0, %v17152_v2 }
 0x38e   :  { %v17548_v33 = vadd.f32 %v21744_v53, %v21743_v63  ;;  %v13100_v52 = vld [vmem:[%s20312_s6 + $0x60] sm:$0xff]   ;;  %v21749_v63 = vld [vmem:[#allocation211_spill] sm:$0xff]  ;;  %v21750_v53 = vld [vmem:[#allocation89_spill] sm:$0xff]  ;;  %v17575_v34 = vadd.f32 %v21752_v14, %v21751_v47  ;;  %v17590_v47 = vadd.f32 %v3834_v28, %v17395_v51  ;;  %v3836_v17 = vpop.f32.mrf.mxu0  ;;  %v13609_v51 = vmov 1983009808  }
 0x38f   :  { %21748 = vst [vmem:[#allocation58_spill] sm:$0xff] %v17558_v15  ;;  %v13101_v10 = vld [vmem:[%s20312_s6 + $0x20] sm:$0xff]   ;;  %v17571_v46 = vadd.f32 %v21750_v53, %v21749_v63  ;;  %12331 = vmatprep.subr.bf16.mxu0 %v13100_v52  ;;  %v21759_v14 = vld [vmem:[#allocation68_spill] sm:$0xff]  ;;  %v3949_v63 = vpop.f32.mrf.mxu1  ;;  %v17605_v31 = vrot.slane %v4522_v16, %v21763_v1  ;;  %v4741_v28 = vunpack.c.l.s4 %v13609_v51  ;;  %v21769_v1 = vld [vmem:[#allocation101_spill] sm:$0xff] }
 0x390   :  { %v13102_v3 = vld [vmem:[%s20312_s6 + $0xe0] sm:$0xff]   ;;  %21757 = vst [vmem:[#allocation244_spill] sm:$0xff] %v17590_v47  ;;  %v21761_v5 = vld [vmem:[#allocation212_spill] sm:$0xff]  ;;  %12332 = vmatpush3.bf16.msra.mxu0 %v13101_v10  ;;  %v21770_v51 = vld [vmem:[#allocation69_spill] sm:$0xff]  ;;  %v3838_v53 = vpop.f32.mrf.mxu0  ;;  %v21772_v47 = vsub.s32 2, %v17152_v2 }
 0x391   :  { %v21754_v18 = vld [vmem:[#allocation94_spill] sm:$0xff]  ;;  %v17601_v37 = vadd.f32 %v21762_v4, %v21761_v5  ;;  %12353 = vmatprep.subr.bf16.mxu1 %v13102_v3  ;;  %v17615_v4 = vadd.f32 %v3949_v63, %v17415_v38  ;;  %v21768_v5 = vld [vmem:[#allocation12_spill] sm:$0xff]  ;;  %v21780_v52 = vld [vmem:[#allocation213_spill] sm:$0xff]  ;;  %v4742_v38 = vunpack.c.0.s8 %v4741_v28 }
 0x392   :  { %v17579_v41 = vadd.f32 %v21754_v18, %v21753_v6  ;;  %v17593_v18 = vadd.f32 %v3947_v49, %v17407_v43  ;;  %v21760_v6 = vld [vmem:[#allocation95_spill] sm:$0xff]  ;;  %12354 = vmatpush3.bf16.msra.mxu1 %v13103_v57  ;;  %v17619_v15 = vadd.f32 %v21769_v1, %v21768_v5  ;;  %v21771_v10 = vld [vmem:[#allocation102_spill] sm:$0xff]  ;;  %v3951_v49 = vpop.f32.mrf.mxu1  ;;  %v17638_v1 = vadd.f32 %v3838_v53, %v17419_v29  ;;  %v21781_v43 = vld [vmem:[#allocation104_spill] sm:$0xff]  ;;  %v3840_v11 = vpop.f32.mrf.mxu0 }
 0x393   :  { %v17597_v26 = vadd.f32 %v21760_v6, %v21759_v14  ;;  %v17612_v6 = vadd.f32 %v3836_v17, %v17411_v45  ;;  %21767 = vst [vmem:[#allocation2_spill] sm:$0xff] %v17615_v4  ;;  %v17623_v3 = vadd.f32 %v21771_v10, %v21770_v51  ;;  %v17627_v14 = vrot.slane %v4522_v16, %v21772_v47  ;;  %v21778_v10 = vld [vmem:[#allocation70_spill] sm:$0xff]  ;;  %v21791_v63 = vld [vmem:[#allocation111_spill] sm:$0xff]  ;;  %v21801_v57 = vld [vmem:[#allocation117_spill] sm:$0xff] }
 0x394   :  { %21758 = vst [vmem:[#allocation187_spill] sm:$0xff] %v17593_v18  ;;  %v21773_v17 = vsub.s32 1, %v17152_v2  ;;  %21776 = vst [vmem:[#allocation188_spill] sm:$0xff] %v17638_v1  ;;  %v17641_v51 = vadd.f32 %v3951_v49, %v17431_v59  ;;  %v21779_v18 = vld [vmem:[#allocation103_spill] sm:$0xff]  ;;  %v3953_v22 = vpop.f32.mrf.mxu1  ;;  %v17658_v49 = vadd.f32 %v3840_v11, %v17435_v21  ;;  %v21788_v4 = vld [vmem:[#allocation214_spill] sm:$0xff]  ;;  %v3844_v11 = vpop.f32.mrf.mxu0 }
 0x395   :  { %21766 = vst [vmem:[#allocation312_spill] sm:$0xff] %v17612_v6  ;;  %v17645_v47 = vadd.f32 %v21779_v18, %v21778_v10  ;;  %v17651_v6 = vrot.slane %v4522_v16, %v4538_v58  ;;  %v17661_v18 = vadd.f32 %v3953_v22, %v17439_v20  ;;  %v21786_v10 = vld [vmem:[#allocation13_spill] sm:$0xff]  ;;  %v21789_v28 = vld [vmem:[#allocation110_spill] sm:$0xff]  ;;  %v21793_v59 = vld [vmem:[#allocation112_spill] sm:$0xff] }
 0x396   :  { %v17631_v45 = vrot.slane %v4522_v16, %v21773_v17  ;;  %21777 = vst [vmem:[#allocation245_spill] sm:$0xff] %v17641_v51  ;;  %v17649_v17 = vadd.f32 %v21781_v43, %v21780_v52  ;;  %21784 = vst [vmem:[#allocation290_spill] sm:$0xff] %v17658_v49  ;;  %v21787_v43 = vld [vmem:[#allocation109_spill] sm:$0xff]  ;;  %v17669_v58 = vadd.f32 %v21789_v28, %v21788_v4  ;;  %v21790_v16 = vld [vmem:[#allocation14_spill] sm:$0xff]  ;;  %v3957_v21 = vpop.f32.mrf.mxu1 }
 0x397   :  { %21785 = vst [vmem:[#allocation313_spill] sm:$0xff] %v17661_v18  ;;  %v17665_v52 = vadd.f32 %v21787_v43, %v21786_v10  ;;  %v17673_v29 = vadd.f32 %v21791_v63, %v21790_v16  ;;  %v21792_v1 = vld [vmem:[#allocation217_spill] sm:$0xff]  ;;  %v17687_v28 = vadd.f32 %v3844_v11, %v17443_v8  ;;  %v17690_v63 = vadd.f32 %v3957_v21, %v17455_v30  ;;  %v21799_v16 = vld [vmem:[#allocation116_spill] sm:$0xff]  ;;  %v21800_v5 = vld [vmem:[#allocation71_spill] sm:$0xff]  ;;  %v3846_v8 = vpop.f32.mrf.mxu0 }
 0x398   :  { %v17677_v51 = vadd.f32 %v21793_v59, %v21792_v1  ;;  %v13104_v22 = vld [vmem:[%s20312_s6 + $0x58] sm:$0xff]   ;;  %v21798_v59 = vld [vmem:[#allocation15_spill] sm:$0xff]  ;;  %v17701_v10 = vadd.f32 %v21801_v57, %v21800_v5  ;;  %v21802_v49 = vld [vmem:[#allocation72_spill] sm:$0xff]  ;;  %v3959_v11 = vpop.f32.mrf.mxu1  ;;  %v17708_v30 = vsub.s32 %v4742_v38, %v17152_v2  ;;  %v17715_v20 = vadd.f32 %v3846_v8, %v17459_v36 }
 0x399   :  { %21796 = vst [vmem:[#allocation189_spill] sm:$0xff] %v17687_v28  ;;  %21797 = vst [vmem:[#allocation246_spill] sm:$0xff] %v17690_v63  ;;  %v13105_v1 = vld [vmem:[%s20312_s6 + $0x18] sm:$0xff]   ;;  %v17697_v53 = vadd.f32 %v21799_v16, %v21798_v59  ;;  %v21803_v43 = vld [vmem:[#allocation118_spill] sm:$0xff]  ;;  %12333 = vmatprep.subr.bf16.mxu0 %v13104_v22  ;;  %v17718_v57 = vadd.f32 %v3959_v11, %v17463_v35  ;;  %v3848_v8 = vpop.f32.mrf.mxu0 }
 0x39a   :  { %v17705_v18 = vadd.f32 %v21803_v43, %v21802_v49  ;;  %21807 = vst [vmem:[#allocation314_spill] sm:$0xff] %v17715_v20  ;;  %12334 = vmatpush3.bf16.msra.mxu0 %v13105_v1  ;;  %v21809_v5 = vld [vmem:[#allocation218_spill] sm:$0xff]  ;;  %v21810_v49 = vld [vmem:[#allocation119_spill] sm:$0xff]  ;;  %v21812_v38 = vld [vmem:[#allocation16_spill] sm:$0xff]  ;;  %v3961_v35 = vpop.f32.mrf.mxu1 }
 0x39b   :  { %21808 = vst [vmem:[#allocation190_spill] sm:$0xff] %v17718_v57  ;;  %v17722_v43 = vadd.f32 %v21810_v49, %v21809_v5  ;;  %v21813_v2 = vld [vmem:[#allocation123_spill] sm:$0xff]  ;;  %v21816_v4 = vld [vmem:[#allocation124_spill] sm:$0xff]  ;;  %v21818_v16 = vld [vmem:[#allocation74_spill] sm:$0xff]  ;;  %v17747_v49 = vadd.f32 %v3848_v8, %v17467_v13  ;;  %v3850_v13 = vpop.f32.mrf.mxu0 }
 0x39c   :  { %21804 = vst [vmem:[#allocation291_spill] sm:$0xff] %v17705_v18  ;;  %v17726_v22 = vadd.f32 %v21813_v2, %v21812_v38  ;;  %v21815_v18 = vld [vmem:[#allocation73_spill] sm:$0xff]  ;;  %v21826_v38 = vld [vmem:[#allocation126_spill] sm:$0xff]  ;;  %v3963_v8 = vpop.f32.mrf.mxu1 }
 0x39d   :  { %21811 = vst [vmem:[#allocation247_spill] sm:$0xff] %v17722_v43  ;;  %v17730_v28 = vadd.f32 %v21816_v4, %v21815_v18  ;;  %v21819_v63 = vld [vmem:[#allocation125_spill] sm:$0xff]  ;;  %21823 = vst [vmem:[#allocation248_spill] sm:$0xff] %v17747_v49  ;;  %v21830_v43 = vld [vmem:[#allocation168_spill] sm:$0xff] }
 0x39e   :  { %21814 = vst [vmem:[#allocation292_spill] sm:$0xff] %v17726_v22  ;;  %v17734_v36 = vadd.f32 %v21819_v63, %v21818_v16  ;;  %v13106_v1 = vld [vmem:[%s20312_s6 + $0xd8] sm:$0xff]   ;;  %v17750_v63 = vadd.f32 %v3961_v35, %v17481_v60  ;;  %v21825_v16 = vld [vmem:[#allocation219_spill] sm:$0xff]  ;;  %v21829_v22 = vld [vmem:[#allocation220_spill] sm:$0xff] }
 0x39f   :  { %21817 = vst [vmem:[#allocation315_spill] sm:$0xff] %v17730_v28  ;;  %v13107_v11 = vld [vmem:[%s20312_s6 + $0x98] sm:$0xff]   ;;  %v17754_v59 = vadd.f32 %v21826_v38, %v21825_v16  ;;  %v17762_v5 = vadd.f32 %v21830_v43, %v21829_v22  ;;  %v21831_v20 = vld [vmem:[#allocation18_spill] sm:$0xff]  ;;  %12355 = vmatprep.subr.bf16.mxu1 %v13106_v1  ;;  %v21842_v38 = vld [vmem:[#allocation75_spill] sm:$0xff]  ;;  %v3967_v16 = vpop.f32.mrf.mxu1 }
 0x3a0   :  { %21820 = vst [vmem:[#allocation195_spill] sm:$0xff] %v17734_v36  ;;  %21824 = vst [vmem:[#allocation3_spill] sm:$0xff] %v17750_v63  ;;  %v21827_v21 = vld [vmem:[#allocation17_spill] sm:$0xff]  ;;  %v21828_v36 = vld [vmem:[#allocation167_spill] sm:$0xff]  ;;  %12356 = vmatpush3.bf16.msra.mxu1 %v13107_v11  ;;  %v3854_v11 = vpop.f32.mrf.mxu0 }
 0x3a1   :  { %v17758_v28 = vadd.f32 %v21828_v36, %v21827_v21  ;;  %v21832_v4 = vld [vmem:[#allocation169_spill] sm:$0xff]  ;;  %v17773_v21 = vadd.f32 %v3850_v13, %v17485_v23  ;;  %v17776_v36 = vadd.f32 %v3963_v8, %v17489_v56  ;;  %v21838_v22 = vld [vmem:[#allocation170_spill] sm:$0xff]  ;;  %v21845_v13 = vld [vmem:[#allocation76_spill] sm:$0xff]  ;;  %v17805_v18 = vadd.f32 %v3854_v11, %v17493_v27 }
 0x3a2   :  { %v17766_v57 = vadd.f32 %v21832_v4, %v21831_v20  ;;  %v13108_v20 = vld [vmem:[%s20312_s6 + $0x50] sm:$0xff]   ;;  %v21837_v43 = vld [vmem:[#allocation221_spill] sm:$0xff]  ;;  %v21839_v4 = vld [vmem:[#allocation19_spill] sm:$0xff] }
 0x3a3   :  { %21835 = vst [vmem:[#allocation316_spill] sm:$0xff] %v17773_v21  ;;  %21836 = vst [vmem:[#allocation59_spill] sm:$0xff] %v17776_v36  ;;  %v17783_v1 = vadd.f32 %v21838_v22, %v21837_v43  ;;  %v21840_v35 = vld [vmem:[#allocation173_spill] sm:$0xff]  ;;  %v21843_v63 = vld [vmem:[#allocation174_spill] sm:$0xff]  ;;  %12335 = vmatprep.subr.bf16.mxu0 %v13108_v20 }
 0x3a4   :  { %v17787_v49 = vadd.f32 %v21840_v35, %v21839_v4  ;;  %v17791_v23 = vadd.f32 %v21843_v63, %v21842_v38  ;;  %v21846_v56 = vld [vmem:[#allocation177_spill] sm:$0xff]  ;;  %v13109_v60 = vld [vmem:[%s20312_s6 + $0x10] sm:$0xff]   ;;  %21850 = vst [vmem:[#allocation196_spill] sm:$0xff] %v17805_v18  ;;  %v17808_v63 = vadd.f32 %v3967_v16, %v17507_v7  ;;  %v21852_v4 = vld [vmem:[#allocation222_spill] sm:$0xff] }
 0x3a5   :  { %v17795_v8 = vadd.f32 %v21846_v56, %v21845_v13  ;;  %v13110_v38 = vld [vmem:[%s20312_s6 + $0xd0] sm:$0xff]   ;;  %v13112_v56 = vld [vmem:[%s20312_s6 + $0x48] sm:$0xff]   ;;  %v21853_v22 = vld [vmem:[#allocation178_spill] sm:$0xff]  ;;  %12336 = vmatpush3.bf16.msra.mxu0 %v13109_v60 }
 0x3a6   :  { %21841 = vst [vmem:[#allocation249_spill] sm:$0xff] %v17787_v49  ;;  %21844 = vst [vmem:[#allocation60_spill] sm:$0xff] %v17791_v23  ;;  %v13111_v13 = vld [vmem:[%s20312_s6 + $0x90] sm:$0xff]   ;;  %v17821_v27 = vadd.f32 %v21853_v22, %v21852_v4  ;;  %v21856_v7 = vld [vmem:[#allocation183_spill] sm:$0xff]  ;;  %v3969_v23 = vpop.f32.mrf.mxu1  ;;  %12357 = vmatprep.subr.bf16.mxu1 %v13110_v38  ;;  %12337 = vmatprep.subr.bf16.mxu0 %v13112_v56 }
 0x3a7   :  { %21847 = vst [vmem:[#allocation317_spill] sm:$0xff] %v17795_v8  ;;  %21851 = vst [vmem:[#allocation250_spill] sm:$0xff] %v17808_v63  ;;  %v21855_v11 = vld [vmem:[#allocation20_spill] sm:$0xff]  ;;  %v21858_v20 = vld [vmem:[#allocation77_spill] sm:$0xff]  ;;  %v3856_v8 = vpop.f32.mrf.mxu0  ;;  %12358 = vmatpush3.bf16.msra.mxu1 %v13111_v13 }
 0x3a8   :  { %21854 = vst [vmem:[#allocation4_spill] sm:$0xff] %v17821_v27  ;;  %v17825_v16 = vadd.f32 %v21856_v7, %v21855_v11  ;;  %v21859_v36 = vld [vmem:[#allocation184_spill] sm:$0xff]  ;;  %v21861_v21 = vld [vmem:[#allocation78_spill] sm:$0xff]  ;;  %v21862_v43 = vld [vmem:[#allocation185_spill] sm:$0xff] }
 0x3a9   :  { %v17829_v35 = vadd.f32 %v21859_v36, %v21858_v20  ;;  %v17833_v2 = vadd.f32 %v21862_v43, %v21861_v21  ;;  %v13113_v22 = vld [vmem:[%s20312_s6 + $0x8] sm:$0xff]   ;;  %v17846_v21 = vadd.f32 %v3856_v8, %v17511_v42  ;;  %v17849_v43 = vadd.f32 %v3969_v23, %v17515_v39  ;;  %v21869_v7 = vld [vmem:[#allocation186_spill] sm:$0xff]  ;;  %v21871_v20 = vld [vmem:[#allocation21_spill] sm:$0xff]  ;;  %v3858_v38 = vpop.f32.mrf.mxu0  ;;  %v3971_v36 = vpop.f32.mrf.mxu1 }
 0x3aa   :  { %21857 = vst [vmem:[#allocation318_spill] sm:$0xff] %v17825_v16  ;;  %v13114_v4 = vld [vmem:[%s20312_s6 + $0xc8] sm:$0xff]   ;;  %v21874_v8 = vld [vmem:[#allocation224_spill] sm:$0xff]  ;;  %v13117_v11 = vld [vmem:[%s20312_s6] sm:$0xff]   ;;  %v17883_v13 = vadd.f32 %v3971_v36, %v17536_v48  ;;  %12338 = vmatpush3.bf16.msra.mxu0 %v13113_v22 }
 0x3ab   :  { %21860 = vst [vmem:[#allocation61_spill] sm:$0xff] %v17829_v35  ;;  %21863 = vst [vmem:[#allocation251_spill] sm:$0xff] %v17833_v2  ;;  %v13115_v60 = vld [vmem:[%s20312_s6 + $0x88] sm:$0xff]   ;;  %v13116_v2 = vld [vmem:[%s20312_s6 + $0x40] sm:$0xff]   ;;  %12359 = vmatprep.subr.bf16.mxu1 %v13114_v4  ;;  %v3973_v48 = vpop.f32.mrf.mxu1 }
 0x3ac   :  { %21866 = vst [vmem:[#allocation62_spill] sm:$0xff] %v17846_v21  ;;  %21867 = vst [vmem:[#allocation319_spill] sm:$0xff] %v17849_v43  ;;  %v21868_v35 = vld [vmem:[#allocation223_spill] sm:$0xff]  ;;  %v21875_v39 = vld [vmem:[#allocation192_spill] sm:$0xff]  ;;  %12339 = vmatprep.subr.bf16.mxu0 %v13116_v2  ;;  %12360 = vmatpush3.bf16.msra.mxu1 %v13115_v60 }
 0x3ad   :  { %v17859_v18 = vadd.f32 %v21869_v7, %v21868_v35  ;;  %v21872_v63 = vld [vmem:[#allocation191_spill] sm:$0xff]  ;;  %v17867_v23 = vadd.f32 %v21875_v39, %v21874_v8  ;;  %v13118_v35 = vld [vmem:[%s20312_s6 + $0xc0] sm:$0xff]   ;;  %v17880_v8 = vadd.f32 %v3858_v38, %v17519_v25  ;;  %21880 = vst [vmem:[#allocation198_spill] sm:$0xff] %v17883_v13  ;;  %v21882_v39 = vld [vmem:[#allocation193_spill] sm:$0xff]  ;;  %v3860_v38 = vpop.f32.mrf.mxu0 }
 0x3ae   :  { %v17863_v42 = vadd.f32 %v21872_v63, %v21871_v20  ;;  %v21881_v56 = vld [vmem:[#allocation22_spill] sm:$0xff]  ;;  %v21885_v49 = vld [vmem:[#allocation293_spill] sm:$0xff]  ;;  %v21886_v63 = vld [vmem:[#allocation199_spill] sm:$0xff]  ;;  %12361 = vmatprep.subr.bf16.mxu1 %v13118_v35  ;;  %12340 = vmatpush3.bf16.msra.mxu0 %v13117_v11 }
 0x3af   :  { %21870 = vst [vmem:[#allocation197_spill] sm:$0xff] %v17859_v18  ;;  %21876 = vst [vmem:[#allocation5_spill] sm:$0xff] %v17867_v23  ;;  %v17887_v23 = vadd.f32 %v21882_v39, %v21881_v56  ;;  %v21883_v18 = vld [vmem:[#allocation225_spill] sm:$0xff]  ;;  %v21884_v16 = vld [vmem:[#allocation194_spill] sm:$0xff]  ;;  %v17895_v21 = vadd.f32 %v21886_v63, %v21885_v49  ;;  %v17909_v49 = vadd.f32 %v3860_v38, %v17540_v55  ;;  %v4010_v38 = vpop.f32.mrf.mxu0 }
 0x3b0   :  { %21873 = vst [vmem:[#allocation252_spill] sm:$0xff] %v17863_v42  ;;  %21879 = vst [vmem:[#allocation253_spill] sm:$0xff] %v17880_v8  ;;  %v17891_v27 = vadd.f32 %v21884_v16, %v21883_v18  ;;  %v21887_v42 = vld [vmem:[#allocation226_spill] sm:$0xff]  ;;  %v21888_v43 = vld [vmem:[#allocation200_spill] sm:$0xff]  ;;  %v17912_v63 = vadd.f32 %v3973_v48, %v17544_v44  ;;  %v4123_v44 = vpop.f32.mrf.mxu1 }
 0x3b1   :  { %v17899_v25 = vadd.f32 %v21888_v43, %v21887_v42  ;;  %v13119_v4 = vld [vmem:[%s20312_s6 + $0x80] sm:$0xff]   ;;  %21892 = vst [vmem:[#allocation6_spill] sm:$0xff] %v17909_v49  ;;  %v21895_v42 = vld [vmem:[#allocation201_spill] sm:$0xff]  ;;  %v21896_v39 = vld [vmem:[#allocation227_spill] sm:$0xff] }
 0x3b2   :  { %21893 = vst [vmem:[#allocation254_spill] sm:$0xff] %v17912_v63  ;;  %v21894_v43 = vld [vmem:[#allocation294_spill] sm:$0xff]  ;;  %v21899_v56 = vld [vmem:[#allocation207_spill] sm:$0xff]  ;;  %v21901_v16 = vld [vmem:[#allocation228_spill] sm:$0xff]  ;;  %12362 = vmatpush3.bf16.msra.mxu1 %v13119_v4 }
 0x3b3   :  { %21889 = vst [vmem:[#allocation320_spill] sm:$0xff] %v17899_v25  ;;  %v17916_v22 = vadd.f32 %v21895_v42, %v21894_v43  ;;  %v21897_v20 = vld [vmem:[#allocation202_spill] sm:$0xff]  ;;  %v21898_v25 = vld [vmem:[#allocation295_spill] sm:$0xff]  ;;  %v21902_v13 = vld [vmem:[#allocation208_spill] sm:$0xff] }
 0x3b4   :  { %v17920_v7 = vadd.f32 %v21897_v20, %v21896_v39  ;;  %v17924_v8 = vadd.f32 %v21899_v56, %v21898_v25  ;;  %v17928_v55 = vadd.f32 %v21902_v13, %v21901_v16  ;;  %v4206_v20 = vadd.f32 %v4010_v38, %v17548_v33  ;;  %v21906_v25 = vld [vmem:[#allocation296_spill] sm:$0xff]  ;;  %v21907_v56 = vld [vmem:[#allocation209_spill] sm:$0xff]  ;;  %v21909_v16 = vld [vmem:[#allocation210_spill] sm:$0xff]  ;;  %v4012_v33 = vpop.f32.mrf.mxu0  ;;  %v4125_v38 = vpop.f32.mrf.mxu1 }
 0x3b5   :  { %v4208_v39 = vadd.f32 %v4123_v44, %v17571_v46  ;;  %v17938_v18 = vadd.f32 %v21907_v56, %v21906_v25  ;;  %v21908_v13 = vld [vmem:[#allocation229_spill] sm:$0xff]  ;;  %v21913_v48 = vld [vmem:[#allocation230_spill] sm:$0xff]  ;;  %v21914_v49 = vld [vmem:[#allocation216_spill] sm:$0xff] }
 0x3b6   :  { %21900 = vst [vmem:[#allocation203_spill] sm:$0xff] %v17924_v8  ;;  %21903 = vst [vmem:[#allocation321_spill] sm:$0xff] %v17928_v55  ;;  %v17942_v36 = vadd.f32 %v21909_v16, %v21908_v13  ;;  %v21910_v60 = vld [vmem:[#allocation297_spill] sm:$0xff]  ;;  %v21911_v55 = vld [vmem:[#allocation215_spill] sm:$0xff]  ;;  %v17950_v42 = vadd.f32 %v21914_v49, %v21913_v48  ;;  %v4207_v13 = vadd.f32 %v4012_v33, %v17575_v34 }
 0x3b7   :  { %v17946_v8 = vadd.f32 %v21911_v55, %v21910_v60  ;;  %v13120_v46 = vld [vmem:[%s20312_s6 + $0x178] sm:$0xff]   ;;  %v21916_v35 = vld [vmem:[#allocation139_spill] sm:$0xff]  ;;  %v4209_v55 = vadd.f32 %v4125_v38, %v17579_v41  ;;  %v21918_v16 = vld [vmem:[#allocation298_spill] sm:$0xff]  ;;  %v21924_v34 = vmax.f32 %v21598_v19, %v17179_v62 }
 0x3b8   :  { %21915 = vst [vmem:[#allocation255_spill] sm:$0xff] %v17950_v42  ;;  %v4334_v44 = vmax.f32 %v21916_v35, %v4206_v20  ;;  %v21917_v25 = vld [vmem:[#allocation257_spill] sm:$0xff]  ;;  %v21919_v60 = vld [vmem:[#allocation324_spill] sm:$0xff]  ;;  %v21920_v49 = vld [vmem:[#allocation231_spill] sm:$0xff]  ;;  %v4127_v20 = vpop.f32.mrf.mxu1  ;;  %12369 = vmatprep.subr.bf16.mxu0 %v13120_v46 }
 0x3b9   :  { %21912 = vst [vmem:[#allocation7_spill] sm:$0xff] %v17946_v8  ;;  %v4336_v56 = vmax.f32 %v21917_v25, %v4208_v39  ;;  %v17961_v63 = vadd.f32 %v21919_v60, %v21918_v16  ;;  %v21921_v48 = vld [vmem:[#allocation325_spill] sm:$0xff]  ;;  %v21922_v11 = vld [vmem:[#allocation299_spill] sm:$0xff]  ;;  %v21923_v2 = vld [vmem:[#allocation326_spill] sm:$0xff]  ;;  %v4014_v8 = vpop.f32.mrf.mxu0  ;;  %v21925_v39 = vmax.f32 %v21599_v54, %v17181_v40  ;;  %v4216_v40 = vadd.f32 %v4127_v20, %v17601_v37 }
 0x3ba   :  { %v17965_v43 = vadd.f32 %v21921_v48, %v21920_v49  ;;  %v17969_v42 = vadd.f32 %v21923_v2, %v21922_v11  ;;  %v4458_v41 = vmax.f32 %v21924_v34, %v4334_v44  ;;  %v21926_v38 = vld [vmem:[#allocation140_spill] sm:$0xff]  ;;  %v21927_v25 = vld [vmem:[#allocation258_spill] sm:$0xff]  ;;  %v13122_v2 = vld [vmem:[%s20312_s6 + $0x1f8] sm:$0xff]   ;;  %v4214_v62 = vadd.f32 %v4014_v8, %v17597_v26  ;;  %v4129_v44 = vpop.f32.mrf.mxu1 }
 0x3bb   :  { %v4460_v33 = vmax.f32 %v21925_v39, %v4336_v56  ;;  %v4335_v35 = vmax.f32 %v21926_v38, %v4207_v13  ;;  %v4337_v16 = vmax.f32 %v21927_v25, %v4209_v55  ;;  %v21928_v60 = vld [vmem:[#allocation232_spill] sm:$0xff]  ;;  %v21929_v49 = vld [vmem:[#allocation327_spill] sm:$0xff]  ;;  %v4016_v54 = vpop.f32.mrf.mxu0  ;;  %v21932_v55 = vmax.f32 %v15722_v32, %v17191_v61  ;;  %12391 = vmatprep.subr.bf16.mxu1 %v13122_v2  ;;  %v21934_v38 = vld [vmem:[#allocation141_spill] sm:$0xff] }
 0x3bc   :  { %v17984_v4 = vadd.f32 %v21929_v49, %v21928_v60  ;;  %v21930_v46 = vld [vmem:[#allocation300_spill] sm:$0xff]  ;;  %v4544_v56 = vadd.f32 %v17605_v31, %v4458_v41  ;;  %v21933_v34 = vmax.f32 %v15724_v9, %v17193_v12  ;;  %v4342_v25 = vmax.f32 %v21934_v38, %v4214_v62  ;;  %v21935_v26 = vld [vmem:[#allocation259_spill] sm:$0xff]  ;;  %v4133_v60 = vpop.f32.mrf.mxu1  ;;  %v21945_v38 = vld [vmem:[#allocation341_spill] sm:$0xff] }
 0x3bd   :  { %v21931_v48 = vld [vmem:[#allocation328_spill] sm:$0xff]  ;;  %v4546_v13 = vadd.f32 %v17627_v14, %v4460_v33  ;;  %v4459_v11 = vmax.f32 %v21932_v55, %v4335_v35  ;;  %v4344_v8 = vmax.f32 %v21935_v26, %v4216_v40  ;;  %v4215_v37 = vadd.f32 %v4016_v54, %v17619_v15  ;;  %v4020_v41 = vpop.f32.mrf.mxu0  ;;  %v21937_v35 = vld [vmem:[#allocation83_spill] sm:$0xff] }
 0x3be   :  { %v17988_v19 = vadd.f32 %v21931_v48, %v21930_v46  ;;  %v4461_v39 = vmax.f32 %v21933_v34, %v4337_v16  ;;  %v4217_v20 = vadd.f32 %v4129_v44, %v17623_v3  ;;  %v4608_v33 = vmax.f32 %v4544_v56, 0.0  ;;  %v21939_v46 = vld [vmem:[#allocation142_spill] sm:$0xff]  ;;  %v21940_v48 = vld [vmem:[#allocation260_spill] sm:$0xff]  ;;  %v4135_v40 = vpop.f32.mrf.mxu1 }
 0x3bf   :  { %v4610_v49 = vmax.f32 %v4546_v13, 0.0  ;;  %v4545_v32 = vadd.f32 %v17631_v45, %v4459_v11  ;;  %v21936_v9 = vmax.f32 %v15732_v0, %v17203_v50  ;;  %v21938_v16 = vmax.f32 %v15734_v24, %v21937_v35  ;;  %v4022_v62 = vpop.f32.mrf.mxu0  ;;  %v21941_v50 = vld [vmem:[#allocation87_spill] sm:$0xff]  ;;  %v21942_v11 = vld [vmem:[#allocation84_spill] sm:$0xff] }
 0x3c0   :  { %v4547_v61 = vadd.f32 %v17651_v6, %v4461_v39  ;;  %v4343_v15 = vmax.f32 %v21939_v46, %v4215_v37  ;;  %v4345_v3 = vmax.f32 %v21940_v48, %v4217_v20  ;;  %v4222_v56 = vadd.f32 %v4020_v41, %v17645_v47  ;;  %v21944_v39 = vld [vmem:[#allocation23_spill] sm:$0xff]  ;;  %v4137_v37 = vpop.f32.mrf.mxu1  ;;  %v21948_v41 = vld [vmem:[#allocation261_spill] sm:$0xff]  ;;  %v21949_v48 = vld [vmem:[#allocation24_spill] sm:$0xff] }
 0x3c1   :  { %v4462_v12 = vmax.f32 %v21936_v9, %v4342_v25  ;;  %v4464_v2 = vmax.f32 %v21938_v16, %v4344_v8  ;;  %v4609_v54 = vmax.f32 %v4545_v32, 0.0  ;;  %v4224_v13 = vadd.f32 %v4133_v60, %v17649_v17  ;;  %v4024_v8 = vpop.f32.mrf.mxu0 }
 0x3c2   :  { %v4611_v44 = vmax.f32 %v4547_v61, 0.0  ;;  %v21943_v24 = vmax.f32 %v21941_v50, %v21942_v11  ;;  %v21946_v25 = vmax.f32 %v21944_v39, %v21945_v38  ;;  %v21947_v61 = vld [vmem:[#allocation143_spill] sm:$0xff]  ;;  %v4223_v50 = vadd.f32 %v4022_v62, %v17665_v52  ;;  %v21955_v39 = vld [vmem:[#allocation233_spill] sm:$0xff]  ;;  %v21962_v62 = vld [vmem:[#allocation262_spill] sm:$0xff] }
 0x3c3   :  { %v4548_v55 = vadd.f32 %v17605_v31, %v4462_v12  ;;  %v4550_v0 = vadd.f32 %v17627_v14, %v4464_v2  ;;  %v11732_v20 = vpack.c.bf16 %v4609_v54, %v4608_v33  ;;  %v4350_v47 = vmax.f32 %v21947_v61, %v4222_v56  ;;  %v4026_v16 = vpop.f32.mrf.mxu0  ;;  %v4139_v2 = vpop.f32.mrf.mxu1  ;;  %v21952_v54 = vld [vmem:[#allocation90_spill] sm:$0xff]  ;;  %v21956_v38 = vld [vmem:[#allocation329_spill] sm:$0xff] }
 0x3c4   :  { %v4463_v34 = vmax.f32 %v21943_v24, %v4343_v15  ;;  %v4465_v26 = vmax.f32 %v21946_v25, %v4345_v3  ;;  %v11734_v32 = vpack.c.bf16 %v4611_v44, %v4610_v49  ;;  %v4352_v17 = vmax.f32 %v21948_v41, %v4224_v13  ;;  %v21950_v3 = vld [vmem:[#allocation342_spill] sm:$0xff]  ;;  %v21953_v44 = vld [vmem:[#allocation343_spill] sm:$0xff] }
 0x3c5   :  { %v4612_v60 = vmax.f32 %v4548_v55, 0.0  ;;  %v4614_v9 = vmax.f32 %v4550_v0, 0.0  ;;  %v4746_v46 = vrot.slane %v11732_v20, %v17708_v30  ;;  %v21951_v33 = vmax.f32 %v21949_v48, %v21950_v3  ;;  %v4030_v24 = vpop.f32.mrf.mxu0  ;;  %v21959_v20 = vld [vmem:[#allocation330_spill] sm:$0xff]  ;;  %v21964_v3 = vld [vmem:[#allocation331_spill] sm:$0xff] }
 0x3c6   :  { %v4549_v12 = vadd.f32 %v17631_v45, %v4463_v34  ;;  %v4551_v35 = vadd.f32 %v17651_v6, %v4465_v26  ;;  %v4760_v15 = vrot.slane %v11734_v32, %v17708_v30  ;;  %v21954_v56 = vmax.f32 %v21952_v54, %v21953_v44  ;;  %v4143_v34 = vpop.f32.mrf.mxu1  ;;  %v21958_v26 = vld [vmem:[#allocation301_spill] sm:$0xff]  ;;  %v21963_v48 = vld [vmem:[#allocation234_spill] sm:$0xff]  ;;  %v21967_v44 = vld [vmem:[#allocation332_spill] sm:$0xff] }
 0x3c7   :  { %v4466_v49 = vmax.f32 %v21951_v33, %v4350_v47  ;;  %v4225_v11 = vadd.f32 %v4135_v40, %v17669_v58  ;;  %v18040_v25 = vadd.f32 %v21956_v38, %v21955_v39  ;;  %v18044_v32 = vadd.f32 %v21959_v20, %v21958_v26  ;;  %v4032_v40 = vpop.f32.mrf.mxu0  ;;  %v21966_v54 = vld [vmem:[#allocation302_spill] sm:$0xff]  ;;  %v21973_v38 = vld [vmem:[#allocation345_spill] sm:$0xff] }
 0x3c8   :  { %v4468_v13 = vmax.f32 %v21954_v56, %v4352_v17  ;;  %v4613_v55 = vmax.f32 %v4549_v12, 0.0  ;;  %v4615_v0 = vmax.f32 %v4551_v35, 0.0  ;;  %v18046_v61 = vcombine.low %v4746_v46, %v4760_v15  ;;  %v21961_v12 = vld [vmem:[#allocation144_spill] sm:$0xff]  ;;  %v4145_v35 = vpop.f32.mrf.mxu1 }
 0x3c9   :  { %21957 = vst [vmem:[#allocation63_spill] sm:$0xff] %v18040_v25  ;;  %21960 = vst [vmem:[#allocation322_spill] sm:$0xff] %v18044_v32  ;;  %v18048_v47 = vcombine.high %v4746_v46, %v4760_v15  ;;  %v4351_v52 = vmax.f32 %v21961_v12, %v4223_v50  ;;  %v4353_v58 = vmax.f32 %v21962_v62, %v4225_v11  ;;  %v21969_v15 = vld [vmem:[#allocation91_spill] sm:$0xff]  ;;  %v21972_v11 = vld [vmem:[#allocation25_spill] sm:$0xff]  ;;  %v4034_v12 = vpop.f32.mrf.mxu0 }
 0x3ca   :  { %v11733_v41 = vpack.c.bf16 %v4613_v55, %v4612_v60  ;;  %v11735_v17 = vpack.c.bf16 %v4615_v0, %v4614_v9  ;;  %v18054_v33 = vadd.f32 %v21964_v3, %v21963_v48  ;;  %v18058_v56 = vadd.f32 %v21967_v44, %v21966_v54  ;;  %v21970_v55 = vld [vmem:[#allocation344_spill] sm:$0xff]  ;;  %v4147_v62 = vpop.f32.mrf.mxu1  ;;  %v21985_v32 = vld [vmem:[#allocation27_spill] sm:$0xff] }
 0x3cb   :  { %v4552_v39 = vadd.f32 %v17605_v31, %v4466_v49  ;;  %v4554_v46 = vadd.f32 %v17627_v14, %v4468_v13  ;;  %v21971_v0 = vmax.f32 %v21969_v15, %v21970_v55  ;;  %v21974_v26 = vmax.f32 %v21972_v11, %v21973_v38  ;;  %v4036_v44 = vpop.f32.mrf.mxu0  ;;  %v21975_v15 = vld [vmem:[#allocation145_spill] sm:$0xff] }
 0x3cc   :  { %21965 = vst [vmem:[#allocation64_spill] sm:$0xff] %v18054_v33  ;;  %21968 = vst [vmem:[#allocation256_spill] sm:$0xff] %v18058_v56  ;;  %v4753_v60 = vrot.slane %v11733_v41, %v17708_v30  ;;  %v4767_v9 = vrot.slane %v11735_v17, %v17708_v30  ;;  %v4230_v48 = vadd.f32 %v4024_v8, %v17673_v29  ;;  %v21977_v8 = vld [vmem:[#allocation146_spill] sm:$0xff] }
 0x3cd   :  { %v4467_v50 = vmax.f32 %v21971_v0, %v4351_v52  ;;  %v4469_v20 = vmax.f32 %v21974_v26, %v4353_v58  ;;  %v4232_v49 = vadd.f32 %v4137_v37, %v17677_v51  ;;  %v4231_v13 = vadd.f32 %v4026_v16, %v17697_v53  ;;  %v4149_v58 = vpop.f32.mrf.mxu1  ;;  %v21976_v0 = vld [vmem:[#allocation263_spill] sm:$0xff]  ;;  %v21978_v37 = vld [vmem:[#allocation264_spill] sm:$0xff] }
 0x3ce   :  { %v4233_v41 = vadd.f32 %v4139_v2, %v17701_v10  ;;  %v18074_v3 = vcombine.low %v4753_v60, %v4767_v9  ;;  %v18076_v17 = vcombine.high %v4753_v60, %v4767_v9  ;;  %v4358_v55 = vmax.f32 %v21975_v15, %v4230_v48  ;;  %v21979_v60 = vld [vmem:[#allocation26_spill] sm:$0xff]  ;;  %v21982_v26 = vld [vmem:[#allocation92_spill] sm:$0xff] }
 0x3cf   :  { %v4553_v52 = vadd.f32 %v17631_v45, %v4467_v50  ;;  %v4555_v54 = vadd.f32 %v17651_v6, %v4469_v20  ;;  %v4360_v29 = vmax.f32 %v21976_v0, %v4232_v49  ;;  %v4359_v51 = vmax.f32 %v21977_v8, %v4231_v13  ;;  %v21980_v9 = vld [vmem:[#allocation346_spill] sm:$0xff]  ;;  %v21983_v20 = vld [vmem:[#allocation347_spill] sm:$0xff]  ;;  %v21986_v48 = vld [vmem:[#allocation348_spill] sm:$0xff] }
 0x3d0   :  { %v4361_v53 = vmax.f32 %v21978_v37, %v4233_v41  ;;  %v4616_v16 = vmax.f32 %v4552_v39, 0.0  ;;  %v4618_v10 = vmax.f32 %v4554_v46, 0.0  ;;  %v21981_v38 = vmax.f32 %v21979_v60, %v21980_v9  ;;  %v21988_v0 = vld [vmem:[#allocation28_spill] sm:$0xff]  ;;  %v21989_v13 = vld [vmem:[#allocation349_spill] sm:$0xff]  ;;  %v21992_v37 = vld [vmem:[#allocation247_spill] sm:$0xff]  ;;  %v4040_v60 = vpop.f32.mrf.mxu0 }
 0x3d1   :  { %v4617_v2 = vmax.f32 %v4553_v52, 0.0  ;;  %v4619_v11 = vmax.f32 %v4555_v54, 0.0  ;;  %v21984_v56 = vmax.f32 %v21982_v26, %v21983_v20  ;;  %v21987_v15 = vmax.f32 %v21985_v32, %v21986_v48  ;;  %v21991_v52 = vld [vmem:[#allocation291_spill] sm:$0xff]  ;;  %v21996_v48 = vld [vmem:[#allocation286_spill] sm:$0xff] }
 0x3d2   :  { %v4470_v50 = vmax.f32 %v21981_v38, %v4358_v55  ;;  %v21990_v8 = vmax.f32 %v21988_v0, %v21989_v13  ;;  %v4238_v54 = vadd.f32 %v4030_v24, %v21991_v52  ;;  %v4240_v25 = vadd.f32 %v4143_v34, %v21992_v37  ;;  %v4153_v55 = vpop.f32.mrf.mxu1  ;;  %v21998_v0 = vld [vmem:[#allocation30_spill] sm:$0xff] }
 0x3d3   :  { %v4472_v33 = vmax.f32 %v21984_v56, %v4360_v29  ;;  %v4471_v49 = vmax.f32 %v21987_v15, %v4359_v51  ;;  %v11736_v39 = vpack.c.bf16 %v4617_v2, %v4616_v16  ;;  %v11738_v46 = vpack.c.bf16 %v4619_v11, %v4618_v10  ;;  %v21993_v16 = vld [vmem:[#allocation147_spill] sm:$0xff]  ;;  %v21994_v2 = vld [vmem:[#allocation265_spill] sm:$0xff]  ;;  %v21999_v13 = vld [vmem:[#allocation306_spill] sm:$0xff] }
 0x3d4   :  { %v4473_v41 = vmax.f32 %v21990_v8, %v4361_v53  ;;  %v4556_v9 = vadd.f32 %v17605_v31, %v4470_v50  ;;  %v4366_v10 = vmax.f32 %v21993_v16, %v4238_v54  ;;  %v4368_v24 = vmax.f32 %v21994_v2, %v4240_v25  ;;  %v22001_v54 = vld [vmem:[#allocation292_spill] sm:$0xff]  ;;  %v22006_v16 = vld [vmem:[#allocation334_spill] sm:$0xff] }
 0x3d5   :  { %v4558_v56 = vadd.f32 %v17627_v14, %v4472_v33  ;;  %v4557_v29 = vadd.f32 %v17631_v45, %v4471_v49  ;;  %v4782_v51 = vrot.slane %v11736_v39, %v17708_v30  ;;  %v4796_v53 = vrot.slane %v11738_v46, %v17708_v30  ;;  %v21995_v33 = vld [vmem:[#allocation29_spill] sm:$0xff]  ;;  %v4042_v39 = vpop.f32.mrf.mxu0  ;;  %v4155_v46 = vpop.f32.mrf.mxu1 }
 0x3d6   :  { %v4559_v32 = vadd.f32 %v17651_v6, %v4473_v41  ;;  %v4620_v11 = vmax.f32 %v4556_v9, 0.0  ;;  %v21997_v15 = vmax.f32 %v21995_v33, %v21996_v48  ;;  %v22000_v8 = vmax.f32 %v21998_v0, %v21999_v13  ;;  %v22002_v9 = vld [vmem:[#allocation315_spill] sm:$0xff] }
 0x3d7   :  { %v4622_v34 = vmax.f32 %v4558_v56, 0.0  ;;  %v4621_v38 = vmax.f32 %v4557_v29, 0.0  ;;  %v18106_v20 = vcombine.low %v4782_v51, %v4796_v53  ;;  %v18108_v50 = vcombine.high %v4782_v51, %v4796_v53  ;;  %v22003_v29 = vld [vmem:[#allocation235_spill] sm:$0xff] }
 0x3d8   :  { %v4623_v26 = vmax.f32 %v4559_v32, 0.0  ;;  %v4474_v49 = vmax.f32 %v21997_v15, %v4366_v10  ;;  %v4476_v41 = vmax.f32 %v22000_v8, %v4368_v24  ;;  %v4239_v37 = vadd.f32 %v4032_v40, %v22001_v54  ;;  %v22004_v32 = vld [vmem:[#allocation333_spill] sm:$0xff]  ;;  %v22005_v53 = vld [vmem:[#allocation303_spill] sm:$0xff]  ;;  %v18138_v54 = vpop.f32.mrf.mxu0 }
 0x3d9   :  { %v11737_v52 = vpack.c.bf16 %v4621_v38, %v4620_v11  ;;  %v4241_v56 = vadd.f32 %v4145_v35, %v22002_v9  ;;  %v18120_v51 = vadd.f32 %v22004_v32, %v22003_v29  ;;  %v18124_v2 = vadd.f32 %v22006_v16, %v22005_v53  ;;  %v22009_v38 = vld [vmem:[#allocation266_spill] sm:$0xff]  ;;  %v22011_v48 = vld [vmem:[#allocation335_spill] sm:$0xff] }
 0x3da   :  { %v11739_v25 = vpack.c.bf16 %v4623_v26, %v4622_v34  ;;  %v4560_v10 = vadd.f32 %v17605_v31, %v4474_v49  ;;  %v4562_v24 = vadd.f32 %v17627_v14, %v4476_v41  ;;  %v22008_v34 = vld [vmem:[#allocation148_spill] sm:$0xff]  ;;  %v22013_v0 = vld [vmem:[#allocation195_spill] sm:$0xff]  ;;  %v4248_v8 = vadd.f32 %v4147_v62, %v17754_v59  ;;  %v18140_v49 = vpop.f32.mrf.mxu1  ;;  %v22017_v29 = vld [vmem:[#allocation98_spill] sm:$0xff] }
 0x3db   :  { %22007 = vst [vmem:[#allocation204_spill] sm:$0xff] %v18124_v2  ;;  %v4789_v33 = vrot.slane %v11737_v52, %v17708_v30  ;;  %v4367_v40 = vmax.f32 %v22008_v34, %v4239_v37  ;;  %v4369_v35 = vmax.f32 %v22009_v38, %v4241_v56  ;;  %v22010_v26 = vld [vmem:[#allocation236_spill] sm:$0xff]  ;;  %v4246_v13 = vadd.f32 %v4034_v12, %v22013_v0  ;;  %v22018_v32 = vld [vmem:[#allocation239_spill] sm:$0xff]  ;;  %v22020_v34 = vld [vmem:[#allocation149_spill] sm:$0xff] }
 0x3dc   :  { %v4803_v11 = vrot.slane %v11739_v25, %v17708_v30  ;;  %v18134_v15 = vadd.f32 %v22011_v48, %v22010_v26  ;;  %v22014_v25 = vld [vmem:[#allocation97_spill] sm:$0xff]  ;;  %v22015_v37 = vld [vmem:[#allocation180_spill] sm:$0xff]  ;;  %v22019_v53 = vmax.f32 %v22017_v29, %v22018_v32  ;;  %v22021_v38 = vld [vmem:[#allocation267_spill] sm:$0xff]  ;;  %v4247_v62 = vadd.f32 %v4036_v44, %v17758_v28  ;;  %v4046_v44 = vpop.f32.mrf.mxu0 }
 0x3dd   :  { %v22016_v9 = vmax.f32 %v22014_v25, %v22015_v37  ;;  %v4374_v12 = vmax.f32 %v22020_v34, %v4246_v13  ;;  %v4376_v59 = vmax.f32 %v22021_v38, %v4248_v8  ;;  %v4249_v26 = vadd.f32 %v4149_v58, %v17762_v5  ;;  %v22022_v25 = vld [vmem:[#allocation99_spill] sm:$0xff]  ;;  %v22025_v29 = vld [vmem:[#allocation100_spill] sm:$0xff]  ;;  %v4159_v5 = vpop.f32.mrf.mxu1  ;;  %v22030_v38 = vld [vmem:[#allocation105_spill] sm:$0xff] }
 0x3de   :  { %22012 = vst [vmem:[#allocation323_spill] sm:$0xff] %v18134_v15  ;;  %v18142_v41 = vcombine.low %v4789_v33, %v4803_v11  ;;  %v18144_v52 = vcombine.high %v4789_v33, %v4803_v11  ;;  %v4477_v16 = vmax.f32 %v22019_v53, %v4369_v35  ;;  %v4624_v48 = vmax.f32 %v4560_v10, 0.0  ;;  %v22026_v35 = vld [vmem:[#allocation307_spill] sm:$0xff]  ;;  %v22028_v53 = vld [vmem:[#allocation150_spill] sm:$0xff]  ;;  %v22029_v34 = vld [vmem:[#allocation268_spill] sm:$0xff] }
 0x3df   :  { %v4475_v56 = vmax.f32 %v22016_v9, %v4367_v40  ;;  %v4626_v0 = vmax.f32 %v4562_v24, 0.0  ;;  %v22023_v40 = vld [vmem:[#allocation287_spill] sm:$0xff]  ;;  %v22027_v32 = vmax.f32 %v22025_v29, %v22026_v35  ;;  %v4375_v8 = vmax.f32 %v22028_v53, %v4247_v62  ;;  %v22034_v62 = vld [vmem:[#allocation240_spill] sm:$0xff]  ;;  %v22037_v53 = vld [vmem:[#allocation269_spill] sm:$0xff] }
 0x3e0   :  { %v4563_v11 = vadd.f32 %v17651_v6, %v4477_v16  ;;  %v22024_v37 = vmax.f32 %v22022_v25, %v22023_v40  ;;  %v4377_v28 = vmax.f32 %v22029_v34, %v4249_v26  ;;  %v4254_v24 = vadd.f32 %v4040_v60, %v17766_v57  ;;  %v22031_v25 = vld [vmem:[#allocation53_spill] sm:$0xff]  ;;  %v4163_v34 = vpop.f32.mrf.mxu1 }
 0x3e1   :  { %v4561_v33 = vadd.f32 %v17631_v45, %v4475_v56  ;;  %v4480_v13 = vmax.f32 %v22027_v32, %v4376_v59  ;;  %v4256_v56 = vadd.f32 %v4153_v55, %v17783_v1  ;;  %v22032_v40 = vmax.f32 %v22030_v38, %v22031_v25  ;;  %v22038_v25 = vld [vmem:[#allocation32_spill] sm:$0xff]  ;;  %v22080_v15 = vld [vmem:[#allocation113_spill] sm:$0xff] }
 0x3e2   :  { %v4478_v9 = vmax.f32 %v22024_v37, %v4374_v12  ;;  %v4627_v10 = vmax.f32 %v4563_v11, 0.0  ;;  %v22033_v37 = vld [vmem:[#allocation31_spill] sm:$0xff] }
 0x3e3   :  { %v4625_v58 = vmax.f32 %v4561_v33, 0.0  ;;  %v4566_v12 = vadd.f32 %v17627_v14, %v4480_v13  ;;  %v4479_v59 = vmax.f32 %v22032_v40, %v4375_v8  ;;  %v22035_v29 = vmax.f32 %v22033_v37, %v22034_v62  ;;  %v22036_v33 = vld [vmem:[#allocation151_spill] sm:$0xff]  ;;  %v4050_v13 = vpop.f32.mrf.mxu0  ;;  %v22044_v40 = vld [vmem:[#allocation249_spill] sm:$0xff]  ;;  %v22045_v37 = vld [vmem:[#allocation60_spill] sm:$0xff] }
 0x3e4   :  { %v4564_v16 = vadd.f32 %v17605_v31, %v4478_v9  ;;  %v11742_v32 = vpack.c.bf16 %v4627_v10, %v4626_v0  ;;  %v4382_v11 = vmax.f32 %v22036_v33, %v4254_v24  ;;  %v4384_v57 = vmax.f32 %v22037_v53, %v4256_v56  ;;  %v22042_v10 = vld [vmem:[#allocation308_spill] sm:$0xff] }
 0x3e5   :  { %v4481_v26 = vmax.f32 %v22035_v29, %v4377_v28  ;;  %v11740_v35 = vpack.c.bf16 %v4625_v58, %v4624_v48  ;;  %v4630_v1 = vmax.f32 %v4566_v12, 0.0  ;;  %v4565_v55 = vadd.f32 %v17631_v45, %v4479_v59  ;;  %v22039_v28 = vld [vmem:[#allocation54_spill] sm:$0xff]  ;;  %v22046_v29 = vld [vmem:[#allocation304_spill] sm:$0xff] }
 0x3e6   :  { %v4628_v60 = vmax.f32 %v4564_v16, 0.0  ;;  %v4832_v38 = vrot.slane %v11742_v32, %v17708_v30  ;;  %v22040_v48 = vmax.f32 %v22038_v25, %v22039_v28  ;;  %v22041_v58 = vld [vmem:[#allocation106_spill] sm:$0xff]  ;;  %v4255_v59 = vadd.f32 %v4042_v39, %v22044_v40  ;;  %v22050_v32 = vld [vmem:[#allocation337_spill] sm:$0xff] }
 0x3e7   :  { %v4567_v9 = vadd.f32 %v17651_v6, %v4481_v26  ;;  %v4818_v8 = vrot.slane %v11740_v35, %v17708_v30  ;;  %v22043_v24 = vmax.f32 %v22041_v58, %v22042_v10  ;;  %v4629_v16 = vmax.f32 %v4565_v55, 0.0  ;;  %v22047_v26 = vld [vmem:[#allocation336_spill] sm:$0xff]  ;;  %v22049_v35 = vld [vmem:[#allocation237_spill] sm:$0xff]  ;;  %v4052_v58 = vpop.f32.mrf.mxu0 }
 0x3e8   :  { %v4482_v0 = vmax.f32 %v22040_v48, %v4382_v11  ;;  %v4257_v62 = vadd.f32 %v4155_v46, %v22045_v37  ;;  %v18192_v33 = vadd.f32 %v22047_v26, %v22046_v29  ;;  %v18196_v53 = vadd.f32 %v22050_v32, %v22049_v35  ;;  %v22053_v55 = vld [vmem:[#allocation152_spill] sm:$0xff]  ;;  %v22054_v48 = vld [vmem:[#allocation270_spill] sm:$0xff]  ;;  %v4165_v46 = vpop.f32.mrf.mxu1  ;;  %v22055_v10 = vld [vmem:[#allocation305_spill] sm:$0xff] }
 0x3e9   :  { %v4484_v56 = vmax.f32 %v22043_v24, %v4384_v57  ;;  %v4631_v12 = vmax.f32 %v4567_v9, 0.0  ;;  %v18198_v25 = vcombine.low %v4818_v8, %v4832_v38  ;;  %v18200_v11 = vcombine.high %v4818_v8, %v4832_v38  ;;  %v22056_v24 = vld [vmem:[#allocation339_spill] sm:$0xff]  ;;  %v22058_v8 = vld [vmem:[#allocation33_spill] sm:$0xff] }
 0x3ea   :  { %22048 = vst [vmem:[#allocation8_spill] sm:$0xff] %v18192_v33  ;;  %22051 = vst [vmem:[#allocation79_spill] sm:$0xff] %v18196_v53  ;;  %v11741_v28 = vpack.c.bf16 %v4629_v16, %v4628_v60  ;;  %v4383_v9 = vmax.f32 %v22053_v55, %v4255_v59  ;;  %v4385_v39 = vmax.f32 %v22054_v48, %v4257_v62  ;;  %v13610_v26 = vmov 1966171168   ;;  %v22059_v38 = vld [vmem:[#allocation181_spill] sm:$0xff]  ;;  %v22061_v59 = vld [vmem:[#allocation34_spill] sm:$0xff] }
 0x3eb   :  { %22052 = vst [vmem:[#allocation65_spill] sm:$0xff] %v18200_v11  ;;  %v11743_v57 = vpack.c.bf16 %v4631_v12, %v4630_v1  ;;  %v18206_v40 = vadd.f32 %v22056_v24, %v22055_v10  ;;  %v4568_v37 = vadd.f32 %v17605_v31, %v4482_v0  ;;  %v4570_v29 = vadd.f32 %v17627_v14, %v4484_v56  ;;  %v22062_v62 = vld [vmem:[#allocation241_spill] sm:$0xff]  ;;  %v22065_v10 = vld [vmem:[#allocation4_spill] sm:$0xff]  ;;  %v22066_v24 = vld [vmem:[#allocation318_spill] sm:$0xff] }
 0x3ec   :  { %v18210_v35 = vunpack.c.l.s4 %v13610_v26  ;;  %v4825_v60 = vrot.slane %v11741_v28, %v17708_v30  ;;  %v22060_v16 = vmax.f32 %v22058_v8, %v22059_v38  ;;  %v22063_v32 = vmax.f32 %v22061_v59, %v22062_v62  ;;  %v22064_v48 = vld [vmem:[#allocation317_spill] sm:$0xff]  ;;  %v4054_v38 = vpop.f32.mrf.mxu0 }
 0x3ed   :  { %22057 = vst [vmem:[#allocation80_spill] sm:$0xff] %v18206_v40  ;;  %v4839_v1 = vrot.slane %v11743_v57, %v17708_v30  ;;  %v4262_v0 = vadd.f32 %v18138_v54, %v22064_v48  ;;  %v4264_v56 = vadd.f32 %v18140_v49, %v22065_v10  ;;  %v4263_v26 = vadd.f32 %v4046_v44, %v22066_v24  ;;  %v22067_v11 = vld [vmem:[#allocation61_spill] sm:$0xff]  ;;  %v22071_v54 = vld [vmem:[#allocation271_spill] sm:$0xff]  ;;  %v22073_v48 = vld [vmem:[#allocation272_spill] sm:$0xff] }
 0x3ee   :  { %v4483_v12 = vmax.f32 %v22060_v16, %v4383_v9  ;;  %v4485_v55 = vmax.f32 %v22063_v32, %v4385_v39  ;;  %v4265_v28 = vadd.f32 %v4159_v5, %v22067_v11  ;;  %v4167_v39 = vpop.f32.mrf.mxu1  ;;  %v22070_v16 = vld [vmem:[#allocation153_spill] sm:$0xff]  ;;  %v22072_v32 = vld [vmem:[#allocation154_spill] sm:$0xff]  ;;  %v4632_v10 = vmax.f32 %v4568_v37, 0.0 }
 0x3ef   :  { %v18226_v40 = vcombine.low %v4825_v60, %v4839_v1  ;;  %v18228_v57 = vcombine.high %v4825_v60, %v4839_v1  ;;  %v4390_v59 = vmax.f32 %v22070_v16, %v4262_v0  ;;  %v4392_v62 = vmax.f32 %v22071_v54, %v4264_v56  ;;  %v22074_v60 = vld [vmem:[#allocation107_spill] sm:$0xff]  ;;  %v22075_v1 = vld [vmem:[#allocation288_spill] sm:$0xff]  ;;  %v22081_v0 = vld [vmem:[#allocation309_spill] sm:$0xff] }
 0x3f0   :  { %v4569_v9 = vadd.f32 %v17631_v45, %v4483_v12  ;;  %v4571_v8 = vadd.f32 %v17651_v6, %v4485_v55  ;;  %v4391_v49 = vmax.f32 %v22072_v32, %v4263_v26  ;;  %v4393_v44 = vmax.f32 %v22073_v48, %v4265_v28  ;;  %v22078_v55 = vld [vmem:[#allocation182_spill] sm:$0xff]  ;;  %v22083_v54 = vld [vmem:[#allocation35_spill] sm:$0xff]  ;;  %v22084_v26 = vld [vmem:[#allocation289_spill] sm:$0xff] }
 0x3f1   :  { %22068 = vst [vmem:[#allocation66_spill] sm:$0xff] %v18226_v40  ;;  %22069 = vst [vmem:[#allocation81_spill] sm:$0xff] %v18228_v57  ;;  %v4634_v5 = vmax.f32 %v4570_v29, 0.0  ;;  %v22076_v57 = vmax.f32 %v22074_v60, %v22075_v1  ;;  %v22077_v40 = vld [vmem:[#allocation108_spill] sm:$0xff]  ;;  %v22082_v16 = vmax.f32 %v22080_v15, %v22081_v0  ;;  %v22085_v32 = vmax.f32 %v22083_v54, %v22084_v26  ;;  %v22087_v48 = vld [vmem:[#allocation197_spill] sm:$0xff]  ;;  %v4056_v60 = vpop.f32.mrf.mxu0 }
 0x3f2   :  { %v4633_v11 = vmax.f32 %v4569_v9, 0.0  ;;  %v4635_v24 = vmax.f32 %v4571_v8, 0.0  ;;  %v22079_v53 = vmax.f32 %v22077_v40, %v22078_v55  ;;  %v22086_v9 = vld [vmem:[#allocation251_spill] sm:$0xff]  ;;  %v4272_v2 = vadd.f32 %v4163_v34, %v22087_v48  ;;  %v22091_v0 = vld [vmem:[#allocation242_spill] sm:$0xff] }
 0x3f3   :  { %v4486_v12 = vmax.f32 %v22076_v57, %v4390_v59  ;;  %v4487_v56 = vmax.f32 %v22082_v16, %v4391_v49  ;;  %v4489_v28 = vmax.f32 %v22085_v32, %v4393_v44  ;;  %v4270_v8 = vadd.f32 %v4050_v13, %v22086_v9  ;;  %v4169_v57 = vpop.f32.mrf.mxu1  ;;  %v22088_v44 = vld [vmem:[#allocation155_spill] sm:$0xff]  ;;  %v22093_v54 = vld [vmem:[#allocation114_spill] sm:$0xff] }
 0x3f4   :  { %v4488_v33 = vmax.f32 %v22079_v53, %v4392_v62  ;;  %v11744_v37 = vpack.c.bf16 %v4633_v11, %v4632_v10  ;;  %v11746_v29 = vpack.c.bf16 %v4635_v24, %v4634_v5  ;;  %v22089_v5 = vld [vmem:[#allocation273_spill] sm:$0xff]  ;;  %v22094_v26 = vld [vmem:[#allocation55_spill] sm:$0xff] }
 0x3f5   :  { %v4572_v59 = vadd.f32 %v17605_v31, %v4486_v12  ;;  %v4573_v40 = vadd.f32 %v17631_v45, %v4487_v56  ;;  %v4575_v15 = vadd.f32 %v17651_v6, %v4489_v28  ;;  %v4398_v10 = vmax.f32 %v22088_v44, %v4270_v8  ;;  %v22096_v8 = vld [vmem:[#allocation252_spill] sm:$0xff] }
 0x3f6   :  { %v4574_v53 = vadd.f32 %v17627_v14, %v4488_v33  ;;  %v4854_v62 = vrot.slane %v11744_v37, %v17708_v30  ;;  %v4868_v49 = vrot.slane %v11746_v29, %v17708_v30  ;;  %v4400_v13 = vmax.f32 %v22089_v5, %v4272_v2  ;;  %v22090_v33 = vld [vmem:[#allocation36_spill] sm:$0xff]  ;;  %v4060_v37 = vpop.f32.mrf.mxu0  ;;  %v4173_v29 = vpop.f32.mrf.mxu1 }
 0x3f7   :  { %v4636_v11 = vmax.f32 %v4572_v59, 0.0  ;;  %v4637_v24 = vmax.f32 %v4573_v40, 0.0  ;;  %v4639_v1 = vmax.f32 %v4575_v15, 0.0  ;;  %v22092_v16 = vmax.f32 %v22090_v33, %v22091_v0  ;;  %v22097_v59 = vld [vmem:[#allocation5_spill] sm:$0xff]  ;;  %v22098_v40 = vld [vmem:[#allocation238_spill] sm:$0xff]  ;;  %v22099_v15 = vld [vmem:[#allocation340_spill] sm:$0xff] }
 0x3f8   :  { %v4638_v34 = vmax.f32 %v4574_v53, 0.0  ;;  %v18258_v55 = vcombine.low %v4854_v62, %v4868_v49  ;;  %v18260_v12 = vcombine.high %v4854_v62, %v4868_v49  ;;  %v22095_v32 = vmax.f32 %v22093_v54, %v22094_v26 }
 0x3f9   :  { %v4490_v56 = vmax.f32 %v22092_v16, %v4398_v10  ;;  %v11745_v9 = vpack.c.bf16 %v4637_v24, %v4636_v11  ;;  %v4271_v48 = vadd.f32 %v4052_v58, %v22096_v8  ;;  %v4273_v53 = vadd.f32 %v4165_v46, %v22097_v59  ;;  %v22100_v11 = vld [vmem:[#allocation156_spill] sm:$0xff]  ;;  %v22101_v24 = vld [vmem:[#allocation274_spill] sm:$0xff]  ;;  %v4062_v16 = vpop.f32.mrf.mxu0 }
 0x3fa   :  { %v4492_v28 = vmax.f32 %v22095_v32, %v4400_v13  ;;  %v11747_v2 = vpack.c.bf16 %v4639_v1, %v4638_v34  ;;  %v18272_v62 = vadd.f32 %v22099_v15, %v22098_v40  ;;  %v6253_v10 = vunpack.c.0.s8 %v18210_v35  ;;  %v22102_v35 = vld [vmem:[#allocation37_spill] sm:$0xff]  ;;  %v22103_v32 = vld [vmem:[#allocation310_spill] sm:$0xff]  ;;  %v22106_v8 = vld [vmem:[#allocation56_spill] sm:$0xff] }
 0x3fb   :  { %v4576_v49 = vadd.f32 %v17605_v31, %v4490_v56  ;;  %v4861_v5 = vrot.slane %v11745_v9, %v17708_v30  ;;  %v4399_v34 = vmax.f32 %v22100_v11, %v4271_v48  ;;  %v4401_v58 = vmax.f32 %v22101_v24, %v4273_v53  ;;  %v4175_v56 = vpop.f32.mrf.mxu1  ;;  %v22108_v53 = vld [vmem:[#allocation157_spill] sm:$0xff]  ;;  %v22109_v15 = vld [vmem:[#allocation275_spill] sm:$0xff] }
 0x3fc   :  { %v4578_v44 = vadd.f32 %v17627_v14, %v4492_v28  ;;  %v4875_v13 = vrot.slane %v11747_v2, %v17708_v30  ;;  %v4278_v33 = vadd.f32 %v4054_v38, %v17887_v23  ;;  %v4280_v0 = vadd.f32 %v4167_v39, %v17891_v27  ;;  %v22105_v2 = vld [vmem:[#allocation38_spill] sm:$0xff]  ;;  %v22110_v38 = vld [vmem:[#allocation320_spill] sm:$0xff]  ;;  %v22113_v24 = vld [vmem:[#allocation243_spill] sm:$0xff] }
 0x3fd   :  { %v4640_v1 = vmax.f32 %v4576_v49, 0.0  ;;  %v22104_v28 = vmax.f32 %v22102_v35, %v22103_v32  ;;  %v22107_v48 = vmax.f32 %v22105_v2, %v22106_v8  ;;  %v4279_v27 = vadd.f32 %v4056_v60, %v17895_v21  ;;  %v22116_v32 = vld [vmem:[#allocation57_spill] sm:$0xff]  ;;  %v22118_v21 = vld [vmem:[#allocation158_spill] sm:$0xff]  ;;  %v4064_v8 = vpop.f32.mrf.mxu0 }
 0x3fe   :  { %v4642_v46 = vmax.f32 %v4578_v44, 0.0  ;;  %v18283_v54 = vcombine.low %v4861_v5, %v4875_v13  ;;  %v18285_v26 = vcombine.high %v4861_v5, %v4875_v13  ;;  %v4406_v40 = vmax.f32 %v22108_v53, %v4278_v33  ;;  %v22111_v13 = vld [vmem:[#allocation338_spill] sm:$0xff]  ;;  %v22115_v33 = vld [vmem:[#allocation39_spill] sm:$0xff]  ;;  %v22229_v49 = vld [vmem:[#allocation137_spill] sm:$0xff] }
 0x3ff   :  { %v4491_v9 = vmax.f32 %v22104_v28, %v4399_v34  ;;  %v4493_v59 = vmax.f32 %v22107_v48, %v4401_v58  ;;  %v4408_v23 = vmax.f32 %v22109_v15, %v4280_v0  ;;  %v4281_v39 = vadd.f32 %v4169_v57, %v22110_v38  ;;  %v22112_v34 = vld [vmem:[#allocation115_spill] sm:$0xff]  ;;  %v22119_v57 = vld [vmem:[#allocation276_spill] sm:$0xff]  ;;  %v4177_v48 = vpop.f32.mrf.mxu1 }
 0x400   :  { %v18301_v11 = vsub.s32 %v6253_v10, %v22111_v13  ;;  %v22114_v58 = vmax.f32 %v22112_v34, %v22113_v24  ;;  %v22117_v0 = vmax.f32 %v22115_v33, %v22116_v32  ;;  %v4407_v60 = vmax.f32 %v22118_v21, %v4279_v27  ;;  %v22120_v38 = vld [vmem:[#allocation40_spill] sm:$0xff]  ;;  %v22121_v13 = vld [vmem:[#allocation311_spill] sm:$0xff]  ;;  %v22124_v27 = vld [vmem:[#allocation58_spill] sm:$0xff] }
 0x401   :  { %v4577_v44 = vadd.f32 %v17631_v45, %v4491_v9  ;;  %v4579_v5 = vadd.f32 %v17651_v6, %v4493_v59  ;;  %v4409_v2 = vmax.f32 %v22119_v57, %v4281_v39  ;;  %v4286_v59 = vadd.f32 %v4060_v37, %v17916_v22  ;;  %v22123_v24 = vld [vmem:[#allocation120_spill] sm:$0xff]  ;;  %v4179_v21 = vpop.f32.mrf.mxu1 }
 0x402   :  { %v4494_v35 = vmax.f32 %v22114_v58, %v4406_v40  ;;  %v4496_v28 = vmax.f32 %v22117_v0, %v4408_v23  ;;  %v4288_v10 = vadd.f32 %v4173_v29, %v17920_v7  ;;  %v22122_v34 = vmax.f32 %v22120_v38, %v22121_v13  ;;  %v22127_v0 = vld [vmem:[#allocation277_spill] sm:$0xff]  ;;  %v22134_v13 = vld [vmem:[#allocation203_spill] sm:$0xff] }
 0x403   :  { %v4641_v9 = vmax.f32 %v4577_v44, 0.0  ;;  %v4643_v53 = vmax.f32 %v4579_v5, 0.0  ;;  %v22125_v58 = vmax.f32 %v22123_v24, %v22124_v27  ;;  %v22126_v44 = vld [vmem:[#allocation159_spill] sm:$0xff]  ;;  %v22128_v38 = vld [vmem:[#allocation41_spill] sm:$0xff] }
 0x404   :  { %v4580_v15 = vadd.f32 %v17605_v31, %v4494_v35  ;;  %v4582_v40 = vadd.f32 %v17627_v14, %v4496_v28  ;;  %v4495_v23 = vmax.f32 %v22122_v34, %v4407_v60  ;;  %v4414_v5 = vmax.f32 %v22126_v44, %v4286_v59  ;;  %v4066_v28 = vpop.f32.mrf.mxu0 }
 0x405   :  { %v4497_v39 = vmax.f32 %v22125_v58, %v4409_v2  ;;  %v11748_v33 = vpack.c.bf16 %v4641_v9, %v4640_v1  ;;  %v11750_v32 = vpack.c.bf16 %v4643_v53, %v4642_v46  ;;  %v4416_v22 = vmax.f32 %v22127_v0, %v4288_v10  ;;  %v22129_v2 = vld [vmem:[#allocation244_spill] sm:$0xff]  ;;  %v22131_v9 = vld [vmem:[#allocation42_spill] sm:$0xff]  ;;  %v22132_v53 = vld [vmem:[#allocation187_spill] sm:$0xff] }
 0x406   :  { %v4644_v37 = vmax.f32 %v4580_v15, 0.0  ;;  %v4646_v7 = vmax.f32 %v4582_v40, 0.0  ;;  %v4581_v29 = vadd.f32 %v17631_v45, %v4495_v23  ;;  %v22130_v1 = vmax.f32 %v22128_v38, %v22129_v2  ;;  %v22135_v23 = vld [vmem:[#allocation321_spill] sm:$0xff]  ;;  %v22137_v38 = vld [vmem:[#allocation278_spill] sm:$0xff] }
 0x407   :  { %v4583_v35 = vadd.f32 %v17651_v6, %v4497_v39  ;;  %v4890_v60 = vrot.slane %v11748_v33, %v17708_v30  ;;  %v4904_v57 = vrot.slane %v11750_v32, %v17708_v30  ;;  %v22133_v59 = vmax.f32 %v22131_v9, %v22132_v53 }
 0x408   :  { %v4498_v46 = vmax.f32 %v22130_v1, %v4414_v5  ;;  %v4645_v15 = vmax.f32 %v4581_v29, 0.0  ;;  %v4287_v34 = vadd.f32 %v4062_v16, %v22134_v13  ;;  %v4289_v24 = vadd.f32 %v4175_v56, %v22135_v23  ;;  %v22136_v5 = vld [vmem:[#allocation160_spill] sm:$0xff]  ;;  %v4070_v29 = vpop.f32.mrf.mxu0  ;;  %v22153_v16 = vld [vmem:[#allocation43_spill] sm:$0xff] }
 0x409   :  { %v4500_v10 = vmax.f32 %v22133_v59, %v4416_v22  ;;  %v4647_v40 = vmax.f32 %v4583_v35, 0.0  ;;  %v18337_v39 = vcombine.low %v4890_v60, %v4904_v57  ;;  %v18339_v33 = vcombine.high %v4890_v60, %v4904_v57  ;;  %v4183_v35 = vpop.f32.mrf.mxu1  ;;  %v22141_v59 = vld [vmem:[#allocation122_spill] sm:$0xff]  ;;  %v22156_v56 = vld [vmem:[#allocation44_spill] sm:$0xff] }
 0x40a   :  { %v11749_v32 = vpack.c.bf16 %v4645_v15, %v4644_v37  ;;  %v4415_v0 = vmax.f32 %v22136_v5, %v4287_v34  ;;  %v4417_v22 = vmax.f32 %v22137_v38, %v4289_v24  ;;  %v4584_v2 = vadd.f32 %v17605_v31, %v4498_v46  ;;  %v22138_v37 = vld [vmem:[#allocation121_spill] sm:$0xff]  ;;  %v22142_v15 = vld [vmem:[#allocation2_spill] sm:$0xff]  ;;  %v22144_v24 = vld [vmem:[#allocation7_spill] sm:$0xff] }
 0x40b   :  { %v11751_v44 = vpack.c.bf16 %v4647_v40, %v4646_v7  ;;  %v4586_v1 = vadd.f32 %v17627_v14, %v4500_v10  ;;  %v22139_v7 = vld [vmem:[#allocation312_spill] sm:$0xff]  ;;  %v22143_v40 = vmax.f32 %v22141_v59, %v22142_v15  ;;  %v4294_v34 = vadd.f32 %v4064_v8, %v17938_v18  ;;  %v22145_v5 = vld [vmem:[#allocation255_spill] sm:$0xff]  ;;  %v22147_v59 = vld [vmem:[#allocation162_spill] sm:$0xff] }
 0x40c   :  { %v4897_v9 = vrot.slane %v11749_v32, %v17708_v30  ;;  %v22140_v57 = vmax.f32 %v22138_v37, %v22139_v7  ;;  %v4296_v23 = vadd.f32 %v4177_v48, %v17942_v36  ;;  %v4295_v46 = vadd.f32 %v4066_v28, %v22144_v24  ;;  %v4072_v37 = vpop.f32.mrf.mxu0  ;;  %v4185_v7 = vpop.f32.mrf.mxu1  ;;  %v22148_v8 = vld [vmem:[#allocation163_spill] sm:$0xff] }
 0x40d   :  { %v4911_v60 = vrot.slane %v11751_v44, %v17708_v30  ;;  %v4501_v13 = vmax.f32 %v22143_v40, %v4417_v22  ;;  %v4297_v10 = vadd.f32 %v4179_v21, %v22145_v5  ;;  %v22149_v48 = vld [vmem:[#allocation279_spill] sm:$0xff]  ;;  %v4648_v15 = vmax.f32 %v4584_v2, 0.0 }
 0x40e   :  { %v4499_v53 = vmax.f32 %v22140_v57, %v4415_v0  ;;  %v22146_v57 = vld [vmem:[#allocation161_spill] sm:$0xff]  ;;  %v4424_v18 = vmax.f32 %v22147_v59, %v4296_v23  ;;  %v4423_v36 = vmax.f32 %v22148_v8, %v4295_v46  ;;  %v4650_v21 = vmax.f32 %v4586_v1, 0.0  ;;  %v22159_v59 = vld [vmem:[#allocation128_spill] sm:$0xff] }
 0x40f   :  { %v18359_v38 = vcombine.low %v4897_v9, %v4911_v60  ;;  %v18361_v32 = vcombine.high %v4897_v9, %v4911_v60  ;;  %v4587_v0 = vadd.f32 %v17651_v6, %v4501_v13  ;;  %v4422_v22 = vmax.f32 %v22146_v57, %v4294_v34  ;;  %v22150_v9 = vld [vmem:[#allocation127_spill] sm:$0xff]  ;;  %v22151_v60 = vld [vmem:[#allocation188_spill] sm:$0xff]  ;;  %v22154_v13 = vld [vmem:[#allocation245_spill] sm:$0xff] }
 0x410   :  { %v4585_v44 = vadd.f32 %v17631_v45, %v4499_v53  ;;  %v4425_v28 = vmax.f32 %v22149_v48, %v4297_v10  ;;  %v22152_v5 = vmax.f32 %v22150_v9, %v22151_v60  ;;  %v22155_v58 = vmax.f32 %v22153_v16, %v22154_v13  ;;  %v22157_v34 = vld [vmem:[#allocation290_spill] sm:$0xff]  ;;  %v22160_v46 = vld [vmem:[#allocation313_spill] sm:$0xff]  ;;  %v4074_v48 = vpop.f32.mrf.mxu0 }
 0x411   :  { %v4651_v24 = vmax.f32 %v4587_v0, 0.0  ;;  %v22158_v57 = vmax.f32 %v22156_v56, %v22157_v34  ;;  %v22161_v8 = vmax.f32 %v22159_v59, %v22160_v46  ;;  %v4304_v0 = vadd.f32 %v4183_v35, %v17965_v43  ;;  %v22167_v34 = vld [vmem:[#allocation46_spill] sm:$0xff] }
 0x412   :  { %v4649_v40 = vmax.f32 %v4585_v44, 0.0  ;;  %v4502_v53 = vmax.f32 %v22152_v5, %v4422_v22  ;;  %v4504_v27 = vmax.f32 %v22155_v58, %v4424_v18  ;;  %v4302_v44 = vadd.f32 %v4070_v29, %v17961_v63  ;;  %v4187_v22 = vpop.f32.mrf.mxu1  ;;  %v22165_v5 = vld [vmem:[#allocation189_spill] sm:$0xff]  ;;  %v4076_v46 = vpop.f32.mrf.mxu0 }
 0x413   :  { %v4503_v23 = vmax.f32 %v22158_v57, %v4423_v36  ;;  %v4505_v10 = vmax.f32 %v22161_v8, %v4425_v28  ;;  %v11754_v1 = vpack.c.bf16 %v4651_v24, %v4650_v21  ;;  %v22162_v28 = vld [vmem:[#allocation164_spill] sm:$0xff]  ;;  %v22168_v57 = vld [vmem:[#allocation246_spill] sm:$0xff] }
 0x414   :  { %v11752_v2 = vpack.c.bf16 %v4649_v40, %v4648_v15  ;;  %v4588_v9 = vadd.f32 %v17605_v31, %v4502_v53  ;;  %v4590_v58 = vadd.f32 %v17627_v14, %v4504_v27  ;;  %v4430_v15 = vmax.f32 %v22162_v28, %v4302_v44  ;;  %v22163_v21 = vld [vmem:[#allocation280_spill] sm:$0xff]  ;;  %v22164_v27 = vld [vmem:[#allocation45_spill] sm:$0xff]  ;;  %v4189_v8 = vpop.f32.mrf.mxu1 }
 0x415   :  { %v4589_v16 = vadd.f32 %v17631_v45, %v4503_v23  ;;  %v4591_v56 = vadd.f32 %v17651_v6, %v4505_v10  ;;  %v4940_v36 = vrot.slane %v11754_v1, %v17708_v30  ;;  %v4432_v63 = vmax.f32 %v22163_v21, %v4304_v0 }
 0x416   :  { %v4926_v18 = vrot.slane %v11752_v2, %v17708_v30  ;;  %v4652_v29 = vmax.f32 %v4588_v9, 0.0  ;;  %v4654_v43 = vmax.f32 %v4590_v58, 0.0  ;;  %v22166_v53 = vmax.f32 %v22164_v27, %v22165_v5  ;;  %v22173_v27 = vld [vmem:[#allocation129_spill] sm:$0xff]  ;;  %v22174_v5 = vld [vmem:[#allocation314_spill] sm:$0xff]  ;;  %v22218_v9 = vld [vmem:[#allocation80_spill] sm:$0xff] }
 0x417   :  { %v4653_v35 = vmax.f32 %v4589_v16, 0.0  ;;  %v4655_v40 = vmax.f32 %v4591_v56, 0.0  ;;  %v22169_v23 = vmax.f32 %v22167_v34, %v22168_v57  ;;  %v4303_v1 = vadd.f32 %v4072_v37, %v17969_v42  ;;  %v22172_v37 = vld [vmem:[#allocation63_spill] sm:$0xff]  ;;  %v22176_v34 = vld [vmem:[#allocation130_spill] sm:$0xff] }
 0x418   :  { %v18391_v24 = vcombine.low %v4926_v18, %v4940_v36  ;;  %v18393_v60 = vcombine.high %v4926_v18, %v4940_v36  ;;  %v4506_v13 = vmax.f32 %v22166_v53, %v4430_v15  ;;  %v4305_v44 = vadd.f32 %v4185_v7, %v17984_v4  ;;  %v22170_v36 = vld [vmem:[#allocation165_spill] sm:$0xff]  ;;  %v22171_v15 = vld [vmem:[#allocation166_spill] sm:$0xff] }
 0x419   :  { %v4508_v59 = vmax.f32 %v22169_v23, %v4432_v63  ;;  %v11753_v10 = vpack.c.bf16 %v4653_v35, %v4652_v29  ;;  %v11755_v2 = vpack.c.bf16 %v4655_v40, %v4654_v43  ;;  %v4431_v28 = vmax.f32 %v22170_v36, %v4303_v1  ;;  %v4080_v29 = vpop.f32.mrf.mxu0  ;;  %v4193_v43 = vpop.f32.mrf.mxu1  ;;  %v22177_v57 = vld [vmem:[#allocation190_spill] sm:$0xff]  ;;  %v22180_v1 = vld [vmem:[#allocation171_spill] sm:$0xff] }
 0x41a   :  { %v4592_v58 = vadd.f32 %v17605_v31, %v4506_v13  ;;  %v4433_v21 = vmax.f32 %v22171_v15, %v4305_v44  ;;  %v4310_v4 = vadd.f32 %v4074_v48, %v17988_v19  ;;  %v4312_v7 = vadd.f32 %v4187_v22, %v22172_v37  ;;  %v22181_v48 = vld [vmem:[#allocation322_spill] sm:$0xff]  ;;  %v22182_v44 = vld [vmem:[#allocation64_spill] sm:$0xff] }
 0x41b   :  { %v4594_v16 = vadd.f32 %v17627_v14, %v4508_v59  ;;  %v4933_v56 = vrot.slane %v11753_v10, %v17708_v30  ;;  %v4947_v18 = vrot.slane %v11755_v2, %v17708_v30  ;;  %v22175_v53 = vmax.f32 %v22173_v27, %v22174_v5  ;;  %v22179_v10 = vld [vmem:[#allocation281_spill] sm:$0xff]  ;;  %v22184_v15 = vld [vmem:[#allocation248_spill] sm:$0xff]  ;;  %v22186_v27 = vld [vmem:[#allocation47_spill] sm:$0xff] }
 0x41c   :  { %v4656_v63 = vmax.f32 %v4592_v58, 0.0  ;;  %v22178_v23 = vmax.f32 %v22176_v34, %v22177_v57  ;;  %v4438_v2 = vmax.f32 %v22179_v10, %v4310_v4  ;;  %v4440_v19 = vmax.f32 %v22180_v1, %v4312_v7  ;;  %v22187_v4 = vld [vmem:[#allocation3_spill] sm:$0xff]  ;;  %v22190_v34 = vld [vmem:[#allocation172_spill] sm:$0xff]  ;;  %v4082_v57 = vpop.f32.mrf.mxu0 }
 0x41d   :  { %v4658_v42 = vmax.f32 %v4594_v16, 0.0  ;;  %v18413_v35 = vcombine.low %v4933_v56, %v4947_v18  ;;  %v18415_v40 = vcombine.high %v4933_v56, %v4947_v18  ;;  %v4507_v13 = vmax.f32 %v22175_v53, %v4431_v28  ;;  %v22183_v28 = vld [vmem:[#allocation131_spill] sm:$0xff]  ;;  %v22189_v53 = vld [vmem:[#allocation282_spill] sm:$0xff] }
 0x41e   :  { %v4509_v59 = vmax.f32 %v22178_v23, %v4433_v21  ;;  %v4311_v22 = vadd.f32 %v4076_v46, %v22181_v48  ;;  %v4313_v58 = vadd.f32 %v4189_v8, %v22182_v44  ;;  %v22185_v37 = vmax.f32 %v22183_v28, %v22184_v15  ;;  %v4195_v23 = vpop.f32.mrf.mxu1  ;;  %v22191_v48 = vld [vmem:[#allocation256_spill] sm:$0xff] }
 0x41f   :  { %v4593_v18 = vadd.f32 %v17631_v45, %v4507_v13  ;;  %v22188_v5 = vmax.f32 %v22186_v27, %v22187_v4  ;;  %v4318_v13 = vadd.f32 %v4080_v29, %v22191_v48  ;;  %v22192_v28 = vld [vmem:[#allocation48_spill] sm:$0xff] }
 0x420   :  { %v4595_v36 = vadd.f32 %v17651_v6, %v4509_v59  ;;  %v4510_v21 = vmax.f32 %v22185_v37, %v4438_v2  ;;  %v4439_v46 = vmax.f32 %v22189_v53, %v4311_v22  ;;  %v4441_v8 = vmax.f32 %v22190_v34, %v4313_v58  ;;  %v22193_v15 = vld [vmem:[#allocation316_spill] sm:$0xff]  ;;  %v22196_v22 = vld [vmem:[#allocation59_spill] sm:$0xff]  ;;  %v4197_v16 = vpop.f32.mrf.mxu1 }
 0x421   :  { %v4512_v7 = vmax.f32 %v22188_v5, %v4440_v19  ;;  %v4657_v10 = vmax.f32 %v4593_v18, 0.0  ;;  %v4320_v59 = vadd.f32 %v4193_v43, %v18120_v51  ;;  %v22194_v37 = vmax.f32 %v22192_v28, %v22193_v15  ;;  %v22195_v27 = vld [vmem:[#allocation132_spill] sm:$0xff]  ;;  %v22198_v18 = vld [vmem:[#allocation283_spill] sm:$0xff]  ;;  %v22200_v15 = vld [vmem:[#allocation49_spill] sm:$0xff] }
 0x422   :  { %v4659_v1 = vmax.f32 %v4595_v36, 0.0  ;;  %v4596_v44 = vadd.f32 %v17605_v31, %v4510_v21  ;;  %v22197_v4 = vmax.f32 %v22195_v27, %v22196_v22  ;;  %v4446_v36 = vmax.f32 %v22198_v18, %v4318_v13  ;;  %v22199_v34 = vld [vmem:[#allocation175_spill] sm:$0xff] }
 0x423   :  { %v4598_v2 = vadd.f32 %v17627_v14, %v4512_v7  ;;  %v4511_v19 = vmax.f32 %v22194_v37, %v4439_v46  ;;  %v11756_v5 = vpack.c.bf16 %v4657_v10, %v4656_v63  ;;  %v4448_v29 = vmax.f32 %v22199_v34, %v4320_v59  ;;  %v4084_v7 = vpop.f32.mrf.mxu0  ;;  %v22203_v10 = vld [vmem:[#allocation50_spill] sm:$0xff]  ;;  %v22206_v37 = vld [vmem:[#allocation204_spill] sm:$0xff]  ;;  %v22207_v27 = vld [vmem:[#allocation323_spill] sm:$0xff] }
 0x424   :  { %v4513_v58 = vmax.f32 %v22197_v4, %v4441_v8  ;;  %v11758_v53 = vpack.c.bf16 %v4659_v1, %v4658_v42  ;;  %v4660_v48 = vmax.f32 %v4596_v44, 0.0  ;;  %v22201_v8 = vld [vmem:[#allocation196_spill] sm:$0xff]  ;;  %v22204_v1 = vld [vmem:[#allocation250_spill] sm:$0xff]  ;;  %v4321_v22 = vadd.f32 %v4195_v23, %v22207_v27 }
 0x425   :  { %v4662_v51 = vmax.f32 %v4598_v2, 0.0  ;;  %v4597_v43 = vadd.f32 %v17631_v45, %v4511_v19  ;;  %v4962_v46 = vrot.slane %v11756_v5, %v17708_v30  ;;  %v22202_v63 = vmax.f32 %v22200_v15, %v22201_v8  ;;  %v22208_v34 = vld [vmem:[#allocation284_spill] sm:$0xff] }
 0x426   :  { %v4599_v21 = vadd.f32 %v17651_v6, %v4513_v58  ;;  %v4976_v28 = vrot.slane %v11758_v53, %v17708_v30  ;;  %v22205_v13 = vmax.f32 %v22203_v10, %v22204_v1  ;;  %v4319_v19 = vadd.f32 %v4082_v57, %v22206_v37  ;;  %v22209_v8 = vld [vmem:[#allocation176_spill] sm:$0xff] }
 0x427   :  { %v4514_v42 = vmax.f32 %v22202_v63, %v4446_v36  ;;  %v4661_v44 = vmax.f32 %v4597_v43, 0.0  ;;  %v5085_v4 = vunpack.i.h.s16 %v18258_v55  ;;  %v5105_v58 = vunpack.i.h.s16 %v18337_v39  ;;  %v4086_v43 = vpop.f32.mrf.mxu0  ;;  %v22216_v27 = vld [vmem:[#allocation8_spill] sm:$0xff] }
 0x428   :  { %v4516_v59 = vmax.f32 %v22205_v13, %v4448_v29  ;;  %v4663_v2 = vmax.f32 %v4599_v21, 0.0  ;;  %v18465_v5 = vcombine.low %v4962_v46, %v4976_v28  ;;  %v18467_v53 = vcombine.high %v4962_v46, %v4976_v28  ;;  %v4199_v21 = vpop.f32.mrf.mxu1 }
 0x429   :  { %v11757_v18 = vpack.c.bf16 %v4661_v44, %v4660_v48  ;;  %v4447_v15 = vmax.f32 %v22208_v34, %v4319_v19  ;;  %v4449_v29 = vmax.f32 %v22209_v8, %v4321_v22  ;;  %v5125_v57 = vunpack.i.h.s16 %v18391_v24  ;;  %v22210_v48 = vld [vmem:[#allocation133_spill] sm:$0xff]  ;;  %v22213_v44 = vld [vmem:[#allocation134_spill] sm:$0xff]  ;;  %v22217_v34 = vld [vmem:[#allocation79_spill] sm:$0xff] }
 0x42a   :  { %v11759_v36 = vpack.c.bf16 %v4663_v2, %v4662_v51  ;;  %v5145_v23 = vunpack.i.h.s16 %v18465_v5  ;;  %v4600_v63 = vadd.f32 %v17605_v31, %v4514_v42  ;;  %v4602_v10 = vadd.f32 %v17627_v14, %v4516_v59  ;;  %v22211_v51 = vld [vmem:[#allocation62_spill] sm:$0xff]  ;;  %v22214_v2 = vld [vmem:[#allocation319_spill] sm:$0xff] }
 0x42b   :  { %v4969_v1 = vrot.slane %v11757_v18, %v17708_v30  ;;  %v22212_v28 = vmax.f32 %v22210_v48, %v22211_v51  ;;  %v22215_v37 = vmax.f32 %v22213_v44, %v22214_v2  ;;  %v4326_v22 = vadd.f32 %v4084_v7, %v22216_v27  ;;  %v22219_v48 = vld [vmem:[#allocation285_spill] sm:$0xff]  ;;  %v22221_v44 = vld [vmem:[#allocation52_spill] sm:$0xff]  ;;  %v22222_v2 = vld [vmem:[#allocation179_spill] sm:$0xff] }
 0x42c   :  { %v4983_v46 = vrot.slane %v11759_v36, %v17708_v30  ;;  %v4328_v8 = vadd.f32 %v4197_v16, %v22217_v34  ;;  %v4327_v42 = vadd.f32 %v4086_v43, %v22218_v9  ;;  %v4329_v59 = vadd.f32 %v4199_v21, %v18272_v62  ;;  %v22223_v21 = vld [vmem:[#allocation135_spill] sm:$0xff]  ;;  %v22224_v27 = vld [vmem:[#allocation253_spill] sm:$0xff]  ;;  %v22226_v34 = vld [vmem:[#allocation136_spill] sm:$0xff] }
 0x42d   :  { %v4515_v13 = vmax.f32 %v22212_v28, %v4447_v15  ;;  %v4517_v19 = vmax.f32 %v22215_v37, %v4449_v29  ;;  %v4454_v51 = vmax.f32 %v22219_v48, %v4326_v22  ;;  %v22220_v28 = vld [vmem:[#allocation51_spill] sm:$0xff]  ;;  %v4664_v37 = vmax.f32 %v4600_v63, 0.0  ;;  %v22230_v22 = vld [vmem:[#allocation6_spill] sm:$0xff] }
 0x42e   :  { %v18487_v0 = vcombine.low %v4969_v1, %v4983_v46  ;;  %v18489_v18 = vcombine.high %v4969_v1, %v4983_v46  ;;  %v4456_v29 = vmax.f32 %v22220_v28, %v4328_v8  ;;  %v4455_v7 = vmax.f32 %v22221_v44, %v4327_v42  ;;  %v22232_v28 = vld [vmem:[#allocation138_spill] sm:$0xff] }
 0x42f   :  { %v4601_v36 = vadd.f32 %v17631_v45, %v4515_v13  ;;  %v4603_v15 = vadd.f32 %v17651_v6, %v4517_v19  ;;  %v4457_v16 = vmax.f32 %v22222_v2, %v4329_v59  ;;  %v4666_v9 = vmax.f32 %v4602_v10, 0.0  ;;  %v22227_v13 = vld [vmem:[#allocation198_spill] sm:$0xff] }
 0x430   :  { %v22225_v1 = vmax.f32 %v22223_v21, %v22224_v27  ;;  %v22228_v56 = vmax.f32 %v22226_v34, %v22227_v13  ;;  %v22231_v48 = vmax.f32 %v22229_v49, %v22230_v22  ;;  %v22233_v42 = vld [vmem:[#allocation254_spill] sm:$0xff] }
 0x431   :  { %v4665_v43 = vmax.f32 %v4601_v36, 0.0  ;;  %v4667_v62 = vmax.f32 %v4603_v15, 0.0  ;;  %v22234_v44 = vmax.f32 %v22232_v28, %v22233_v42  ;;  %v22235_v36 = vunpack.i.h.s16 %v18046_v61  ;;  %v22239_v22 = vld [vmem:[#allocation66_spill] sm:$0xff] }
 0x432   :  { %v4518_v46 = vmax.f32 %v22225_v1, %v4454_v51  ;;  %v4520_v19 = vmax.f32 %v22228_v56, %v4456_v29  ;;  %v4519_v8 = vmax.f32 %v22231_v48, %v4455_v7  ;;  %v22236_v51 = vunpack.i.h.s16 %v18106_v20  ;;  %v22238_v1 = vld [vmem:[#allocation65_spill] sm:$0xff] }
 0x433   :  { %v4521_v59 = vmax.f32 %v22234_v44, %v4457_v16  ;;  %v11760_v63 = vpack.c.bf16 %v4665_v43, %v4664_v37  ;;  %v11762_v10 = vpack.c.bf16 %v4667_v62, %v4666_v9  ;;  %v11764_v15 = vpack.c.b16 %v22235_v36, %v18046_v61 }
 0x434   :  { %v11768_v2 = vpack.c.b16 %v22236_v51, %v18106_v20  ;;  %v4604_v56 = vadd.f32 %v17605_v31, %v4518_v46  ;;  %v4606_v29 = vadd.f32 %v17627_v14, %v4520_v19  ;;  %v4605_v49 = vadd.f32 %v17631_v45, %v4519_v8 }
 0x435   :  { %v4607_v7 = vadd.f32 %v17651_v6, %v4521_v59  ;;  %v4998_v16 = vrot.slane %v11760_v63, %v17708_v30  ;;  %v5012_v37 = vrot.slane %v11762_v10, %v17708_v30  ;;  %v22237_v9 = vunpack.i.h.s16 %v18198_v25 }
 0x436   :  { %v11776_v43 = vpack.c.b16 %v5085_v4, %v18258_v55  ;;  %v4668_v62 = vmax.f32 %v4604_v56, 0.0  ;;  %v4670_v20 = vmax.f32 %v4606_v29, 0.0  ;;  %v4669_v21 = vmax.f32 %v4605_v49, 0.0 }
 0x437   :  { %v11772_v61 = vpack.c.b16 %v22237_v9, %v18198_v25  ;;  %v4671_v31 = vmax.f32 %v4607_v7, 0.0  ;;  %v5020_v27 = vcombine.low %v4998_v16, %v5012_v37  ;;  %v18525_v14 = vcombine.high %v4998_v16, %v5012_v37 }
 0x438   :  { %v11780_v45 = vpack.c.b16 %v5105_v58, %v18337_v39  ;;  %v11784_v6 = vpack.c.b16 %v5125_v57, %v18391_v24  ;;  %v5070_v46 = vunpack.i.h.s16 %v22238_v1  ;;  %v11761_v34 = vpack.c.bf16 %v4669_v21, %v4668_v62 }
 0x439   :  { %v11763_v13 = vpack.c.bf16 %v4671_v31, %v4670_v20  ;;  %v11797_v19 = vpack.i.b16 %v11768_v2, %v11764_v15  ;;  %v5075_v25 = vunpack.i.h.s16 %v22239_v22  ;;  %v5165_v48 = vunpack.i.h.s16 %v5020_v27 }
 0x43a   :  { %v11801_v55 = vpack.i.b16 %v11776_v43, %v11772_v61  ;;  %v11805_v4 = vpack.i.b16 %v11784_v6, %v11780_v45  ;;  %v5090_v8 = vunpack.i.h.s16 %v18260_v12  ;;  %v5005_v28 = vrot.slane %v11761_v34, %v17708_v30 }
 0x43b   :  { %v5019_v42 = vrot.slane %v11763_v13, %v17708_v30  ;;  %v11788_v39 = vpack.c.b16 %v5145_v23, %v18465_v5  ;;  %v11792_v58 = vpack.c.b16 %v5165_v48, %v5020_v27  ;;  %v5048_v44 = vunpack.i.h.s16 %v11768_v2 }
 0x43c   :  { %v6247_v24 = vcombine.low %v11797_v19, %v11801_v55  ;;  %v6248_v57 = vcombine.high %v11797_v19, %v11801_v55  ;;  %v5110_v59 = vunpack.i.h.s16 %v18339_v33  ;;  %v5088_v36 = vunpack.i.h.s16 %v11776_v43  ;;  %v13121_v55 = vld [vmem:[%s20312_s6 + $0x138] sm:$0xff]  }
 0x43d   :  { %v18536_v63 = vcombine.low %v5005_v28, %v5019_v42  ;;  %v18538_v10 = vcombine.high %v5005_v28, %v5019_v42  ;;  %v11809_v51 = vpack.i.b16 %v11792_v58, %v11788_v39  ;;  %v5028_v56 = vunpack.i.h.s16 %v11764_v15 }
 0x43e   :  { %v5068_v29 = vunpack.i.h.s16 %v11772_v61  ;;  %v5128_v49 = vunpack.i.h.s16 %v11784_v6  ;;  %v5130_v7 = vunpack.i.h.s16 %v18393_v60  ;;  %v5108_v30 = vunpack.i.h.s16 %v11780_v45 }
 0x43f   :  { %v5148_v16 = vunpack.i.h.s16 %v11788_v39  ;;  %v5168_v5 = vunpack.i.h.s16 %v11792_v58  ;;  %v6249_v23 = vcombine.low %v11805_v4, %v11809_v51  ;;  %v6250_v37 = vcombine.high %v11805_v4, %v11809_v51  ;;  %v13123_v51 = vld [vmem:[%s20312_s6 + $0x1b8] sm:$0xff]  }
 0x440   :  { %v6216_v9 = vpack.i.b16 %v5048_v44, %v5028_v56  ;;  %v6224_v2 = vpack.i.b16 %v5088_v36, %v5068_v29  ;;  %v6257_v62 = vrot.slane %v6247_v24, %v18301_v11  ;;  %v18543_v20 = vrot.slane %v6248_v57, %v18301_v11  ;;  %v13124_v56 = vld [vmem:[%s20312_s6 + $0x170] sm:$0xff]  }
 0x441   :  { %v6232_v21 = vpack.i.b16 %v5128_v49, %v5108_v30  ;;  %v6240_v43 = vpack.i.b16 %v5168_v5, %v5148_v16  ;;  %v6271_v15 = vrot.slane %v6249_v23, %v18301_v11  ;;  %v18547_v61 = vrot.slane %v6250_v37, %v18301_v11 }
 0x442   :  { %v6315_v31 = vcombine.low %v6216_v9, %v6224_v2  ;;  %v6316_v27 = vcombine.high %v6216_v9, %v6224_v2  ;;  %v5150_v45 = vunpack.i.h.s16 %v18467_v53  ;;  %v5170_v6 = vunpack.i.h.s16 %v18525_v14 }
 0x443   :  { %v6317_v34 = vcombine.low %v6232_v21, %v6240_v43  ;;  %v6318_v13 = vcombine.high %v6232_v21, %v6240_v43  ;;  %v6279_v19 = vcombine.low %v6257_v62, %v6271_v15  ;;  %v6280_v48 = vcombine.high %v6257_v62, %v6271_v15  ;;  %v13126_v43 = vld [vmem:[%s20312_s6 + $0x1f0] sm:$0xff]  }
 0x444   :  { %v6281_v4 = vcombine.low %v18543_v20, %v18547_v61  ;;  %v6282_v28 = vcombine.high %v18543_v20, %v18547_v61  ;;  %v18559_v42 = vrot.slane %v6315_v31, %v18301_v11  ;;  %v6332_v58 = vrot.slane %v6316_v27, %v18301_v11 }
 0x445   :  { %v18562_v39 = vrot.slane %v6317_v34, %v18301_v11  ;;  %v6346_v24 = vrot.slane %v6318_v13, %v18301_v11  ;;  %v6289_v57 = vrot.slane %v6279_v19, %v18301_v11  ;;  %v6303_v44 = vrot.slane %v6280_v48, %v18301_v11 }
 0x446   :  { %v6310_v36 = vrot.slane %v6282_v28, %v18301_v11  ;;  %v22240_v29 = vunpack.i.h.s16 %v18108_v50  ;;  %v22241_v2 = vunpack.i.h.s16 %v18048_v47  ;;  %v11777_v21 = vpack.c.b16 %v5090_v8, %v18260_v12  ;;  %v22242_v12 = vld [vmem:[#allocation81_spill] sm:$0xff] }
 0x447   :  { %v6347_v30 = vcombine.low %v18559_v42, %v18562_v39  ;;  %v6348_v16 = vcombine.high %v18559_v42, %v18562_v39  ;;  %v6349_v5 = vcombine.low %v6332_v58, %v6346_v24  ;;  %v6350_v23 = vcombine.high %v6332_v58, %v6346_v24  ;;  %9959 = vmatprep.mubr.bf16.mxu0 %v6303_v44  ;;  %v13148_v42 = vld [vmem:[%s20312_s6 + $0x140] sm:$0xff]  }
 0x448   :  { %v11769_v49 = vpack.c.b16 %v22240_v29, %v18108_v50  ;;  %v6311_v37 = vcombine.high %v6289_v57, %v6289_v57  ;;  %v6313_v9 = vcombine.high %v6303_v44, %v6303_v44  ;;  %v11765_v62 = vpack.c.b16 %v22241_v2, %v18048_v47  ;;  %9960 = vmatmul.mubr.bf16.vlgmr.msra.gmra.mxu0 %v6289_v57  ;;  %v13125_v50 = vld [vmem:[%s20312_s6 + $0x130] sm:$0xff]   ;;  %v13134_v2 = vld [vmem:[%s20312_s6 + $0x1e0] sm:$0xff]  }
 0x449   :  { %v18593_v15 = vrot.slane %v6347_v30, %v18301_v11  ;;  %v18596_v31 = vrot.slane %v6350_v23, %v18301_v11  ;;  %v18599_v27 = vrot.slane %v6349_v5, %v18301_v11  ;;  %v11773_v47 = vpack.c.b16 %v5070_v46, %v22238_v1  ;;  %12370 = vmatpush3.bf16.msra.mxu0 %v13121_v55  ;;  %v13127_v1 = vld [vmem:[%s20312_s6 + $0x1b0] sm:$0xff]   ;;  %v13128_v46 = vld [vmem:[%s20312_s6 + $0x168] sm:$0xff]  }
 0x44a   :  { %v5080_v8 = vunpack.i.h.s16 %v22242_v12  ;;  %v5095_v34 = vunpack.i.h.s16 %v18283_v54  ;;  %9999 = vmatprep.mubr.bf16.mxu1 %v6313_v9  ;;  %v11781_v13 = vpack.c.b16 %v5110_v59, %v18339_v33  ;;  %v11785_v19 = vpack.c.b16 %v5130_v7, %v18393_v60  ;;  %10039 = vmatprep.mubr.bf16.mxu0 %v6310_v36  ;;  %v13129_v33 = vld [vmem:[%s20312_s6 + $0x128] sm:$0xff]   ;;  %v13133_v9 = vld [vmem:[%s20312_s6 + $0x120] sm:$0xff]  }
 0x44b   :  { %v5115_v48 = vunpack.i.h.s16 %v18359_v38  ;;  %10000 = vmatmul.mubr.bf16.vlgmr.msra.gmra.mxu1 %v6311_v37  ;;  %v6314_v28 = vcombine.high %v6310_v36, %v6310_v36  ;;  %v11789_v55 = vpack.c.b16 %v5150_v45, %v18467_v53  ;;  %v5053_v58 = vunpack.i.h.s16 %v11769_v49  ;;  %12371 = vmatprep.subr.bf16.mxu0 %v13124_v56  ;;  %v13130_v60 = vld [vmem:[%s20312_s6 + $0x1e8] sm:$0xff]   ;;  %v13132_v56 = vld [vmem:[%s20312_s6 + $0x160] sm:$0xff]  }
 0x44c   :  { %12392 = vmatpush3.bf16.msra.mxu1 %v13123_v51  ;;  %v11793_v59 = vpack.c.b16 %v5170_v6, %v18525_v14  ;;  %v11798_v7 = vpack.i.b16 %v11769_v49, %v11765_v62  ;;  %v11802_v24 = vpack.i.b16 %v11777_v21, %v11773_v47  ;;  %v5033_v57 = vunpack.i.h.s16 %v11765_v62  ;;  %v13131_v51 = vld [vmem:[%s20312_s6 + $0x1a8] sm:$0xff]  }
 0x44d   :  { %10079 = vmatprep.mubr.bf16.mxu1 %v6314_v28  ;;  %12393 = vmatprep.subr.bf16.mxu1 %v13126_v43  ;;  %v11806_v44 = vpack.i.b16 %v11785_v19, %v11781_v13  ;;  %v5073_v53 = vunpack.i.h.s16 %v11773_v47  ;;  %v5093_v45 = vunpack.i.h.s16 %v11777_v21  ;;  %v5113_v36 = vunpack.i.h.s16 %v11781_v13 }
 0x44e   :  { %12372 = vmatpush3.bf16.msra.mxu0 %v13125_v50  ;;  %v11810_v29 = vpack.i.b16 %v11793_v59, %v11789_v55  ;;  %v6383_v14 = vcombine.low %v11798_v7, %v11802_v24  ;;  %v6384_v6 = vcombine.high %v11798_v7, %v11802_v24  ;;  %v5133_v49 = vunpack.i.h.s16 %v11785_v19 }
 0x44f   :  { %12373 = vmatprep.subr.bf16.mxu0 %v13128_v46  ;;  %v5153_v30 = vunpack.i.h.s16 %v11789_v55  ;;  %v5173_v5 = vunpack.i.h.s16 %v11793_v59  ;;  %v6218_v23 = vpack.i.b16 %v5053_v58, %v5033_v57  ;;  %v6226_v37 = vpack.i.b16 %v5093_v45, %v5073_v53  ;;  %v13135_v55 = vld [vmem:[%s20312_s6 + $0x1a0] sm:$0xff]   ;;  %v13136_v58 = vld [vmem:[%s20312_s6 + $0x158] sm:$0xff]  }
 0x450   :  { %12394 = vmatpush3.bf16.msra.mxu1 %v13127_v1  ;;  %v6385_v62 = vcombine.low %v11806_v44, %v11810_v29  ;;  %v6393_v21 = vrot.slane %v6383_v14, %v18301_v11  ;;  %v6386_v50 = vcombine.high %v11806_v44, %v11810_v29  ;;  %v6400_v43 = vrot.slane %v6384_v6, %v18301_v11  ;;  %v13138_v53 = vld [vmem:[%s20312_s6 + $0x1d8] sm:$0xff]  }
 0x451   :  { %12395 = vmatprep.subr.bf16.mxu1 %v13130_v60  ;;  %v6234_v47 = vpack.i.b16 %v5133_v49, %v5113_v36  ;;  %v6242_v13 = vpack.i.b16 %v5173_v5, %v5153_v30  ;;  %v6451_v19 = vcombine.low %v6218_v23, %v6226_v37  ;;  %v6452_v28 = vcombine.high %v6218_v23, %v6226_v37  ;;  %v13139_v5 = vld [vmem:[%s20312_s6 + $0x198] sm:$0xff]   ;;  %v13140_v23 = vld [vmem:[%s20312_s6 + $0x150] sm:$0xff]  }
 0x452   :  { %v5135_v1 = vunpack.i.h.s16 %v18413_v35  ;;  %v5155_v46 = vunpack.i.h.s16 %v18487_v0  ;;  %12374 = vmatpush3.bf16.msra.mxu0 %v13129_v33  ;;  %v6407_v59 = vrot.slane %v6385_v62, %v18301_v11  ;;  %v6414_v60 = vrot.slane %v6386_v50, %v18301_v11  ;;  %v13137_v33 = vld [vmem:[%s20312_s6 + $0x118] sm:$0xff]  }
 0x453   :  { %12375 = vmatprep.subr.bf16.mxu0 %v13132_v56  ;;  %v6453_v7 = vcombine.low %v6234_v47, %v6242_v13  ;;  %v6461_v24 = vrot.slane %v6451_v19, %v18301_v11  ;;  %v6454_v57 = vcombine.high %v6234_v47, %v6242_v13  ;;  %v6468_v44 = vrot.slane %v6452_v28, %v18301_v11  ;;  %v13141_v13 = vld [vmem:[%s20312_s6 + $0x110] sm:$0xff]  }
 0x454   :  { %12396 = vmatpush3.bf16.msra.mxu1 %v13131_v51  ;;  %v6415_v45 = vcombine.low %v6393_v21, %v6407_v59  ;;  %v6416_v36 = vcombine.high %v6393_v21, %v6407_v59  ;;  %v6417_v29 = vcombine.low %v6400_v43, %v6414_v60  ;;  %v6418_v14 = vcombine.high %v6400_v43, %v6414_v60  ;;  %v13142_v19 = vld [vmem:[%s20312_s6 + $0x1d0] sm:$0xff]  }
 0x455   :  { %v5175_v56 = vunpack.i.h.s16 %v18536_v63  ;;  %12397 = vmatprep.subr.bf16.mxu1 %v13134_v2  ;;  %v6475_v6 = vrot.slane %v6453_v7, %v18301_v11  ;;  %v6482_v49 = vrot.slane %v6454_v57, %v18301_v11  ;;  %v22243_v51 = vunpack.i.h.s16 %v18142_v41 }
 0x456   :  { %12376 = vmatpush3.bf16.msra.mxu0 %v13133_v9  ;;  %v18672_v37 = vrot.slane %v6416_v36, %v18301_v11  ;;  %v18675_v2 = vrot.slane %v6415_v45, %v18301_v11  ;;  %v18678_v62 = vrot.slane %v6418_v14, %v18301_v11  ;;  %v5100_v47 = vunpack.i.h.s16 %v18285_v26 }
 0x457   :  { %v18663_v30 = vpack.c.b16 %v22243_v51, %v18142_v41  ;;  %v18681_v41 = vrot.slane %v6417_v29, %v18301_v11  ;;  %12377 = vmatprep.subr.bf16.mxu0 %v13136_v58  ;;  %v6483_v9 = vcombine.low %v6461_v24, %v6475_v6  ;;  %v6484_v21 = vcombine.high %v6461_v24, %v6475_v6  ;;  %v13147_v29 = vld [vmem:[%s20312_s6 + $0x188] sm:$0xff]  }
 0x458   :  { %v6485_v50 = vcombine.low %v6468_v44, %v6482_v49  ;;  %v6486_v43 = vcombine.high %v6468_v44, %v6482_v49  ;;  %12398 = vmatpush3.bf16.msra.mxu1 %v13135_v55  ;;  %v22244_v28 = vunpack.i.h.s16 %v18074_v3  ;;  %v11774_v58 = vpack.c.b16 %v5075_v25, %v22239_v22  ;;  %v13143_v22 = vld [vmem:[%s20312_s6 + $0x190] sm:$0xff]  }
 0x459   :  { %v11778_v55 = vpack.c.b16 %v5095_v34, %v18283_v54  ;;  %12399 = vmatprep.subr.bf16.mxu1 %v13138_v53  ;;  %v18700_v60 = vrot.slane %v6484_v21, %v18301_v11  ;;  %v18703_v7 = vrot.slane %v6483_v9, %v18301_v11  ;;  %v13144_v54 = vld [vmem:[%s20312_s6 + $0x148] sm:$0xff]   ;;  %v11782_v25 = vpack.c.b16 %v5115_v48, %v18359_v38 }
 0x45a   :  { %v11766_v59 = vpack.c.b16 %v22244_v28, %v18074_v3  ;;  %v18706_v24 = vrot.slane %v6486_v43, %v18301_v11  ;;  %v18709_v3 = vrot.slane %v6485_v50, %v18301_v11  ;;  %12378 = vmatpush3.bf16.msra.mxu0 %v13137_v33  ;;  %v11786_v34 = vpack.c.b16 %v5135_v1, %v18413_v35  ;;  %v13145_v38 = vld [vmem:[%s20312_s6 + $0x108] sm:$0xff]  }
 0x45b   :  { %v11790_v57 = vpack.c.b16 %v5155_v46, %v18487_v0  ;;  %v11794_v44 = vpack.c.b16 %v5175_v56, %v18536_v63  ;;  %v5120_v33 = vunpack.i.h.s16 %v18361_v32  ;;  %v5140_v53 = vunpack.i.h.s16 %v18415_v40  ;;  %12379 = vmatprep.subr.bf16.mxu0 %v13140_v23  ;;  %v13146_v0 = vld [vmem:[%s20312_s6 + $0x1c8] sm:$0xff]   ;;  %v13150_v23 = vld [vmem:[%s20312_s6 + $0x1c0] sm:$0xff]  }
 0x45c   :  { %v18729_v45 = vrot.slane %v6281_v4, %v18301_v11  ;;  %v11799_v36 = vpack.i.b16 %v18663_v30, %v11766_v59  ;;  %12400 = vmatpush3.bf16.msra.mxu1 %v13139_v5  ;;  %v18742_v35 = vrot.slane %v6348_v16, %v18301_v11  ;;  %v11803_v63 = vpack.i.b16 %v11778_v55, %v11774_v58  ;;  %v13149_v5 = vld [vmem:[%s20312_s6 + $0x100] sm:$0xff]  }
 0x45d   :  { %v11807_v20 = vpack.i.b16 %v11786_v34, %v11782_v25  ;;  %v11811_v61 = vpack.i.b16 %v11794_v44, %v11790_v57  ;;  %12401 = vmatprep.subr.bf16.mxu1 %v13142_v19  ;;  %v5038_v4 = vunpack.i.h.s16 %v11766_v59  ;;  %v5058_v48 = vunpack.i.h.s16 %v18663_v30 }
 0x45e   :  { %v5078_v1 = vunpack.i.h.s16 %v11774_v58  ;;  %v5098_v46 = vunpack.i.h.s16 %v11778_v55  ;;  %12380 = vmatpush3.bf16.msra.mxu0 %v13141_v13  ;;  %v6519_v39 = vcombine.low %v11799_v36, %v11803_v63  ;;  %v6520_v14 = vcombine.high %v11799_v36, %v11803_v63  ;;  %v13151_v58 = vld [vmem:[%s20312_s6 + $0x180] sm:$0xff]   ;;  %v13152_v55 = vld [vmem:[%s20312_s6 + $0x278] sm:$0xff]  }
 0x45f   :  { %v6521_v16 = vcombine.low %v11807_v20, %v11811_v61  ;;  %v6522_v56 = vcombine.high %v11807_v20, %v11811_v61  ;;  %12381 = vmatprep.subr.bf16.mxu0 %v13144_v54  ;;  %v5118_v6 = vunpack.i.h.s16 %v11782_v25  ;;  %v5138_v49 = vunpack.i.h.s16 %v11786_v34  ;;  %v13154_v63 = vld [vmem:[%s20312_s6 + $0x2f8] sm:$0xff]  }
 0x460   :  { %v5158_v51 = vunpack.i.h.s16 %v11790_v57  ;;  %v5178_v30 = vunpack.i.h.s16 %v11794_v44  ;;  %12402 = vmatpush3.bf16.msra.mxu1 %v13143_v22  ;;  %v6529_v9 = vrot.slane %v6519_v39, %v18301_v11  ;;  %v6536_v50 = vrot.slane %v6520_v14, %v18301_v11 }
 0x461   :  { %v6543_v21 = vrot.slane %v6521_v16, %v18301_v11  ;;  %v6550_v43 = vrot.slane %v6522_v56, %v18301_v11  ;;  %12403 = vmatprep.subr.bf16.mxu1 %v13146_v0  ;;  %v6220_v13 = vpack.i.b16 %v5058_v48, %v5038_v4  ;;  %v6228_v19 = vpack.i.b16 %v5098_v46, %v5078_v1  ;;  %v13155_v56 = vld [vmem:[%s20312_s6 + $0x2b8] sm:$0xff]  }
 0x462   :  { %v6236_v28 = vpack.i.b16 %v5138_v49, %v5118_v6  ;;  %v6244_v59 = vpack.i.b16 %v5178_v30, %v5158_v51  ;;  %12382 = vmatpush3.bf16.msra.mxu0 %v13145_v38  ;;  %v13153_v38 = vld [vmem:[%s20312_s6 + $0x238] sm:$0xff]   ;;  %v5160_v39 = vunpack.i.h.s16 %v18489_v18  ;;  %v5180_v16 = vunpack.i.h.s16 %v18538_v10  ;;  %v13156_v49 = vld [vmem:[%s20312_s6 + $0x270] sm:$0xff]  }
 0x463   :  { %v6551_v22 = vcombine.low %v6529_v9, %v6543_v21  ;;  %v6552_v54 = vcombine.high %v6529_v9, %v6543_v21  ;;  %v6553_v25 = vcombine.low %v6536_v50, %v6550_v43  ;;  %v6554_v34 = vcombine.high %v6536_v50, %v6550_v43  ;;  %12383 = vmatprep.subr.bf16.mxu0 %v13148_v42 }
 0x464   :  { %v6587_v57 = vcombine.low %v6220_v13, %v6228_v19  ;;  %v6589_v44 = vcombine.low %v6236_v28, %v6244_v59  ;;  %v6588_v36 = vcombine.high %v6220_v13, %v6228_v19  ;;  %v6590_v0 = vcombine.high %v6236_v28, %v6244_v59  ;;  %12404 = vmatpush3.bf16.msra.mxu1 %v13147_v29  ;;  %v13157_v28 = vld [vmem:[%s20312_s6 + $0x230] sm:$0xff]  }
 0x465   :  { %v18774_v20 = vrot.slane %v6552_v54, %v18301_v11  ;;  %v18777_v61 = vrot.slane %v6551_v22, %v18301_v11  ;;  %v18780_v4 = vrot.slane %v6554_v34, %v18301_v11  ;;  %v18783_v48 = vrot.slane %v6553_v25, %v18301_v11  ;;  %12405 = vmatprep.subr.bf16.mxu1 %v13150_v23  ;;  %v13159_v59 = vld [vmem:[%s20312_s6 + $0x2b0] sm:$0xff]  }
 0x466   :  { %v6597_v1 = vrot.slane %v6587_v57, %v18301_v11  ;;  %v6611_v46 = vrot.slane %v6589_v44, %v18301_v11  ;;  %v6604_v29 = vrot.slane %v6588_v36, %v18301_v11  ;;  %v6618_v42 = vrot.slane %v6590_v0, %v18301_v11  ;;  %12384 = vmatpush3.bf16.msra.mxu0 %v13149_v5  ;;  %v13163_v44 = vld [vmem:[%s20312_s6 + $0x2a8] sm:$0xff]   ;;  %v13164_v36 = vld [vmem:[%s20312_s6 + $0x260] sm:$0xff]  }
 0x467   :  { %v6312_v14 = vcombine.high %v18729_v45, %v18729_v45  ;;  %v6381_v6 = vcombine.high %v18742_v35, %v18742_v35  ;;  %12413 = vmatprep.subr.bf16.mxu0 %v13152_v55  ;;  %v22245_v5 = vunpack.i.h.s16 %v18076_v17  ;;  %v22246_v50 = vunpack.i.h.s16 %v18144_v52 }
 0x468   :  { %v6619_v51 = vcombine.low %v6597_v1, %v6611_v46  ;;  %v6620_v30 = vcombine.high %v6597_v1, %v6611_v46  ;;  %v6621_v23 = vcombine.low %v6604_v29, %v6618_v42  ;;  %v6622_v9 = vcombine.high %v6604_v29, %v6618_v42  ;;  %12406 = vmatpush3.bf16.msra.mxu1 %v13151_v58  ;;  %v13165_v42 = vld [vmem:[%s20312_s6 + $0x220] sm:$0xff]  }
 0x469   :  { %v11767_v21 = vpack.c.b16 %v22245_v5, %v18076_v17  ;;  %v11771_v43 = vpack.c.b16 %v22246_v50, %v18144_v52  ;;  %v11775_v13 = vpack.c.b16 %v5080_v8, %v22242_v12  ;;  %v11779_v19 = vpack.c.b16 %v5100_v47, %v18285_v26  ;;  %10040 = vmatmul.mubr.bf16.vlgmr.msra.gmra.mxu0 %v18729_v45  ;;  %v13158_v17 = vld [vmem:[%s20312_s6 + $0x2f0] sm:$0xff]  }
 0x46a   :  { %12435 = vmatprep.subr.bf16.mxu1 %v13154_v63  ;;  %v18821_v52 = vrot.slane %v6620_v30, %v18301_v11  ;;  %v18824_v12 = vrot.slane %v6619_v51, %v18301_v11  ;;  %v18827_v8 = vrot.slane %v6622_v9, %v18301_v11  ;;  %12414 = vmatpush3.bf16.msra.mxu0 %v13153_v38  ;;  %v13168_v9 = vld [vmem:[%s20312_s6 + $0x258] sm:$0xff]  }
 0x46b   :  { %10119 = vmatprep.mubr.bf16.mxu0 %v18742_v35  ;;  %v18831_v26 = vrot.slane %v6621_v23, %v18301_v11  ;;  %v11783_v47 = vpack.c.b16 %v5120_v33, %v18361_v32  ;;  %v11787_v45 = vpack.c.b16 %v5140_v53, %v18415_v40  ;;  %10080 = vmatmul.mubr.bf16.vlgmr.msra.gmra.mxu1 %v6312_v14  ;;  %v13160_v35 = vld [vmem:[%s20312_s6 + $0x268] sm:$0xff]   ;;  %v5063_v58 = vunpack.i.h.s16 %v11771_v43  ;;  %v13167_v23 = vld [vmem:[%s20312_s6 + $0x2a0] sm:$0xff]  }
 0x46c   :  { %12415 = vmatprep.subr.bf16.mxu0 %v13156_v49  ;;  %12436 = vmatpush3.bf16.msra.mxu1 %v13155_v56  ;;  %v13161_v32 = vld [vmem:[%s20312_s6 + $0x228] sm:$0xff]   ;;  %v11791_v33 = vpack.c.b16 %v5160_v39, %v18489_v18  ;;  %v11795_v53 = vpack.c.b16 %v5180_v16, %v18538_v10  ;;  %v11800_v55 = vpack.i.b16 %v11771_v43, %v11767_v21  ;;  %v5043_v22 = vunpack.i.h.s16 %v11767_v21  ;;  %v13166_v39 = vld [vmem:[%s20312_s6 + $0x2e0] sm:$0xff]  }
 0x46d   :  { %10159 = vmatprep.mubr.bf16.mxu1 %v6381_v6  ;;  %v13162_v40 = vld [vmem:[%s20312_s6 + $0x2e8] sm:$0xff]   ;;  %12437 = vmatprep.subr.bf16.mxu1 %v13158_v17  ;;  %v11804_v54 = vpack.i.b16 %v11779_v19, %v11775_v13  ;;  %v11808_v25 = vpack.i.b16 %v11787_v45, %v11783_v47  ;;  %v5083_v34 = vunpack.i.h.s16 %v11775_v13  ;;  %v5103_v57 = vunpack.i.h.s16 %v11779_v19  ;;  %v13170_v17 = vld [vmem:[%s20312_s6 + $0x2d8] sm:$0xff]  }
 0x46e   :  { %12416 = vmatpush3.bf16.msra.mxu0 %v13157_v28  ;;  %v11812_v0 = vpack.i.b16 %v11795_v53, %v11791_v33  ;;  %v5123_v18 = vunpack.i.h.s16 %v11783_v47  ;;  %v5143_v38 = vunpack.i.h.s16 %v11787_v45  ;;  %v5163_v10 = vunpack.i.h.s16 %v11791_v33  ;;  %v13169_v28 = vld [vmem:[%s20312_s6 + $0x218] sm:$0xff]  }
 0x46f   :  { %12417 = vmatprep.subr.bf16.mxu0 %v13160_v35  ;;  %v6655_v63 = vcombine.low %v11800_v55, %v11804_v54  ;;  %v6656_v1 = vcombine.high %v11800_v55, %v11804_v54  ;;  %v5183_v46 = vunpack.i.h.s16 %v11795_v53  ;;  %v6222_v29 = vpack.i.b16 %v5063_v58, %v5043_v22  ;;  %v13171_v53 = vld [vmem:[%s20312_s6 + $0x298] sm:$0xff]   ;;  %v13172_v55 = vld [vmem:[%s20312_s6 + $0x250] sm:$0xff]  }
 0x470   :  { %12438 = vmatpush3.bf16.msra.mxu1 %v13159_v59  ;;  %v6657_v16 = vcombine.low %v11808_v25, %v11812_v0  ;;  %v6658_v14 = vcombine.high %v11808_v25, %v11812_v0  ;;  %v6230_v56 = vpack.i.b16 %v5103_v57, %v5083_v34  ;;  %v6238_v6 = vpack.i.b16 %v5143_v38, %v5123_v18  ;;  %v13173_v18 = vld [vmem:[%s20312_s6 + $0x210] sm:$0xff]  }
 0x471   :  { %12439 = vmatprep.subr.bf16.mxu1 %v13162_v40  ;;  %v6665_v49 = vrot.slane %v6655_v63, %v18301_v11  ;;  %v6672_v51 = vrot.slane %v6656_v1, %v18301_v11  ;;  %v6246_v30 = vpack.i.b16 %v5183_v46, %v5163_v10  ;;  %v13174_v38 = vld [vmem:[%s20312_s6 + $0x2d0] sm:$0xff]  }
 0x472   :  { %12418 = vmatpush3.bf16.msra.mxu0 %v13161_v32  ;;  %v6679_v5 = vrot.slane %v6657_v16, %v18301_v11  ;;  %v6686_v21 = vrot.slane %v6658_v14, %v18301_v11  ;;  %v6723_v50 = vcombine.low %v6222_v29, %v6230_v56  ;;  %v6724_v43 = vcombine.high %v6222_v29, %v6230_v56  ;;  %v13175_v29 = vld [vmem:[%s20312_s6 + $0x290] sm:$0xff]   ;;  %v13179_v16 = vld [vmem:[%s20312_s6 + $0x288] sm:$0xff]   ;;  %v13180_v14 = vld [vmem:[%s20312_s6 + $0x240] sm:$0xff]  }
 0x473   :  { %12419 = vmatprep.subr.bf16.mxu0 %v13164_v36  ;;  %v6725_v13 = vcombine.low %v6238_v6, %v6246_v30  ;;  %v6726_v19 = vcombine.high %v6238_v6, %v6246_v30  ;;  %v13181_v56 = vld [vmem:[%s20312_s6 + $0x200] sm:$0xff]   ;;  %v13185_v30 = vld [vmem:[%s20312_s6 + $0x338] sm:$0xff]  }
 0x474   :  { %12440 = vmatpush3.bf16.msra.mxu1 %v13163_v44  ;;  %v6687_v47 = vcombine.low %v6665_v49, %v6679_v5  ;;  %v6688_v45 = vcombine.high %v6665_v49, %v6679_v5  ;;  %v6689_v59 = vcombine.low %v6672_v51, %v6686_v21  ;;  %v6690_v35 = vcombine.high %v6672_v51, %v6686_v21  ;;  %v13182_v6 = vld [vmem:[%s20312_s6 + $0x2c0] sm:$0xff]   ;;  %v13184_v51 = vld [vmem:[%s20312_s6 + $0x378] sm:$0xff]   ;;  %v13188_v5 = vld [vmem:[%s20312_s6 + $0x370] sm:$0xff]  }
 0x475   :  { %12441 = vmatprep.subr.bf16.mxu1 %v13166_v39  ;;  %v6733_v58 = vrot.slane %v6723_v50, %v18301_v11  ;;  %v6747_v32 = vrot.slane %v6725_v13, %v18301_v11  ;;  %v6740_v40 = vrot.slane %v6724_v43, %v18301_v11  ;;  %v6754_v33 = vrot.slane %v6726_v19, %v18301_v11  ;;  %v13177_v39 = vld [vmem:[%s20312_s6 + $0x208] sm:$0xff]   ;;  %v13183_v49 = vld [vmem:[%s20312_s6 + $0x280] sm:$0xff]   ;;  %v13189_v50 = vld [vmem:[%s20312_s6 + $0x330] sm:$0xff]  }
 0x476   :  { %12420 = vmatpush3.bf16.msra.mxu0 %v13165_v42  ;;  %v18892_v22 = vrot.slane %v6688_v45, %v18301_v11  ;;  %v18895_v54 = vrot.slane %v6687_v47, %v18301_v11  ;;  %v18898_v25 = vrot.slane %v6690_v35, %v18301_v11  ;;  %v18901_v34 = vrot.slane %v6689_v59, %v18301_v11  ;;  %v13176_v42 = vld [vmem:[%s20312_s6 + $0x248] sm:$0xff]   ;;  %v13190_v43 = vld [vmem:[%s20312_s6 + $0x3f0] sm:$0xff]   ;;  %v13197_v45 = vld [vmem:[%s20312_s6 + $0x320] sm:$0xff]  }
 0x477   :  { %12421 = vmatprep.subr.bf16.mxu0 %v13168_v9  ;;  %v6755_v57 = vcombine.low %v6733_v58, %v6747_v32  ;;  %v6756_v44 = vcombine.high %v6733_v58, %v6747_v32  ;;  %v6757_v36 = vcombine.low %v6740_v40, %v6754_v33  ;;  %v6758_v0 = vcombine.high %v6740_v40, %v6754_v33  ;;  %v13187_v9 = vld [vmem:[%s20312_s6 + $0x3b8] sm:$0xff]   ;;  %v13191_v19 = vld [vmem:[%s20312_s6 + $0x3b0] sm:$0xff]   ;;  %v13195_v47 = vld [vmem:[%s20312_s6 + $0x3a8] sm:$0xff]  }
 0x478   :  { %12442 = vmatpush3.bf16.msra.mxu1 %v13167_v23  ;;  %v13186_v23 = vld [vmem:[%s20312_s6 + $0x3f8] sm:$0xff]   ;;  %v6379_v21 = vcombine.high %v18593_v15, %v18593_v15  ;;  %v6382_v13 = vcombine.high %v18596_v31, %v18596_v31  ;;  %v13198_v59 = vld [vmem:[%s20312_s6 + $0x3e0] sm:$0xff]  }
 0x479   :  { %12443 = vmatprep.subr.bf16.mxu1 %v13170_v17  ;;  %v18910_v10 = vrot.slane %v6756_v44, %v18301_v11  ;;  %v18913_v63 = vrot.slane %v6755_v57, %v18301_v11  ;;  %v18916_v1 = vrot.slane %v6758_v0, %v18301_v11  ;;  %v18919_v46 = vrot.slane %v6757_v36, %v18301_v11  ;;  %v13178_v11 = vld [vmem:[%s20312_s6 + $0x2c8] sm:$0xff]   ;;  %v13196_v17 = vld [vmem:[%s20312_s6 + $0x360] sm:$0xff]   ;;  %v13200_v58 = vld [vmem:[%s20312_s6 + $0x358] sm:$0xff]  }
 0x47a   :  { %12422 = vmatpush3.bf16.msra.mxu0 %v13169_v28  ;;  %v13194_v28 = vld [vmem:[%s20312_s6 + $0x3e8] sm:$0xff]   ;;  %v13199_v35 = vld [vmem:[%s20312_s6 + $0x3a0] sm:$0xff]   ;;  %v13201_v32 = vld [vmem:[%s20312_s6 + $0x318] sm:$0xff]  }
 0x47b   :  { %12423 = vmatprep.subr.bf16.mxu0 %v13172_v55  ;;  %v13202_v40 = vld [vmem:[%s20312_s6 + $0x3d8] sm:$0xff]   ;;  %v13205_v55 = vld [vmem:[%s20312_s6 + $0x310] sm:$0xff]   ;;  %v13208_v36 = vld [vmem:[%s20312_s6 + $0x348] sm:$0xff]  }
 0x47c   :  { %12444 = vmatpush3.bf16.msra.mxu1 %v13171_v53  ;;  %v13203_v33 = vld [vmem:[%s20312_s6 + $0x398] sm:$0xff]   ;;  %v13204_v53 = vld [vmem:[%s20312_s6 + $0x350] sm:$0xff]   ;;  %v13209_v0 = vld [vmem:[%s20312_s6 + $0x308] sm:$0xff]  }
 0x47d   :  { %12445 = vmatprep.subr.bf16.mxu1 %v13174_v38  ;;  %v13206_v57 = vld [vmem:[%s20312_s6 + $0x3d0] sm:$0xff]   ;;  %v13211_v38 = vld [vmem:[%s20312_s6 + $0x388] sm:$0xff]  }
 0x47e   :  { %12424 = vmatpush3.bf16.msra.mxu0 %v13173_v18  ;;  %v13207_v44 = vld [vmem:[%s20312_s6 + $0x390] sm:$0xff]   ;;  %v13210_v18 = vld [vmem:[%s20312_s6 + $0x3c8] sm:$0xff]  }
 0x47f   :  { %12425 = vmatprep.subr.bf16.mxu0 %v13176_v42  ;;  %v13213_v42 = vld [vmem:[%s20312_s6 + $0x300] sm:$0xff]  }
 0x480   :  { %12446 = vmatpush3.bf16.msra.mxu1 %v13175_v29  ;;  %v13212_v29 = vld [vmem:[%s20312_s6 + $0x340] sm:$0xff]  }
 0x481   :  { %12447 = vmatprep.subr.bf16.mxu1 %v13178_v11  ;;  %v13215_v11 = vld [vmem:[%s20312_s6 + $0x380] sm:$0xff]  }
 0x482   :  { %12426 = vmatpush3.bf16.msra.mxu0 %v13177_v39  ;;  %v13214_v39 = vld [vmem:[%s20312_s6 + $0x3c0] sm:$0xff]  }
 0x483   :  { %12427 = vmatprep.subr.bf16.mxu0 %v13180_v14  ;;  %v13217_v14 = vld [vmem:[%s20312_s6 + $0x438] sm:$0xff]  }
 0x484   :  { %12448 = vmatpush3.bf16.msra.mxu1 %v13179_v16  ;;  %v13216_v16 = vld [vmem:[%s20312_s6 + $0x478] sm:$0xff]  }
 0x485   :  { %12449 = vmatprep.subr.bf16.mxu1 %v13182_v6  ;;  %v13219_v6 = vld [vmem:[%s20312_s6 + $0x4b8] sm:$0xff]  }
 0x486   :  { %12428 = vmatpush3.bf16.msra.mxu0 %v13181_v56  ;;  %v13218_v56 = vld [vmem:[%s20312_s6 + $0x4f8] sm:$0xff]  }
 0x487   :  { %12457 = vmatprep.subr.bf16.mxu0 %v13184_v51  ;;  %v13221_v51 = vld [vmem:[%s20312_s6 + $0x430] sm:$0xff]  }
 0x488   :  { %12450 = vmatpush3.bf16.msra.mxu1 %v13183_v49  ;;  %v13220_v49 = vld [vmem:[%s20312_s6 + $0x470] sm:$0xff]  }
 0x489   :  { %10120 = vmatmul.mubr.bf16.vlgmr.msra.gmra.mxu0 %v18593_v15  ;;  %12479 = vmatprep.subr.bf16.mxu1 %v13186_v23  ;;  %v13192_v15 = vld [vmem:[%s20312_s6 + $0x368] sm:$0xff]   ;;  %v13222_v23 = vld [vmem:[%s20312_s6 + $0x4f0] sm:$0xff]  }
 0x48a   :  { %12458 = vmatpush3.bf16.msra.mxu0 %v13185_v30  ;;  %10199 = vmatprep.mubr.bf16.mxu0 %v18596_v31  ;;  %v13193_v31 = vld [vmem:[%s20312_s6 + $0x328] sm:$0xff]   ;;  %v6380_v30 = vcombine.high %v18599_v27, %v18599_v27 }
 0x48b   :  { %10160 = vmatmul.mubr.bf16.vlgmr.msra.gmra.mxu1 %v6379_v21  ;;  %12459 = vmatprep.subr.bf16.mxu0 %v13188_v5  ;;  %v6449_v5 = vcombine.high %v18672_v37, %v18672_v37  ;;  %v13223_v21 = vld [vmem:[%s20312_s6 + $0x4b0] sm:$0xff]  }
 0x48c   :  { %12480 = vmatpush3.bf16.msra.mxu1 %v13187_v9  ;;  %10239 = vmatprep.mubr.bf16.mxu1 %v6382_v13  ;;  %v13224_v9 = vld [vmem:[%s20312_s6 + $0x468] sm:$0xff]   ;;  %v13229_v13 = vld [vmem:[%s20312_s6 + $0x420] sm:$0xff]  }
 0x48d   :  { %12481 = vmatprep.subr.bf16.mxu1 %v13190_v43  ;;  %v13227_v43 = vld [vmem:[%s20312_s6 + $0x4a8] sm:$0xff]  }
 0x48e   :  { %12460 = vmatpush3.bf16.msra.mxu0 %v13189_v50  ;;  %v13225_v50 = vld [vmem:[%s20312_s6 + $0x428] sm:$0xff]  }
 0x48f   :  { %12461 = vmatprep.subr.bf16.mxu0 %v13192_v15  ;;  %v13231_v15 = vld [vmem:[%s20312_s6 + $0x4a0] sm:$0xff]  }
 0x490   :  { %12482 = vmatpush3.bf16.msra.mxu1 %v13191_v19  ;;  %v13230_v19 = vld [vmem:[%s20312_s6 + $0x4e0] sm:$0xff]  }
 0x491   :  { %12483 = vmatprep.subr.bf16.mxu1 %v13194_v28  ;;  %v13232_v28 = vld [vmem:[%s20312_s6 + $0x458] sm:$0xff]  }
 0x492   :  { %12462 = vmatpush3.bf16.msra.mxu0 %v13193_v31  ;;  %v13233_v31 = vld [vmem:[%s20312_s6 + $0x418] sm:$0xff]  }
 0x493   :  { %12463 = vmatprep.subr.bf16.mxu0 %v13196_v17  ;;  %v13234_v17 = vld [vmem:[%s20312_s6 + $0x4d8] sm:$0xff]  }
 0x494   :  { %12484 = vmatpush3.bf16.msra.mxu1 %v13195_v47  ;;  %v13235_v47 = vld [vmem:[%s20312_s6 + $0x498] sm:$0xff]  }
 0x495   :  { %12485 = vmatprep.subr.bf16.mxu1 %v13198_v59  ;;  %v13237_v59 = vld [vmem:[%s20312_s6 + $0x410] sm:$0xff]  }
 0x496   :  { %12464 = vmatpush3.bf16.msra.mxu0 %v13197_v45  ;;  %v13236_v45 = vld [vmem:[%s20312_s6 + $0x450] sm:$0xff]  }
 0x497   :  { %12465 = vmatprep.subr.bf16.mxu0 %v13200_v58  ;;  %v13239_v58 = vld [vmem:[%s20312_s6 + $0x490] sm:$0xff]  }
 0x498   :  { %12486 = vmatpush3.bf16.msra.mxu1 %v13199_v35  ;;  %v13238_v35 = vld [vmem:[%s20312_s6 + $0x4d0] sm:$0xff]  }
 0x499   :  { %12487 = vmatprep.subr.bf16.mxu1 %v13202_v40  ;;  %v13241_v40 = vld [vmem:[%s20312_s6 + $0x408] sm:$0xff]  }
 0x49a   :  { %12466 = vmatpush3.bf16.msra.mxu0 %v13201_v32  ;;  %v13240_v32 = vld [vmem:[%s20312_s6 + $0x448] sm:$0xff]  }
 0x49b   :  { %12467 = vmatprep.subr.bf16.mxu0 %v13204_v53  ;;  %v13243_v53 = vld [vmem:[%s20312_s6 + $0x488] sm:$0xff]  }
 0x49c   :  { %12488 = vmatpush3.bf16.msra.mxu1 %v13203_v33  ;;  %v13242_v33 = vld [vmem:[%s20312_s6 + $0x4c8] sm:$0xff]  }
 0x49d   :  { %12489 = vmatprep.subr.bf16.mxu1 %v13206_v57  ;;  %v13245_v57 = vld [vmem:[%s20312_s6 + $0x400] sm:$0xff]  }
 0x49e   :  { %12468 = vmatpush3.bf16.msra.mxu0 %v13205_v55  ;;  %v13244_v55 = vld [vmem:[%s20312_s6 + $0x440] sm:$0xff]  }
 0x49f   :  { %12469 = vmatprep.subr.bf16.mxu0 %v13208_v36  ;;  %v13247_v36 = vld [vmem:[%s20312_s6 + $0x480] sm:$0xff]  }
 0x4a0   :  { %12490 = vmatpush3.bf16.msra.mxu1 %v13207_v44  ;;  %v13246_v44 = vld [vmem:[%s20312_s6 + $0x4c0] sm:$0xff]  }
 0x4a1   :  { %12491 = vmatprep.subr.bf16.mxu1 %v13210_v18  ;;  %v13249_v18 = vld [vmem:[%s20312_s6 + $0x538] sm:$0xff]  }
 0x4a2   :  { %12470 = vmatpush3.bf16.msra.mxu0 %v13209_v0  ;;  %v13248_v0 = vld [vmem:[%s20312_s6 + $0x578] sm:$0xff]  }
 0x4a3   :  { %12471 = vmatprep.subr.bf16.mxu0 %v13212_v29  ;;  %v13251_v29 = vld [vmem:[%s20312_s6 + $0x5b8] sm:$0xff]  }
 0x4a4   :  { %12492 = vmatpush3.bf16.msra.mxu1 %v13211_v38  ;;  %v13250_v38 = vld [vmem:[%s20312_s6 + $0x5f8] sm:$0xff]  }
 0x4a5   :  { %12493 = vmatprep.subr.bf16.mxu1 %v13214_v39  ;;  %v13253_v39 = vld [vmem:[%s20312_s6 + $0x530] sm:$0xff]  }
 0x4a6   :  { %12472 = vmatpush3.bf16.msra.mxu0 %v13213_v42  ;;  %v13252_v42 = vld [vmem:[%s20312_s6 + $0x570] sm:$0xff]  }
 0x4a7   :  { %12501 = vmatprep.subr.bf16.mxu0 %v13216_v16  ;;  %v13254_v16 = vld [vmem:[%s20312_s6 + $0x5f0] sm:$0xff]  }
 0x4a8   :  { %12494 = vmatpush3.bf16.msra.mxu1 %v13215_v11  ;;  %v6447_v11 = vcombine.high %v18675_v2, %v18675_v2 }
 0x4a9   :  { %10200 = vmatmul.mubr.bf16.vlgmr.msra.gmra.mxu0 %v18599_v27  ;;  %12523 = vmatprep.subr.bf16.mxu1 %v13218_v56  ;;  %v13226_v27 = vld [vmem:[%s20312_s6 + $0x4e8] sm:$0xff]   ;;  %v6450_v56 = vcombine.high %v18678_v62, %v18678_v62 }
 0x4aa   :  { %12502 = vmatpush3.bf16.msra.mxu0 %v13217_v14  ;;  %10279 = vmatprep.mubr.bf16.mxu0 %v18672_v37  ;;  %v13228_v37 = vld [vmem:[%s20312_s6 + $0x460] sm:$0xff]   ;;  %v13256_v14 = vld [vmem:[%s20312_s6 + $0x568] sm:$0xff]  }
 0x4ab   :  { %10240 = vmatmul.mubr.bf16.vlgmr.msra.gmra.mxu1 %v6380_v30  ;;  %12503 = vmatprep.subr.bf16.mxu0 %v13220_v49  ;;  %v13257_v49 = vld [vmem:[%s20312_s6 + $0x528] sm:$0xff]   ;;  %v13261_v30 = vld [vmem:[%s20312_s6 + $0x520] sm:$0xff]  }
 0x4ac   :  { %12524 = vmatpush3.bf16.msra.mxu1 %v13219_v6  ;;  %10319 = vmatprep.mubr.bf16.mxu1 %v6449_v5  ;;  %v13255_v6 = vld [vmem:[%s20312_s6 + $0x5b0] sm:$0xff]   ;;  %v13264_v5 = vld [vmem:[%s20312_s6 + $0x558] sm:$0xff]  }
 0x4ad   :  { %12525 = vmatprep.subr.bf16.mxu1 %v13222_v23  ;;  %v13262_v23 = vld [vmem:[%s20312_s6 + $0x5e0] sm:$0xff]  }
 0x4ae   :  { %12504 = vmatpush3.bf16.msra.mxu0 %v13221_v51  ;;  %v13259_v51 = vld [vmem:[%s20312_s6 + $0x5a8] sm:$0xff]  }
 0x4af   :  { %12505 = vmatprep.subr.bf16.mxu0 %v13224_v9  ;;  %v13263_v9 = vld [vmem:[%s20312_s6 + $0x5a0] sm:$0xff]  }
 0x4b0   :  { %12526 = vmatpush3.bf16.msra.mxu1 %v13223_v21  ;;  %v13265_v21 = vld [vmem:[%s20312_s6 + $0x518] sm:$0xff]  }
 0x4b1   :  { %12527 = vmatprep.subr.bf16.mxu1 %v13226_v27  ;;  %v13266_v27 = vld [vmem:[%s20312_s6 + $0x5d8] sm:$0xff]  }
 0x4b2   :  { %12506 = vmatpush3.bf16.msra.mxu0 %v13225_v50  ;;  %v13267_v50 = vld [vmem:[%s20312_s6 + $0x598] sm:$0xff]  }
 0x4b3   :  { %12507 = vmatprep.subr.bf16.mxu0 %v13228_v37  ;;  %v13268_v37 = vld [vmem:[%s20312_s6 + $0x550] sm:$0xff]  }
 0x4b4   :  { %12528 = vmatpush3.bf16.msra.mxu1 %v13227_v43  ;;  %v13269_v43 = vld [vmem:[%s20312_s6 + $0x510] sm:$0xff]  }
 0x4b5   :  { %12529 = vmatprep.subr.bf16.mxu1 %v13230_v19  ;;  %v13271_v19 = vld [vmem:[%s20312_s6 + $0x590] sm:$0xff]  }
 0x4b6   :  { %12508 = vmatpush3.bf16.msra.mxu0 %v13229_v13  ;;  %v13270_v13 = vld [vmem:[%s20312_s6 + $0x5d0] sm:$0xff]  }
 0x4b7   :  { %12509 = vmatprep.subr.bf16.mxu0 %v13232_v28  ;;  %v13273_v28 = vld [vmem:[%s20312_s6 + $0x508] sm:$0xff]  }
 0x4b8   :  { %12530 = vmatpush3.bf16.msra.mxu1 %v13231_v15  ;;  %v13272_v15 = vld [vmem:[%s20312_s6 + $0x548] sm:$0xff]  }
 0x4b9   :  { %12531 = vmatprep.subr.bf16.mxu1 %v13234_v17  ;;  %v13275_v17 = vld [vmem:[%s20312_s6 + $0x588] sm:$0xff]  }
 0x4ba   :  { %12510 = vmatpush3.bf16.msra.mxu0 %v13233_v31  ;;  %v13274_v31 = vld [vmem:[%s20312_s6 + $0x5c8] sm:$0xff]  }
 0x4bb   :  { %12511 = vmatprep.subr.bf16.mxu0 %v13236_v45  ;;  %v13277_v45 = vld [vmem:[%s20312_s6 + $0x500] sm:$0xff]  }
 0x4bc   :  { %12532 = vmatpush3.bf16.msra.mxu1 %v13235_v47  ;;  %v13276_v47 = vld [vmem:[%s20312_s6 + $0x540] sm:$0xff]  }
 0x4bd   :  { %12533 = vmatprep.subr.bf16.mxu1 %v13238_v35  ;;  %v13279_v35 = vld [vmem:[%s20312_s6 + $0x580] sm:$0xff]  }
 0x4be   :  { %12512 = vmatpush3.bf16.msra.mxu0 %v13237_v59  ;;  %v13278_v59 = vld [vmem:[%s20312_s6 + $0x5c0] sm:$0xff]  }
 0x4bf   :  { %12513 = vmatprep.subr.bf16.mxu0 %v13240_v32  ;;  %v13281_v32 = vld [vmem:[%s20312_s6 + $0x638] sm:$0xff]  }
 0x4c0   :  { %12534 = vmatpush3.bf16.msra.mxu1 %v13239_v58  ;;  %v13280_v58 = vld [vmem:[%s20312_s6 + $0x678] sm:$0xff]  }
 0x4c1   :  { %12535 = vmatprep.subr.bf16.mxu1 %v13242_v33  ;;  %v13283_v33 = vld [vmem:[%s20312_s6 + $0x6b8] sm:$0xff]  }
 0x4c2   :  { %12514 = vmatpush3.bf16.msra.mxu0 %v13241_v40  ;;  %v13282_v40 = vld [vmem:[%s20312_s6 + $0x6f8] sm:$0xff]  }
 0x4c3   :  { %12515 = vmatprep.subr.bf16.mxu0 %v13244_v55  ;;  %v13285_v55 = vld [vmem:[%s20312_s6 + $0x630] sm:$0xff]  }
 0x4c4   :  { %12536 = vmatpush3.bf16.msra.mxu1 %v13243_v53  ;;  %v13284_v53 = vld [vmem:[%s20312_s6 + $0x670] sm:$0xff]  }
 0x4c5   :  { %12537 = vmatprep.subr.bf16.mxu1 %v13246_v44  ;;  %v13286_v44 = vld [vmem:[%s20312_s6 + $0x6f0] sm:$0xff]  }
 0x4c6   :  { %12516 = vmatpush3.bf16.msra.mxu0 %v13245_v57  ;;  %v6448_v57 = vcombine.high %v18681_v41, %v18681_v41 }
 0x4c7   :  { %12545 = vmatprep.subr.bf16.mxu0 %v13248_v0  ;;  %v6517_v0 = vcombine.high %v18700_v60, %v18700_v60 }
 0x4c8   :  { %12538 = vmatpush3.bf16.msra.mxu1 %v13247_v36  ;;  %v13288_v36 = vld [vmem:[%s20312_s6 + $0x668] sm:$0xff]  }
 0x4c9   :  { %10280 = vmatmul.mubr.bf16.vlgmr.msra.gmra.mxu0 %v18675_v2  ;;  %12567 = vmatprep.subr.bf16.mxu1 %v13250_v38  ;;  %v13258_v2 = vld [vmem:[%s20312_s6 + $0x5e8] sm:$0xff]  }
 0x4ca   :  { %12546 = vmatpush3.bf16.msra.mxu0 %v13249_v18  ;;  %10359 = vmatprep.mubr.bf16.mxu0 %v18678_v62  ;;  %v13260_v62 = vld [vmem:[%s20312_s6 + $0x560] sm:$0xff]   ;;  %v13287_v18 = vld [vmem:[%s20312_s6 + $0x6b0] sm:$0xff]   ;;  %v13289_v38 = vld [vmem:[%s20312_s6 + $0x628] sm:$0xff]  }
 0x4cb   :  { %10320 = vmatmul.mubr.bf16.vlgmr.msra.gmra.mxu1 %v6447_v11  ;;  %12547 = vmatprep.subr.bf16.mxu0 %v13252_v42  ;;  %v13293_v42 = vld [vmem:[%s20312_s6 + $0x620] sm:$0xff]  }
 0x4cc   :  { %12568 = vmatpush3.bf16.msra.mxu1 %v13251_v29  ;;  %10399 = vmatprep.mubr.bf16.mxu1 %v6450_v56  ;;  %v13291_v29 = vld [vmem:[%s20312_s6 + $0x6a8] sm:$0xff]   ;;  %v13295_v11 = vld [vmem:[%s20312_s6 + $0x6a0] sm:$0xff]   ;;  %v13298_v56 = vld [vmem:[%s20312_s6 + $0x6d8] sm:$0xff]  }
 0x4cd   :  { %12569 = vmatprep.subr.bf16.mxu1 %v13254_v16  ;;  %v13296_v16 = vld [vmem:[%s20312_s6 + $0x658] sm:$0xff]  }
 0x4ce   :  { %12548 = vmatpush3.bf16.msra.mxu0 %v13253_v39  ;;  %v13294_v39 = vld [vmem:[%s20312_s6 + $0x6e0] sm:$0xff]  }
 0x4cf   :  { %12549 = vmatprep.subr.bf16.mxu0 %v13256_v14  ;;  %v13297_v14 = vld [vmem:[%s20312_s6 + $0x618] sm:$0xff]  }
 0x4d0   :  { %12570 = vmatpush3.bf16.msra.mxu1 %v13255_v6  ;;  %v13299_v6 = vld [vmem:[%s20312_s6 + $0x698] sm:$0xff]  }
 0x4d1   :  { %12571 = vmatprep.subr.bf16.mxu1 %v13258_v2  ;;  %v13300_v2 = vld [vmem:[%s20312_s6 + $0x650] sm:$0xff]  }
 0x4d2   :  { %12550 = vmatpush3.bf16.msra.mxu0 %v13257_v49  ;;  %v13301_v49 = vld [vmem:[%s20312_s6 + $0x610] sm:$0xff]  }
 0x4d3   :  { %12551 = vmatprep.subr.bf16.mxu0 %v13260_v62  ;;  %v13302_v62 = vld [vmem:[%s20312_s6 + $0x6d0] sm:$0xff]  }
 0x4d4   :  { %12572 = vmatpush3.bf16.msra.mxu1 %v13259_v51  ;;  %v13303_v51 = vld [vmem:[%s20312_s6 + $0x690] sm:$0xff]  }
 0x4d5   :  { %12573 = vmatprep.subr.bf16.mxu1 %v13262_v23  ;;  %v13305_v23 = vld [vmem:[%s20312_s6 + $0x608] sm:$0xff]  }
 0x4d6   :  { %12552 = vmatpush3.bf16.msra.mxu0 %v13261_v30  ;;  %v13304_v30 = vld [vmem:[%s20312_s6 + $0x648] sm:$0xff]  }
 0x4d7   :  { %12553 = vmatprep.subr.bf16.mxu0 %v13264_v5  ;;  %v13307_v5 = vld [vmem:[%s20312_s6 + $0x688] sm:$0xff]  }
 0x4d8   :  { %12574 = vmatpush3.bf16.msra.mxu1 %v13263_v9  ;;  %v13306_v9 = vld [vmem:[%s20312_s6 + $0x6c8] sm:$0xff]  }
 0x4d9   :  { %12575 = vmatprep.subr.bf16.mxu1 %v13266_v27  ;;  %v13309_v27 = vld [vmem:[%s20312_s6 + $0x600] sm:$0xff]  }
 0x4da   :  { %12554 = vmatpush3.bf16.msra.mxu0 %v13265_v21  ;;  %v13308_v21 = vld [vmem:[%s20312_s6 + $0x640] sm:$0xff]  }
 0x4db   :  { %12555 = vmatprep.subr.bf16.mxu0 %v13268_v37  ;;  %v13311_v37 = vld [vmem:[%s20312_s6 + $0x680] sm:$0xff]  }
 0x4dc   :  { %12576 = vmatpush3.bf16.msra.mxu1 %v13267_v50  ;;  %v13310_v50 = vld [vmem:[%s20312_s6 + $0x6c0] sm:$0xff]  }
 0x4dd   :  { %12577 = vmatprep.subr.bf16.mxu1 %v13270_v13  ;;  %v13313_v13 = vld [vmem:[%s20312_s6 + $0x738] sm:$0xff]  }
 0x4de   :  { %12556 = vmatpush3.bf16.msra.mxu0 %v13269_v43  ;;  %v13312_v43 = vld [vmem:[%s20312_s6 + $0x778] sm:$0xff]  }
 0x4df   :  { %12557 = vmatprep.subr.bf16.mxu0 %v13272_v15  ;;  %v13315_v15 = vld [vmem:[%s20312_s6 + $0x7b8] sm:$0xff]  }
 0x4e0   :  { %12578 = vmatpush3.bf16.msra.mxu1 %v13271_v19  ;;  %v13314_v19 = vld [vmem:[%s20312_s6 + $0x7f8] sm:$0xff]  }
 0x4e1   :  { %12579 = vmatprep.subr.bf16.mxu1 %v13274_v31  ;;  %v13317_v31 = vld [vmem:[%s20312_s6 + $0x730] sm:$0xff]  }
 0x4e2   :  { %12558 = vmatpush3.bf16.msra.mxu0 %v13273_v28  ;;  %v13316_v28 = vld [vmem:[%s20312_s6 + $0x770] sm:$0xff]  }
 0x4e3   :  { %12559 = vmatprep.subr.bf16.mxu0 %v13276_v47  ;;  %v6515_v47 = vcombine.high %v18703_v7, %v18703_v7 }
 0x4e4   :  { %12580 = vmatpush3.bf16.msra.mxu1 %v13275_v17 }
 0x4e5   :  { %12581 = vmatprep.subr.bf16.mxu1 %v13278_v59  ;;  %v13318_v59 = vld [vmem:[%s20312_s6 + $0x7f0] sm:$0xff]  }
 0x4e6   :  { %12560 = vmatpush3.bf16.msra.mxu0 %v13277_v45  ;;  %v11796_v45 = vld [vmem:[%s20314_s7] ss:$0 sm:$0xff] }
 0x4e7   :  { %12589 = vmatprep.subr.bf16.mxu0 %v13280_v58  ;;  %v6518_v58 = vcombine.high %v18706_v24, %v18706_v24 }
 0x4e8   :  { %12582 = vmatpush3.bf16.msra.mxu1 %v13279_v35  ;;  %v13320_v35 = vld [vmem:[%s20312_s6 + $0x768] sm:$0xff]  }
 0x4e9   :  { %10360 = vmatmul.mubr.bf16.vlgmr.msra.gmra.mxu0 %v18681_v41  ;;  %12611 = vmatprep.subr.bf16.mxu1 %v13282_v40  ;;  %v13290_v41 = vld [vmem:[%s20312_s6 + $0x6e8] sm:$0xff]  }
 0x4ea   :  { %12590 = vmatpush3.bf16.msra.mxu0 %v13281_v32  ;;  %10439 = vmatprep.mubr.bf16.mxu0 %v18700_v60  ;;  %v13292_v60 = vld [vmem:[%s20312_s6 + $0x660] sm:$0xff]  }
 0x4eb   :  { %10400 = vmatmul.mubr.bf16.vlgmr.msra.gmra.mxu1 %v6448_v57  ;;  %12591 = vmatprep.subr.bf16.mxu0 %v13284_v53 }
 0x4ec   :  { %12612 = vmatpush3.bf16.msra.mxu1 %v13283_v33  ;;  %10479 = vmatprep.mubr.bf16.mxu1 %v6517_v0  ;;  %v13322_v33 = vld [vmem:[%s20312_s6 + $0x7e8] sm:$0xff]   ;;  %v13324_v0 = vld [vmem:[%s20312_s6 + $0x760] sm:$0xff]  }
 0x4ed   :  { %12613 = vmatprep.subr.bf16.mxu1 %v13286_v44 }
 0x4ee   :  { %12592 = vmatpush3.bf16.msra.mxu0 %v13285_v55 }
 0x4ef   :  { %12593 = vmatprep.subr.bf16.mxu0 %v13288_v36  ;;  %v13321_v36 = vld [vmem:[%s20312_s6 + $0x728] sm:$0xff]  }
 0x4f0   :  { %12614 = vmatpush3.bf16.msra.mxu1 %v13287_v18 }
 0x4f1   :  { %12615 = vmatprep.subr.bf16.mxu1 %v13290_v41 }
 0x4f2   :  { %12594 = vmatpush3.bf16.msra.mxu0 %v13289_v38 }
 0x4f3   :  { %12595 = vmatprep.subr.bf16.mxu0 %v13292_v60  ;;  %v13323_v60 = vld [vmem:[%s20312_s6 + $0x7a8] sm:$0xff]  }
 0x4f4   :  { %12616 = vmatpush3.bf16.msra.mxu1 %v13291_v29 }
 0x4f5   :  { %12617 = vmatprep.subr.bf16.mxu1 %v13294_v39  ;;  %v13326_v39 = vld [vmem:[%s20312_s6 + $0x7e0] sm:$0xff]  }
 0x4f6   :  { %12596 = vmatpush3.bf16.msra.mxu0 %v13293_v42  ;;  %v13325_v42 = vld [vmem:[%s20312_s6 + $0x720] sm:$0xff]  }
 0x4f7   :  { %12597 = vmatprep.subr.bf16.mxu0 %v13296_v16  ;;  %v13328_v16 = vld [vmem:[%s20312_s6 + $0x758] sm:$0xff]  }
 0x4f8   :  { %12618 = vmatpush3.bf16.msra.mxu1 %v13295_v11  ;;  %v13327_v11 = vld [vmem:[%s20312_s6 + $0x7a0] sm:$0xff]  }
 0x4f9   :  { %12619 = vmatprep.subr.bf16.mxu1 %v13298_v56  ;;  %v13330_v56 = vld [vmem:[%s20312_s6 + $0x7d8] sm:$0xff]  }
 0x4fa   :  { %12598 = vmatpush3.bf16.msra.mxu0 %v13297_v14  ;;  %v13329_v14 = vld [vmem:[%s20312_s6 + $0x718] sm:$0xff]  }
 0x4fb   :  { %12599 = vmatprep.subr.bf16.mxu0 %v13300_v2  ;;  %v13332_v2 = vld [vmem:[%s20312_s6 + $0x750] sm:$0xff]  }
 0x4fc   :  { %12620 = vmatpush3.bf16.msra.mxu1 %v13299_v6  ;;  %v13331_v6 = vld [vmem:[%s20312_s6 + $0x798] sm:$0xff]  }
 0x4fd   :  { %12621 = vmatprep.subr.bf16.mxu1 %v13302_v62  ;;  %v13334_v62 = vld [vmem:[%s20312_s6 + $0x7d0] sm:$0xff]  }
 0x4fe   :  { %12600 = vmatpush3.bf16.msra.mxu0 %v13301_v49  ;;  %v13333_v49 = vld [vmem:[%s20312_s6 + $0x710] sm:$0xff]  }
 0x4ff   :  { %12601 = vmatprep.subr.bf16.mxu0 %v13304_v30  ;;  %v13336_v30 = vld [vmem:[%s20312_s6 + $0x748] sm:$0xff]  }
 0x500   :  { %12622 = vmatpush3.bf16.msra.mxu1 %v13303_v51  ;;  %v13335_v51 = vld [vmem:[%s20312_s6 + $0x790] sm:$0xff]  }
 0x501   :  { %12623 = vmatprep.subr.bf16.mxu1 %v13306_v9  ;;  %v13338_v9 = vld [vmem:[%s20312_s6 + $0x7c8] sm:$0xff]  }
 0x502   :  { %12602 = vmatpush3.bf16.msra.mxu0 %v13305_v23  ;;  %v13337_v23 = vld [vmem:[%s20312_s6 + $0x708] sm:$0xff]  }
 0x503   :  { %12603 = vmatprep.subr.bf16.mxu0 %v13308_v21  ;;  %v13340_v21 = vld [vmem:[%s20312_s6 + $0x740] sm:$0xff]  }
 0x504   :  { %12624 = vmatpush3.bf16.msra.mxu1 %v13307_v5  ;;  %v13339_v5 = vld [vmem:[%s20312_s6 + $0x788] sm:$0xff]  }
 0x505   :  { %12625 = vmatprep.subr.bf16.mxu1 %v13310_v50  ;;  %v13342_v50 = vld [vmem:[%s20312_s6 + $0x7c0] sm:$0xff]  }
 0x506   :  { %12604 = vmatpush3.bf16.msra.mxu0 %v13309_v27  ;;  %v13341_v27 = vld [vmem:[%s20312_s6 + $0x700] sm:$0xff]  }
 0x507   :  { %12633 = vmatprep.subr.bf16.mxu0 %v13312_v43  ;;  %v13344_v43 = vld [vmem:[%s20312_s6 + $0x878] sm:$0xff]  }
 0x508   :  { %12626 = vmatpush3.bf16.msra.mxu1 %v13311_v37  ;;  %v12341_v17 = vpop.f32.mrf.mxu0  ;;  %v13343_v37 = vld [vmem:[%s20312_s6 + $0x780] sm:$0xff]  }
 0x509   :  { %10440 = vmatmul.mubr.bf16.vlgmr.msra.gmra.mxu0 %v18703_v7  ;;  %12655 = vmatprep.subr.bf16.mxu1 %v13314_v19  ;;  %v13319_v7 = vld [vmem:[%s20312_s6 + $0x7b0] sm:$0xff]   ;;  %v13346_v19 = vld [vmem:[%s20312_s6 + $0x8f8] sm:$0xff]  }
 0x50a   :  { %12634 = vmatpush3.bf16.msra.mxu0 %v13313_v13  ;;  %10519 = vmatprep.mubr.bf16.mxu0 %v18706_v24  ;;  %v12342_v32 = vpop.f32.mrf.mxu0  ;;  %v13345_v13 = vld [vmem:[%s20312_s6 + $0x838] sm:$0xff]  }
 0x50b   :  { %10480 = vmatmul.mubr.bf16.vlgmr.msra.gmra.mxu1 %v6515_v47  ;;  %v12363_v40 = vpop.f32.mrf.mxu1  ;;  %12635 = vmatprep.subr.bf16.mxu0 %v13316_v28  ;;  %v12343_v53 = vadd.f32 %v12342_v32, %v12341_v17  ;;  %v13348_v28 = vld [vmem:[%s20312_s6 + $0x870] sm:$0xff]   ;;  %v6516_v47 = vcombine.high %v18709_v3, %v18709_v3  ;;  %v13354_v32 = vld [vmem:[%s20312_s6 + $0x8e8] sm:$0xff]  }
 0x50c   :  { %12656 = vmatpush3.bf16.msra.mxu1 %v13315_v15  ;;  %10559 = vmatprep.mubr.bf16.mxu1 %v6518_v58  ;;  %v12344_v55 = vpop.f32.mrf.mxu0  ;;  %v13347_v15 = vld [vmem:[%s20312_s6 + $0x8b8] sm:$0xff]   ;;  %v13351_v58 = vld [vmem:[%s20312_s6 + $0x8b0] sm:$0xff]  }
 0x50d   :  { %v12364_v57 = vpop.f32.mrf.mxu1  ;;  %12657 = vmatprep.subr.bf16.mxu1 %v13318_v59  ;;  %v9962_v44 = vadd.f32 %v12343_v53, %v11796_v45  ;;  %v13350_v45 = vld [vmem:[%s20312_s6 + $0x8f0] sm:$0xff]   ;;  %v13352_v59 = vld [vmem:[%s20312_s6 + $0x868] sm:$0xff]  }
 0x50e   :  { %v12365_v24 = vadd.f32 %v12364_v57, %v12363_v40  ;;  %12636 = vmatpush3.bf16.msra.mxu0 %v13317_v31  ;;  %v12345_v18 = vpop.f32.mrf.mxu0  ;;  %v13349_v31 = vld [vmem:[%s20312_s6 + $0x830] sm:$0xff]   ;;  %v13353_v57 = vld [vmem:[%s20312_s6 + $0x828] sm:$0xff]  }
 0x50f   :  { %v12366_v41 = vpop.f32.mrf.mxu1  ;;  %12637 = vmatprep.subr.bf16.mxu0 %v13320_v35  ;;  %v6585_v35 = vcombine.high %v18774_v20, %v18774_v20  ;;  %v13355_v18 = vld [vmem:[%s20312_s6 + $0x8a8] sm:$0xff]  }
 0x510   :  { %v19401_v38 = vadd.f32 %v12365_v24, %v9962_v44  ;;  %12658 = vmatpush3.bf16.msra.mxu1 %v13319_v7  ;;  %v13356_v44 = vld [vmem:[%s20312_s6 + $0x860] sm:$0xff]  }
 0x511   :  { %v12367_v29 = vpop.f32.mrf.mxu1  ;;  %12659 = vmatprep.subr.bf16.mxu1 %v13322_v33 }
 0x512   :  { %12638 = vmatpush3.bf16.msra.mxu0 %v13321_v36  ;;  %v13359_v29 = vld [vmem:[%s20312_s6 + $0x8a0] sm:$0xff]  }
 0x513   :  { %12639 = vmatprep.subr.bf16.mxu0 %v13324_v0 }
 0x514   :  { %12660 = vmatpush3.bf16.msra.mxu1 %v13323_v60  ;;  %v13358_v60 = vld [vmem:[%s20312_s6 + $0x8e0] sm:$0xff]  }
 0x515   :  { %12661 = vmatprep.subr.bf16.mxu1 %v13326_v39  ;;  %v13361_v39 = vld [vmem:[%s20312_s6 + $0x818] sm:$0xff]  }
 0x516   :  { %12640 = vmatpush3.bf16.msra.mxu0 %v13325_v42  ;;  %v13360_v42 = vld [vmem:[%s20312_s6 + $0x858] sm:$0xff]  }
 0x517   :  { %12641 = vmatprep.subr.bf16.mxu0 %v13328_v16  ;;  %v13363_v16 = vld [vmem:[%s20312_s6 + $0x898] sm:$0xff]  }
 0x518   :  { %12662 = vmatpush3.bf16.msra.mxu1 %v13327_v11  ;;  %v13362_v11 = vld [vmem:[%s20312_s6 + $0x8d8] sm:$0xff]  }
 0x519   :  { %12663 = vmatprep.subr.bf16.mxu1 %v13330_v56  ;;  %v13365_v56 = vld [vmem:[%s20312_s6 + $0x810] sm:$0xff]  }
 0x51a   :  { %12642 = vmatpush3.bf16.msra.mxu0 %v13329_v14  ;;  %v13364_v14 = vld [vmem:[%s20312_s6 + $0x850] sm:$0xff]  }
 0x51b   :  { %12643 = vmatprep.subr.bf16.mxu0 %v13332_v2  ;;  %v13367_v2 = vld [vmem:[%s20312_s6 + $0x890] sm:$0xff]  }
 0x51c   :  { %12664 = vmatpush3.bf16.msra.mxu1 %v13331_v6  ;;  %v13366_v6 = vld [vmem:[%s20312_s6 + $0x8d0] sm:$0xff]  }
 0x51d   :  { %12665 = vmatprep.subr.bf16.mxu1 %v13334_v62  ;;  %v13369_v62 = vld [vmem:[%s20312_s6 + $0x808] sm:$0xff]  }
 0x51e   :  { %12644 = vmatpush3.bf16.msra.mxu0 %v13333_v49  ;;  %v13368_v49 = vld [vmem:[%s20312_s6 + $0x848] sm:$0xff]  }
 0x51f   :  { %12645 = vmatprep.subr.bf16.mxu0 %v13336_v30  ;;  %v13371_v30 = vld [vmem:[%s20312_s6 + $0x888] sm:$0xff]  }
 0x520   :  { %12666 = vmatpush3.bf16.msra.mxu1 %v13335_v51  ;;  %v13370_v51 = vld [vmem:[%s20312_s6 + $0x8c8] sm:$0xff]  }
 0x521   :  { %12667 = vmatprep.subr.bf16.mxu1 %v13338_v9  ;;  %v13373_v9 = vld [vmem:[%s20312_s6 + $0x800] sm:$0xff]  }
 0x522   :  { %12646 = vmatpush3.bf16.msra.mxu0 %v13337_v23  ;;  %v13372_v23 = vld [vmem:[%s20312_s6 + $0x840] sm:$0xff]  }
 0x523   :  { %12647 = vmatprep.subr.bf16.mxu0 %v13340_v21  ;;  %v13375_v21 = vld [vmem:[%s20312_s6 + $0x880] sm:$0xff]  }
 0x524   :  { %12668 = vmatpush3.bf16.msra.mxu1 %v13339_v5  ;;  %v13374_v5 = vld [vmem:[%s20312_s6 + $0x8c0] sm:$0xff]  }
 0x525   :  { %12669 = vmatprep.subr.bf16.mxu1 %v13342_v50  ;;  %v13377_v50 = vld [vmem:[%s20312_s6 + $0x938] sm:$0xff]  }
 0x526   :  { %12648 = vmatpush3.bf16.msra.mxu0 %v13341_v27  ;;  %v13376_v27 = vld [vmem:[%s20312_s6 + $0x978] sm:$0xff]  }
 0x527   :  { %12677 = vmatprep.subr.bf16.mxu0 %v13344_v43  ;;  %v13379_v43 = vld [vmem:[%s20312_s6 + $0x9b8] sm:$0xff]  }
 0x528   :  { %12670 = vmatpush3.bf16.msra.mxu1 %v13343_v37  ;;  %v13378_v37 = vld [vmem:[%s20312_s6 + $0x9f8] sm:$0xff]  }
 0x529   :  { %v12385_v17 = vpop.f32.mrf.mxu0  ;;  %10520 = vmatmul.mubr.bf16.vlgmr.msra.gmra.mxu0 %v18709_v3  ;;  %12699 = vmatprep.subr.bf16.mxu1 %v13346_v19  ;;  %v13381_v19 = vld [vmem:[%s20312_s6 + $0x930] sm:$0xff]  }
 0x52a   :  { %12678 = vmatpush3.bf16.msra.mxu0 %v13345_v13  ;;  %10599 = vmatprep.mubr.bf16.mxu0 %v18774_v20  ;;  %v13380_v13 = vld [vmem:[%s20312_s6 + $0x970] sm:$0xff]  }
 0x52b   :  { %v12386_v3 = vpop.f32.mrf.mxu0  ;;  %v12407_v7 = vpop.f32.mrf.mxu1  ;;  %10560 = vmatmul.mubr.bf16.vlgmr.msra.gmra.mxu1 %v6516_v47  ;;  %12679 = vmatprep.subr.bf16.mxu0 %v13348_v28  ;;  %v6583_v28 = vcombine.high %v18777_v61, %v18777_v61  ;;  %v6586_v47 = vcombine.high %v18780_v4, %v18780_v4 }
 0x52c   :  { %v12387_v40 = vadd.f32 %v12386_v3, %v12385_v17  ;;  %12700 = vmatpush3.bf16.msra.mxu1 %v13347_v15  ;;  %10639 = vmatprep.mubr.bf16.mxu1 %v6585_v35  ;;  %v13384_v17 = vld [vmem:[%s20312_s6 + $0x968] sm:$0xff]  }
 0x52d   :  { %v12388_v33 = vpop.f32.mrf.mxu0  ;;  %v12408_v53 = vpop.f32.mrf.mxu1  ;;  %12701 = vmatprep.subr.bf16.mxu1 %v13350_v45  ;;  %v13383_v45 = vld [vmem:[%s20312_s6 + $0x9b0] sm:$0xff]   ;;  %v13386_v35 = vld [vmem:[%s20312_s6 + $0x9e8] sm:$0xff]  }
 0x52e   :  { %v10042_v20 = vadd.f32 %v12387_v40, %v19401_v38  ;;  %v12409_v55 = vadd.f32 %v12408_v53, %v12407_v7  ;;  %12680 = vmatpush3.bf16.msra.mxu0 %v13349_v31  ;;  %v13357_v38 = vld [vmem:[%s20312_s6 + $0x820] sm:$0xff]   ;;  %v13382_v31 = vld [vmem:[%s20312_s6 + $0x9f0] sm:$0xff]   ;;  %v13385_v40 = vld [vmem:[%s20312_s6 + $0x928] sm:$0xff]  }
 0x52f   :  { %v12389_v24 = vpop.f32.mrf.mxu0  ;;  %v12410_v36 = vpop.f32.mrf.mxu1  ;;  %12681 = vmatprep.subr.bf16.mxu0 %v13352_v59  ;;  %v13388_v33 = vld [vmem:[%s20312_s6 + $0x960] sm:$0xff]  }
 0x530   :  { %v19506_v0 = vadd.f32 %v12409_v55, %v10042_v20  ;;  %12702 = vmatpush3.bf16.msra.mxu1 %v13351_v58  ;;  %v13389_v24 = vld [vmem:[%s20312_s6 + $0x920] sm:$0xff]  }
 0x531   :  { %v12411_v41 = vpop.f32.mrf.mxu1  ;;  %12703 = vmatprep.subr.bf16.mxu1 %v13354_v32  ;;  %v13390_v36 = vld [vmem:[%s20312_s6 + $0x9e0] sm:$0xff]  }
 0x532   :  { %12682 = vmatpush3.bf16.msra.mxu0 %v13353_v57  ;;  %v13387_v57 = vld [vmem:[%s20312_s6 + $0x9a8] sm:$0xff]   ;;  %v13393_v41 = vld [vmem:[%s20312_s6 + $0x918] sm:$0xff]  }
 0x533   :  { %12683 = vmatprep.subr.bf16.mxu0 %v13356_v44 }
 0x534   :  { %12704 = vmatpush3.bf16.msra.mxu1 %v13355_v18  ;;  %v13392_v18 = vld [vmem:[%s20312_s6 + $0x958] sm:$0xff]  }
 0x535   :  { %12705 = vmatprep.subr.bf16.mxu1 %v13358_v60  ;;  %v13395_v60 = vld [vmem:[%s20312_s6 + $0x998] sm:$0xff]  }
 0x536   :  { %12684 = vmatpush3.bf16.msra.mxu0 %v13357_v38  ;;  %v13394_v38 = vld [vmem:[%s20312_s6 + $0x9d8] sm:$0xff]  }
 0x537   :  { %12685 = vmatprep.subr.bf16.mxu0 %v13360_v42  ;;  %v13397_v42 = vld [vmem:[%s20312_s6 + $0x910] sm:$0xff]  }
 0x538   :  { %12706 = vmatpush3.bf16.msra.mxu1 %v13359_v29  ;;  %v13396_v29 = vld [vmem:[%s20312_s6 + $0x950] sm:$0xff]  }
 0x539   :  { %12707 = vmatprep.subr.bf16.mxu1 %v13362_v11  ;;  %v13399_v11 = vld [vmem:[%s20312_s6 + $0x990] sm:$0xff]  }
 0x53a   :  { %12686 = vmatpush3.bf16.msra.mxu0 %v13361_v39  ;;  %v13398_v39 = vld [vmem:[%s20312_s6 + $0x9d0] sm:$0xff]  }
 0x53b   :  { %12687 = vmatprep.subr.bf16.mxu0 %v13364_v14  ;;  %v13401_v14 = vld [vmem:[%s20312_s6 + $0x908] sm:$0xff]  }
 0x53c   :  { %12708 = vmatpush3.bf16.msra.mxu1 %v13363_v16  ;;  %v13400_v16 = vld [vmem:[%s20312_s6 + $0x948] sm:$0xff]  }
 0x53d   :  { %12709 = vmatprep.subr.bf16.mxu1 %v13366_v6  ;;  %v13403_v6 = vld [vmem:[%s20312_s6 + $0x988] sm:$0xff]  }
 0x53e   :  { %12688 = vmatpush3.bf16.msra.mxu0 %v13365_v56  ;;  %v13402_v56 = vld [vmem:[%s20312_s6 + $0x9c8] sm:$0xff]  }
 0x53f   :  { %12689 = vmatprep.subr.bf16.mxu0 %v13368_v49  ;;  %v13405_v49 = vld [vmem:[%s20312_s6 + $0x900] sm:$0xff]  }
 0x540   :  { %12710 = vmatpush3.bf16.msra.mxu1 %v13367_v2  ;;  %v13404_v2 = vld [vmem:[%s20312_s6 + $0x940] sm:$0xff]  }
 0x541   :  { %12711 = vmatprep.subr.bf16.mxu1 %v13370_v51  ;;  %v13407_v51 = vld [vmem:[%s20312_s6 + $0x980] sm:$0xff]  }
 0x542   :  { %12690 = vmatpush3.bf16.msra.mxu0 %v13369_v62  ;;  %v13406_v62 = vld [vmem:[%s20312_s6 + $0x9c0] sm:$0xff]  }
 0x543   :  { %12691 = vmatprep.subr.bf16.mxu0 %v13372_v23  ;;  %v13409_v23 = vld [vmem:[%s20312_s6 + $0xa38] sm:$0xff]  }
 0x544   :  { %12712 = vmatpush3.bf16.msra.mxu1 %v13371_v30  ;;  %v13408_v30 = vld [vmem:[%s20312_s6 + $0xa78] sm:$0xff]  }
 0x545   :  { %12713 = vmatprep.subr.bf16.mxu1 %v13374_v5  ;;  %v13411_v5 = vld [vmem:[%s20312_s6 + $0xab8] sm:$0xff]  }
 0x546   :  { %12692 = vmatpush3.bf16.msra.mxu0 %v13373_v9  ;;  %v13410_v9 = vld [vmem:[%s20312_s6 + $0xaf8] sm:$0xff]  }
 0x547   :  { %12721 = vmatprep.subr.bf16.mxu0 %v13376_v27  ;;  %v13413_v27 = vld [vmem:[%s20312_s6 + $0xa30] sm:$0xff]  }
 0x548   :  { %12714 = vmatpush3.bf16.msra.mxu1 %v13375_v21  ;;  %v13412_v21 = vld [vmem:[%s20312_s6 + $0xa70] sm:$0xff]  }
 0x549   :  { %v12429_v15 = vpop.f32.mrf.mxu0  ;;  %10600 = vmatmul.mubr.bf16.vlgmr.msra.gmra.mxu0 %v18777_v61  ;;  %12743 = vmatprep.subr.bf16.mxu1 %v13378_v37  ;;  %v6584_v37 = vcombine.high %v18783_v48, %v18783_v48 }
 0x54a   :  { %12722 = vmatpush3.bf16.msra.mxu0 %v13377_v50  ;;  %10679 = vmatprep.mubr.bf16.mxu0 %v18780_v4 }
 0x54b   :  { %v12430_v61 = vpop.f32.mrf.mxu0  ;;  %v12451_v59 = vpop.f32.mrf.mxu1  ;;  %10640 = vmatmul.mubr.bf16.vlgmr.msra.gmra.mxu1 %v6583_v28  ;;  %12723 = vmatprep.subr.bf16.mxu0 %v13380_v13  ;;  %v13416_v13 = vld [vmem:[%s20312_s6 + $0xa68] sm:$0xff]  }
 0x54c   :  { %v12431_v58 = vadd.f32 %v12430_v61, %v12429_v15  ;;  %12744 = vmatpush3.bf16.msra.mxu1 %v13379_v43  ;;  %10719 = vmatprep.mubr.bf16.mxu1 %v6586_v47  ;;  %v13414_v43 = vld [vmem:[%s20312_s6 + $0xaf0] sm:$0xff]  }
 0x54d   :  { %v12432_v3 = vpop.f32.mrf.mxu0  ;;  %v12452_v7 = vpop.f32.mrf.mxu1  ;;  %12745 = vmatprep.subr.bf16.mxu1 %v13382_v31  ;;  %v13415_v15 = vld [vmem:[%s20312_s6 + $0xab0] sm:$0xff]   ;;  %v13418_v31 = vld [vmem:[%s20312_s6 + $0xae8] sm:$0xff]  }
 0x54e   :  { %v10122_v4 = vadd.f32 %v12431_v58, %v19506_v0  ;;  %v12453_v32 = vadd.f32 %v12452_v7, %v12451_v59  ;;  %12724 = vmatpush3.bf16.msra.mxu0 %v13381_v19  ;;  %v13391_v0 = vld [vmem:[%s20312_s6 + $0x9a0] sm:$0xff]   ;;  %v6653_v19 = vcombine.high %v18821_v52, %v18821_v52  ;;  %v13417_v59 = vld [vmem:[%s20312_s6 + $0xa28] sm:$0xff]  }
 0x54f   :  { %v12433_v53 = vpop.f32.mrf.mxu0  ;;  %v12454_v20 = vpop.f32.mrf.mxu1  ;;  %12725 = vmatprep.subr.bf16.mxu0 %v13384_v17 }
 0x550   :  { %v19611_v55 = vadd.f32 %v12453_v32, %v10122_v4  ;;  %12746 = vmatpush3.bf16.msra.mxu1 %v13383_v45  ;;  %v13419_v4 = vld [vmem:[%s20312_s6 + $0xaa8] sm:$0xff]   ;;  %v13424_v53 = vld [vmem:[%s20312_s6 + $0xa58] sm:$0xff]   ;;  %v13423_v20 = vld [vmem:[%s20312_s6 + $0xaa0] sm:$0xff]  }
 0x551   :  { %v12455_v44 = vpop.f32.mrf.mxu1  ;;  %12747 = vmatprep.subr.bf16.mxu1 %v13386_v35  ;;  %v13420_v35 = vld [vmem:[%s20312_s6 + $0xa60] sm:$0xff]  }
 0x552   :  { %12726 = vmatpush3.bf16.msra.mxu0 %v13385_v40  ;;  %v13422_v40 = vld [vmem:[%s20312_s6 + $0xae0] sm:$0xff]   ;;  %v13428_v44 = vld [vmem:[%s20312_s6 + $0xa50] sm:$0xff]  }
 0x553   :  { %12727 = vmatprep.subr.bf16.mxu0 %v13388_v33  ;;  %v13421_v33 = vld [vmem:[%s20312_s6 + $0xa20] sm:$0xff]  }
 0x554   :  { %12748 = vmatpush3.bf16.msra.mxu1 %v13387_v57  ;;  %v13425_v57 = vld [vmem:[%s20312_s6 + $0xa18] sm:$0xff]  }
 0x555   :  { %12749 = vmatprep.subr.bf16.mxu1 %v13390_v36  ;;  %v13430_v36 = vld [vmem:[%s20312_s6 + $0xad0] sm:$0xff]  }
 0x556   :  { %12728 = vmatpush3.bf16.msra.mxu0 %v13389_v24  ;;  %v13427_v24 = vld [vmem:[%s20312_s6 + $0xa98] sm:$0xff]  }
 0x557   :  { %12729 = vmatprep.subr.bf16.mxu0 %v13392_v18  ;;  %v13432_v18 = vld [vmem:[%s20312_s6 + $0xa48] sm:$0xff]  }
 0x558   :  { %12750 = vmatpush3.bf16.msra.mxu1 %v13391_v0  ;;  %v13429_v0 = vld [vmem:[%s20312_s6 + $0xa10] sm:$0xff]  }
 0x559   :  { %12751 = vmatprep.subr.bf16.mxu1 %v13394_v38  ;;  %v13434_v38 = vld [vmem:[%s20312_s6 + $0xac8] sm:$0xff]  }
 0x55a   :  { %12730 = vmatpush3.bf16.msra.mxu0 %v13393_v41  ;;  %v13431_v41 = vld [vmem:[%s20312_s6 + $0xa90] sm:$0xff]  }
 0x55b   :  { %12731 = vmatprep.subr.bf16.mxu0 %v13396_v29  ;;  %v13436_v29 = vld [vmem:[%s20312_s6 + $0xa40] sm:$0xff]  }
 0x55c   :  { %12752 = vmatpush3.bf16.msra.mxu1 %v13395_v60  ;;  %v13433_v60 = vld [vmem:[%s20312_s6 + $0xa08] sm:$0xff]  }
 0x55d   :  { %12753 = vmatprep.subr.bf16.mxu1 %v13398_v39  ;;  %v13438_v39 = vld [vmem:[%s20312_s6 + $0xac0] sm:$0xff]  }
 0x55e   :  { %12732 = vmatpush3.bf16.msra.mxu0 %v13397_v42  ;;  %v13435_v42 = vld [vmem:[%s20312_s6 + $0xa88] sm:$0xff]  }
 0x55f   :  { %12733 = vmatprep.subr.bf16.mxu0 %v13400_v16  ;;  %v13440_v16 = vld [vmem:[%s20312_s6 + $0xb78] sm:$0xff]  }
 0x560   :  { %12754 = vmatpush3.bf16.msra.mxu1 %v13399_v11  ;;  %v13437_v11 = vld [vmem:[%s20312_s6 + $0xa00] sm:$0xff]  }
 0x561   :  { %12755 = vmatprep.subr.bf16.mxu1 %v13402_v56  ;;  %v13442_v56 = vld [vmem:[%s20312_s6 + $0xbf8] sm:$0xff]  }
 0x562   :  { %12734 = vmatpush3.bf16.msra.mxu0 %v13401_v14  ;;  %v13439_v14 = vld [vmem:[%s20312_s6 + $0xa80] sm:$0xff]  }
 0x563   :  { %12735 = vmatprep.subr.bf16.mxu0 %v13404_v2  ;;  %v13444_v2 = vld [vmem:[%s20312_s6 + $0xb70] sm:$0xff]  }
 0x564   :  { %12756 = vmatpush3.bf16.msra.mxu1 %v13403_v6  ;;  %v13441_v6 = vld [vmem:[%s20312_s6 + $0xb38] sm:$0xff]  }
 0x565   :  { %12757 = vmatprep.subr.bf16.mxu1 %v13406_v62 }
 0x566   :  { %12736 = vmatpush3.bf16.msra.mxu0 %v13405_v49  ;;  %v13443_v49 = vld [vmem:[%s20312_s6 + $0xbb8] sm:$0xff]  }
 0x567   :  { %12765 = vmatprep.subr.bf16.mxu0 %v13408_v30  ;;  %v13446_v30 = vld [vmem:[%s20312_s6 + $0xbf0] sm:$0xff]  }
 0x568   :  { %12758 = vmatpush3.bf16.msra.mxu1 %v13407_v51  ;;  %v6651_v51 = vcombine.high %v18824_v12, %v18824_v12 }
 0x569   :  { %v12473_v50 = vpop.f32.mrf.mxu0  ;;  %10680 = vmatmul.mubr.bf16.vlgmr.msra.gmra.mxu0 %v18783_v48  ;;  %12787 = vmatprep.subr.bf16.mxu1 %v13410_v9  ;;  %v13445_v9 = vld [vmem:[%s20312_s6 + $0xb30] sm:$0xff]  }
 0x56a   :  { %12766 = vmatpush3.bf16.msra.mxu0 %v13409_v23  ;;  %10759 = vmatprep.mubr.bf16.mxu0 %v18821_v52  ;;  %v6654_v23 = vcombine.high %v18827_v8, %v18827_v8 }
 0x56b   :  { %v12474_v48 = vpop.f32.mrf.mxu0  ;;  %v12495_v28 = vpop.f32.mrf.mxu1  ;;  %10720 = vmatmul.mubr.bf16.vlgmr.msra.gmra.mxu1 %v6584_v37  ;;  %12767 = vmatprep.subr.bf16.mxu0 %v13412_v21 }
 0x56c   :  { %v12475_v17 = vadd.f32 %v12474_v48, %v12473_v50  ;;  %12788 = vmatpush3.bf16.msra.mxu1 %v13411_v5  ;;  %10799 = vmatprep.mubr.bf16.mxu1 %v6653_v19  ;;  %v13447_v50 = vld [vmem:[%s20312_s6 + $0xbb0] sm:$0xff]  }
 0x56d   :  { %v12476_v47 = vpop.f32.mrf.mxu0  ;;  %v12496_v45 = vpop.f32.mrf.mxu1  ;;  %12789 = vmatprep.subr.bf16.mxu1 %v13414_v43  ;;  %v13450_v43 = vld [vmem:[%s20312_s6 + $0xbe8] sm:$0xff]  }
 0x56e   :  { %v10202_v52 = vadd.f32 %v12475_v17, %v19611_v55  ;;  %v12497_v61 = vadd.f32 %v12496_v45, %v12495_v28  ;;  %12768 = vmatpush3.bf16.msra.mxu0 %v13413_v27  ;;  %v13426_v55 = vld [vmem:[%s20312_s6 + $0xad8] sm:$0xff]   ;;  %v13451_v47 = vld [vmem:[%s20312_s6 + $0xba8] sm:$0xff]  }
 0x56f   :  { %v12477_v58 = vpop.f32.mrf.mxu0  ;;  %v12498_v3 = vpop.f32.mrf.mxu1  ;;  %12769 = vmatprep.subr.bf16.mxu0 %v13416_v13 }
 0x570   :  { %v19716_v7 = vadd.f32 %v12497_v61, %v10202_v52  ;;  %12790 = vmatpush3.bf16.msra.mxu1 %v13415_v15  ;;  %v13449_v15 = vld [vmem:[%s20312_s6 + $0xb28] sm:$0xff]   ;;  %v13454_v52 = vld [vmem:[%s20312_s6 + $0xbe0] sm:$0xff]   ;;  %v13458_v58 = vld [vmem:[%s20312_s6 + $0xbd8] sm:$0xff]  }
 0x571   :  { %v12499_v32 = vpop.f32.mrf.mxu1  ;;  %12791 = vmatprep.subr.bf16.mxu1 %v13418_v31  ;;  %v13452_v31 = vld [vmem:[%s20312_s6 + $0xb60] sm:$0xff]   ;;  %v13457_v3 = vld [vmem:[%s20312_s6 + $0xb18] sm:$0xff]  }
 0x572   :  { %12770 = vmatpush3.bf16.msra.mxu0 %v13417_v59  ;;  %v13453_v61 = vld [vmem:[%s20312_s6 + $0xb20] sm:$0xff]   ;;  %v13456_v59 = vld [vmem:[%s20312_s6 + $0xb58] sm:$0xff]   ;;  %v13462_v32 = vld [vmem:[%s20312_s6 + $0xbd0] sm:$0xff]  }
 0x573   :  { %12771 = vmatprep.subr.bf16.mxu0 %v13420_v35  ;;  %v13455_v35 = vld [vmem:[%s20312_s6 + $0xba0] sm:$0xff]  }
 0x574   :  { %12792 = vmatpush3.bf16.msra.mxu1 %v13419_v4  ;;  %v13459_v4 = vld [vmem:[%s20312_s6 + $0xb98] sm:$0xff]  }
 0x575   :  { %12793 = vmatprep.subr.bf16.mxu1 %v13422_v40  ;;  %v13461_v40 = vld [vmem:[%s20312_s6 + $0xb10] sm:$0xff]  }
 0x576   :  { %12772 = vmatpush3.bf16.msra.mxu0 %v13421_v33  ;;  %v13464_v33 = vld [vmem:[%s20312_s6 + $0xb48] sm:$0xff]  }
 0x577   :  { %12773 = vmatprep.subr.bf16.mxu0 %v13424_v53  ;;  %v13463_v53 = vld [vmem:[%s20312_s6 + $0xb90] sm:$0xff]  }
 0x578   :  { %12794 = vmatpush3.bf16.msra.mxu1 %v13423_v20  ;;  %v13466_v20 = vld [vmem:[%s20312_s6 + $0xbc8] sm:$0xff]  }
 0x579   :  { %12795 = vmatprep.subr.bf16.mxu1 %v13426_v55  ;;  %v13465_v55 = vld [vmem:[%s20312_s6 + $0xb08] sm:$0xff]  }
 0x57a   :  { %12774 = vmatpush3.bf16.msra.mxu0 %v13425_v57  ;;  %v13468_v57 = vld [vmem:[%s20312_s6 + $0xb40] sm:$0xff]  }
 0x57b   :  { %12775 = vmatprep.subr.bf16.mxu0 %v13428_v44  ;;  %v13467_v44 = vld [vmem:[%s20312_s6 + $0xb88] sm:$0xff]  }
 0x57c   :  { %12796 = vmatpush3.bf16.msra.mxu1 %v13427_v24  ;;  %v13470_v24 = vld [vmem:[%s20312_s6 + $0xbc0] sm:$0xff]  }
 0x57d   :  { %12797 = vmatprep.subr.bf16.mxu1 %v13430_v36  ;;  %v13469_v36 = vld [vmem:[%s20312_s6 + $0xb00] sm:$0xff]  }
 0x57e   :  { %12776 = vmatpush3.bf16.msra.mxu0 %v13429_v0  ;;  %v13472_v0 = vld [vmem:[%s20312_s6 + $0xc78] sm:$0xff]  }
 0x57f   :  { %12777 = vmatprep.subr.bf16.mxu0 %v13432_v18  ;;  %v13471_v18 = vld [vmem:[%s20312_s6 + $0xb80] sm:$0xff]  }
 0x580   :  { %12798 = vmatpush3.bf16.msra.mxu1 %v13431_v41  ;;  %v13474_v41 = vld [vmem:[%s20312_s6 + $0xcf8] sm:$0xff]  }
 0x581   :  { %12799 = vmatprep.subr.bf16.mxu1 %v13434_v38  ;;  %v13473_v38 = vld [vmem:[%s20312_s6 + $0xc38] sm:$0xff]  }
 0x582   :  { %12778 = vmatpush3.bf16.msra.mxu0 %v13433_v60  ;;  %v13476_v60 = vld [vmem:[%s20312_s6 + $0xc70] sm:$0xff]  }
 0x583   :  { %12779 = vmatprep.subr.bf16.mxu0 %v13436_v29  ;;  %v13475_v29 = vld [vmem:[%s20312_s6 + $0xcb8] sm:$0xff]  }
 0x584   :  { %12800 = vmatpush3.bf16.msra.mxu1 %v13435_v42 }
 0x585   :  { %12801 = vmatprep.subr.bf16.mxu1 %v13438_v39  ;;  %v6652_v39 = vcombine.high %v18831_v26, %v18831_v26 }
 0x586   :  { %12780 = vmatpush3.bf16.msra.mxu0 %v13437_v11  ;;  %v13478_v11 = vld [vmem:[%s20312_s6 + $0xcf0] sm:$0xff]  }
 0x587   :  { %12809 = vmatprep.subr.bf16.mxu0 %v13440_v16  ;;  %v6721_v16 = vcombine.high %v18892_v22, %v18892_v22 }
 0x588   :  { %12802 = vmatpush3.bf16.msra.mxu1 %v13439_v14  ;;  %v13477_v14 = vld [vmem:[%s20312_s6 + $0xc30] sm:$0xff]  }
 0x589   :  { %v12517_v62 = vpop.f32.mrf.mxu0  ;;  %10760 = vmatmul.mubr.bf16.vlgmr.msra.gmra.mxu0 %v18824_v12  ;;  %12831 = vmatprep.subr.bf16.mxu1 %v13442_v56  ;;  %v13448_v12 = vld [vmem:[%s20312_s6 + $0xb68] sm:$0xff]  }
 0x58a   :  { %12810 = vmatpush3.bf16.msra.mxu0 %v13441_v6  ;;  %10839 = vmatprep.mubr.bf16.mxu0 %v18827_v8 }
 0x58b   :  { %v12518_v5 = vpop.f32.mrf.mxu0  ;;  %v12539_v21 = vpop.f32.mrf.mxu1  ;;  %10800 = vmatmul.mubr.bf16.vlgmr.msra.gmra.mxu1 %v6651_v51  ;;  %12811 = vmatprep.subr.bf16.mxu0 %v13444_v2  ;;  %v13482_v51 = vld [vmem:[%s20312_s6 + $0xce8] sm:$0xff]  }
 0x58c   :  { %v12519_v27 = vadd.f32 %v12518_v5, %v12517_v62  ;;  %12832 = vmatpush3.bf16.msra.mxu1 %v13443_v49  ;;  %10879 = vmatprep.mubr.bf16.mxu1 %v6654_v23  ;;  %v13479_v49 = vld [vmem:[%s20312_s6 + $0xcb0] sm:$0xff]  }
 0x58d   :  { %v12520_v8 = vpop.f32.mrf.mxu0  ;;  %v12540_v37 = vpop.f32.mrf.mxu1  ;;  %12833 = vmatprep.subr.bf16.mxu1 %v13446_v30 }
 0x58e   :  { %v10282_v13 = vadd.f32 %v12519_v27, %v19716_v7  ;;  %v12541_v19 = vadd.f32 %v12540_v37, %v12539_v21  ;;  %12812 = vmatpush3.bf16.msra.mxu0 %v13445_v9  ;;  %v13460_v7 = vld [vmem:[%s20312_s6 + $0xb50] sm:$0xff]   ;;  %v13481_v9 = vld [vmem:[%s20312_s6 + $0xc28] sm:$0xff]   ;;  %v13486_v37 = vld [vmem:[%s20312_s6 + $0xce0] sm:$0xff]  }
 0x58f   :  { %v12521_v48 = vpop.f32.mrf.mxu0  ;;  %v12542_v28 = vpop.f32.mrf.mxu1  ;;  %12813 = vmatprep.subr.bf16.mxu0 %v13448_v12  ;;  %v13484_v12 = vld [vmem:[%s20312_s6 + $0xc60] sm:$0xff]  }
 0x590   :  { %v19821_v17 = vadd.f32 %v12541_v19, %v10282_v13  ;;  %12834 = vmatpush3.bf16.msra.mxu1 %v13447_v50  ;;  %v13483_v50 = vld [vmem:[%s20312_s6 + $0xca8] sm:$0xff]   ;;  %v13488_v13 = vld [vmem:[%s20312_s6 + $0xc58] sm:$0xff]   ;;  %v13487_v19 = vld [vmem:[%s20312_s6 + $0xca0] sm:$0xff]  }
 0x591   :  { %v12543_v45 = vpop.f32.mrf.mxu1  ;;  %12835 = vmatprep.subr.bf16.mxu1 %v13450_v43  ;;  %v13485_v43 = vld [vmem:[%s20312_s6 + $0xc20] sm:$0xff]   ;;  %v13489_v48 = vld [vmem:[%s20312_s6 + $0xc18] sm:$0xff]   ;;  %v13492_v28 = vld [vmem:[%s20312_s6 + $0xc50] sm:$0xff]  }
 0x592   :  { %12814 = vmatpush3.bf16.msra.mxu0 %v13449_v15  ;;  %v13490_v15 = vld [vmem:[%s20312_s6 + $0xcd8] sm:$0xff]   ;;  %v13496_v45 = vld [vmem:[%s20312_s6 + $0xc48] sm:$0xff]  }
 0x593   :  { %12815 = vmatprep.subr.bf16.mxu0 %v13452_v31  ;;  %v13491_v31 = vld [vmem:[%s20312_s6 + $0xc98] sm:$0xff]  }
 0x594   :  { %12836 = vmatpush3.bf16.msra.mxu1 %v13451_v47  ;;  %v13493_v47 = vld [vmem:[%s20312_s6 + $0xc10] sm:$0xff]  }
 0x595   :  { %12837 = vmatprep.subr.bf16.mxu1 %v13454_v52  ;;  %v13495_v52 = vld [vmem:[%s20312_s6 + $0xc90] sm:$0xff]  }
 0x596   :  { %12816 = vmatpush3.bf16.msra.mxu0 %v13453_v61  ;;  %v13498_v61 = vld [vmem:[%s20312_s6 + $0xcc8] sm:$0xff]  }
 0x597   :  { %12817 = vmatprep.subr.bf16.mxu0 %v13456_v59  ;;  %v13497_v59 = vld [vmem:[%s20312_s6 + $0xc08] sm:$0xff]  }
 0x598   :  { %12838 = vmatpush3.bf16.msra.mxu1 %v13455_v35  ;;  %v13500_v35 = vld [vmem:[%s20312_s6 + $0xc40] sm:$0xff]  }
 0x599   :  { %12839 = vmatprep.subr.bf16.mxu1 %v13458_v58  ;;  %v13499_v58 = vld [vmem:[%s20312_s6 + $0xc88] sm:$0xff]  }
 0x59a   :  { %12818 = vmatpush3.bf16.msra.mxu0 %v13457_v3  ;;  %v13502_v3 = vld [vmem:[%s20312_s6 + $0xcc0] sm:$0xff]  }
 0x59b   :  { %12819 = vmatprep.subr.bf16.mxu0 %v13460_v7  ;;  %v13501_v7 = vld [vmem:[%s20312_s6 + $0xc00] sm:$0xff]  }
 0x59c   :  { %12840 = vmatpush3.bf16.msra.mxu1 %v13459_v4  ;;  %v13504_v4 = vld [vmem:[%s20312_s6 + $0xd78] sm:$0xff]  }
 0x59d   :  { %12841 = vmatprep.subr.bf16.mxu1 %v13462_v32  ;;  %v13503_v32 = vld [vmem:[%s20312_s6 + $0xc80] sm:$0xff]  }
 0x59e   :  { %12820 = vmatpush3.bf16.msra.mxu0 %v13461_v40  ;;  %v13506_v40 = vld [vmem:[%s20312_s6 + $0xdf8] sm:$0xff]  }
 0x59f   :  { %12821 = vmatprep.subr.bf16.mxu0 %v13464_v33  ;;  %v13505_v33 = vld [vmem:[%s20312_s6 + $0xd38] sm:$0xff]  }
 0x5a0   :  { %12842 = vmatpush3.bf16.msra.mxu1 %v13463_v53  ;;  %v13508_v53 = vld [vmem:[%s20312_s6 + $0xd70] sm:$0xff]  }
 0x5a1   :  { %12843 = vmatprep.subr.bf16.mxu1 %v13466_v20  ;;  %v13507_v20 = vld [vmem:[%s20312_s6 + $0xdb8] sm:$0xff]  }
 0x5a2   :  { %12822 = vmatpush3.bf16.msra.mxu0 %v13465_v55 }
 0x5a3   :  { %12823 = vmatprep.subr.bf16.mxu0 %v13468_v57  ;;  %v6719_v57 = vcombine.high %v18895_v54, %v18895_v54 }
 0x5a4   :  { %12844 = vmatpush3.bf16.msra.mxu1 %v13467_v44  ;;  %v13510_v44 = vld [vmem:[%s20312_s6 + $0xdf0] sm:$0xff]  }
 0x5a5   :  { %12845 = vmatprep.subr.bf16.mxu1 %v13470_v24  ;;  %v6722_v24 = vcombine.high %v18898_v25, %v18898_v25 }
 0x5a6   :  { %12824 = vmatpush3.bf16.msra.mxu0 %v13469_v36  ;;  %v13509_v36 = vld [vmem:[%s20312_s6 + $0xd30] sm:$0xff]  }
 0x5a7   :  { %12853 = vmatprep.subr.bf16.mxu0 %v13472_v0 }
 0x5a8   :  { %12846 = vmatpush3.bf16.msra.mxu1 %v13471_v18 }
 0x5a9   :  { %v12561_v42 = vpop.f32.mrf.mxu0  ;;  %10840 = vmatmul.mubr.bf16.vlgmr.msra.gmra.mxu0 %v18831_v26  ;;  %12875 = vmatprep.subr.bf16.mxu1 %v13474_v41  ;;  %v13480_v26 = vld [vmem:[%s20312_s6 + $0xc68] sm:$0xff]  }
 0x5aa   :  { %12854 = vmatpush3.bf16.msra.mxu0 %v13473_v38  ;;  %10919 = vmatprep.mubr.bf16.mxu0 %v18892_v22  ;;  %v13511_v38 = vld [vmem:[%s20312_s6 + $0xdb0] sm:$0xff]  }
 0x5ab   :  { %v12562_v56 = vpop.f32.mrf.mxu0  ;;  %v12583_v6 = vpop.f32.mrf.mxu1  ;;  %10880 = vmatmul.mubr.bf16.vlgmr.msra.gmra.mxu1 %v6652_v39  ;;  %12855 = vmatprep.subr.bf16.mxu0 %v13476_v60 }
 0x5ac   :  { %v12563_v2 = vadd.f32 %v12562_v56, %v12561_v42  ;;  %12876 = vmatpush3.bf16.msra.mxu1 %v13475_v29  ;;  %10959 = vmatprep.mubr.bf16.mxu1 %v6721_v16  ;;  %v13514_v29 = vld [vmem:[%s20312_s6 + $0xde8] sm:$0xff]   ;;  %v13516_v56 = vld [vmem:[%s20312_s6 + $0xd60] sm:$0xff]  }
 0x5ad   :  { %v12564_v22 = vpop.f32.mrf.mxu0  ;;  %v12584_v62 = vpop.f32.mrf.mxu1  ;;  %12877 = vmatprep.subr.bf16.mxu1 %v13478_v11  ;;  %v13513_v11 = vld [vmem:[%s20312_s6 + $0xd28] sm:$0xff]  }
 0x5ae   :  { %v10362_v30 = vadd.f32 %v12563_v2, %v19821_v17  ;;  %v12585_v23 = vadd.f32 %v12584_v62, %v12583_v6  ;;  %12856 = vmatpush3.bf16.msra.mxu0 %v13477_v14  ;;  %v13494_v17 = vld [vmem:[%s20312_s6 + $0xcd0] sm:$0xff]   ;;  %v13517_v22 = vld [vmem:[%s20312_s6 + $0xd20] sm:$0xff]   ;;  %v13520_v62 = vld [vmem:[%s20312_s6 + $0xd58] sm:$0xff]  }
 0x5af   :  { %v12565_v5 = vpop.f32.mrf.mxu0  ;;  %v12586_v21 = vpop.f32.mrf.mxu1  ;;  %12857 = vmatprep.subr.bf16.mxu0 %v13480_v26  ;;  %v13515_v26 = vld [vmem:[%s20312_s6 + $0xda8] sm:$0xff]  }
 0x5b0   :  { %v19926_v27 = vadd.f32 %v12585_v23, %v10362_v30  ;;  %12878 = vmatpush3.bf16.msra.mxu1 %v13479_v49  ;;  %v13518_v49 = vld [vmem:[%s20312_s6 + $0xde0] sm:$0xff]   ;;  %v13522_v30 = vld [vmem:[%s20312_s6 + $0xdd8] sm:$0xff]   ;;  %v13526_v21 = vld [vmem:[%s20312_s6 + $0xdd0] sm:$0xff]  }
 0x5b1   :  { %v12587_v8 = vpop.f32.mrf.mxu1  ;;  %12879 = vmatprep.subr.bf16.mxu1 %v13482_v51  ;;  %v13519_v51 = vld [vmem:[%s20312_s6 + $0xda0] sm:$0xff]   ;;  %v13521_v23 = vld [vmem:[%s20312_s6 + $0xd18] sm:$0xff]  }
 0x5b2   :  { %12858 = vmatpush3.bf16.msra.mxu0 %v13481_v9  ;;  %v13524_v9 = vld [vmem:[%s20312_s6 + $0xd50] sm:$0xff]   ;;  %v13523_v5 = vld [vmem:[%s20312_s6 + $0xd98] sm:$0xff]   ;;  %v13530_v8 = vld [vmem:[%s20312_s6 + $0xdc8] sm:$0xff]  }
 0x5b3   :  { %12859 = vmatprep.subr.bf16.mxu0 %v13484_v12  ;;  %v13525_v12 = vld [vmem:[%s20312_s6 + $0xd10] sm:$0xff]  }
 0x5b4   :  { %12880 = vmatpush3.bf16.msra.mxu1 %v13483_v50  ;;  %v13527_v50 = vld [vmem:[%s20312_s6 + $0xd90] sm:$0xff]  }
 0x5b5   :  { %12881 = vmatprep.subr.bf16.mxu1 %v13486_v37  ;;  %v13529_v37 = vld [vmem:[%s20312_s6 + $0xd08] sm:$0xff]  }
 0x5b6   :  { %12860 = vmatpush3.bf16.msra.mxu0 %v13485_v43  ;;  %v13532_v43 = vld [vmem:[%s20312_s6 + $0xd40] sm:$0xff]  }
 0x5b7   :  { %12861 = vmatprep.subr.bf16.mxu0 %v13488_v13  ;;  %v13531_v13 = vld [vmem:[%s20312_s6 + $0xd88] sm:$0xff]  }
 0x5b8   :  { %12882 = vmatpush3.bf16.msra.mxu1 %v13487_v19  ;;  %v13534_v19 = vld [vmem:[%s20312_s6 + $0xdc0] sm:$0xff]  }
 0x5b9   :  { %12883 = vmatprep.subr.bf16.mxu1 %v13490_v15  ;;  %v13533_v15 = vld [vmem:[%s20312_s6 + $0xd00] sm:$0xff]  }
 0x5ba   :  { %12862 = vmatpush3.bf16.msra.mxu0 %v13489_v48  ;;  %v13536_v48 = vld [vmem:[%s20312_s6 + $0xe78] sm:$0xff]  }
 0x5bb   :  { %12863 = vmatprep.subr.bf16.mxu0 %v13492_v28  ;;  %v13535_v28 = vld [vmem:[%s20312_s6 + $0xd80] sm:$0xff]  }
 0x5bc   :  { %12884 = vmatpush3.bf16.msra.mxu1 %v13491_v31  ;;  %v13538_v31 = vld [vmem:[%s20312_s6 + $0xef8] sm:$0xff]  }
 0x5bd   :  { %12885 = vmatprep.subr.bf16.mxu1 %v13494_v17  ;;  %v13537_v17 = vld [vmem:[%s20312_s6 + $0xe38] sm:$0xff]  }
 0x5be   :  { %12864 = vmatpush3.bf16.msra.mxu0 %v13493_v47  ;;  %v13540_v47 = vld [vmem:[%s20312_s6 + $0xe70] sm:$0xff]  }
 0x5bf   :  { %12865 = vmatprep.subr.bf16.mxu0 %v13496_v45  ;;  %v13539_v45 = vld [vmem:[%s20312_s6 + $0xeb8] sm:$0xff]  }
 0x5c0   :  { %12886 = vmatpush3.bf16.msra.mxu1 %v13495_v52 }
 0x5c1   :  { %12887 = vmatprep.subr.bf16.mxu1 %v13498_v61  ;;  %v6720_v61 = vcombine.high %v18901_v34, %v18901_v34 }
 0x5c2   :  { %12866 = vmatpush3.bf16.msra.mxu0 %v13497_v59  ;;  %v13542_v59 = vld [vmem:[%s20312_s6 + $0xef0] sm:$0xff]  }
 0x5c3   :  { %12867 = vmatprep.subr.bf16.mxu0 %v13500_v35  ;;  %v6789_v35 = vcombine.high %v18910_v10, %v18910_v10 }
 0x5c4   :  { %12888 = vmatpush3.bf16.msra.mxu1 %v13499_v58  ;;  %v13541_v58 = vld [vmem:[%s20312_s6 + $0xe30] sm:$0xff]  }
 0x5c5   :  { %12889 = vmatprep.subr.bf16.mxu1 %v13502_v3 }
 0x5c6   :  { %12868 = vmatpush3.bf16.msra.mxu0 %v13501_v7 }
 0x5c7   :  { %12897 = vmatprep.subr.bf16.mxu0 %v13504_v4 }
 0x5c8   :  { %12890 = vmatpush3.bf16.msra.mxu1 %v13503_v32  ;;  %v13543_v32 = vld [vmem:[%s20312_s6 + $0xeb0] sm:$0xff]  }
 0x5c9   :  { %v12605_v55 = vpop.f32.mrf.mxu0  ;;  %10920 = vmatmul.mubr.bf16.vlgmr.msra.gmra.mxu0 %v18895_v54  ;;  %12919 = vmatprep.subr.bf16.mxu1 %v13506_v40  ;;  %v13512_v54 = vld [vmem:[%s20312_s6 + $0xd68] sm:$0xff]  }
 0x5ca   :  { %12898 = vmatpush3.bf16.msra.mxu0 %v13505_v33  ;;  %10999 = vmatprep.mubr.bf16.mxu0 %v18898_v25  ;;  %v13546_v33 = vld [vmem:[%s20312_s6 + $0xee8] sm:$0xff]  }
 0x5cb   :  { %v12606_v0 = vpop.f32.mrf.mxu0  ;;  %v12627_v18 = vpop.f32.mrf.mxu1  ;;  %10960 = vmatmul.mubr.bf16.vlgmr.msra.gmra.mxu1 %v6719_v57  ;;  %12899 = vmatprep.subr.bf16.mxu0 %v13508_v53 }
 0x5cc   :  { %v12607_v41 = vadd.f32 %v12606_v0, %v12605_v55  ;;  %12920 = vmatpush3.bf16.msra.mxu1 %v13507_v20  ;;  %11039 = vmatprep.mubr.bf16.mxu1 %v6722_v24  ;;  %v13545_v55 = vld [vmem:[%s20312_s6 + $0xe28] sm:$0xff]   ;;  %v13548_v24 = vld [vmem:[%s20312_s6 + $0xe60] sm:$0xff]  }
 0x5cd   :  { %v12608_v25 = vpop.f32.mrf.mxu0  ;;  %v12628_v60 = vpop.f32.mrf.mxu1  ;;  %12921 = vmatprep.subr.bf16.mxu1 %v13510_v44  ;;  %v13547_v0 = vld [vmem:[%s20312_s6 + $0xea8] sm:$0xff]  }
 0x5ce   :  { %v10442_v42 = vadd.f32 %v12607_v41, %v19926_v27  ;;  %v12629_v39 = vadd.f32 %v12628_v60, %v12627_v18  ;;  %12900 = vmatpush3.bf16.msra.mxu0 %v13509_v36  ;;  %v13528_v27 = vld [vmem:[%s20312_s6 + $0xd48] sm:$0xff]   ;;  %v13549_v41 = vld [vmem:[%s20312_s6 + $0xe20] sm:$0xff]   ;;  %v13554_v60 = vld [vmem:[%s20312_s6 + $0xed8] sm:$0xff]  }
 0x5cf   :  { %v12609_v16 = vpop.f32.mrf.mxu0  ;;  %v12630_v14 = vpop.f32.mrf.mxu1  ;;  %12901 = vmatprep.subr.bf16.mxu0 %v13512_v54  ;;  %v13550_v54 = vld [vmem:[%s20312_s6 + $0xee0] sm:$0xff]  }
 0x5d0   :  { %v20031_v6 = vadd.f32 %v12629_v39, %v10442_v42  ;;  %12922 = vmatpush3.bf16.msra.mxu1 %v13511_v38  ;;  %v13552_v38 = vld [vmem:[%s20312_s6 + $0xe58] sm:$0xff]   ;;  %v13551_v25 = vld [vmem:[%s20312_s6 + $0xea0] sm:$0xff]   ;;  %v13556_v42 = vld [vmem:[%s20312_s6 + $0xe50] sm:$0xff]  }
 0x5d1   :  { %v12631_v2 = vpop.f32.mrf.mxu1  ;;  %12923 = vmatprep.subr.bf16.mxu1 %v13514_v29  ;;  %v13553_v29 = vld [vmem:[%s20312_s6 + $0xe18] sm:$0xff]   ;;  %v13557_v16 = vld [vmem:[%s20312_s6 + $0xe10] sm:$0xff]   ;;  %v13560_v14 = vld [vmem:[%s20312_s6 + $0xe48] sm:$0xff]  }
 0x5d2   :  { %12902 = vmatpush3.bf16.msra.mxu0 %v13513_v11  ;;  %v13555_v39 = vld [vmem:[%s20312_s6 + $0xe98] sm:$0xff]   ;;  %v13558_v11 = vld [vmem:[%s20312_s6 + $0xed0] sm:$0xff]   ;;  %v13564_v2 = vld [vmem:[%s20312_s6 + $0xe40] sm:$0xff]  }
 0x5d3   :  { %12903 = vmatprep.subr.bf16.mxu0 %v13516_v56  ;;  %v13559_v56 = vld [vmem:[%s20312_s6 + $0xe90] sm:$0xff]  }
 0x5d4   :  { %12924 = vmatpush3.bf16.msra.mxu1 %v13515_v26  ;;  %v13561_v26 = vld [vmem:[%s20312_s6 + $0xe08] sm:$0xff]  }
 0x5d5   :  { %12925 = vmatprep.subr.bf16.mxu1 %v13518_v49  ;;  %v13563_v49 = vld [vmem:[%s20312_s6 + $0xe88] sm:$0xff]  }
 0x5d6   :  { %12904 = vmatpush3.bf16.msra.mxu0 %v13517_v22  ;;  %v13566_v22 = vld [vmem:[%s20312_s6 + $0xec0] sm:$0xff]  }
 0x5d7   :  { %12905 = vmatprep.subr.bf16.mxu0 %v13520_v62  ;;  %v13565_v62 = vld [vmem:[%s20312_s6 + $0xe00] sm:$0xff]  }
 0x5d8   :  { %12926 = vmatpush3.bf16.msra.mxu1 %v13519_v51  ;;  %v13568_v51 = vld [vmem:[%s20312_s6 + $0xf78] sm:$0xff]  }
 0x5d9   :  { %12927 = vmatprep.subr.bf16.mxu1 %v13522_v30  ;;  %v13567_v30 = vld [vmem:[%s20312_s6 + $0xe80] sm:$0xff]  }
 0x5da   :  { %12906 = vmatpush3.bf16.msra.mxu0 %v13521_v23  ;;  %v13570_v23 = vld [vmem:[%s20312_s6 + $0xff8] sm:$0xff]  }
 0x5db   :  { %12907 = vmatprep.subr.bf16.mxu0 %v13524_v9  ;;  %v13569_v9 = vld [vmem:[%s20312_s6 + $0xf38] sm:$0xff]  }
 0x5dc   :  { %12928 = vmatpush3.bf16.msra.mxu1 %v13523_v5  ;;  %v13572_v5 = vld [vmem:[%s20312_s6 + $0xf70] sm:$0xff]  }
 0x5dd   :  { %12929 = vmatprep.subr.bf16.mxu1 %v13526_v21  ;;  %v13571_v21 = vld [vmem:[%s20312_s6 + $0xfb8] sm:$0xff]  }
 0x5de   :  { %12908 = vmatpush3.bf16.msra.mxu0 %v13525_v12 }
 0x5df   :  { %12909 = vmatprep.subr.bf16.mxu0 %v13528_v27  ;;  %v6787_v27 = vcombine.high %v18913_v63, %v18913_v63 }
 0x5e0   :  { %12930 = vmatpush3.bf16.msra.mxu1 %v13527_v50  ;;  %v13574_v50 = vld [vmem:[%s20312_s6 + $0xff0] sm:$0xff]  }
 0x5e1   :  { %12931 = vmatprep.subr.bf16.mxu1 %v13530_v8  ;;  %v6790_v8 = vcombine.high %v18916_v1, %v18916_v1 }
 0x5e2   :  { %12910 = vmatpush3.bf16.msra.mxu0 %v13529_v37  ;;  %v13573_v37 = vld [vmem:[%s20312_s6 + $0xf30] sm:$0xff]  }
 0x5e3   :  { %12911 = vmatprep.subr.bf16.mxu0 %v13532_v43 }
 0x5e4   :  { %12932 = vmatpush3.bf16.msra.mxu1 %v13531_v13 }
 0x5e5   :  { %12933 = vmatprep.subr.bf16.mxu1 %v13534_v19 }
 0x5e6   :  { %12912 = vmatpush3.bf16.msra.mxu0 %v13533_v15  ;;  %v13575_v15 = vld [vmem:[%s20312_s6 + $0xfb0] sm:$0xff]  }
 0x5e7   :  { %12941 = vmatprep.subr.bf16.mxu0 %v13536_v48 }
 0x5e8   :  { %12934 = vmatpush3.bf16.msra.mxu1 %v13535_v28  ;;  %v13578_v28 = vld [vmem:[%s20312_s6 + $0xfe8] sm:$0xff]  }
 0x5e9   :  { %v12649_v52 = vpop.f32.mrf.mxu0  ;;  %11000 = vmatmul.mubr.bf16.vlgmr.msra.gmra.mxu0 %v18901_v34  ;;  %12963 = vmatprep.subr.bf16.mxu1 %v13538_v31  ;;  %v13544_v34 = vld [vmem:[%s20312_s6 + $0xe68] sm:$0xff]  }
 0x5ea   :  { %12942 = vmatpush3.bf16.msra.mxu0 %v13537_v17  ;;  %11079 = vmatprep.mubr.bf16.mxu0 %v18910_v10 }
 0x5eb   :  { %v12650_v3 = vpop.f32.mrf.mxu0  ;;  %v12671_v7 = vpop.f32.mrf.mxu1  ;;  %11040 = vmatmul.mubr.bf16.vlgmr.msra.gmra.mxu1 %v6720_v61  ;;  %12943 = vmatprep.subr.bf16.mxu0 %v13540_v47  ;;  %v13577_v47 = vld [vmem:[%s20312_s6 + $0xf28] sm:$0xff]   ;;  %v13580_v61 = vld [vmem:[%s20312_s6 + $0xf60] sm:$0xff]  }
 0x5ec   :  { %v12651_v4 = vadd.f32 %v12650_v3, %v12649_v52  ;;  %12964 = vmatpush3.bf16.msra.mxu1 %v13539_v45  ;;  %11119 = vmatprep.mubr.bf16.mxu1 %v6789_v35  ;;  %v13579_v35 = vld [vmem:[%s20312_s6 + $0xfa8] sm:$0xff]   ;;  %v13582_v3 = vld [vmem:[%s20312_s6 + $0xfe0] sm:$0xff]  }
 0x5ed   :  { %v12652_v10 = vpop.f32.mrf.mxu0  ;;  %v12672_v40 = vpop.f32.mrf.mxu1  ;;  %12965 = vmatprep.subr.bf16.mxu1 %v13542_v59 }
 0x5ee   :  { %v10522_v53 = vadd.f32 %v12651_v4, %v20031_v6  ;;  %v12673_v20 = vadd.f32 %v12672_v40, %v12671_v7  ;;  %12944 = vmatpush3.bf16.msra.mxu0 %v13541_v58  ;;  %v13562_v6 = vld [vmem:[%s20312_s6 + $0xec8] sm:$0xff]   ;;  %v13581_v7 = vld [vmem:[%s20312_s6 + $0xf20] sm:$0xff]   ;;  %v13585_v10 = vld [vmem:[%s20312_s6 + $0xf18] sm:$0xff]  }
 0x5ef   :  { %v12653_v57 = vpop.f32.mrf.mxu0  ;;  %v12674_v44 = vpop.f32.mrf.mxu1  ;;  %12945 = vmatprep.subr.bf16.mxu0 %v13544_v34  ;;  %v13584_v34 = vld [vmem:[%s20312_s6 + $0xf58] sm:$0xff]   ;;  %v13583_v4 = vld [vmem:[%s20312_s6 + $0xfa0] sm:$0xff]   ;;  %v13588_v40 = vld [vmem:[%s20312_s6 + $0xf50] sm:$0xff]  }
 0x5f0   :  { %v20136_v36 = vadd.f32 %v12673_v20, %v10522_v53  ;;  %12966 = vmatpush3.bf16.msra.mxu1 %v13543_v32  ;;  %v13586_v32 = vld [vmem:[%s20312_s6 + $0xfd8] sm:$0xff]   ;;  %v13590_v53 = vld [vmem:[%s20312_s6 + $0xfd0] sm:$0xff]   ;;  %v13594_v44 = vld [vmem:[%s20312_s6 + $0xfc8] sm:$0xff]  }
 0x5f1   :  { %v12675_v18 = vpop.f32.mrf.mxu1  ;;  %12967 = vmatprep.subr.bf16.mxu1 %v13546_v33  ;;  %v13587_v33 = vld [vmem:[%s20312_s6 + $0xf98] sm:$0xff]   ;;  %v13589_v20 = vld [vmem:[%s20312_s6 + $0xf10] sm:$0xff]  }
 0x5f2   :  { %12946 = vmatpush3.bf16.msra.mxu0 %v13545_v55  ;;  %v13592_v55 = vld [vmem:[%s20312_s6 + $0xf48] sm:$0xff]   ;;  %v13591_v57 = vld [vmem:[%s20312_s6 + $0xf90] sm:$0xff]   ;;  %v13598_v18 = vld [vmem:[%s20312_s6 + $0xfc0] sm:$0xff]  }
 0x5f3   :  { %12947 = vmatprep.subr.bf16.mxu0 %v13548_v24  ;;  %v13593_v24 = vld [vmem:[%s20312_s6 + $0xf08] sm:$0xff]  }
 0x5f4   :  { %12968 = vmatpush3.bf16.msra.mxu1 %v13547_v0  ;;  %v13595_v0 = vld [vmem:[%s20312_s6 + $0xf88] sm:$0xff]  }
 0x5f5   :  { %12969 = vmatprep.subr.bf16.mxu1 %v13550_v54  ;;  %v13597_v54 = vld [vmem:[%s20312_s6 + $0xf00] sm:$0xff]  }
 0x5f6   :  { %12948 = vmatpush3.bf16.msra.mxu0 %v13549_v41  ;;  %v13599_v41 = vld [vmem:[%s20312_s6 + $0xf80] sm:$0xff]  }
 0x5f7   :  { %12949 = vmatprep.subr.bf16.mxu0 %v13552_v38 }
 0x5f8   :  { %12970 = vmatpush3.bf16.msra.mxu1 %v13551_v25  ;;  %v6788_v25 = vcombine.high %v18919_v46, %v18919_v46 }
 0x5f9   :  { %12971 = vmatprep.subr.bf16.mxu1 %v13554_v60 }
 0x5fa   :  { %12950 = vmatpush3.bf16.msra.mxu0 %v13553_v29 }
 0x5fb   :  { %12951 = vmatprep.subr.bf16.mxu0 %v13556_v42 }
 0x5fc   :  { %12972 = vmatpush3.bf16.msra.mxu1 %v13555_v39 }
 0x5fd   :  { %12973 = vmatprep.subr.bf16.mxu1 %v13558_v11 }
 0x5fe   :  { %12952 = vmatpush3.bf16.msra.mxu0 %v13557_v16 }
 0x5ff   :  { %12953 = vmatprep.subr.bf16.mxu0 %v13560_v14 }
 0x600   :  { %12974 = vmatpush3.bf16.msra.mxu1 %v13559_v56 }
 0x601   :  { %12975 = vmatprep.subr.bf16.mxu1 %v13562_v6 }
 0x602   :  { %12954 = vmatpush3.bf16.msra.mxu0 %v13561_v26 }
 0x603   :  { %12955 = vmatprep.subr.bf16.mxu0 %v13564_v2 }
 0x604   :  { %12976 = vmatpush3.bf16.msra.mxu1 %v13563_v49 }
 0x605   :  { %12977 = vmatprep.subr.bf16.mxu1 %v13566_v22 }
 0x606   :  { %12956 = vmatpush3.bf16.msra.mxu0 %v13565_v62 }
 0x607   :  { %12985 = vmatprep.subr.bf16.mxu0 %v13568_v51 }
 0x608   :  { %12978 = vmatpush3.bf16.msra.mxu1 %v13567_v30 }
 0x609   :  { %v12693_v12 = vpop.f32.mrf.mxu0  ;;  %11080 = vmatmul.mubr.bf16.vlgmr.msra.gmra.mxu0 %v18913_v63  ;;  %13007 = vmatprep.subr.bf16.mxu1 %v13570_v23  ;;  %v13576_v63 = vld [vmem:[%s20312_s6 + $0xf68] sm:$0xff]  }
 0x60a   :  { %12986 = vmatpush3.bf16.msra.mxu0 %v13569_v9  ;;  %11159 = vmatprep.mubr.bf16.mxu0 %v18916_v1 }
 0x60b   :  { %v12694_v43 = vpop.f32.mrf.mxu0  ;;  %v12715_v13 = vpop.f32.mrf.mxu1  ;;  %11120 = vmatmul.mubr.bf16.vlgmr.msra.gmra.mxu1 %v6787_v27  ;;  %12987 = vmatprep.subr.bf16.mxu0 %v13572_v5 }
 0x60c   :  { %v12695_v19 = vadd.f32 %v12694_v43, %v12693_v12  ;;  %13008 = vmatpush3.bf16.msra.mxu1 %v13571_v21  ;;  %11199 = vmatprep.mubr.bf16.mxu1 %v6790_v8 }
 0x60d   :  { %v12696_v1 = vpop.f32.mrf.mxu0  ;;  %v12716_v48 = vpop.f32.mrf.mxu1  ;;  %13009 = vmatprep.subr.bf16.mxu1 %v13574_v50 }
 0x60e   :  { %v10602_v31 = vadd.f32 %v12695_v19, %v20136_v36  ;;  %v12717_v17 = vadd.f32 %v12716_v48, %v12715_v13  ;;  %12988 = vmatpush3.bf16.msra.mxu0 %v13573_v37  ;;  %v13596_v36 = vld [vmem:[%s20312_s6 + $0xf40] sm:$0xff]  }
 0x60f   :  { %v12697_v45 = vpop.f32.mrf.mxu0  ;;  %v12718_v52 = vpop.f32.mrf.mxu1  ;;  %12989 = vmatprep.subr.bf16.mxu0 %v13576_v63 }
 0x610   :  { %v10642_v59 = vadd.f32 %v12717_v17, %v10602_v31  ;;  %13010 = vmatpush3.bf16.msra.mxu1 %v13575_v15 }
 0x611   :  { %v12719_v58 = vpop.f32.mrf.mxu1  ;;  %13011 = vmatprep.subr.bf16.mxu1 %v13578_v28 }
 0x612   :  { %12990 = vmatpush3.bf16.msra.mxu0 %v13577_v47 }
 0x613   :  { %12991 = vmatprep.subr.bf16.mxu0 %v13580_v61 }
 0x614   :  { %13012 = vmatpush3.bf16.msra.mxu1 %v13579_v35 }
 0x615   :  { %13013 = vmatprep.subr.bf16.mxu1 %v13582_v3 }
 0x616   :  { %12992 = vmatpush3.bf16.msra.mxu0 %v13581_v7 }
 0x617   :  { %12993 = vmatprep.subr.bf16.mxu0 %v13584_v34 }
 0x618   :  { %13014 = vmatpush3.bf16.msra.mxu1 %v13583_v4 }
 0x619   :  { %13015 = vmatprep.subr.bf16.mxu1 %v13586_v32 }
 0x61a   :  { %12994 = vmatpush3.bf16.msra.mxu0 %v13585_v10 }
 0x61b   :  { %12995 = vmatprep.subr.bf16.mxu0 %v13588_v40 }
 0x61c   :  { %13016 = vmatpush3.bf16.msra.mxu1 %v13587_v33 }
 0x61d   :  { %13017 = vmatprep.subr.bf16.mxu1 %v13590_v53 }
 0x61e   :  { %12996 = vmatpush3.bf16.msra.mxu0 %v13589_v20 }
 0x61f   :  { %12997 = vmatprep.subr.bf16.mxu0 %v13592_v55 }
 0x620   :  { %13018 = vmatpush3.bf16.msra.mxu1 %v13591_v57 }
 0x621   :  { %13019 = vmatprep.subr.bf16.mxu1 %v13594_v44 }
 0x622   :  { %12998 = vmatpush3.bf16.msra.mxu0 %v13593_v24 }
 0x623   :  { %12999 = vmatprep.subr.bf16.mxu0 %v13596_v36 }
 0x624   :  { %13020 = vmatpush3.bf16.msra.mxu1 %v13595_v0 }
 0x625   :  { %13021 = vmatprep.subr.bf16.mxu1 %v13598_v18 }
 0x626   :  { %13000 = vmatpush3.bf16.msra.mxu0 %v13597_v54 }
 0x628   :  { %13022 = vmatpush3.bf16.msra.mxu1 %v13599_v41 }
 0x629   :  { %v12737_v38 = vpop.f32.mrf.mxu0  ;;  %11160 = vmatmul.mubr.bf16.vlgmr.msra.gmra.mxu0 %v18919_v46 }
 0x62b   :  { %v12738_v60 = vpop.f32.mrf.mxu0  ;;  %v12759_v29 = vpop.f32.mrf.mxu1  ;;  %11200 = vmatmul.mubr.bf16.vlgmr.msra.gmra.mxu1 %v6788_v25 }
 0x62c   :  { %v12739_v42 = vadd.f32 %v12738_v60, %v12737_v38 }
 0x62d   :  { %v12740_v39 = vpop.f32.mrf.mxu0  ;;  %v12760_v11 = vpop.f32.mrf.mxu1 }
 0x62e   :  { %v10682_v16 = vadd.f32 %v12739_v42, %v10642_v59  ;;  %v12761_v14 = vadd.f32 %v12760_v11, %v12759_v29 }
 0x62f   :  { %v12741_v56 = vpop.f32.mrf.mxu0  ;;  %v12762_v6 = vpop.f32.mrf.mxu1 }
 0x630   :  { %v10722_v26 = vadd.f32 %v12761_v14, %v10682_v16 }
 0x631   :  { %v12763_v2 = vpop.f32.mrf.mxu1 }
 0x649   :  { %v12781_v49 = vpop.f32.mrf.mxu0 }
 0x64b   :  { %v12782_v22 = vpop.f32.mrf.mxu0  ;;  %v12803_v62 = vpop.f32.mrf.mxu1 }
 0x64c   :  { %v12783_v51 = vadd.f32 %v12782_v22, %v12781_v49 }
 0x64d   :  { %v12784_v30 = vpop.f32.mrf.mxu0  ;;  %v12804_v23 = vpop.f32.mrf.mxu1 }
 0x64e   :  { %v10762_v9 = vadd.f32 %v12783_v51, %v10722_v26  ;;  %v12805_v46 = vadd.f32 %v12804_v23, %v12803_v62 }
 0x64f   :  { %v12785_v5 = vpop.f32.mrf.mxu0  ;;  %v12806_v21 = vpop.f32.mrf.mxu1 }
 0x650   :  { %v10802_v12 = vadd.f32 %v12805_v46, %v10762_v9 }
 0x651   :  { %v12807_v27 = vpop.f32.mrf.mxu1 }
 0x669   :  { %v12825_v50 = vpop.f32.mrf.mxu0 }
 0x66b   :  { %v12826_v8 = vpop.f32.mrf.mxu0  ;;  %v12847_v37 = vpop.f32.mrf.mxu1 }
 0x66c   :  { %v12827_v43 = vadd.f32 %v12826_v8, %v12825_v50 }
 0x66d   :  { %v12828_v13 = vpop.f32.mrf.mxu0  ;;  %v12848_v63 = vpop.f32.mrf.mxu1 }
 0x66e   :  { %v10842_v19 = vadd.f32 %v12827_v43, %v10802_v12  ;;  %v12849_v15 = vadd.f32 %v12848_v63, %v12847_v37 }
 0x66f   :  { %v12829_v1 = vpop.f32.mrf.mxu0  ;;  %v12850_v48 = vpop.f32.mrf.mxu1 }
 0x670   :  { %v10882_v28 = vadd.f32 %v12849_v15, %v10842_v19 }
 0x671   :  { %v12851_v31 = vpop.f32.mrf.mxu1 }
 0x689   :  { %v12869_v17 = vpop.f32.mrf.mxu0 }
 0x68b   :  { %v12870_v47 = vpop.f32.mrf.mxu0  ;;  %v12891_v45 = vpop.f32.mrf.mxu1 }
 0x68c   :  { %v12871_v52 = vadd.f32 %v12870_v47, %v12869_v17 }
 0x68d   :  { %v12872_v61 = vpop.f32.mrf.mxu0  ;;  %v12892_v59 = vpop.f32.mrf.mxu1 }
 0x68e   :  { %v10922_v35 = vadd.f32 %v12871_v52, %v10882_v28  ;;  %v12893_v58 = vadd.f32 %v12892_v59, %v12891_v45 }
 0x68f   :  { %v12873_v3 = vpop.f32.mrf.mxu0  ;;  %v12894_v7 = vpop.f32.mrf.mxu1 }
 0x690   :  { %v10962_v34 = vadd.f32 %v12893_v58, %v10922_v35 }
 0x691   :  { %v12895_v4 = vpop.f32.mrf.mxu1 }
 0x6a9   :  { %v12913_v32 = vpop.f32.mrf.mxu0 }
 0x6ab   :  { %v12914_v10 = vpop.f32.mrf.mxu0  ;;  %v12935_v40 = vpop.f32.mrf.mxu1 }
 0x6ac   :  { %v12915_v25 = vadd.f32 %v12914_v10, %v12913_v32 }
 0x6ad   :  { %v12916_v33 = vpop.f32.mrf.mxu0  ;;  %v12936_v53 = vpop.f32.mrf.mxu1 }
 0x6ae   :  { %v11002_v60 = vadd.f32 %v12915_v25, %v10962_v34  ;;  %v12937_v29 = vadd.f32 %v12936_v53, %v12935_v40 }
 0x6af   :  { %v12917_v20 = vpop.f32.mrf.mxu0  ;;  %v12938_v55 = vpop.f32.mrf.mxu1 }
 0x6b0   :  { %v11042_v39 = vadd.f32 %v12937_v29, %v11002_v60 }
 0x6b1   :  { %v12939_v57 = vpop.f32.mrf.mxu1 }
 0x6c9   :  { %v12957_v44 = vpop.f32.mrf.mxu0 }
 0x6cb   :  { %v12958_v24 = vpop.f32.mrf.mxu0  ;;  %v12979_v36 = vpop.f32.mrf.mxu1 }
 0x6cc   :  { %v12959_v42 = vadd.f32 %v12958_v24, %v12957_v44 }
 0x6cd   :  { %v12960_v0 = vpop.f32.mrf.mxu0  ;;  %v12980_v18 = vpop.f32.mrf.mxu1 }
 0x6ce   :  { %v11082_v11 = vadd.f32 %v12959_v42, %v11042_v39  ;;  %v12981_v16 = vadd.f32 %v12980_v18, %v12979_v36 }
 0x6cf   :  { %v12961_v54 = vpop.f32.mrf.mxu0  ;;  %v12982_v41 = vpop.f32.mrf.mxu1 }
 0x6d0   :  { %v11122_v26 = vadd.f32 %v12981_v16, %v11082_v11 }
 0x6d1   :  { %v12983_v38 = vpop.f32.mrf.mxu1 }
 0x6e9   :  { %v13001_v14 = vpop.f32.mrf.mxu0 }
 0x6eb   :  { %v13002_v56 = vpop.f32.mrf.mxu0  ;;  %v13023_v6 = vpop.f32.mrf.mxu1 }
 0x6ec   :  { %v13003_v2 = vadd.f32 %v13002_v56, %v13001_v14 }
 0x6ed   :  { %v13004_v49 = vpop.f32.mrf.mxu0  ;;  %v13024_v22 = vpop.f32.mrf.mxu1 }
 0x6ee   :  { %v11162_v62 = vadd.f32 %v13003_v2, %v11122_v26  ;;  %v13025_v51 = vadd.f32 %v13024_v22, %v13023_v6 }
 0x6ef   :  { %v13005_v30 = vpop.f32.mrf.mxu0  ;;  %v13026_v23 = vpop.f32.mrf.mxu1 }
 0x6f0   :  { %v11202_v9 = vadd.f32 %v13025_v51, %v11162_v62 }
 0x6f1   :  { %v13027_v46 = vpop.f32.mrf.mxu1 }
 0x6f2   :  { %11207 = vst [vmem:[%s20315_s8] sm:$0xff] %v11202_v9 }

</bundles_post_ra>
